<compile_context>
chip_gen: v5e
topology: v5e:2x2
jax: 0.10.0
libtpu: 0.0.40
codegen_flags: <defaults>
</compile_context>

<pallas_src>
import functools

import jax
import jax.numpy as jnp
from jax.experimental import pallas as pl
from jax.experimental.pallas import tpu as pltpu


def _round_up(x, m):
    return (x + m - 1) // m * m


# ----------------------------------------------------------------------------
# Pallas kernel: tiled (M,K)@(K,N) with f32 accumulator and fused epilogue
#   (bias add -> optional LeakyReLU -> optional skip add -> cast & store).
# ----------------------------------------------------------------------------
def _mm_fused_kernel(x_ref, w_ref, b_ref, *rest, leaky_slope, has_skip):
    if has_skip:
        s_ref, o_ref, acc_ref = rest
    else:
        s_ref = None
        o_ref, acc_ref = rest

    k = pl.program_id(2)

    @pl.when(k == 0)
    def _init():
        acc_ref[...] = jnp.zeros_like(acc_ref)

    acc_ref[...] += jnp.dot(x_ref[...], w_ref[...],
                            preferred_element_type=jnp.float32)

    @pl.when(k == pl.num_programs(2) - 1)
    def _finalize():
        # Epilogue kept in f32 (v5e has no bf16 VPU path); cast only at store.
        r = acc_ref[...] + b_ref[...].astype(jnp.float32)
        if leaky_slope is not None:
            r = jnp.where(r >= 0.0, r, jnp.float32(leaky_slope) * r)
        if has_skip:
            r = r + s_ref[...].astype(jnp.float32)
        o_ref[...] = r.astype(o_ref.dtype)


def _pallas_matmul_fused(patches, wmat, bias, skip, leaky_slope, out_dtype):
    M, K = patches.shape
    _, N = wmat.shape

    # MXU-friendly, generation-safe tile sizes (working set ~2 MiB per step,
    # fits v7x's 64 MiB VMEM with plenty of headroom for double buffering).
    Kp = _round_up(K, 128)
    tk = 512 if Kp % 512 == 0 else (256 if Kp % 256 == 0 else 128)
    Np = _round_up(N, 128)
    tn = 256 if Np % 256 == 0 else 128
    if M >= 256:
        tm, Mp = 256, _round_up(M, 256)
    else:
        tm = _round_up(M, 16)
        Mp = tm

    # bf16 MXU inputs; zero padding keeps the matmul exact on the valid slice.
    x = jnp.pad(patches.astype(jnp.bfloat16), ((0, Mp - M), (0, Kp - K)))
    w = jnp.pad(wmat.astype(jnp.bfloat16), ((0, Kp - K), (0, Np - N)))
    b = jnp.pad(bias.astype(jnp.float32), (0, Np - N)).reshape(1, Np)

    has_skip = skip is not None
    in_arrays = [x, w, b]
    in_specs = [
        pl.BlockSpec((tm, tk), lambda i, j, k: (i, k)),
        pl.BlockSpec((tk, tn), lambda i, j, k: (k, j)),
        pl.BlockSpec((1, tn), lambda i, j, k: (0, j)),
    ]
    if has_skip:
        s = jnp.pad(skip.astype(jnp.bfloat16), ((0, Mp - M), (0, Np - N)))
        in_arrays.append(s)
        in_specs.append(pl.BlockSpec((tm, tn), lambda i, j, k: (i, j)))

    kernel = functools.partial(_mm_fused_kernel, leaky_slope=leaky_slope,
                               has_skip=has_skip)

    out_bytes = jnp.dtype(out_dtype).itemsize
    cost = pl.CostEstimate(
        flops=int(2 * Mp * Np * Kp),
        transcendentals=0,
        bytes_accessed=int(Mp * Kp * 2 + Kp * Np * 2 + Np * 4
                           + (Mp * Np * 2 if has_skip else 0)
                           + Mp * Np * out_bytes),
    )

    out = pl.pallas_call(
        kernel,
        out_shape=jax.ShapeDtypeStruct((Mp, Np), out_dtype),
        grid=(Mp // tm, Np // tn, Kp // tk),
        in_specs=in_specs,
        out_specs=pl.BlockSpec((tm, tn), lambda i, j, k: (i, j)),
        scratch_shapes=[pltpu.VMEM((tm, tn), jnp.float32)],
        compiler_params=pltpu.CompilerParams(
            dimension_semantics=("parallel", "parallel", "arbitrary")),
        cost_estimate=cost,
    )(*in_arrays)
    return out[:M, :N]


# ----------------------------------------------------------------------------
# Glue: im2col (slicing only, bf16), conv wrapper, bilinear x2 upsample,
# deterministic spectral normalization of weights.
# ----------------------------------------------------------------------------
def _im2col(x, kh, kw, stride, pad):
    # x: (N, H, W, C) -> (N*Ho*Wo, kh*kw*C), patch order (kh, kw, C)
    n, h, w, c = x.shape
    xp = jnp.pad(x, ((0, 0), (pad, pad), (pad, pad), (0, 0)))
    ho = (h + 2 * pad - kh) // stride + 1
    wo = (w + 2 * pad - kw) // stride + 1
    cols = []
    for i in range(kh):
        for j in range(kw):
            cols.append(
                xp[:, i:i + stride * ho:stride, j:j + stride * wo:stride, :])
    patches = jnp.stack(cols, axis=3)            # (N, Ho, Wo, kh*kw, C)
    return patches.reshape(n * ho * wo, kh * kw * c), ho, wo


def _conv2d(x, w_oihw, bias, stride, pad, leaky_slope, skip=None,
            out_dtype=jnp.bfloat16):
    # x: NHWC (bf16) ; w_oihw: PyTorch layout (Cout, Cin, KH, KW)
    n = x.shape[0]
    cout, cin, kh, kw = w_oihw.shape
    patches, ho, wo = _im2col(x, kh, kw, stride, pad)
    wmat = jnp.transpose(w_oihw, (2, 3, 1, 0)).reshape(kh * kw * cin, cout)
    if bias is None:
        bias = jnp.zeros((cout,), jnp.float32)
    skip2d = None
    if skip is not None:
        skip2d = skip.reshape(n * ho * wo, cout)
    out = _pallas_matmul_fused(patches, wmat, bias, skip2d, leaky_slope,
                               out_dtype)
    return out.reshape(n, ho, wo, cout)


def _upsample_bilinear_x2(x):
    # Matches torch F.interpolate(scale_factor=2, mode='bilinear',
    # align_corners=False) for NHWC input.  Lerp in f32, store input dtype.
    n, h, w, c = x.shape
    dtype = x.dtype
    xf = x.astype(jnp.float32)

    def idx_lam(in_size):
        o = jnp.arange(in_size * 2, dtype=jnp.float32)
        src = (o + 0.5) / 2.0 - 0.5
        src = jnp.clip(src, 0.0, float(in_size - 1))
        i0 = jnp.clip(jnp.floor(src).astype(jnp.int32), 0, in_size - 1)
        i1 = jnp.minimum(i0 + 1, in_size - 1)
        lam = src - i0.astype(jnp.float32)
        return i0, i1, lam

    i0, i1, lh = idx_lam(h)
    xf = (xf[:, i0] * (1.0 - lh)[None, :, None, None]
          + xf[:, i1] * lh[None, :, None, None])
    j0, j1, lw = idx_lam(w)
    xf = (xf[:, :, j0] * (1.0 - lw)[None, None, :, None]
          + xf[:, :, j1] * lw[None, None, :, None])
    return xf.astype(dtype)


def _spectral_normalize(w_oihw, n_iter=30):
    cout = w_oihw.shape[0]
    mat = w_oihw.reshape(cout, -1)
    v = jnp.ones((mat.shape[1],), jnp.float32) / jnp.sqrt(
        jnp.float32(mat.shape[1]))
    u = jnp.ones((cout,), jnp.float32) / jnp.sqrt(jnp.float32(cout))
    for _ in range(n_iter):
        u = mat @ v
        u = u / (jnp.linalg.norm(u) + 1e-12)
        v = mat.T @ u
        v = v / (jnp.linalg.norm(v) + 1e-12)
    sigma = u @ (mat @ v)
    return w_oihw / sigma


# ----------------------------------------------------------------------------
# Parameter construction (deterministic, synthetic).
# ----------------------------------------------------------------------------
def init_params(key, in_channels, out_channels, channels):
    ks = jax.random.split(key, 12)
    c = channels

    def w(k, shape, scale=0.05):
        return scale * jax.random.normal(k, shape, jnp.float32)

    return {
        "conv1_w": w(ks[0], (64, in_channels, 3, 3)),
        "conv1_b": w(ks[1], (64,)),
        "down1_w": _spectral_normalize(w(ks[2], (2 * c, c, 4, 4))),
        "down2_w": _spectral_normalize(w(ks[3], (4 * c, 2 * c, 4, 4))),
        "down3_w": _spectral_normalize(w(ks[4], (8 * c, 4 * c, 4, 4))),
        "up1_w": _spectral_normalize(w(ks[5], (4 * c, 8 * c, 3, 3))),
        "up2_w": _spectral_normalize(w(ks[6], (2 * c, 4 * c, 3, 3))),
        "up3_w": _spectral_normalize(w(ks[7], (c, 2 * c, 3, 3))),
        "conv2_w": _spectral_normalize(w(ks[8], (c, c, 3, 3))),
        "conv3_w": _spectral_normalize(w(ks[9], (c, c, 3, 3))),
        "conv4_w": w(ks[10], (out_channels, c, 3, 3)),
        "conv4_b": w(ks[11], (out_channels,)),
    }


# ----------------------------------------------------------------------------
# Forward pass (NCHW in, NCHW out — matches the PyTorch module).
# ----------------------------------------------------------------------------
def discriminator_unet_forward(x_nchw, params):
    slope = 0.2
    x = jnp.transpose(x_nchw, (0, 2, 3, 1)).astype(jnp.bfloat16)  # -> NHWC

    out1 = _conv2d(x, params["conv1_w"], params["conv1_b"], 1, 1, None)
    down1 = _conv2d(out1, params["down1_w"], None, 2, 1, slope)
    down2 = _conv2d(down1, params["down2_w"], None, 2, 1, slope)
    down3 = _conv2d(down2, params["down3_w"], None, 2, 1, slope)

    # Up path: skip adds are fused into the conv epilogue inside the kernel.
    down3u = _upsample_bilinear_x2(down3)
    up1 = _conv2d(down3u, params["up1_w"], None, 1, 1, slope, skip=down2)

    up1u = _upsample_bilinear_x2(up1)
    up2 = _conv2d(up1u, params["up2_w"], None, 1, 1, slope, skip=down1)

    up2u = _upsample_bilinear_x2(up2)
    up3 = _conv2d(up2u, params["up3_w"], None, 1, 1, slope, skip=out1)

    out = _conv2d(up3, params["conv2_w"], None, 1, 1, slope)
    out = _conv2d(out, params["conv3_w"], None, 1, 1, slope)
    out = _conv2d(out, params["conv4_w"], params["conv4_b"], 1, 1, None,
                  out_dtype=jnp.float32)

    return jnp.transpose(out, (0, 3, 1, 2))                      # -> NCHW


if __name__ == "__main__":
    IN_CHANNELS = 3
    OUT_CHANNELS = 1
    CHANNELS = 64        # conv1 hardcodes 64 output channels, so channels=64
    BATCH, SPATIAL = 2, 16

    key = jax.random.PRNGKey(0)
    k_x, k_p = jax.random.split(key)
    x = jax.random.normal(k_x, (BATCH, IN_CHANNELS, SPATIAL, SPATIAL),
                          jnp.float32)
    params = init_params(k_p, IN_CHANNELS, OUT_CHANNELS, CHANNELS)

    fwd = jax.jit(discriminator_unet_forward)
    out = fwd(x, params)
    jax.block_until_ready(out)

    assert out.shape == (BATCH, OUT_CHANNELS, SPATIAL, SPATIAL), out.shape
    assert jnp.all(jnp.isfinite(out))
    print("KERNEL_OK")
</pallas_src>

<mosaic_0001>
module attributes {stable_mosaic.version = 11 : i64} {
  func.func @_mm_fused_kernel(%arg0: i32, %arg1: i32, %arg2: i32, %arg3: memref<256x128xbf16, #tpu.memory_space<vmem>>, %arg4: memref<128x128xbf16, #tpu.memory_space<vmem>>, %arg5: memref<1x128xf32, #tpu.memory_space<vmem>>, %arg6: memref<256x128xbf16, #tpu.memory_space<vmem>>, %arg7: memref<256x128xf32, #tpu.memory_space<vmem>>) attributes {dimension_semantics = [#tpu.dimension_semantics<parallel>, #tpu.dimension_semantics<parallel>, #tpu.dimension_semantics<arbitrary>], iteration_bounds = array<i64: 2, 1, 1>, scalar_prefetch = 0 : i64, scratch_operands = 1 : i64, tpu.core_type = #tpu.core_type<tc>, window_params = [{transform_indices = @transform_0, window_bounds = array<i64: 256, 128>}, {transform_indices = @transform_1, window_bounds = array<i64: 128, 128>}, {transform_indices = @transform_2, window_bounds = array<i64: 1, 128>}, {transform_indices = @transform_3, window_bounds = array<i64: 256, 128>}]} {
    %c0_i32 = arith.constant 0 : i32
    %0 = arith.cmpi eq, %arg2, %c0_i32 : i32
    %1 = arith.extui %0 : i1 to i32
    %c0_i32_0 = arith.constant 0 : i32
    %2 = arith.cmpi ne, %1, %c0_i32_0 : i32
    scf.if %2 {
      %cst_10 = arith.constant 0.000000e+00 : f32
      %12 = vector.broadcast %cst_10 : f32 to vector<256x128xf32>
      %c0_11 = arith.constant 0 : index
      %c0_12 = arith.constant 0 : index
      %13 = vector.load %arg7[%c0_11, %c0_12] : memref<256x128xf32, #tpu.memory_space<vmem>>, vector<256x128xf32>
      tpu.vector_store %arg7[%c0_11, %c0_12], %12 {strides = array<i32>} : memref<256x128xf32, #tpu.memory_space<vmem>>, vector<256x128xf32>,
    } else {
    }
    %c0 = arith.constant 0 : index
    %c0_1 = arith.constant 0 : index
    %3 = vector.load %arg7[%c0, %c0_1] : memref<256x128xf32, #tpu.memory_space<vmem>>, vector<256x128xf32>
    %c0_2 = arith.constant 0 : index
    %c0_3 = arith.constant 0 : index
    %4 = vector.load %arg3[%c0_2, %c0_3] : memref<256x128xbf16, #tpu.memory_space<vmem>>, vector<256x128xbf16>
    %c0_4 = arith.constant 0 : index
    %c0_5 = arith.constant 0 : index
    %5 = vector.load %arg4[%c0_4, %c0_5] : memref<128x128xbf16, #tpu.memory_space<vmem>>, vector<128x128xbf16>
    %cst = arith.constant dense<0.000000e+00> : vector<256x128xf32>
    %6 = tpu.matmul %4, %5, %cst {dimension_numbers = #tpu.dot_dimension_numbers<[1], [0], [0], [1], [0, 0, 1, 1], [], []>} : vector<256x128xbf16>, vector<128x128xbf16>, vector<256x128xf32> -> vector<256x128xf32>
    %7 = arith.addf %3, %6 : vector<256x128xf32>
    %c0_6 = arith.constant 0 : index
    %c0_7 = arith.constant 0 : index
    %8 = vector.load %arg7[%c0_6, %c0_7] : memref<256x128xf32, #tpu.memory_space<vmem>>, vector<256x128xf32>
    tpu.vector_store %arg7[%c0_6, %c0_7], %7 {strides = array<i32>} : memref<256x128xf32, #tpu.memory_space<vmem>>, vector<256x128xf32>,
    %c0_i32_8 = arith.constant 0 : i32
    %9 = arith.cmpi eq, %arg2, %c0_i32_8 : i32
    %10 = arith.extui %9 : i1 to i32
    %c0_i32_9 = arith.constant 0 : i32
    %11 = arith.cmpi ne, %10, %c0_i32_9 : i32
    scf.if %11 {
      %c0_10 = arith.constant 0 : index
      %c0_11 = arith.constant 0 : index
      %12 = vector.load %arg7[%c0_10, %c0_11] : memref<256x128xf32, #tpu.memory_space<vmem>>, vector<256x128xf32>
      %c0_12 = arith.constant 0 : index
      %c0_13 = arith.constant 0 : index
      %13 = vector.load %arg5[%c0_12, %c0_13] : memref<1x128xf32, #tpu.memory_space<vmem>>, vector<1x128xf32>
      %14 = vector.broadcast %13 : vector<1x128xf32> to vector<256x128xf32>
      %15 = arith.addf %12, %14 : vector<256x128xf32>
      %16 = arith.truncf %15 : vector<256x128xf32> to vector<256x128xbf16>
      %c0_14 = arith.constant 0 : index
      %c0_15 = arith.constant 0 : index
      %17 = vector.load %arg6[%c0_14, %c0_15] : memref<256x128xbf16, #tpu.memory_space<vmem>>, vector<256x128xbf16>
      tpu.vector_store %arg6[%c0_14, %c0_15], %16 {strides = array<i32>} : memref<256x128xbf16, #tpu.memory_space<vmem>>, vector<256x128xbf16>,
    } else {
    }
    return
  }
  func.func @transform_0(%arg0: i32, %arg1: i32, %arg2: i32) -> (i32, i32) {
    %c0_i32 = arith.constant 0 : i32
    return %arg0, %arg2 : i32, i32
  }
  func.func @transform_1(%arg0: i32, %arg1: i32, %arg2: i32) -> (i32, i32) {
    %c0_i32 = arith.constant 0 : i32
    return %arg2, %arg1 : i32, i32
  }
  func.func @transform_2(%arg0: i32, %arg1: i32, %arg2: i32) -> (i32, i32) {
    %c0_i32 = arith.constant 0 : i32
    %c0_i32_0 = arith.constant 0 : i32
    return %c0_i32, %arg1 : i32, i32
  }
  func.func @transform_3(%arg0: i32, %arg1: i32, %arg2: i32) -> (i32, i32) {
    %c0_i32 = arith.constant 0 : i32
    return %arg0, %arg1 : i32, i32
  }
}

module attributes {stable_mosaic.version = 11 : i64} {
  func.func @_mm_fused_kernel(%arg0: i32, %arg1: i32, %arg2: i32, %arg3: memref<128x512xbf16, #tpu.memory_space<vmem>>, %arg4: memref<512x128xbf16, #tpu.memory_space<vmem>>, %arg5: memref<1x128xf32, #tpu.memory_space<vmem>>, %arg6: memref<128x128xbf16, #tpu.memory_space<vmem>>, %arg7: memref<128x128xf32, #tpu.memory_space<vmem>>) attributes {dimension_semantics = [#tpu.dimension_semantics<parallel>, #tpu.dimension_semantics<parallel>, #tpu.dimension_semantics<arbitrary>], iteration_bounds = array<i64: 1, 1, 2>, scalar_prefetch = 0 : i64, scratch_operands = 1 : i64, tpu.core_type = #tpu.core_type<tc>, window_params = [{transform_indices = @transform_0, window_bounds = array<i64: 128, 512>}, {transform_indices = @transform_1, window_bounds = array<i64: 512, 128>}, {transform_indices = @transform_2, window_bounds = array<i64: 1, 128>}, {transform_indices = @transform_3, window_bounds = array<i64: 128, 128>}]} {
    %c0_i32 = arith.constant 0 : i32
    %0 = arith.cmpi eq, %arg2, %c0_i32 : i32
    %1 = arith.extui %0 : i1 to i32
    %c0_i32_0 = arith.constant 0 : i32
    %2 = arith.cmpi ne, %1, %c0_i32_0 : i32
    scf.if %2 {
      %cst_9 = arith.constant 0.000000e+00 : f32
      %12 = vector.broadcast %cst_9 : f32 to vector<128x128xf32>
      %c0_10 = arith.constant 0 : index
      %c0_11 = arith.constant 0 : index
      %13 = vector.load %arg7[%c0_10, %c0_11] : memref<128x128xf32, #tpu.memory_space<vmem>>, vector<128x128xf32>
      tpu.vector_store %arg7[%c0_10, %c0_11], %12 {strides = array<i32>} : memref<128x128xf32, #tpu.memory_space<vmem>>, vector<128x128xf32>,
    } else {
    }
    %c0 = arith.constant 0 : index
    %c0_1 = arith.constant 0 : index
    %3 = vector.load %arg7[%c0, %c0_1] : memref<128x128xf32, #tpu.memory_space<vmem>>, vector<128x128xf32>
    %c0_2 = arith.constant 0 : index
    %c0_3 = arith.constant 0 : index
    %4 = vector.load %arg3[%c0_2, %c0_3] : memref<128x512xbf16, #tpu.memory_space<vmem>>, vector<128x512xbf16>
    %c0_4 = arith.constant 0 : index
    %c0_5 = arith.constant 0 : index
    %5 = vector.load %arg4[%c0_4, %c0_5] : memref<512x128xbf16, #tpu.memory_space<vmem>>, vector<512x128xbf16>
    %cst = arith.constant dense<0.000000e+00> : vector<128x128xf32>
    %6 = tpu.matmul %4, %5, %cst {dimension_numbers = #tpu.dot_dimension_numbers<[1], [0], [0], [1], [0, 0, 1, 1], [], []>} : vector<128x512xbf16>, vector<512x128xbf16>, vector<128x128xf32> -> vector<128x128xf32>
    %7 = arith.addf %3, %6 : vector<128x128xf32>
    %c0_6 = arith.constant 0 : index
    %c0_7 = arith.constant 0 : index
    %8 = vector.load %arg7[%c0_6, %c0_7] : memref<128x128xf32, #tpu.memory_space<vmem>>, vector<128x128xf32>
    tpu.vector_store %arg7[%c0_6, %c0_7], %7 {strides = array<i32>} : memref<128x128xf32, #tpu.memory_space<vmem>>, vector<128x128xf32>,
    %c1_i32 = arith.constant 1 : i32
    %9 = arith.cmpi eq, %arg2, %c1_i32 : i32
    %10 = arith.extui %9 : i1 to i32
    %c0_i32_8 = arith.constant 0 : i32
    %11 = arith.cmpi ne, %10, %c0_i32_8 : i32
    scf.if %11 {
      %c0_9 = arith.constant 0 : index
      %c0_10 = arith.constant 0 : index
      %12 = vector.load %arg7[%c0_9, %c0_10] : memref<128x128xf32, #tpu.memory_space<vmem>>, vector<128x128xf32>
      %c0_11 = arith.constant 0 : index
      %c0_12 = arith.constant 0 : index
      %13 = vector.load %arg5[%c0_11, %c0_12] : memref<1x128xf32, #tpu.memory_space<vmem>>, vector<1x128xf32>
      %14 = vector.broadcast %13 : vector<1x128xf32> to vector<128x128xf32>
      %15 = arith.addf %12, %14 : vector<128x128xf32>
      %cst_13 = arith.constant 0.000000e+00 : f32
      %16 = vector.broadcast %cst_13 : f32 to vector<128x128xf32>
      %17 = arith.cmpf oge, %15, %16 : vector<128x128xf32>
      %cst_14 = arith.constant 2.000000e-01 : f32
      %18 = vector.broadcast %cst_14 : f32 to vector<128x128xf32>
      %19 = arith.mulf %18, %15 : vector<128x128xf32>
      %20 = arith.select %17, %15, %19 : vector<128x128xi1>, vector<128x128xf32>
      %21 = arith.truncf %20 : vector<128x128xf32> to vector<128x128xbf16>
      %c0_15 = arith.constant 0 : index
      %c0_16 = arith.constant 0 : index
      %22 = vector.load %arg6[%c0_15, %c0_16] : memref<128x128xbf16, #tpu.memory_space<vmem>>, vector<128x128xbf16>
      tpu.vector_store %arg6[%c0_15, %c0_16], %21 {strides = array<i32>} : memref<128x128xbf16, #tpu.memory_space<vmem>>, vector<128x128xbf16>,
    } else {
    }
    return
  }
  func.func @transform_0(%arg0: i32, %arg1: i32, %arg2: i32) -> (i32, i32) {
    %c0_i32 = arith.constant 0 : i32
    return %arg0, %arg2 : i32, i32
  }
  func.func @transform_1(%arg0: i32, %arg1: i32, %arg2: i32) -> (i32, i32) {
    %c0_i32 = arith.constant 0 : i32
    return %arg2, %arg1 : i32, i32
  }
  func.func @transform_2(%arg0: i32, %arg1: i32, %arg2: i32) -> (i32, i32) {
    %c0_i32 = arith.constant 0 : i32
    %c0_i32_0 = arith.constant 0 : i32
    return %c0_i32, %arg1 : i32, i32
  }
  func.func @transform_3(%arg0: i32, %arg1: i32, %arg2: i32) -> (i32, i32) {
    %c0_i32 = arith.constant 0 : i32
    return %arg0, %arg1 : i32, i32
  }
}

module attributes {stable_mosaic.version = 11 : i64} {
  func.func @_mm_fused_kernel(%arg0: i32, %arg1: i32, %arg2: i32, %arg3: memref<32x512xbf16, #tpu.memory_space<vmem>>, %arg4: memref<512x256xbf16, #tpu.memory_space<vmem>>, %arg5: memref<1x256xf32, #tpu.memory_space<vmem>>, %arg6: memref<32x256xbf16, #tpu.memory_space<vmem>>, %arg7: memref<32x256xf32, #tpu.memory_space<vmem>>) attributes {dimension_semantics = [#tpu.dimension_semantics<parallel>, #tpu.dimension_semantics<parallel>, #tpu.dimension_semantics<arbitrary>], iteration_bounds = array<i64: 1, 1, 4>, scalar_prefetch = 0 : i64, scratch_operands = 1 : i64, tpu.core_type = #tpu.core_type<tc>, window_params = [{transform_indices = @transform_0, window_bounds = array<i64: 32, 512>}, {transform_indices = @transform_1, window_bounds = array<i64: 512, 256>}, {transform_indices = @transform_2, window_bounds = array<i64: 1, 256>}, {transform_indices = @transform_3, window_bounds = array<i64: 32, 256>}]} {
    %c0_i32 = arith.constant 0 : i32
    %0 = arith.cmpi eq, %arg2, %c0_i32 : i32
    %1 = arith.extui %0 : i1 to i32
    %c0_i32_0 = arith.constant 0 : i32
    %2 = arith.cmpi ne, %1, %c0_i32_0 : i32
    scf.if %2 {
      %cst_9 = arith.constant 0.000000e+00 : f32
      %12 = vector.broadcast %cst_9 : f32 to vector<32x256xf32>
      %c0_10 = arith.constant 0 : index
      %c0_11 = arith.constant 0 : index
      %13 = vector.load %arg7[%c0_10, %c0_11] : memref<32x256xf32, #tpu.memory_space<vmem>>, vector<32x256xf32>
      tpu.vector_store %arg7[%c0_10, %c0_11], %12 {strides = array<i32>} : memref<32x256xf32, #tpu.memory_space<vmem>>, vector<32x256xf32>,
    } else {
    }
    %c0 = arith.constant 0 : index
    %c0_1 = arith.constant 0 : index
    %3 = vector.load %arg7[%c0, %c0_1] : memref<32x256xf32, #tpu.memory_space<vmem>>, vector<32x256xf32>
    %c0_2 = arith.constant 0 : index
    %c0_3 = arith.constant 0 : index
    %4 = vector.load %arg3[%c0_2, %c0_3] : memref<32x512xbf16, #tpu.memory_space<vmem>>, vector<32x512xbf16>
    %c0_4 = arith.constant 0 : index
    %c0_5 = arith.constant 0 : index
    %5 = vector.load %arg4[%c0_4, %c0_5] : memref<512x256xbf16, #tpu.memory_space<vmem>>, vector<512x256xbf16>
    %cst = arith.constant dense<0.000000e+00> : vector<32x256xf32>
    %6 = tpu.matmul %4, %5, %cst {dimension_numbers = #tpu.dot_dimension_numbers<[1], [0], [0], [1], [0, 0, 1, 1], [], []>} : vector<32x512xbf16>, vector<512x256xbf16>, vector<32x256xf32> -> vector<32x256xf32>
    %7 = arith.addf %3, %6 : vector<32x256xf32>
    %c0_6 = arith.constant 0 : index
    %c0_7 = arith.constant 0 : index
    %8 = vector.load %arg7[%c0_6, %c0_7] : memref<32x256xf32, #tpu.memory_space<vmem>>, vector<32x256xf32>
    tpu.vector_store %arg7[%c0_6, %c0_7], %7 {strides = array<i32>} : memref<32x256xf32, #tpu.memory_space<vmem>>, vector<32x256xf32>,
    %c3_i32 = arith.constant 3 : i32
    %9 = arith.cmpi eq, %arg2, %c3_i32 : i32
    %10 = arith.extui %9 : i1 to i32
    %c0_i32_8 = arith.constant 0 : i32
    %11 = arith.cmpi ne, %10, %c0_i32_8 : i32
    scf.if %11 {
      %c0_9 = arith.constant 0 : index
      %c0_10 = arith.constant 0 : index
      %12 = vector.load %arg7[%c0_9, %c0_10] : memref<32x256xf32, #tpu.memory_space<vmem>>, vector<32x256xf32>
      %c0_11 = arith.constant 0 : index
      %c0_12 = arith.constant 0 : index
      %13 = vector.load %arg5[%c0_11, %c0_12] : memref<1x256xf32, #tpu.memory_space<vmem>>, vector<1x256xf32>
      %14 = vector.broadcast %13 : vector<1x256xf32> to vector<32x256xf32>
      %15 = arith.addf %12, %14 : vector<32x256xf32>
      %cst_13 = arith.constant 0.000000e+00 : f32
      %16 = vector.broadcast %cst_13 : f32 to vector<32x256xf32>
      %17 = arith.cmpf oge, %15, %16 : vector<32x256xf32>
      %cst_14 = arith.constant 2.000000e-01 : f32
      %18 = vector.broadcast %cst_14 : f32 to vector<32x256xf32>
      %19 = arith.mulf %18, %15 : vector<32x256xf32>
      %20 = arith.select %17, %15, %19 : vector<32x256xi1>, vector<32x256xf32>
      %21 = arith.truncf %20 : vector<32x256xf32> to vector<32x256xbf16>
      %c0_15 = arith.constant 0 : index
      %c0_16 = arith.constant 0 : index
      %22 = vector.load %arg6[%c0_15, %c0_16] : memref<32x256xbf16, #tpu.memory_space<vmem>>, vector<32x256xbf16>
      tpu.vector_store %arg6[%c0_15, %c0_16], %21 {strides = array<i32>} : memref<32x256xbf16, #tpu.memory_space<vmem>>, vector<32x256xbf16>,
    } else {
    }
    return
  }
  func.func @transform_0(%arg0: i32, %arg1: i32, %arg2: i32) -> (i32, i32) {
    %c0_i32 = arith.constant 0 : i32
    return %arg0, %arg2 : i32, i32
  }
  func.func @transform_1(%arg0: i32, %arg1: i32, %arg2: i32) -> (i32, i32) {
    %c0_i32 = arith.constant 0 : i32
    return %arg2, %arg1 : i32, i32
  }
  func.func @transform_2(%arg0: i32, %arg1: i32, %arg2: i32) -> (i32, i32) {
    %c0_i32 = arith.constant 0 : i32
    %c0_i32_0 = arith.constant 0 : i32
    return %c0_i32, %arg1 : i32, i32
  }
  func.func @transform_3(%arg0: i32, %arg1: i32, %arg2: i32) -> (i32, i32) {
    %c0_i32 = arith.constant 0 : i32
    return %arg0, %arg1 : i32, i32
  }
}

module attributes {stable_mosaic.version = 11 : i64} {
  func.func @_mm_fused_kernel(%arg0: i32, %arg1: i32, %arg2: i32, %arg3: memref<16x512xbf16, #tpu.memory_space<vmem>>, %arg4: memref<512x256xbf16, #tpu.memory_space<vmem>>, %arg5: memref<1x256xf32, #tpu.memory_space<vmem>>, %arg6: memref<16x256xbf16, #tpu.memory_space<vmem>>, %arg7: memref<16x256xf32, #tpu.memory_space<vmem>>) attributes {dimension_semantics = [#tpu.dimension_semantics<parallel>, #tpu.dimension_semantics<parallel>, #tpu.dimension_semantics<arbitrary>], iteration_bounds = array<i64: 1, 2, 8>, scalar_prefetch = 0 : i64, scratch_operands = 1 : i64, tpu.core_type = #tpu.core_type<tc>, window_params = [{transform_indices = @transform_0, window_bounds = array<i64: 16, 512>}, {transform_indices = @transform_1, window_bounds = array<i64: 512, 256>}, {transform_indices = @transform_2, window_bounds = array<i64: 1, 256>}, {transform_indices = @transform_3, window_bounds = array<i64: 16, 256>}]} {
    %c0_i32 = arith.constant 0 : i32
    %0 = arith.cmpi eq, %arg2, %c0_i32 : i32
    %1 = arith.extui %0 : i1 to i32
    %c0_i32_0 = arith.constant 0 : i32
    %2 = arith.cmpi ne, %1, %c0_i32_0 : i32
    scf.if %2 {
      %cst_9 = arith.constant 0.000000e+00 : f32
      %12 = vector.broadcast %cst_9 : f32 to vector<16x256xf32>
      %c0_10 = arith.constant 0 : index
      %c0_11 = arith.constant 0 : index
      %13 = vector.load %arg7[%c0_10, %c0_11] : memref<16x256xf32, #tpu.memory_space<vmem>>, vector<16x256xf32>
      tpu.vector_store %arg7[%c0_10, %c0_11], %12 {strides = array<i32>} : memref<16x256xf32, #tpu.memory_space<vmem>>, vector<16x256xf32>,
    } else {
    }
    %c0 = arith.constant 0 : index
    %c0_1 = arith.constant 0 : index
    %3 = vector.load %arg7[%c0, %c0_1] : memref<16x256xf32, #tpu.memory_space<vmem>>, vector<16x256xf32>
    %c0_2 = arith.constant 0 : index
    %c0_3 = arith.constant 0 : index
    %4 = vector.load %arg3[%c0_2, %c0_3] : memref<16x512xbf16, #tpu.memory_space<vmem>>, vector<16x512xbf16>
    %c0_4 = arith.constant 0 : index
    %c0_5 = arith.constant 0 : index
    %5 = vector.load %arg4[%c0_4, %c0_5] : memref<512x256xbf16, #tpu.memory_space<vmem>>, vector<512x256xbf16>
    %cst = arith.constant dense<0.000000e+00> : vector<16x256xf32>
    %6 = tpu.matmul %4, %5, %cst {dimension_numbers = #tpu.dot_dimension_numbers<[1], [0], [0], [1], [0, 0, 1, 1], [], []>} : vector<16x512xbf16>, vector<512x256xbf16>, vector<16x256xf32> -> vector<16x256xf32>
    %7 = arith.addf %3, %6 : vector<16x256xf32>
    %c0_6 = arith.constant 0 : index
    %c0_7 = arith.constant 0 : index
    %8 = vector.load %arg7[%c0_6, %c0_7] : memref<16x256xf32, #tpu.memory_space<vmem>>, vector<16x256xf32>
    tpu.vector_store %arg7[%c0_6, %c0_7], %7 {strides = array<i32>} : memref<16x256xf32, #tpu.memory_space<vmem>>, vector<16x256xf32>,
    %c7_i32 = arith.constant 7 : i32
    %9 = arith.cmpi eq, %arg2, %c7_i32 : i32
    %10 = arith.extui %9 : i1 to i32
    %c0_i32_8 = arith.constant 0 : i32
    %11 = arith.cmpi ne, %10, %c0_i32_8 : i32
    scf.if %11 {
      %c0_9 = arith.constant 0 : index
      %c0_10 = arith.constant 0 : index
      %12 = vector.load %arg7[%c0_9, %c0_10] : memref<16x256xf32, #tpu.memory_space<vmem>>, vector<16x256xf32>
      %c0_11 = arith.constant 0 : index
      %c0_12 = arith.constant 0 : index
      %13 = vector.load %arg5[%c0_11, %c0_12] : memref<1x256xf32, #tpu.memory_space<vmem>>, vector<1x256xf32>
      %14 = vector.broadcast %13 : vector<1x256xf32> to vector<16x256xf32>
      %15 = arith.addf %12, %14 : vector<16x256xf32>
      %cst_13 = arith.constant 0.000000e+00 : f32
      %16 = vector.broadcast %cst_13 : f32 to vector<16x256xf32>
      %17 = arith.cmpf oge, %15, %16 : vector<16x256xf32>
      %cst_14 = arith.constant 2.000000e-01 : f32
      %18 = vector.broadcast %cst_14 : f32 to vector<16x256xf32>
      %19 = arith.mulf %18, %15 : vector<16x256xf32>
      %20 = arith.select %17, %15, %19 : vector<16x256xi1>, vector<16x256xf32>
      %21 = arith.truncf %20 : vector<16x256xf32> to vector<16x256xbf16>
      %c0_15 = arith.constant 0 : index
      %c0_16 = arith.constant 0 : index
      %22 = vector.load %arg6[%c0_15, %c0_16] : memref<16x256xbf16, #tpu.memory_space<vmem>>, vector<16x256xbf16>
      tpu.vector_store %arg6[%c0_15, %c0_16], %21 {strides = array<i32>} : memref<16x256xbf16, #tpu.memory_space<vmem>>, vector<16x256xbf16>,
    } else {
    }
    return
  }
  func.func @transform_0(%arg0: i32, %arg1: i32, %arg2: i32) -> (i32, i32) {
    %c0_i32 = arith.constant 0 : i32
    return %arg0, %arg2 : i32, i32
  }
  func.func @transform_1(%arg0: i32, %arg1: i32, %arg2: i32) -> (i32, i32) {
    %c0_i32 = arith.constant 0 : i32
    return %arg2, %arg1 : i32, i32
  }
  func.func @transform_2(%arg0: i32, %arg1: i32, %arg2: i32) -> (i32, i32) {
    %c0_i32 = arith.constant 0 : i32
    %c0_i32_0 = arith.constant 0 : i32
    return %c0_i32, %arg1 : i32, i32
  }
  func.func @transform_3(%arg0: i32, %arg1: i32, %arg2: i32) -> (i32, i32) {
    %c0_i32 = arith.constant 0 : i32
    return %arg0, %arg1 : i32, i32
  }
}

module attributes {stable_mosaic.version = 11 : i64} {
  func.func @_mm_fused_kernel(%arg0: i32, %arg1: i32, %arg2: i32, %arg3: memref<32x512xbf16, #tpu.memory_space<vmem>>, %arg4: memref<512x256xbf16, #tpu.memory_space<vmem>>, %arg5: memref<1x256xf32, #tpu.memory_space<vmem>>, %arg6: memref<32x256xbf16, #tpu.memory_space<vmem>>, %arg7: memref<32x256xbf16, #tpu.memory_space<vmem>>, %arg8: memref<32x256xf32, #tpu.memory_space<vmem>>) attributes {dimension_semantics = [#tpu.dimension_semantics<parallel>, #tpu.dimension_semantics<parallel>, #tpu.dimension_semantics<arbitrary>], iteration_bounds = array<i64: 1, 1, 9>, scalar_prefetch = 0 : i64, scratch_operands = 1 : i64, tpu.core_type = #tpu.core_type<tc>, window_params = [{transform_indices = @transform_0, window_bounds = array<i64: 32, 512>}, {transform_indices = @transform_1, window_bounds = array<i64: 512, 256>}, {transform_indices = @transform_2, window_bounds = array<i64: 1, 256>}, {transform_indices = @transform_3, window_bounds = array<i64: 32, 256>}, {transform_indices = @transform_4, window_bounds = array<i64: 32, 256>}]} {
    %c0_i32 = arith.constant 0 : i32
    %0 = arith.cmpi eq, %arg2, %c0_i32 : i32
    %1 = arith.extui %0 : i1 to i32
    %c0_i32_0 = arith.constant 0 : i32
    %2 = arith.cmpi ne, %1, %c0_i32_0 : i32
    scf.if %2 {
      %cst_9 = arith.constant 0.000000e+00 : f32
      %12 = vector.broadcast %cst_9 : f32 to vector<32x256xf32>
      %c0_10 = arith.constant 0 : index
      %c0_11 = arith.constant 0 : index
      %13 = vector.load %arg8[%c0_10, %c0_11] : memref<32x256xf32, #tpu.memory_space<vmem>>, vector<32x256xf32>
      tpu.vector_store %arg8[%c0_10, %c0_11], %12 {strides = array<i32>} : memref<32x256xf32, #tpu.memory_space<vmem>>, vector<32x256xf32>,
    } else {
    }
    %c0 = arith.constant 0 : index
    %c0_1 = arith.constant 0 : index
    %3 = vector.load %arg8[%c0, %c0_1] : memref<32x256xf32, #tpu.memory_space<vmem>>, vector<32x256xf32>
    %c0_2 = arith.constant 0 : index
    %c0_3 = arith.constant 0 : index
    %4 = vector.load %arg3[%c0_2, %c0_3] : memref<32x512xbf16, #tpu.memory_space<vmem>>, vector<32x512xbf16>
    %c0_4 = arith.constant 0 : index
    %c0_5 = arith.constant 0 : index
    %5 = vector.load %arg4[%c0_4, %c0_5] : memref<512x256xbf16, #tpu.memory_space<vmem>>, vector<512x256xbf16>
    %cst = arith.constant dense<0.000000e+00> : vector<32x256xf32>
    %6 = tpu.matmul %4, %5, %cst {dimension_numbers = #tpu.dot_dimension_numbers<[1], [0], [0], [1], [0, 0, 1, 1], [], []>} : vector<32x512xbf16>, vector<512x256xbf16>, vector<32x256xf32> -> vector<32x256xf32>
    %7 = arith.addf %3, %6 : vector<32x256xf32>
    %c0_6 = arith.constant 0 : index
    %c0_7 = arith.constant 0 : index
    %8 = vector.load %arg8[%c0_6, %c0_7] : memref<32x256xf32, #tpu.memory_space<vmem>>, vector<32x256xf32>
    tpu.vector_store %arg8[%c0_6, %c0_7], %7 {strides = array<i32>} : memref<32x256xf32, #tpu.memory_space<vmem>>, vector<32x256xf32>,
    %c8_i32 = arith.constant 8 : i32
    %9 = arith.cmpi eq, %arg2, %c8_i32 : i32
    %10 = arith.extui %9 : i1 to i32
    %c0_i32_8 = arith.constant 0 : i32
    %11 = arith.cmpi ne, %10, %c0_i32_8 : i32
    scf.if %11 {
      %c0_9 = arith.constant 0 : index
      %c0_10 = arith.constant 0 : index
      %12 = vector.load %arg8[%c0_9, %c0_10] : memref<32x256xf32, #tpu.memory_space<vmem>>, vector<32x256xf32>
      %c0_11 = arith.constant 0 : index
      %c0_12 = arith.constant 0 : index
      %13 = vector.load %arg5[%c0_11, %c0_12] : memref<1x256xf32, #tpu.memory_space<vmem>>, vector<1x256xf32>
      %14 = vector.broadcast %13 : vector<1x256xf32> to vector<32x256xf32>
      %15 = arith.addf %12, %14 : vector<32x256xf32>
      %cst_13 = arith.constant 0.000000e+00 : f32
      %16 = vector.broadcast %cst_13 : f32 to vector<32x256xf32>
      %17 = arith.cmpf oge, %15, %16 : vector<32x256xf32>
      %cst_14 = arith.constant 2.000000e-01 : f32
      %18 = vector.broadcast %cst_14 : f32 to vector<32x256xf32>
      %19 = arith.mulf %18, %15 : vector<32x256xf32>
      %20 = arith.select %17, %15, %19 : vector<32x256xi1>, vector<32x256xf32>
      %c0_15 = arith.constant 0 : index
      %c0_16 = arith.constant 0 : index
      %21 = vector.load %arg6[%c0_15, %c0_16] : memref<32x256xbf16, #tpu.memory_space<vmem>>, vector<32x256xbf16>
      %22 = arith.extf %21 : vector<32x256xbf16> to vector<32x256xf32>
      %23 = arith.addf %20, %22 : vector<32x256xf32>
      %24 = arith.truncf %23 : vector<32x256xf32> to vector<32x256xbf16>
      %c0_17 = arith.constant 0 : index
      %c0_18 = arith.constant 0 : index
      %25 = vector.load %arg7[%c0_17, %c0_18] : memref<32x256xbf16, #tpu.memory_space<vmem>>, vector<32x256xbf16>
      tpu.vector_store %arg7[%c0_17, %c0_18], %24 {strides = array<i32>} : memref<32x256xbf16, #tpu.memory_space<vmem>>, vector<32x256xbf16>,
    } else {
    }
    return
  }
  func.func @transform_0(%arg0: i32, %arg1: i32, %arg2: i32) -> (i32, i32) {
    %c0_i32 = arith.constant 0 : i32
    return %arg0, %arg2 : i32, i32
  }
  func.func @transform_1(%arg0: i32, %arg1: i32, %arg2: i32) -> (i32, i32) {
    %c0_i32 = arith.constant 0 : i32
    return %arg2, %arg1 : i32, i32
  }
  func.func @transform_2(%arg0: i32, %arg1: i32, %arg2: i32) -> (i32, i32) {
    %c0_i32 = arith.constant 0 : i32
    %c0_i32_0 = arith.constant 0 : i32
    return %c0_i32, %arg1 : i32, i32
  }
  func.func @transform_3(%arg0: i32, %arg1: i32, %arg2: i32) -> (i32, i32) {
    %c0_i32 = arith.constant 0 : i32
    return %arg0, %arg1 : i32, i32
  }
  func.func @transform_4(%arg0: i32, %arg1: i32, %arg2: i32) -> (i32, i32) {
    %c0_i32 = arith.constant 0 : i32
    return %arg0, %arg1 : i32, i32
  }
}

module attributes {stable_mosaic.version = 11 : i64} {
  func.func @_mm_fused_kernel(%arg0: i32, %arg1: i32, %arg2: i32, %arg3: memref<128x256xbf16, #tpu.memory_space<vmem>>, %arg4: memref<256x128xbf16, #tpu.memory_space<vmem>>, %arg5: memref<1x128xf32, #tpu.memory_space<vmem>>, %arg6: memref<128x128xbf16, #tpu.memory_space<vmem>>, %arg7: memref<128x128xbf16, #tpu.memory_space<vmem>>, %arg8: memref<128x128xf32, #tpu.memory_space<vmem>>) attributes {dimension_semantics = [#tpu.dimension_semantics<parallel>, #tpu.dimension_semantics<parallel>, #tpu.dimension_semantics<arbitrary>], iteration_bounds = array<i64: 1, 1, 9>, scalar_prefetch = 0 : i64, scratch_operands = 1 : i64, tpu.core_type = #tpu.core_type<tc>, window_params = [{transform_indices = @transform_0, window_bounds = array<i64: 128, 256>}, {transform_indices = @transform_1, window_bounds = array<i64: 256, 128>}, {transform_indices = @transform_2, window_bounds = array<i64: 1, 128>}, {transform_indices = @transform_3, window_bounds = array<i64: 128, 128>}, {transform_indices = @transform_4, window_bounds = array<i64: 128, 128>}]} {
    %c0_i32 = arith.constant 0 : i32
    %0 = arith.cmpi eq, %arg2, %c0_i32 : i32
    %1 = arith.extui %0 : i1 to i32
    %c0_i32_0 = arith.constant 0 : i32
    %2 = arith.cmpi ne, %1, %c0_i32_0 : i32
    scf.if %2 {
      %cst_9 = arith.constant 0.000000e+00 : f32
      %12 = vector.broadcast %cst_9 : f32 to vector<128x128xf32>
      %c0_10 = arith.constant 0 : index
      %c0_11 = arith.constant 0 : index
      %13 = vector.load %arg8[%c0_10, %c0_11] : memref<128x128xf32, #tpu.memory_space<vmem>>, vector<128x128xf32>
      tpu.vector_store %arg8[%c0_10, %c0_11], %12 {strides = array<i32>} : memref<128x128xf32, #tpu.memory_space<vmem>>, vector<128x128xf32>,
    } else {
    }
    %c0 = arith.constant 0 : index
    %c0_1 = arith.constant 0 : index
    %3 = vector.load %arg8[%c0, %c0_1] : memref<128x128xf32, #tpu.memory_space<vmem>>, vector<128x128xf32>
    %c0_2 = arith.constant 0 : index
    %c0_3 = arith.constant 0 : index
    %4 = vector.load %arg3[%c0_2, %c0_3] : memref<128x256xbf16, #tpu.memory_space<vmem>>, vector<128x256xbf16>
    %c0_4 = arith.constant 0 : index
    %c0_5 = arith.constant 0 : index
    %5 = vector.load %arg4[%c0_4, %c0_5] : memref<256x128xbf16, #tpu.memory_space<vmem>>, vector<256x128xbf16>
    %cst = arith.constant dense<0.000000e+00> : vector<128x128xf32>
    %6 = tpu.matmul %4, %5, %cst {dimension_numbers = #tpu.dot_dimension_numbers<[1], [0], [0], [1], [0, 0, 1, 1], [], []>} : vector<128x256xbf16>, vector<256x128xbf16>, vector<128x128xf32> -> vector<128x128xf32>
    %7 = arith.addf %3, %6 : vector<128x128xf32>
    %c0_6 = arith.constant 0 : index
    %c0_7 = arith.constant 0 : index
    %8 = vector.load %arg8[%c0_6, %c0_7] : memref<128x128xf32, #tpu.memory_space<vmem>>, vector<128x128xf32>
    tpu.vector_store %arg8[%c0_6, %c0_7], %7 {strides = array<i32>} : memref<128x128xf32, #tpu.memory_space<vmem>>, vector<128x128xf32>,
    %c8_i32 = arith.constant 8 : i32
    %9 = arith.cmpi eq, %arg2, %c8_i32 : i32
    %10 = arith.extui %9 : i1 to i32
    %c0_i32_8 = arith.constant 0 : i32
    %11 = arith.cmpi ne, %10, %c0_i32_8 : i32
    scf.if %11 {
      %c0_9 = arith.constant 0 : index
      %c0_10 = arith.constant 0 : index
      %12 = vector.load %arg8[%c0_9, %c0_10] : memref<128x128xf32, #tpu.memory_space<vmem>>, vector<128x128xf32>
      %c0_11 = arith.constant 0 : index
      %c0_12 = arith.constant 0 : index
      %13 = vector.load %arg5[%c0_11, %c0_12] : memref<1x128xf32, #tpu.memory_space<vmem>>, vector<1x128xf32>
      %14 = vector.broadcast %13 : vector<1x128xf32> to vector<128x128xf32>
      %15 = arith.addf %12, %14 : vector<128x128xf32>
      %cst_13 = arith.constant 0.000000e+00 : f32
      %16 = vector.broadcast %cst_13 : f32 to vector<128x128xf32>
      %17 = arith.cmpf oge, %15, %16 : vector<128x128xf32>
      %cst_14 = arith.constant 2.000000e-01 : f32
      %18 = vector.broadcast %cst_14 : f32 to vector<128x128xf32>
      %19 = arith.mulf %18, %15 : vector<128x128xf32>
      %20 = arith.select %17, %15, %19 : vector<128x128xi1>, vector<128x128xf32>
      %c0_15 = arith.constant 0 : index
      %c0_16 = arith.constant 0 : index
      %21 = vector.load %arg6[%c0_15, %c0_16] : memref<128x128xbf16, #tpu.memory_space<vmem>>, vector<128x128xbf16>
      %22 = arith.extf %21 : vector<128x128xbf16> to vector<128x128xf32>
      %23 = arith.addf %20, %22 : vector<128x128xf32>
      %24 = arith.truncf %23 : vector<128x128xf32> to vector<128x128xbf16>
      %c0_17 = arith.constant 0 : index
      %c0_18 = arith.constant 0 : index
      %25 = vector.load %arg7[%c0_17, %c0_18] : memref<128x128xbf16, #tpu.memory_space<vmem>>, vector<128x128xbf16>
      tpu.vector_store %arg7[%c0_17, %c0_18], %24 {strides = array<i32>} : memref<128x128xbf16, #tpu.memory_space<vmem>>, vector<128x128xbf16>,
    } else {
    }
    return
  }
  func.func @transform_0(%arg0: i32, %arg1: i32, %arg2: i32) -> (i32, i32) {
    %c0_i32 = arith.constant 0 : i32
    return %arg0, %arg2 : i32, i32
  }
  func.func @transform_1(%arg0: i32, %arg1: i32, %arg2: i32) -> (i32, i32) {
    %c0_i32 = arith.constant 0 : i32
    return %arg2, %arg1 : i32, i32
  }
  func.func @transform_2(%arg0: i32, %arg1: i32, %arg2: i32) -> (i32, i32) {
    %c0_i32 = arith.constant 0 : i32
    %c0_i32_0 = arith.constant 0 : i32
    return %c0_i32, %arg1 : i32, i32
  }
  func.func @transform_3(%arg0: i32, %arg1: i32, %arg2: i32) -> (i32, i32) {
    %c0_i32 = arith.constant 0 : i32
    return %arg0, %arg1 : i32, i32
  }
  func.func @transform_4(%arg0: i32, %arg1: i32, %arg2: i32) -> (i32, i32) {
    %c0_i32 = arith.constant 0 : i32
    return %arg0, %arg1 : i32, i32
  }
}

module attributes {stable_mosaic.version = 11 : i64} {
  func.func @_mm_fused_kernel(%arg0: i32, %arg1: i32, %arg2: i32, %arg3: memref<256x128xbf16, #tpu.memory_space<vmem>>, %arg4: memref<128x128xbf16, #tpu.memory_space<vmem>>, %arg5: memref<1x128xf32, #tpu.memory_space<vmem>>, %arg6: memref<256x128xbf16, #tpu.memory_space<vmem>>, %arg7: memref<256x128xbf16, #tpu.memory_space<vmem>>, %arg8: memref<256x128xf32, #tpu.memory_space<vmem>>) attributes {dimension_semantics = [#tpu.dimension_semantics<parallel>, #tpu.dimension_semantics<parallel>, #tpu.dimension_semantics<arbitrary>], iteration_bounds = array<i64: 2, 1, 9>, scalar_prefetch = 0 : i64, scratch_operands = 1 : i64, tpu.core_type = #tpu.core_type<tc>, window_params = [{transform_indices = @transform_0, window_bounds = array<i64: 256, 128>}, {transform_indices = @transform_1, window_bounds = array<i64: 128, 128>}, {transform_indices = @transform_2, window_bounds = array<i64: 1, 128>}, {transform_indices = @transform_3, window_bounds = array<i64: 256, 128>}, {transform_indices = @transform_4, window_bounds = array<i64: 256, 128>}]} {
    %c0_i32 = arith.constant 0 : i32
    %0 = arith.cmpi eq, %arg2, %c0_i32 : i32
    %1 = arith.extui %0 : i1 to i32
    %c0_i32_0 = arith.constant 0 : i32
    %2 = arith.cmpi ne, %1, %c0_i32_0 : i32
    scf.if %2 {
      %cst_9 = arith.constant 0.000000e+00 : f32
      %12 = vector.broadcast %cst_9 : f32 to vector<256x128xf32>
      %c0_10 = arith.constant 0 : index
      %c0_11 = arith.constant 0 : index
      %13 = vector.load %arg8[%c0_10, %c0_11] : memref<256x128xf32, #tpu.memory_space<vmem>>, vector<256x128xf32>
      tpu.vector_store %arg8[%c0_10, %c0_11], %12 {strides = array<i32>} : memref<256x128xf32, #tpu.memory_space<vmem>>, vector<256x128xf32>,
    } else {
    }
    %c0 = arith.constant 0 : index
    %c0_1 = arith.constant 0 : index
    %3 = vector.load %arg8[%c0, %c0_1] : memref<256x128xf32, #tpu.memory_space<vmem>>, vector<256x128xf32>
    %c0_2 = arith.constant 0 : index
    %c0_3 = arith.constant 0 : index
    %4 = vector.load %arg3[%c0_2, %c0_3] : memref<256x128xbf16, #tpu.memory_space<vmem>>, vector<256x128xbf16>
    %c0_4 = arith.constant 0 : index
    %c0_5 = arith.constant 0 : index
    %5 = vector.load %arg4[%c0_4, %c0_5] : memref<128x128xbf16, #tpu.memory_space<vmem>>, vector<128x128xbf16>
    %cst = arith.constant dense<0.000000e+00> : vector<256x128xf32>
    %6 = tpu.matmul %4, %5, %cst {dimension_numbers = #tpu.dot_dimension_numbers<[1], [0], [0], [1], [0, 0, 1, 1], [], []>} : vector<256x128xbf16>, vector<128x128xbf16>, vector<256x128xf32> -> vector<256x128xf32>
    %7 = arith.addf %3, %6 : vector<256x128xf32>
    %c0_6 = arith.constant 0 : index
    %c0_7 = arith.constant 0 : index
    %8 = vector.load %arg8[%c0_6, %c0_7] : memref<256x128xf32, #tpu.memory_space<vmem>>, vector<256x128xf32>
    tpu.vector_store %arg8[%c0_6, %c0_7], %7 {strides = array<i32>} : memref<256x128xf32, #tpu.memory_space<vmem>>, vector<256x128xf32>,
    %c8_i32 = arith.constant 8 : i32
    %9 = arith.cmpi eq, %arg2, %c8_i32 : i32
    %10 = arith.extui %9 : i1 to i32
    %c0_i32_8 = arith.constant 0 : i32
    %11 = arith.cmpi ne, %10, %c0_i32_8 : i32
    scf.if %11 {
      %c0_9 = arith.constant 0 : index
      %c0_10 = arith.constant 0 : index
      %12 = vector.load %arg8[%c0_9, %c0_10] : memref<256x128xf32, #tpu.memory_space<vmem>>, vector<256x128xf32>
      %c0_11 = arith.constant 0 : index
      %c0_12 = arith.constant 0 : index
      %13 = vector.load %arg5[%c0_11, %c0_12] : memref<1x128xf32, #tpu.memory_space<vmem>>, vector<1x128xf32>
      %14 = vector.broadcast %13 : vector<1x128xf32> to vector<256x128xf32>
      %15 = arith.addf %12, %14 : vector<256x128xf32>
      %cst_13 = arith.constant 0.000000e+00 : f32
      %16 = vector.broadcast %cst_13 : f32 to vector<256x128xf32>
      %17 = arith.cmpf oge, %15, %16 : vector<256x128xf32>
      %cst_14 = arith.constant 2.000000e-01 : f32
      %18 = vector.broadcast %cst_14 : f32 to vector<256x128xf32>
      %19 = arith.mulf %18, %15 : vector<256x128xf32>
      %20 = arith.select %17, %15, %19 : vector<256x128xi1>, vector<256x128xf32>
      %c0_15 = arith.constant 0 : index
      %c0_16 = arith.constant 0 : index
      %21 = vector.load %arg6[%c0_15, %c0_16] : memref<256x128xbf16, #tpu.memory_space<vmem>>, vector<256x128xbf16>
      %22 = arith.extf %21 : vector<256x128xbf16> to vector<256x128xf32>
      %23 = arith.addf %20, %22 : vector<256x128xf32>
      %24 = arith.truncf %23 : vector<256x128xf32> to vector<256x128xbf16>
      %c0_17 = arith.constant 0 : index
      %c0_18 = arith.constant 0 : index
      %25 = vector.load %arg7[%c0_17, %c0_18] : memref<256x128xbf16, #tpu.memory_space<vmem>>, vector<256x128xbf16>
      tpu.vector_store %arg7[%c0_17, %c0_18], %24 {strides = array<i32>} : memref<256x128xbf16, #tpu.memory_space<vmem>>, vector<256x128xbf16>,
    } else {
    }
    return
  }
  func.func @transform_0(%arg0: i32, %arg1: i32, %arg2: i32) -> (i32, i32) {
    %c0_i32 = arith.constant 0 : i32
    return %arg0, %arg2 : i32, i32
  }
  func.func @transform_1(%arg0: i32, %arg1: i32, %arg2: i32) -> (i32, i32) {
    %c0_i32 = arith.constant 0 : i32
    return %arg2, %arg1 : i32, i32
  }
  func.func @transform_2(%arg0: i32, %arg1: i32, %arg2: i32) -> (i32, i32) {
    %c0_i32 = arith.constant 0 : i32
    %c0_i32_0 = arith.constant 0 : i32
    return %c0_i32, %arg1 : i32, i32
  }
  func.func @transform_3(%arg0: i32, %arg1: i32, %arg2: i32) -> (i32, i32) {
    %c0_i32 = arith.constant 0 : i32
    return %arg0, %arg1 : i32, i32
  }
  func.func @transform_4(%arg0: i32, %arg1: i32, %arg2: i32) -> (i32, i32) {
    %c0_i32 = arith.constant 0 : i32
    return %arg0, %arg1 : i32, i32
  }
}

module attributes {stable_mosaic.version = 11 : i64} {
  func.func @_mm_fused_kernel(%arg0: i32, %arg1: i32, %arg2: i32, %arg3: memref<256x128xbf16, #tpu.memory_space<vmem>>, %arg4: memref<128x128xbf16, #tpu.memory_space<vmem>>, %arg5: memref<1x128xf32, #tpu.memory_space<vmem>>, %arg6: memref<256x128xbf16, #tpu.memory_space<vmem>>, %arg7: memref<256x128xf32, #tpu.memory_space<vmem>>) attributes {dimension_semantics = [#tpu.dimension_semantics<parallel>, #tpu.dimension_semantics<parallel>, #tpu.dimension_semantics<arbitrary>], iteration_bounds = array<i64: 2, 1, 5>, scalar_prefetch = 0 : i64, scratch_operands = 1 : i64, tpu.core_type = #tpu.core_type<tc>, window_params = [{transform_indices = @transform_0, window_bounds = array<i64: 256, 128>}, {transform_indices = @transform_1, window_bounds = array<i64: 128, 128>}, {transform_indices = @transform_2, window_bounds = array<i64: 1, 128>}, {transform_indices = @transform_3, window_bounds = array<i64: 256, 128>}]} {
    %c0_i32 = arith.constant 0 : i32
    %0 = arith.cmpi eq, %arg2, %c0_i32 : i32
    %1 = arith.extui %0 : i1 to i32
    %c0_i32_0 = arith.constant 0 : i32
    %2 = arith.cmpi ne, %1, %c0_i32_0 : i32
    scf.if %2 {
      %cst_9 = arith.constant 0.000000e+00 : f32
      %12 = vector.broadcast %cst_9 : f32 to vector<256x128xf32>
      %c0_10 = arith.constant 0 : index
      %c0_11 = arith.constant 0 : index
      %13 = vector.load %arg7[%c0_10, %c0_11] : memref<256x128xf32, #tpu.memory_space<vmem>>, vector<256x128xf32>
      tpu.vector_store %arg7[%c0_10, %c0_11], %12 {strides = array<i32>} : memref<256x128xf32, #tpu.memory_space<vmem>>, vector<256x128xf32>,
    } else {
    }
    %c0 = arith.constant 0 : index
    %c0_1 = arith.constant 0 : index
    %3 = vector.load %arg7[%c0, %c0_1] : memref<256x128xf32, #tpu.memory_space<vmem>>, vector<256x128xf32>
    %c0_2 = arith.constant 0 : index
    %c0_3 = arith.constant 0 : index
    %4 = vector.load %arg3[%c0_2, %c0_3] : memref<256x128xbf16, #tpu.memory_space<vmem>>, vector<256x128xbf16>
    %c0_4 = arith.constant 0 : index
    %c0_5 = arith.constant 0 : index
    %5 = vector.load %arg4[%c0_4, %c0_5] : memref<128x128xbf16, #tpu.memory_space<vmem>>, vector<128x128xbf16>
    %cst = arith.constant dense<0.000000e+00> : vector<256x128xf32>
    %6 = tpu.matmul %4, %5, %cst {dimension_numbers = #tpu.dot_dimension_numbers<[1], [0], [0], [1], [0, 0, 1, 1], [], []>} : vector<256x128xbf16>, vector<128x128xbf16>, vector<256x128xf32> -> vector<256x128xf32>
    %7 = arith.addf %3, %6 : vector<256x128xf32>
    %c0_6 = arith.constant 0 : index
    %c0_7 = arith.constant 0 : index
    %8 = vector.load %arg7[%c0_6, %c0_7] : memref<256x128xf32, #tpu.memory_space<vmem>>, vector<256x128xf32>
    tpu.vector_store %arg7[%c0_6, %c0_7], %7 {strides = array<i32>} : memref<256x128xf32, #tpu.memory_space<vmem>>, vector<256x128xf32>,
    %c4_i32 = arith.constant 4 : i32
    %9 = arith.cmpi eq, %arg2, %c4_i32 : i32
    %10 = arith.extui %9 : i1 to i32
    %c0_i32_8 = arith.constant 0 : i32
    %11 = arith.cmpi ne, %10, %c0_i32_8 : i32
    scf.if %11 {
      %c0_9 = arith.constant 0 : index
      %c0_10 = arith.constant 0 : index
      %12 = vector.load %arg7[%c0_9, %c0_10] : memref<256x128xf32, #tpu.memory_space<vmem>>, vector<256x128xf32>
      %c0_11 = arith.constant 0 : index
      %c0_12 = arith.constant 0 : index
      %13 = vector.load %arg5[%c0_11, %c0_12] : memref<1x128xf32, #tpu.memory_space<vmem>>, vector<1x128xf32>
      %14 = vector.broadcast %13 : vector<1x128xf32> to vector<256x128xf32>
      %15 = arith.addf %12, %14 : vector<256x128xf32>
      %cst_13 = arith.constant 0.000000e+00 : f32
      %16 = vector.broadcast %cst_13 : f32 to vector<256x128xf32>
      %17 = arith.cmpf oge, %15, %16 : vector<256x128xf32>
      %cst_14 = arith.constant 2.000000e-01 : f32
      %18 = vector.broadcast %cst_14 : f32 to vector<256x128xf32>
      %19 = arith.mulf %18, %15 : vector<256x128xf32>
      %20 = arith.select %17, %15, %19 : vector<256x128xi1>, vector<256x128xf32>
      %21 = arith.truncf %20 : vector<256x128xf32> to vector<256x128xbf16>
      %c0_15 = arith.constant 0 : index
      %c0_16 = arith.constant 0 : index
      %22 = vector.load %arg6[%c0_15, %c0_16] : memref<256x128xbf16, #tpu.memory_space<vmem>>, vector<256x128xbf16>
      tpu.vector_store %arg6[%c0_15, %c0_16], %21 {strides = array<i32>} : memref<256x128xbf16, #tpu.memory_space<vmem>>, vector<256x128xbf16>,
    } else {
    }
    return
  }
  func.func @transform_0(%arg0: i32, %arg1: i32, %arg2: i32) -> (i32, i32) {
    %c0_i32 = arith.constant 0 : i32
    return %arg0, %arg2 : i32, i32
  }
  func.func @transform_1(%arg0: i32, %arg1: i32, %arg2: i32) -> (i32, i32) {
    %c0_i32 = arith.constant 0 : i32
    return %arg2, %arg1 : i32, i32
  }
  func.func @transform_2(%arg0: i32, %arg1: i32, %arg2: i32) -> (i32, i32) {
    %c0_i32 = arith.constant 0 : i32
    %c0_i32_0 = arith.constant 0 : i32
    return %c0_i32, %arg1 : i32, i32
  }
  func.func @transform_3(%arg0: i32, %arg1: i32, %arg2: i32) -> (i32, i32) {
    %c0_i32 = arith.constant 0 : i32
    return %arg0, %arg1 : i32, i32
  }
}

module attributes {stable_mosaic.version = 11 : i64} {
  func.func @_mm_fused_kernel(%arg0: i32, %arg1: i32, %arg2: i32, %arg3: memref<256x128xbf16, #tpu.memory_space<vmem>>, %arg4: memref<128x128xbf16, #tpu.memory_space<vmem>>, %arg5: memref<1x128xf32, #tpu.memory_space<vmem>>, %arg6: memref<256x128xf32, #tpu.memory_space<vmem>>, %arg7: memref<256x128xf32, #tpu.memory_space<vmem>>) attributes {dimension_semantics = [#tpu.dimension_semantics<parallel>, #tpu.dimension_semantics<parallel>, #tpu.dimension_semantics<arbitrary>], iteration_bounds = array<i64: 2, 1, 5>, scalar_prefetch = 0 : i64, scratch_operands = 1 : i64, tpu.core_type = #tpu.core_type<tc>, window_params = [{transform_indices = @transform_0, window_bounds = array<i64: 256, 128>}, {transform_indices = @transform_1, window_bounds = array<i64: 128, 128>}, {transform_indices = @transform_2, window_bounds = array<i64: 1, 128>}, {transform_indices = @transform_3, window_bounds = array<i64: 256, 128>}]} {
    %c0_i32 = arith.constant 0 : i32
    %0 = arith.cmpi eq, %arg2, %c0_i32 : i32
    %1 = arith.extui %0 : i1 to i32
    %c0_i32_0 = arith.constant 0 : i32
    %2 = arith.cmpi ne, %1, %c0_i32_0 : i32
    scf.if %2 {
      %cst_9 = arith.constant 0.000000e+00 : f32
      %12 = vector.broadcast %cst_9 : f32 to vector<256x128xf32>
      %c0_10 = arith.constant 0 : index
      %c0_11 = arith.constant 0 : index
      %13 = vector.load %arg7[%c0_10, %c0_11] : memref<256x128xf32, #tpu.memory_space<vmem>>, vector<256x128xf32>
      tpu.vector_store %arg7[%c0_10, %c0_11], %12 {strides = array<i32>} : memref<256x128xf32, #tpu.memory_space<vmem>>, vector<256x128xf32>,
    } else {
    }
    %c0 = arith.constant 0 : index
    %c0_1 = arith.constant 0 : index
    %3 = vector.load %arg7[%c0, %c0_1] : memref<256x128xf32, #tpu.memory_space<vmem>>, vector<256x128xf32>
    %c0_2 = arith.constant 0 : index
    %c0_3 = arith.constant 0 : index
    %4 = vector.load %arg3[%c0_2, %c0_3] : memref<256x128xbf16, #tpu.memory_space<vmem>>, vector<256x128xbf16>
    %c0_4 = arith.constant 0 : index
    %c0_5 = arith.constant 0 : index
    %5 = vector.load %arg4[%c0_4, %c0_5] : memref<128x128xbf16, #tpu.memory_space<vmem>>, vector<128x128xbf16>
    %cst = arith.constant dense<0.000000e+00> : vector<256x128xf32>
    %6 = tpu.matmul %4, %5, %cst {dimension_numbers = #tpu.dot_dimension_numbers<[1], [0], [0], [1], [0, 0, 1, 1], [], []>} : vector<256x128xbf16>, vector<128x128xbf16>, vector<256x128xf32> -> vector<256x128xf32>
    %7 = arith.addf %3, %6 : vector<256x128xf32>
    %c0_6 = arith.constant 0 : index
    %c0_7 = arith.constant 0 : index
    %8 = vector.load %arg7[%c0_6, %c0_7] : memref<256x128xf32, #tpu.memory_space<vmem>>, vector<256x128xf32>
    tpu.vector_store %arg7[%c0_6, %c0_7], %7 {strides = array<i32>} : memref<256x128xf32, #tpu.memory_space<vmem>>, vector<256x128xf32>,
    %c4_i32 = arith.constant 4 : i32
    %9 = arith.cmpi eq, %arg2, %c4_i32 : i32
    %10 = arith.extui %9 : i1 to i32
    %c0_i32_8 = arith.constant 0 : i32
    %11 = arith.cmpi ne, %10, %c0_i32_8 : i32
    scf.if %11 {
      %c0_9 = arith.constant 0 : index
      %c0_10 = arith.constant 0 : index
      %12 = vector.load %arg7[%c0_9, %c0_10] : memref<256x128xf32, #tpu.memory_space<vmem>>, vector<256x128xf32>
      %c0_11 = arith.constant 0 : index
      %c0_12 = arith.constant 0 : index
      %13 = vector.load %arg5[%c0_11, %c0_12] : memref<1x128xf32, #tpu.memory_space<vmem>>, vector<1x128xf32>
      %14 = vector.broadcast %13 : vector<1x128xf32> to vector<256x128xf32>
      %15 = arith.addf %12, %14 : vector<256x128xf32>
      %c0_13 = arith.constant 0 : index
      %c0_14 = arith.constant 0 : index
      %16 = vector.load %arg6[%c0_13, %c0_14] : memref<256x128xf32, #tpu.memory_space<vmem>>, vector<256x128xf32>
      tpu.vector_store %arg6[%c0_13, %c0_14], %15 {strides = array<i32>} : memref<256x128xf32, #tpu.memory_space<vmem>>, vector<256x128xf32>,
    } else {
    }
    return
  }
  func.func @transform_0(%arg0: i32, %arg1: i32, %arg2: i32) -> (i32, i32) {
    %c0_i32 = arith.constant 0 : i32
    return %arg0, %arg2 : i32, i32
  }
  func.func @transform_1(%arg0: i32, %arg1: i32, %arg2: i32) -> (i32, i32) {
    %c0_i32 = arith.constant 0 : i32
    return %arg2, %arg1 : i32, i32
  }
  func.func @transform_2(%arg0: i32, %arg1: i32, %arg2: i32) -> (i32, i32) {
    %c0_i32 = arith.constant 0 : i32
    %c0_i32_0 = arith.constant 0 : i32
    return %c0_i32, %arg1 : i32, i32
  }
  func.func @transform_3(%arg0: i32, %arg1: i32, %arg2: i32) -> (i32, i32) {
    %c0_i32 = arith.constant 0 : i32
    return %arg0, %arg1 : i32, i32
  }
}

</mosaic_0001>

<bundles_post_ra>
// kernel: discriminator_unet_forward.10
= control target key start
LH: loop header
LB: loop body
LE: loop exit
PB: predicated region body
PF: predicated region fallthrough
CT: control target
= control target key end

     0   :  { %s1239_s12 = smov 0   ;;  %s1241_s13 = smov 0   ;;  %s1379_s0 = inlined_call_operand.vmem [shape: bf16[512,128], index: 0, kind: input, shape index: {}]   ;;  %s1380_s1 = inlined_call_operand.vmem [shape: bf16[128,128], index: 1, kind: input, shape index: {}]   ;;  %s1381_s2 = inlined_call_operand.vmem [shape: f32[1,128], index: 2, kind: input, shape index: {}]   ;;  %s1382_s3 = inlined_call_operand.vmem [shape: bf16[512,128], index: 3, kind: output, shape index: {}]  }
   0x1   :  { %s1243_s14 = smov 0  }
   0x2 LB: > { %s32_s15 = sadd.s32 1, %s1213_s13  ;;  %p924_p0 = scmp.ge.s32.totalorder %s1217_s14, 1  ;;  %s1217_s14 = sphi %s1243_s14, %s13_s14   ;;  %s1213_s13 = sphi %s1241_s13, %s1384_s13   ;;  %s1209_s12 = sphi %s1239_s12, %s1383_s12  }
   0x3   : > { %p34_p1 = scmp.ge.s32.totalorder %s32_s15, 2  ;;  %p188_p2 = scmp.lt.s32.totalorder %s1217_s14, 3 }
   0x5   : > { %s1386_s15 = smov (%p34_p1, %s32_s15), 0  ;;  %p189_p3 = pnand %p924_p0, %p188_p2 }
   0x6   : > { %s925_s24 = sshll.u32 (!%p189_p3), %s1209_s12, 5 }
   0x7   : > { %192 = sbr.rel (%p189_p3) target bundleno = 239 (0xef), region = 32  ;;  %p230_p4 = scmp.lt.s32.totalorder (!%p189_p3), %s925_s24, 63 }
   0xc   : > { %v1050_v0 = vld [vmem:[%s1380_s1 + $0x38] sm:$0xff]  ;;  %v1049_v1 = vld [vmem:[%s1380_s1 + $0x30] sm:$0xff]  ;;  %v1048_v2 = vld [vmem:[%s1380_s1 + $0x28] sm:$0xff]  ;;  %s1388_s24 = smov (!%p230_p4, %s925_s24), 63 }
   0xd   : > { %519 = vmatpush.bf16.msra.mxu0 %v1050_v0  ;;  %1146 = vmatpush.bf16.msra.mxu1 %v1050_v0  ;;  %v1047_v3 = vld [vmem:[%s1380_s1 + $0x20] sm:$0xff]  ;;  %v1046_v4 = vld [vmem:[%s1380_s1 + $0x18] sm:$0xff]  ;;  %v1045_v5 = vld [vmem:[%s1380_s1 + $0x10] sm:$0xff]  ;;  %s926_s4 = sshll.u32 %s1388_s24, 2 }
   0xe   : > { %1147 = vmatpush.bf16.msra.mxu2 %v1050_v0  ;;  %1148 = vmatpush.bf16.msra.mxu3 %v1050_v0  ;;  %v1044_v6 = vld [vmem:[%s1380_s1 + $0x8] sm:$0xff]  ;;  %v1043_v7 = vld [vmem:[%s1380_s1] sm:$0xff]  ;;  %s1292_s9 = scalar_lea.vmem %s1379_s0, %s926_s4  ;;  %s1324_s17 = scalar_lea.vmem %s1382_s3, %s926_s4 }
   0xf   : > { %v1027_v8 = vld [vmem:[%s1292_s9] sm:$0xff]  ;;  %v1028_v12 = vld [vmem:[%s1292_s9 + $0x8] sm:$0xff]  ;;  %v1029_v16 = vld [vmem:[%s1292_s9 + $0x10] sm:$0xff] }
  0x10   : > { %v1031_v9 = vld [vmem:[%s1292_s9 + $0x20] sm:$0xff]  ;;  %v1032_v13 = vld [vmem:[%s1292_s9 + $0x28] sm:$0xff]  ;;  %v1033_v17 = vld [vmem:[%s1292_s9 + $0x30] sm:$0xff] }
  0x11   : > { %520 = vmatpush.bf16.msra.mxu0 %v1049_v1  ;;  %1149 = vmatpush.bf16.msra.mxu1 %v1049_v1  ;;  %v1035_v10 = vld [vmem:[%s1292_s9 + $0x40] sm:$0xff]  ;;  %v1036_v14 = vld [vmem:[%s1292_s9 + $0x48] sm:$0xff]  ;;  %v1037_v18 = vld [vmem:[%s1292_s9 + $0x50] sm:$0xff] }
  0x12   : > { %1150 = vmatpush.bf16.msra.mxu2 %v1049_v1  ;;  %1151 = vmatpush.bf16.msra.mxu3 %v1049_v1  ;;  %v1039_v11 = vld [vmem:[%s1292_s9 + $0x60] sm:$0xff]  ;;  %v1040_v15 = vld [vmem:[%s1292_s9 + $0x68] sm:$0xff]  ;;  %v1041_v19 = vld [vmem:[%s1292_s9 + $0x70] sm:$0xff] }
  0x13   : > { %v1030_v20 = vld [vmem:[%s1292_s9 + $0x18] sm:$0xff]  ;;  %v1313_v26 = vld [vmem:[%s1381_s2] ss:$0 sm:$0xff] }
  0x14   : > { %v1034_v21 = vld [vmem:[%s1292_s9 + $0x38] sm:$0xff] }
  0x15   : > { %521 = vmatpush.bf16.msra.mxu0 %v1048_v2  ;;  %1152 = vmatpush.bf16.msra.mxu1 %v1048_v2  ;;  %v1038_v22 = vld [vmem:[%s1292_s9 + $0x58] sm:$0xff] }
  0x16   : > { %1153 = vmatpush.bf16.msra.mxu2 %v1048_v2  ;;  %1154 = vmatpush.bf16.msra.mxu3 %v1048_v2  ;;  %v1042_v23 = vld [vmem:[%s1292_s9 + $0x78] sm:$0xff] }
  0x19   : > { %522 = vmatpush.bf16.msra.mxu0 %v1047_v3  ;;  %1155 = vmatpush.bf16.msra.mxu1 %v1047_v3 }
  0x1a   : > { %1156 = vmatpush.bf16.msra.mxu2 %v1047_v3  ;;  %1157 = vmatpush.bf16.msra.mxu3 %v1047_v3 }
  0x1d   : > { %523 = vmatpush.bf16.msra.mxu0 %v1046_v4  ;;  %1158 = vmatpush.bf16.msra.mxu1 %v1046_v4 }
  0x1e   : > { %1159 = vmatpush.bf16.msra.mxu2 %v1046_v4  ;;  %1160 = vmatpush.bf16.msra.mxu3 %v1046_v4 }
  0x21   : > { %524 = vmatpush.bf16.msra.mxu0 %v1045_v5  ;;  %1161 = vmatpush.bf16.msra.mxu1 %v1045_v5 }
  0x22   : > { %1162 = vmatpush.bf16.msra.mxu2 %v1045_v5  ;;  %1163 = vmatpush.bf16.msra.mxu3 %v1045_v5 }
  0x25   : > { %525 = vmatpush.bf16.msra.mxu0 %v1044_v6  ;;  %1164 = vmatpush.bf16.msra.mxu1 %v1044_v6 }
  0x26   : > { %1165 = vmatpush.bf16.msra.mxu2 %v1044_v6  ;;  %1166 = vmatpush.bf16.msra.mxu3 %v1044_v6 }
  0x29   : > { %526 = vmatpush.bf16.msra.mxu0 %v1043_v7  ;;  %1167 = vmatpush.bf16.msra.mxu1 %v1043_v7 }
  0x2a   : > { %1168 = vmatpush.bf16.msra.mxu2 %v1043_v7  ;;  %1169 = vmatpush.bf16.msra.mxu3 %v1043_v7 }
  0x2c   : > { %527 = vmatmul.bf16.vlgmr.msra.gmra.mxu0 %v1027_v8  ;;  %547 = vmatmul.bf16.vlgmr.msra.gmra.mxu1 %v1031_v9 }
  0x2d   : > { %567 = vmatmul.bf16.vlgmr.msra.gmra.mxu2 %v1035_v10  ;;  %587 = vmatmul.bf16.vlgmr.msra.gmra.mxu3 %v1039_v11 }
  0x3c   : > { %532 = vmatmul.bf16.gmra.mxu0 %v1028_v12  ;;  %552 = vmatmul.bf16.gmra.mxu1 %v1032_v13 }
  0x3d   : > { %572 = vmatmul.bf16.gmra.mxu2 %v1036_v14  ;;  %592 = vmatmul.bf16.gmra.mxu3 %v1040_v15 }
  0x4c   : > { %537 = vmatmul.bf16.gmra.mxu0 %v1029_v16  ;;  %557 = vmatmul.bf16.gmra.mxu1 %v1033_v17 }
  0x4d   : > { %577 = vmatmul.bf16.gmra.mxu2 %v1037_v18  ;;  %597 = vmatmul.bf16.gmra.mxu3 %v1041_v19 }
  0x5c   : > { %542 = vmatmul.bf16.gmra.mxu0 %v1030_v20  ;;  %562 = vmatmul.bf16.gmra.mxu1 %v1034_v21 }
  0x5d   : > { %582 = vmatmul.bf16.gmra.mxu2 %v1038_v22  ;;  %602 = vmatmul.bf16.gmra.mxu3 %v1042_v23 }
  0xa9   : > { %v528_v24 = vpop.f32.mrf.mxu0  ;;  %v548_v25 = vpop.f32.mrf.mxu1 }
  0xaa   : > { %v711_v31 = vadd.f32 %v1313_v26, %v528_v24  ;;  %v719_v32 = vadd.f32 %v1313_v26, %v548_v25 }
  0xb0   : > { %v568_v27 = vpop.f32.mrf.mxu2  ;;  %v588_v28 = vpop.f32.mrf.mxu3 }
  0xb1   : > { %v530_v29 = vpop.f32.mrf.mxu0  ;;  %v550_v30 = vpop.f32.mrf.mxu1  ;;  %v727_v39 = vadd.f32 %v1313_v26, %v568_v27  ;;  %v735_v40 = vadd.f32 %v1313_v26, %v588_v28 }
  0xb2   : > { %v712_v33 = vadd.f32 %v1313_v26, %v530_v29  ;;  %v720_v34 = vadd.f32 %v1313_v26, %v550_v30 }
  0xb4   : > { %v1054_v35 = vpack.c.bf16 %v712_v33, %v711_v31  ;;  %v1074_v36 = vpack.c.bf16 %v720_v34, %v719_v32 }
  0xb6   : > { %1055 = vst [vmem:[%s1324_s17] sm:$0xff] %v1054_v35  }
  0xb7   : > { %1134 = vst [vmem:[%s1324_s17 + $0x20] sm:$0xff] %v1074_v36  }
  0xb8   : > { %v570_v37 = vpop.f32.mrf.mxu2  ;;  %v590_v38 = vpop.f32.mrf.mxu3 }
  0xb9   : > { %v728_v41 = vadd.f32 %v1313_v26, %v570_v37  ;;  %v736_v42 = vadd.f32 %v1313_v26, %v590_v38  ;;  %v533_v43 = vpop.f32.mrf.mxu0  ;;  %v553_v44 = vpop.f32.mrf.mxu1 }
  0xba   : > { %v713_v51 = vadd.f32 %v1313_v26, %v533_v43  ;;  %v721_v52 = vadd.f32 %v1313_v26, %v553_v44 }
  0xbb   : > { %v1094_v45 = vpack.c.bf16 %v728_v41, %v727_v39  ;;  %v1114_v46 = vpack.c.bf16 %v736_v42, %v735_v40 }
  0xbd   : > { %1138 = vst [vmem:[%s1324_s17 + $0x40] sm:$0xff] %v1094_v45  }
  0xbe   : > { %1142 = vst [vmem:[%s1324_s17 + $0x60] sm:$0xff] %v1114_v46  }
  0xc0   : > { %v573_v47 = vpop.f32.mrf.mxu2  ;;  %v593_v48 = vpop.f32.mrf.mxu3 }
  0xc1   : > { %v535_v49 = vpop.f32.mrf.mxu0  ;;  %v555_v50 = vpop.f32.mrf.mxu1  ;;  %v729_v59 = vadd.f32 %v1313_v26, %v573_v47  ;;  %v737_v60 = vadd.f32 %v1313_v26, %v593_v48 }
  0xc2   : > { %v714_v53 = vadd.f32 %v1313_v26, %v535_v49  ;;  %v722_v54 = vadd.f32 %v1313_v26, %v555_v50 }
  0xc4   : > { %v1059_v55 = vpack.c.bf16 %v714_v53, %v713_v51  ;;  %v1079_v56 = vpack.c.bf16 %v722_v54, %v721_v52 }
  0xc6   : > { %1131 = vst [vmem:[%s1324_s17 + $0x8] sm:$0xff] %v1059_v55  }
  0xc7   : > { %1135 = vst [vmem:[%s1324_s17 + $0x28] sm:$0xff] %v1079_v56  }
  0xc8   : > { %v575_v57 = vpop.f32.mrf.mxu2  ;;  %v595_v58 = vpop.f32.mrf.mxu3 }
  0xc9   : > { %v730_v61 = vadd.f32 %v1313_v26, %v575_v57  ;;  %v738_v62 = vadd.f32 %v1313_v26, %v595_v58  ;;  %v538_v63 = vpop.f32.mrf.mxu0  ;;  %v558_v0 = vpop.f32.mrf.mxu1 }
  0xca   : > { %v715_v7 = vadd.f32 %v1313_v26, %v538_v63  ;;  %v723_v8 = vadd.f32 %v1313_v26, %v558_v0 }
  0xcb   : > { %v1099_v1 = vpack.c.bf16 %v730_v61, %v729_v59  ;;  %v1119_v2 = vpack.c.bf16 %v738_v62, %v737_v60 }
  0xcd   : > { %1139 = vst [vmem:[%s1324_s17 + $0x48] sm:$0xff] %v1099_v1  }
  0xce   : > { %1143 = vst [vmem:[%s1324_s17 + $0x68] sm:$0xff] %v1119_v2  }
  0xd0   : > { %v578_v3 = vpop.f32.mrf.mxu2  ;;  %v598_v4 = vpop.f32.mrf.mxu3 }
  0xd1   : > { %v540_v5 = vpop.f32.mrf.mxu0  ;;  %v560_v6 = vpop.f32.mrf.mxu1  ;;  %v731_v15 = vadd.f32 %v1313_v26, %v578_v3  ;;  %v739_v16 = vadd.f32 %v1313_v26, %v598_v4 }
  0xd2   : > { %v716_v9 = vadd.f32 %v1313_v26, %v540_v5  ;;  %v724_v10 = vadd.f32 %v1313_v26, %v560_v6 }
  0xd4   : > { %v1064_v11 = vpack.c.bf16 %v716_v9, %v715_v7  ;;  %v1084_v12 = vpack.c.bf16 %v724_v10, %v723_v8 }
  0xd6   : > { %1132 = vst [vmem:[%s1324_s17 + $0x10] sm:$0xff] %v1064_v11  }
  0xd7   : > { %1136 = vst [vmem:[%s1324_s17 + $0x30] sm:$0xff] %v1084_v12  }
  0xd8   : > { %v580_v13 = vpop.f32.mrf.mxu2  ;;  %v600_v14 = vpop.f32.mrf.mxu3 }
  0xd9   : > { %v732_v17 = vadd.f32 %v1313_v26, %v580_v13  ;;  %v740_v18 = vadd.f32 %v1313_v26, %v600_v14  ;;  %v543_v19 = vpop.f32.mrf.mxu0  ;;  %v563_v20 = vpop.f32.mrf.mxu1 }
  0xda   : > { %v717_v28 = vadd.f32 %v1313_v26, %v543_v19  ;;  %v725_v29 = vadd.f32 %v1313_v26, %v563_v20 }
  0xdb   : > { %v1104_v21 = vpack.c.bf16 %v732_v17, %v731_v15  ;;  %v1124_v22 = vpack.c.bf16 %v740_v18, %v739_v16 }
  0xdd   : > { %1140 = vst [vmem:[%s1324_s17 + $0x50] sm:$0xff] %v1104_v21  }
  0xde   : > { %1144 = vst [vmem:[%s1324_s17 + $0x70] sm:$0xff] %v1124_v22  }
  0xe0   : > { %v583_v23 = vpop.f32.mrf.mxu2  ;;  %v603_v24 = vpop.f32.mrf.mxu3 }
  0xe1   : > { %v545_v25 = vpop.f32.mrf.mxu0  ;;  %v565_v27 = vpop.f32.mrf.mxu1  ;;  %v733_v36 = vadd.f32 %v1313_v26, %v583_v23  ;;  %v741_v37 = vadd.f32 %v1313_v26, %v603_v24 }
  0xe2   : > { %v718_v30 = vadd.f32 %v1313_v26, %v545_v25  ;;  %v726_v31 = vadd.f32 %v1313_v26, %v565_v27 }
  0xe4   : > { %v1069_v32 = vpack.c.bf16 %v718_v30, %v717_v28  ;;  %v1089_v33 = vpack.c.bf16 %v726_v31, %v725_v29 }
  0xe6   : > { %1133 = vst [vmem:[%s1324_s17 + $0x18] sm:$0xff] %v1069_v32  }
  0xe7   : > { %1137 = vst [vmem:[%s1324_s17 + $0x38] sm:$0xff] %v1089_v33  }
  0xe8   : > { %v585_v34 = vpop.f32.mrf.mxu2  ;;  %v605_v35 = vpop.f32.mrf.mxu3 }
  0xe9   : > { %v734_v38 = vadd.f32 %v1313_v26, %v585_v34  ;;  %v742_v39 = vadd.f32 %v1313_v26, %v605_v35 }
  0xeb   : > { %v1109_v40 = vpack.c.bf16 %v734_v38, %v733_v36  ;;  %v1129_v41 = vpack.c.bf16 %v742_v39, %v741_v37 }
  0xed   : > { %1141 = vst [vmem:[%s1324_s17 + $0x58] sm:$0xff] %v1109_v40  }
  0xee   : > { %1145 = vst [vmem:[%s1324_s17 + $0x78] sm:$0xff] %v1129_v41  }
  0xef PF: > { %s13_s14 = sadd.s32 1, %s1217_s14   ;;  %s1383_s12 = smov %s1213_s13 }
  0xf0   : > { %p10_p5 = scmp.ge.s32.totalorder %s13_s14, 4   ;;  %s1384_s13 = smov %s1386_s15 }
  0xf2   :  { %12 = sbr.rel (!%p10_p5) target bundleno = 2 (0x2), region = 76 }

// kernel: discriminator_unet_forward.11
= control target key start
LH: loop header
LB: loop body
LE: loop exit
PB: predicated region body
PF: predicated region fallthrough
CT: control target
= control target key end

     0   :  { %s1766_s12 = smov 0   ;;  %s1768_s13 = smov 0   ;;  %s2047_s0 = inlined_call_operand.vmem [shape: bf16[128,1024], index: 0, kind: input, shape index: {}]   ;;  %s2048_s1 = inlined_call_operand.vmem [shape: bf16[1024,128], index: 1, kind: input, shape index: {}]   ;;  %s2049_s2 = inlined_call_operand.vmem [shape: f32[1,128], index: 2, kind: input, shape index: {}]   ;;  %s2050_s3 = inlined_call_operand.vmem [shape: bf16[128,128], index: 3, kind: output, shape index: {}]  }
   0x1   :  { %s1770_s14 = smov 0   ;;  %s1772_s15 = smov 0  }
   0x2   :  { %s1774_s16 = smov 0  }
   0x3 LB: > { %s25_s17 = sadd.s32 1, %s1739_s15  ;;  %p48_p1 = scmp.ne.s32.totalorder %s1731_s13, %s1727_s12  ;;  %s1743_s16 = sphi %s1774_s16, %s13_s16   ;;  %s1739_s15 = sphi %s1772_s15, %s2054_s15   ;;  %s1735_s14 = sphi %s1770_s14, %s2053_s14   ;;  %s1731_s13 = sphi %s1768_s13, %s2052_s13   ;;  %s1727_s12 = sphi %s1766_s12, %s2051_s12  }
   0x4   : > { %p26_p0 = scmp.ge.s32.totalorder %s25_s17, 2  ;;  %p49_p2 = scmp.eq.s32.totalorder %s1743_s16, 0 }
   0x5   : > { %s41_s19 = sadd.s32 1, %s1731_s13  ;;  %p1281_p5 = scmp.ge.s32.totalorder %s1743_s16, 2 }
   0x6   : > { %s2056_s17 = smov (%p26_p0, %s25_s17), 0  ;;  %p50_p3 = por %p49_p2, %p48_p1 }
   0x7   : > { %s37_s18 = ssub.s32 %s1739_s15, %s2056_s17  ;;  %162 = sbr.rel (%p1281_p5) target bundleno = 48 (0x30), region = 20 }
   0x8   : > { %p39_p4 = scmp.eq.s32.totalorder %s37_s18, 0 }
   0xa   : > { %s1801_s20 = scalar_select %p39_p4, %s1731_s13, %s41_s19  }
   0xc   : > { %165 = sbr.rel (!%p50_p3) target bundleno = 48 (0x30), region = 24  ;;  %s167_s21 = sand.u32 (%p50_p3), 1, %s1731_s13  }
   0xd   : > { %s1551_s22 = sshll.u32 (%p50_p3), %s1739_s15, 4  ;;  %s1282_s23 = sshll.u32 (%p50_p3), %s167_s21, 8 }
   0xe   : > { %s1809_s26 = scalar_lea.vmem (%p50_p3), %s2047_s0, %s1551_s22  ;;  %s1814_s27 = scalar_lea.vmem (%p50_p3), [#allocation3], %s1282_s23 }
   0xf   : > { %v188_v0 = vld [vmem:[%s1809_s26] sm:$0xff] (%p50_p3)  ;;  %v190_v1 = vld [vmem:[%s1809_s26 + $0x8] sm:$0xff] (%p50_p3) }
  0x10   : > { %v192_v2 = vld [vmem:[%s1809_s26 + $0x20] sm:$0xff] (%p50_p3)  ;;  %189 = vst [vmem:[%s1814_s27] sm:$0xff] (%p50_p3), %v188_v0  ;;  %v194_v3 = vld [vmem:[%s1809_s26 + $0x28] sm:$0xff] (%p50_p3) }
  0x11   : > { %191 = vst [vmem:[%s1814_s27 + $0x8] sm:$0xff] %v190_v1  ;;  %v196_v4 = vld [vmem:[%s1809_s26 + $0x40] sm:$0xff]  ;;  %v198_v5 = vld [vmem:[%s1809_s26 + $0x48] sm:$0xff] }
  0x12   : > { %193 = vst [vmem:[%s1814_s27 + $0x10] sm:$0xff] %v192_v2  ;;  %v200_v6 = vld [vmem:[%s1809_s26 + $0x60] sm:$0xff]  ;;  %v202_v7 = vld [vmem:[%s1809_s26 + $0x68] sm:$0xff] }
  0x13   : > { %195 = vst [vmem:[%s1814_s27 + $0x18] sm:$0xff] %v194_v3  ;;  %v204_v8 = vld [vmem:[%s1809_s26 + $0x80] sm:$0xff]  ;;  %v206_v9 = vld [vmem:[%s1809_s26 + $0x88] sm:$0xff] }
  0x14   : > { %197 = vst [vmem:[%s1814_s27 + $0x20] sm:$0xff] %v196_v4  ;;  %v208_v10 = vld [vmem:[%s1809_s26 + $0xa0] sm:$0xff]  ;;  %v210_v11 = vld [vmem:[%s1809_s26 + $0xa8] sm:$0xff] }
  0x15   : > { %199 = vst [vmem:[%s1814_s27 + $0x28] sm:$0xff] %v198_v5  ;;  %v212_v12 = vld [vmem:[%s1809_s26 + $0xc0] sm:$0xff]  ;;  %v214_v13 = vld [vmem:[%s1809_s26 + $0xc8] sm:$0xff] }
  0x16   : > { %201 = vst [vmem:[%s1814_s27 + $0x30] sm:$0xff] %v200_v6  ;;  %v216_v14 = vld [vmem:[%s1809_s26 + $0xe0] sm:$0xff]  ;;  %v218_v15 = vld [vmem:[%s1809_s26 + $0xe8] sm:$0xff] }
  0x17   : > { %203 = vst [vmem:[%s1814_s27 + $0x38] sm:$0xff] %v202_v7  ;;  %v220_v16 = vld [vmem:[%s1809_s26 + $0x100] sm:$0xff]  ;;  %v222_v17 = vld [vmem:[%s1809_s26 + $0x108] sm:$0xff] }
  0x18   : > { %205 = vst [vmem:[%s1814_s27 + $0x40] sm:$0xff] %v204_v8  ;;  %v224_v18 = vld [vmem:[%s1809_s26 + $0x120] sm:$0xff]  ;;  %v226_v19 = vld [vmem:[%s1809_s26 + $0x128] sm:$0xff] }
  0x19   : > { %207 = vst [vmem:[%s1814_s27 + $0x48] sm:$0xff] %v206_v9  ;;  %v228_v20 = vld [vmem:[%s1809_s26 + $0x140] sm:$0xff]  ;;  %v230_v21 = vld [vmem:[%s1809_s26 + $0x148] sm:$0xff] }
  0x1a   : > { %209 = vst [vmem:[%s1814_s27 + $0x50] sm:$0xff] %v208_v10  ;;  %v232_v22 = vld [vmem:[%s1809_s26 + $0x160] sm:$0xff]  ;;  %v234_v23 = vld [vmem:[%s1809_s26 + $0x168] sm:$0xff] }
  0x1b   : > { %211 = vst [vmem:[%s1814_s27 + $0x58] sm:$0xff] %v210_v11  ;;  %v236_v24 = vld [vmem:[%s1809_s26 + $0x180] sm:$0xff]  ;;  %v238_v25 = vld [vmem:[%s1809_s26 + $0x188] sm:$0xff] }
  0x1c   : > { %213 = vst [vmem:[%s1814_s27 + $0x60] sm:$0xff] %v212_v12  ;;  %v240_v26 = vld [vmem:[%s1809_s26 + $0x1a0] sm:$0xff]  ;;  %v242_v27 = vld [vmem:[%s1809_s26 + $0x1a8] sm:$0xff] }
  0x1d   : > { %215 = vst [vmem:[%s1814_s27 + $0x68] sm:$0xff] %v214_v13  ;;  %v244_v28 = vld [vmem:[%s1809_s26 + $0x1c0] sm:$0xff]  ;;  %v246_v29 = vld [vmem:[%s1809_s26 + $0x1c8] sm:$0xff] }
  0x1e   : > { %217 = vst [vmem:[%s1814_s27 + $0x70] sm:$0xff] %v216_v14  ;;  %v248_v30 = vld [vmem:[%s1809_s26 + $0x1e0] sm:$0xff]  ;;  %v250_v31 = vld [vmem:[%s1809_s26 + $0x1e8] sm:$0xff] }
  0x1f   : > { %219 = vst [vmem:[%s1814_s27 + $0x78] sm:$0xff] %v218_v15 }
  0x20   : > { %221 = vst [vmem:[%s1814_s27 + $0x80] sm:$0xff] %v220_v16 }
  0x21   : > { %223 = vst [vmem:[%s1814_s27 + $0x88] sm:$0xff] %v222_v17 }
  0x22   : > { %225 = vst [vmem:[%s1814_s27 + $0x90] sm:$0xff] %v224_v18 }
  0x23   : > { %227 = vst [vmem:[%s1814_s27 + $0x98] sm:$0xff] %v226_v19 }
  0x24   : > { %229 = vst [vmem:[%s1814_s27 + $0xa0] sm:$0xff] %v228_v20 }
  0x25   : > { %231 = vst [vmem:[%s1814_s27 + $0xa8] sm:$0xff] %v230_v21 }
  0x26   : > { %233 = vst [vmem:[%s1814_s27 + $0xb0] sm:$0xff] %v232_v22 }
  0x27   : > { %235 = vst [vmem:[%s1814_s27 + $0xb8] sm:$0xff] %v234_v23 }
  0x28   : > { %237 = vst [vmem:[%s1814_s27 + $0xc0] sm:$0xff] %v236_v24 }
  0x29   : > { %239 = vst [vmem:[%s1814_s27 + $0xc8] sm:$0xff] %v238_v25 }
  0x2a   : > { %241 = vst [vmem:[%s1814_s27 + $0xd0] sm:$0xff] %v240_v26 }
  0x2b   : > { %243 = vst [vmem:[%s1814_s27 + $0xd8] sm:$0xff] %v242_v27 }
  0x2c   : > { %245 = vst [vmem:[%s1814_s27 + $0xe0] sm:$0xff] %v244_v28 }
  0x2d   : > { %247 = vst [vmem:[%s1814_s27 + $0xe8] sm:$0xff] %v246_v29 }
  0x2e   : > { %249 = vst [vmem:[%s1814_s27 + $0xf0] sm:$0xff] %v248_v30 }
  0x2f   : > { %251 = vst [vmem:[%s1814_s27 + $0xf8] sm:$0xff] %v250_v31 }
  0x30 PF: > { %p1285_p6 = scmp.ge.s32.totalorder %s1743_s16, 1  ;;  %p268_p7 = scmp.lt.s32.totalorder %s1743_s16, 3 }
  0x32   : > { %p269_p8 = pnand %p1285_p6, %p268_p7 }
  0x33   : > { %s275_s28 = sand.u32 (!%p269_p8), 1, %s1727_s12   ;;  %s1287_s29 = sshll.u32 (!%p269_p8), %s1735_s14, 6 }
  0x34   : > { %272 = sbr.rel (%p269_p8) target bundleno = 397 (0x18d), region = 51  ;;  %s1286_s30 = sshll.u32 (!%p269_p8), %s275_s28, 8 }
  0x35   : > { %p315_p9 = scmp.lt.s32.totalorder (!%p269_p8), %s1287_s29, 127  ;;  %s1886_s8 = scalar_lea.vmem (!%p269_p8), [#allocation3], %s1286_s30 }
  0x36   : > { %p1289_p10 = scmp.ne.s32.totalorder (!%p269_p8), %s1735_s14, 0 }
  0x39   : > { %s2058_s29 = smov (!%p315_p9, %s1287_s29), 127  ;;  %338 = sbr.rel (%p1289_p10) target bundleno = 79 (0x4f), region = 59 }
  0x3a   : > { %s1288_s4 = sshll.u32 %s2058_s29, 2 }
  0x3b   : > { %s1884_s7 = scalar_lea.vmem %s2048_s1, %s1288_s4 }
  0x3e   : > { %v1745_v32 = vmov 0.0  }
  0x3f   : > { %339 = vst [vmem:[#allocation2 + $0x30] sm:$0xff] %v1745_v32 }
  0x40   : > { %340 = vst [vmem:[#allocation2] sm:$0xff] %v1745_v32 }
  0x41   : > { %341 = vst [vmem:[#allocation2 + $0x58] sm:$0xff] %v1745_v32 }
  0x42   : > { %342 = vst [vmem:[#allocation2 + $0x18] sm:$0xff] %v1745_v32 }
  0x43   : > { %343 = vst [vmem:[#allocation2 + $0x50] sm:$0xff] %v1745_v32 }
  0x44   : > { %344 = vst [vmem:[#allocation2 + $0x68] sm:$0xff] %v1745_v32 }
  0x45   : > { %345 = vst [vmem:[#allocation2 + $0x8] sm:$0xff] %v1745_v32 }
  0x46   : > { %346 = vst [vmem:[#allocation2 + $0x48] sm:$0xff] %v1745_v32 }
  0x47   : > { %347 = vst [vmem:[#allocation2 + $0x40] sm:$0xff] %v1745_v32 }
  0x48   : > { %348 = vst [vmem:[#allocation2 + $0x20] sm:$0xff] %v1745_v32 }
  0x49   : > { %349 = vst [vmem:[#allocation2 + $0x10] sm:$0xff] %v1745_v32 }
  0x4a   : > { %350 = vst [vmem:[#allocation2 + $0x38] sm:$0xff] %v1745_v32 }
  0x4b   : > { %351 = vst [vmem:[#allocation2 + $0x60] sm:$0xff] %v1745_v32 }
  0x4c   : > { %352 = vst [vmem:[#allocation2 + $0x70] sm:$0xff] %v1745_v32 }
  0x4d   : > { %353 = vst [vmem:[#allocation2 + $0x78] sm:$0xff] %v1745_v32 }
  0x4e   : > { %354 = vst [vmem:[#allocation2 + $0x28] sm:$0xff] %v1745_v32 }
  0x4f PF: > { %v1591_v33 = vld [vmem:[%s1884_s7 + $0x38] sm:$0xff]  ;;  %v1590_v37 = vld [vmem:[%s1884_s7 + $0x30] sm:$0xff]  ;;  %v1589_v41 = vld [vmem:[%s1884_s7 + $0x28] sm:$0xff]  ;;  %p1546_p11 = scmp.ne.s32.totalorder %s1735_s14, 1 }
  0x50   : > { %v1599_v34 = vld [vmem:[%s1884_s7 + $0x78] sm:$0xff]  ;;  %819 = vmatpush.bf16.msra.mxu0 %v1591_v33  ;;  %v1598_v38 = vld [vmem:[%s1884_s7 + $0x70] sm:$0xff]  ;;  %v1597_v42 = vld [vmem:[%s1884_s7 + $0x68] sm:$0xff] }
  0x51   : > { %v1607_v35 = vld [vmem:[%s1884_s7 + $0xb8] sm:$0xff]  ;;  %868 = vmatpush.bf16.msra.mxu1 %v1599_v34  ;;  %v1606_v39 = vld [vmem:[%s1884_s7 + $0xb0] sm:$0xff]  ;;  %v1605_v43 = vld [vmem:[%s1884_s7 + $0xa8] sm:$0xff] }
  0x52   : > { %v1615_v36 = vld [vmem:[%s1884_s7 + $0xf8] sm:$0xff]  ;;  %917 = vmatpush.bf16.msra.mxu2 %v1607_v35  ;;  %v1614_v40 = vld [vmem:[%s1884_s7 + $0xf0] sm:$0xff]  ;;  %v1613_v44 = vld [vmem:[%s1884_s7 + $0xe8] sm:$0xff] }
  0x53   : > { %966 = vmatpush.bf16.msra.mxu3 %v1615_v36  ;;  %v1588_v45 = vld [vmem:[%s1884_s7 + $0x20] sm:$0xff]  ;;  %v1587_v49 = vld [vmem:[%s1884_s7 + $0x18] sm:$0xff]  ;;  %v1586_v53 = vld [vmem:[%s1884_s7 + $0x10] sm:$0xff] }
  0x54   : > { %820 = vmatpush.bf16.msra.mxu0 %v1590_v37  ;;  %v1596_v46 = vld [vmem:[%s1884_s7 + $0x60] sm:$0xff]  ;;  %v1595_v50 = vld [vmem:[%s1884_s7 + $0x58] sm:$0xff]  ;;  %v1594_v54 = vld [vmem:[%s1884_s7 + $0x50] sm:$0xff] }
  0x55   : > { %869 = vmatpush.bf16.msra.mxu1 %v1598_v38  ;;  %v1604_v47 = vld [vmem:[%s1884_s7 + $0xa0] sm:$0xff]  ;;  %v1603_v51 = vld [vmem:[%s1884_s7 + $0x98] sm:$0xff]  ;;  %v1602_v55 = vld [vmem:[%s1884_s7 + $0x90] sm:$0xff] }
  0x56   : > { %918 = vmatpush.bf16.msra.mxu2 %v1606_v39  ;;  %v1612_v48 = vld [vmem:[%s1884_s7 + $0xe0] sm:$0xff]  ;;  %v1611_v52 = vld [vmem:[%s1884_s7 + $0xd8] sm:$0xff]  ;;  %v1610_v56 = vld [vmem:[%s1884_s7 + $0xd0] sm:$0xff] }
  0x57   : > { %967 = vmatpush.bf16.msra.mxu3 %v1614_v40  ;;  %v1585_v57 = vld [vmem:[%s1884_s7 + $0x8] sm:$0xff]  ;;  %v1584_v61 = vld [vmem:[%s1884_s7] sm:$0xff]  ;;  %v1554_v2 = vld [vmem:[%s1886_s8 + $0xc] sm:$0xf0] }
  0x58   : > { %821 = vmatpush.bf16.msra.mxu0 %v1589_v41  ;;  %v1593_v58 = vld [vmem:[%s1884_s7 + $0x48] sm:$0xff]  ;;  %v1592_v62 = vld [vmem:[%s1884_s7 + $0x40] sm:$0xff]  ;;  %v1294_v4 = vld [vmem:[%s1886_s8 + $0x10] sm:$0xf0] }
  0x59   : > { %870 = vmatpush.bf16.msra.mxu1 %v1597_v42  ;;  %v1601_v59 = vld [vmem:[%s1884_s7 + $0x88] sm:$0xff]  ;;  %v1600_v63 = vld [vmem:[%s1884_s7 + $0x80] sm:$0xff]  ;;  %v1555_v6 = vld [vmem:[%s1886_s8 + $0x14] sm:$0xf0] }
  0x5a   : > { %919 = vmatpush.bf16.msra.mxu2 %v1605_v43  ;;  %v1609_v60 = vld [vmem:[%s1884_s7 + $0xc8] sm:$0xff]  ;;  %v1608_v0 = vld [vmem:[%s1884_s7 + $0xc0] sm:$0xff]  ;;  %v1302_v8 = vld [vmem:[%s1886_s8 + $0x18] sm:$0xf0] }
  0x5b   : > { %968 = vmatpush.bf16.msra.mxu3 %v1613_v44  ;;  %v1292_v1 = vld [vmem:[%s1886_s8] sm:$0xf]  ;;  %v1552_v3 = vld [vmem:[%s1886_s8 + $0x4] sm:$0xf]  ;;  %v1300_v5 = vld [vmem:[%s1886_s8 + $0x8] sm:$0xf] }
  0x5c   : > { %822 = vmatpush.bf16.msra.mxu0 %v1588_v45  ;;  %v1553_v7 = vld [vmem:[%s1886_s8 + $0xc] sm:$0xf]  ;;  %v1293_v9 = vor.u32 %v1554_v2, %v1292_v1  ;;  %v1297_v10 = vor.u32 %v1552_v3, %v1294_v4  ;;  %v1301_v11 = vor.u32 %v1555_v6, %v1300_v5  ;;  %v1308_v13 = vld [vmem:[%s1886_s8 + $0x20] sm:$0xf]  ;;  %v1558_v14 = vld [vmem:[%s1886_s8 + $0x2c] sm:$0xf0] }
  0x5d   : > { %871 = vmatpush.bf16.msra.mxu1 %v1596_v46  ;;  %v1305_v12 = vor.u32 %v1553_v7, %v1302_v8  ;;  %v1556_v15 = vld [vmem:[%s1886_s8 + $0x24] sm:$0xf]  ;;  %v1310_v16 = vld [vmem:[%s1886_s8 + $0x30] sm:$0xf0]  ;;  %v1316_v17 = vld [vmem:[%s1886_s8 + $0x28] sm:$0xf]  ;;  %v1309_v21 = vor.u32 %v1558_v14, %v1308_v13 }
  0x5e   : > { %920 = vmatpush.bf16.msra.mxu2 %v1604_v47  ;;  %v1559_v18 = vld [vmem:[%s1886_s8 + $0x34] sm:$0xf0]  ;;  %v1557_v19 = vld [vmem:[%s1886_s8 + $0x2c] sm:$0xf]  ;;  %v1318_v20 = vld [vmem:[%s1886_s8 + $0x38] sm:$0xf0]  ;;  %v1313_v22 = vor.u32 %v1556_v15, %v1310_v16 }
  0x5f   : > { %969 = vmatpush.bf16.msra.mxu3 %v1612_v48  ;;  %v1317_v23 = vor.u32 %v1559_v18, %v1316_v17  ;;  %v1321_v24 = vor.u32 %v1557_v19, %v1318_v20  ;;  %v1324_v25 = vld [vmem:[%s1886_s8 + $0x40] sm:$0xf]  ;;  %v1562_v26 = vld [vmem:[%s1886_s8 + $0x4c] sm:$0xf0]  ;;  %v1560_v27 = vld [vmem:[%s1886_s8 + $0x44] sm:$0xf] }
  0x60   : > { %823 = vmatpush.bf16.msra.mxu0 %v1587_v49  ;;  %v1326_v28 = vld [vmem:[%s1886_s8 + $0x50] sm:$0xf0]  ;;  %v1332_v29 = vld [vmem:[%s1886_s8 + $0x48] sm:$0xf]  ;;  %v1563_v30 = vld [vmem:[%s1886_s8 + $0x54] sm:$0xf0]  ;;  %v1325_v33 = vor.u32 %v1562_v26, %v1324_v25 }
  0x61   : > { %872 = vmatpush.bf16.msra.mxu1 %v1595_v50  ;;  %v1561_v31 = vld [vmem:[%s1886_s8 + $0x4c] sm:$0xf]  ;;  %v1334_v32 = vld [vmem:[%s1886_s8 + $0x58] sm:$0xf0]  ;;  %v1329_v34 = vor.u32 %v1560_v27, %v1326_v28  ;;  %v1333_v35 = vor.u32 %v1563_v30, %v1332_v29  ;;  %v1340_v37 = vld [vmem:[%s1886_s8 + $0x60] sm:$0xf] }
  0x62   : > { %921 = vmatpush.bf16.msra.mxu2 %v1603_v51  ;;  %v1337_v36 = vor.u32 %v1561_v31, %v1334_v32  ;;  %v1566_v38 = vld [vmem:[%s1886_s8 + $0x6c] sm:$0xf0]  ;;  %v1564_v39 = vld [vmem:[%s1886_s8 + $0x64] sm:$0xf]  ;;  %v1342_v40 = vld [vmem:[%s1886_s8 + $0x70] sm:$0xf0] }
  0x63   : > { %970 = vmatpush.bf16.msra.mxu3 %v1611_v52  ;;  %v1348_v41 = vld [vmem:[%s1886_s8 + $0x68] sm:$0xf]  ;;  %v1567_v42 = vld [vmem:[%s1886_s8 + $0x74] sm:$0xf0]  ;;  %v1565_v43 = vld [vmem:[%s1886_s8 + $0x6c] sm:$0xf]  ;;  %v1341_v45 = vor.u32 %v1566_v38, %v1340_v37  ;;  %v1345_v46 = vor.u32 %v1564_v39, %v1342_v40 }
  0x64   : > { %824 = vmatpush.bf16.msra.mxu0 %v1586_v53  ;;  %v1350_v44 = vld [vmem:[%s1886_s8 + $0x78] sm:$0xf0]  ;;  %v1349_v47 = vor.u32 %v1567_v42, %v1348_v41  ;;  %v1356_v49 = vld [vmem:[%s1886_s8 + $0x80] sm:$0xf]  ;;  %v1570_v50 = vld [vmem:[%s1886_s8 + $0x8c] sm:$0xf0] }
  0x65   : > { %873 = vmatpush.bf16.msra.mxu1 %v1594_v54  ;;  %v1353_v48 = vor.u32 %v1565_v43, %v1350_v44  ;;  %v1568_v51 = vld [vmem:[%s1886_s8 + $0x84] sm:$0xf]  ;;  %v1358_v52 = vld [vmem:[%s1886_s8 + $0x90] sm:$0xf0]  ;;  %v1364_v53 = vld [vmem:[%s1886_s8 + $0x88] sm:$0xf] }
  0x66   : > { %922 = vmatpush.bf16.msra.mxu2 %v1602_v55  ;;  %v1571_v54 = vld [vmem:[%s1886_s8 + $0x94] sm:$0xf0]  ;;  %v1569_v55 = vld [vmem:[%s1886_s8 + $0x8c] sm:$0xf]  ;;  %v1380_v1 = vld [vmem:[%s1886_s8 + $0xa8] sm:$0xf] }
  0x67   : > { %971 = vmatpush.bf16.msra.mxu3 %v1610_v56  ;;  %v1366_v56 = vld [vmem:[%s1886_s8 + $0x98] sm:$0xf0]  ;;  %v1575_v2 = vld [vmem:[%s1886_s8 + $0xb4] sm:$0xf0]  ;;  %v1573_v3 = vld [vmem:[%s1886_s8 + $0xac] sm:$0xf] }
  0x68   : > { %825 = vmatpush.bf16.msra.mxu0 %v1585_v57  ;;  %v1357_v57 = vor.u32 %v1570_v50, %v1356_v49  ;;  %v1382_v4 = vld [vmem:[%s1886_s8 + $0xb8] sm:$0xf0]  ;;  %v1381_v7 = vor.u32 %v1575_v2, %v1380_v1  ;;  %v1396_v13 = vld [vmem:[%s1886_s8 + $0xc8] sm:$0xf]  ;;  %v1579_v14 = vld [vmem:[%s1886_s8 + $0xd4] sm:$0xf0] }
  0x69   : > { %874 = vmatpush.bf16.msra.mxu1 %v1593_v58  ;;  %v1361_v58 = vor.u32 %v1568_v51, %v1358_v52  ;;  %v1385_v8 = vor.u32 %v1573_v3, %v1382_v4  ;;  %v1577_v15 = vld [vmem:[%s1886_s8 + $0xcc] sm:$0xf]  ;;  %v1398_v16 = vld [vmem:[%s1886_s8 + $0xd8] sm:$0xf0]  ;;  %v1397_v19 = vor.u32 %v1579_v14, %v1396_v13  ;;  %v1412_v25 = vld [vmem:[%s1886_s8 + $0xe8] sm:$0xf] }
  0x6a   : > { %923 = vmatpush.bf16.msra.mxu2 %v1601_v59  ;;  %v1365_v59 = vor.u32 %v1571_v54, %v1364_v53  ;;  %v1401_v20 = vor.u32 %v1577_v15, %v1398_v16  ;;  %v1583_v26 = vld [vmem:[%s1886_s8 + $0xf4] sm:$0xf0]  ;;  %v1581_v27 = vld [vmem:[%s1886_s8 + $0xec] sm:$0xf]  ;;  %v1414_v28 = vld [vmem:[%s1886_s8 + $0xf8] sm:$0xf0] }
  0x6b   : > { %972 = vmatpush.bf16.msra.mxu3 %v1609_v60  ;;  %v1369_v60 = vor.u32 %v1569_v55, %v1366_v56  ;;  %v1413_v31 = vor.u32 %v1583_v26, %v1412_v25  ;;  %v1417_v32 = vor.u32 %v1581_v27, %v1414_v28  ;;  %v355_v41 = vld [vmem:[#allocation2 + $0x30] sm:$0xff]  ;;  %v356_v50 = vld [vmem:[#allocation2] sm:$0xff]  ;;  %v358_v4 = vld [vmem:[#allocation2 + $0x18] sm:$0xff] }
  0x6c   : > { %826 = vmatpush.bf16.msra.mxu0 %v1584_v61  ;;  %v1372_v61 = vld [vmem:[%s1886_s8 + $0xa0] sm:$0xf]  ;;  %v359_v13 = vld [vmem:[#allocation2 + $0x50] sm:$0xff] }
  0x6d   : > { %875 = vmatpush.bf16.msra.mxu1 %v1592_v62  ;;  %v1574_v62 = vld [vmem:[%s1886_s8 + $0xac] sm:$0xf0] }
  0x6e   : > { %924 = vmatpush.bf16.msra.mxu2 %v1600_v63  ;;  %v1572_v63 = vld [vmem:[%s1886_s8 + $0xa4] sm:$0xf]  ;;  %v1373_v5 = vor.u32 %v1574_v62, %v1372_v61 }
  0x6f   : > { %973 = vmatpush.bf16.msra.mxu3 %v1608_v0  ;;  %827 = vmatmul.bf16.vlgmr.msra.gmra.mxu0 %v1293_v9  ;;  %v1374_v0 = vld [vmem:[%s1886_s8 + $0xb0] sm:$0xf0]  ;;  %v1388_v9 = vld [vmem:[%s1886_s8 + $0xc0] sm:$0xf] }
  0x70   : > { %876 = vmatmul.bf16.vlgmr.msra.gmra.mxu1 %v1297_v10  ;;  %v1377_v6 = vor.u32 %v1572_v63, %v1374_v0  ;;  %v1578_v10 = vld [vmem:[%s1886_s8 + $0xcc] sm:$0xf0] }
  0x71   : > { %925 = vmatmul.bf16.vlgmr.msra.gmra.mxu2 %v1301_v11  ;;  %v1576_v11 = vld [vmem:[%s1886_s8 + $0xc4] sm:$0xf]  ;;  %v1389_v17 = vor.u32 %v1578_v10, %v1388_v9 }
  0x72   : > { %974 = vmatmul.bf16.vlgmr.msra.gmra.mxu3 %v1305_v12  ;;  %v1390_v12 = vld [vmem:[%s1886_s8 + $0xd0] sm:$0xf0] }
  0x73   : > { %v1393_v18 = vor.u32 %v1576_v11, %v1390_v12 }
  0x7f   : > { %832 = vmatmul.bf16.gmra.mxu0 %v1309_v21  ;;  %v1404_v21 = vld [vmem:[%s1886_s8 + $0xe0] sm:$0xf] }
  0x80   : > { %881 = vmatmul.bf16.gmra.mxu1 %v1313_v22  ;;  %v1582_v22 = vld [vmem:[%s1886_s8 + $0xec] sm:$0xf0] }
  0x81   : > { %930 = vmatmul.bf16.gmra.mxu2 %v1317_v23  ;;  %v1580_v23 = vld [vmem:[%s1886_s8 + $0xe4] sm:$0xf]  ;;  %v1405_v29 = vor.u32 %v1582_v22, %v1404_v21  ;;  %v360_v22 = vld [vmem:[#allocation2 + $0x68] sm:$0xff] }
  0x82   : > { %979 = vmatmul.bf16.gmra.mxu3 %v1321_v24  ;;  %v1406_v24 = vld [vmem:[%s1886_s8 + $0xf0] sm:$0xf0] }
  0x83   : > { %v1409_v30 = vor.u32 %v1580_v23, %v1406_v24 }
  0x8f   : > { %837 = vmatmul.bf16.gmra.mxu0 %v1325_v33 }
  0x90   : > { %886 = vmatmul.bf16.gmra.mxu1 %v1329_v34 }
  0x91   : > { %935 = vmatmul.bf16.gmra.mxu2 %v1333_v35 }
  0x92   : > { %984 = vmatmul.bf16.gmra.mxu3 %v1337_v36 }
  0x9f   : > { %842 = vmatmul.bf16.gmra.mxu0 %v1341_v45 }
  0xa0   : > { %891 = vmatmul.bf16.gmra.mxu1 %v1345_v46 }
  0xa1   : > { %940 = vmatmul.bf16.gmra.mxu2 %v1349_v47 }
  0xa2   : > { %989 = vmatmul.bf16.gmra.mxu3 %v1353_v48 }
  0xaf   : > { %847 = vmatmul.bf16.gmra.mxu0 %v1357_v57 }
  0xb0   : > { %896 = vmatmul.bf16.gmra.mxu1 %v1361_v58 }
  0xb1   : > { %945 = vmatmul.bf16.gmra.mxu2 %v1365_v59  ;;  %v357_v59 = vld [vmem:[#allocation2 + $0x58] sm:$0xff] }
  0xb2   : > { %994 = vmatmul.bf16.gmra.mxu3 %v1369_v60 }
  0xbf   : > { %852 = vmatmul.bf16.gmra.mxu0 %v1373_v5 }
  0xc0   : > { %901 = vmatmul.bf16.gmra.mxu1 %v1377_v6 }
  0xc1   : > { %950 = vmatmul.bf16.gmra.mxu2 %v1381_v7 }
  0xc2   : > { %999 = vmatmul.bf16.gmra.mxu3 %v1385_v8 }
  0xcf   : > { %857 = vmatmul.bf16.gmra.mxu0 %v1389_v17 }
  0xd0   : > { %906 = vmatmul.bf16.gmra.mxu1 %v1393_v18 }
  0xd1   : > { %955 = vmatmul.bf16.gmra.mxu2 %v1397_v19 }
  0xd2   : > { %1004 = vmatmul.bf16.gmra.mxu3 %v1401_v20 }
  0xdf   : > { %862 = vmatmul.bf16.gmra.mxu0 %v1405_v29 }
  0xe0   : > { %911 = vmatmul.bf16.gmra.mxu1 %v1409_v30 }
  0xe1   : > { %960 = vmatmul.bf16.gmra.mxu2 %v1413_v31  ;;  %v361_v31 = vld [vmem:[#allocation2 + $0x8] sm:$0xff] }
  0xe2   : > { %1009 = vmatmul.bf16.gmra.mxu3 %v1417_v32 }
  0xec   : > { %v828_v33 = vpop.f32.mrf.mxu0 }
  0xed   : > { %v877_v34 = vpop.f32.mrf.mxu1 }
  0xee   : > { %v878_v35 = vadd.f32 %v877_v34, %v828_v33 }
  0xf4   : > { %v926_v36 = vpop.f32.mrf.mxu2  ;;  %v830_v39 = vpop.f32.mrf.mxu0 }
  0xf5   : > { %v975_v37 = vpop.f32.mrf.mxu3  ;;  %v927_v38 = vadd.f32 %v926_v36, %v878_v35  ;;  %v879_v40 = vpop.f32.mrf.mxu1 }
  0xf6   : > { %v880_v44 = vadd.f32 %v879_v40, %v830_v39  ;;  %v362_v40 = vld [vmem:[#allocation2 + $0x48] sm:$0xff] }
  0xf7   : > { %v976_v42 = vadd.f32 %v975_v37, %v927_v38 }
  0xf9   : > { %v1015_v43 = vadd.f32 %v976_v42, %v355_v41 }
  0xfb   : > { %1031 = vst [vmem:[#allocation2 + $0x30] sm:$0xff] %v1015_v43 }
  0xfc   : > { %v928_v45 = vpop.f32.mrf.mxu2  ;;  %v833_v48 = vpop.f32.mrf.mxu0 }
  0xfd   : > { %v977_v46 = vpop.f32.mrf.mxu3  ;;  %v929_v47 = vadd.f32 %v928_v45, %v880_v44  ;;  %v882_v49 = vpop.f32.mrf.mxu1 }
  0xfe   : > { %v883_v53 = vadd.f32 %v882_v49, %v833_v48  ;;  %v363_v49 = vld [vmem:[#allocation2 + $0x40] sm:$0xff] }
  0xff   : > { %v978_v51 = vadd.f32 %v977_v46, %v929_v47 }
 0x101   : > { %v1016_v52 = vadd.f32 %v978_v51, %v356_v50 }
 0x103   : > { %1032 = vst [vmem:[#allocation2] sm:$0xff] %v1016_v52 }
 0x104   : > { %v931_v54 = vpop.f32.mrf.mxu2  ;;  %v835_v57 = vpop.f32.mrf.mxu0 }
 0x105   : > { %v980_v55 = vpop.f32.mrf.mxu3  ;;  %v932_v56 = vadd.f32 %v931_v54, %v883_v53  ;;  %v884_v58 = vpop.f32.mrf.mxu1 }
 0x106   : > { %v885_v62 = vadd.f32 %v884_v58, %v835_v57  ;;  %v364_v58 = vld [vmem:[#allocation2 + $0x20] sm:$0xff] }
 0x107   : > { %v981_v60 = vadd.f32 %v980_v55, %v932_v56 }
 0x109   : > { %v1017_v61 = vadd.f32 %v981_v60, %v357_v59 }
 0x10b   : > { %1033 = vst [vmem:[#allocation2 + $0x58] sm:$0xff] %v1017_v61 }
 0x10c   : > { %v933_v63 = vpop.f32.mrf.mxu2  ;;  %v838_v2 = vpop.f32.mrf.mxu0 }
 0x10d   : > { %v982_v0 = vpop.f32.mrf.mxu3  ;;  %v934_v1 = vadd.f32 %v933_v63, %v885_v62  ;;  %v887_v3 = vpop.f32.mrf.mxu1 }
 0x10e   : > { %v888_v7 = vadd.f32 %v887_v3, %v838_v2  ;;  %v365_v3 = vld [vmem:[#allocation2 + $0x10] sm:$0xff] }
 0x10f   : > { %v983_v5 = vadd.f32 %v982_v0, %v934_v1 }
 0x111   : > { %v1018_v6 = vadd.f32 %v983_v5, %v358_v4 }
 0x113   : > { %1034 = vst [vmem:[#allocation2 + $0x18] sm:$0xff] %v1018_v6 }
 0x114   : > { %v936_v8 = vpop.f32.mrf.mxu2  ;;  %v840_v11 = vpop.f32.mrf.mxu0 }
 0x115   : > { %v985_v9 = vpop.f32.mrf.mxu3  ;;  %v937_v10 = vadd.f32 %v936_v8, %v888_v7  ;;  %v889_v12 = vpop.f32.mrf.mxu1 }
 0x116   : > { %v890_v16 = vadd.f32 %v889_v12, %v840_v11  ;;  %v366_v12 = vld [vmem:[#allocation2 + $0x38] sm:$0xff] }
 0x117   : > { %v986_v14 = vadd.f32 %v985_v9, %v937_v10 }
 0x119   : > { %v1019_v15 = vadd.f32 %v986_v14, %v359_v13 }
 0x11b   : > { %1035 = vst [vmem:[#allocation2 + $0x50] sm:$0xff] %v1019_v15 }
 0x11c   : > { %v938_v17 = vpop.f32.mrf.mxu2  ;;  %v843_v20 = vpop.f32.mrf.mxu0 }
 0x11d   : > { %v987_v18 = vpop.f32.mrf.mxu3  ;;  %v939_v19 = vadd.f32 %v938_v17, %v890_v16  ;;  %v892_v21 = vpop.f32.mrf.mxu1 }
 0x11e   : > { %v893_v25 = vadd.f32 %v892_v21, %v843_v20  ;;  %v367_v21 = vld [vmem:[#allocation2 + $0x60] sm:$0xff] }
 0x11f   : > { %v988_v23 = vadd.f32 %v987_v18, %v939_v19 }
 0x121   : > { %v1020_v24 = vadd.f32 %v988_v23, %v360_v22 }
 0x123   : > { %1036 = vst [vmem:[#allocation2 + $0x68] sm:$0xff] %v1020_v24 }
 0x124   : > { %v941_v26 = vpop.f32.mrf.mxu2  ;;  %v845_v29 = vpop.f32.mrf.mxu0 }
 0x125   : > { %v990_v27 = vpop.f32.mrf.mxu3  ;;  %v942_v28 = vadd.f32 %v941_v26, %v893_v25  ;;  %v894_v30 = vpop.f32.mrf.mxu1 }
 0x126   : > { %v895_v34 = vadd.f32 %v894_v30, %v845_v29 }
 0x127   : > { %v991_v32 = vadd.f32 %v990_v27, %v942_v28  ;;  %v368_v28 = vld [vmem:[#allocation2 + $0x70] sm:$0xff] }
 0x129   : > { %v1021_v33 = vadd.f32 %v991_v32, %v361_v31 }
 0x12b   : > { %1037 = vst [vmem:[#allocation2 + $0x8] sm:$0xff] %v1021_v33 }
 0x12c   : > { %v943_v35 = vpop.f32.mrf.mxu2  ;;  %v848_v38 = vpop.f32.mrf.mxu0 }
 0x12d   : > { %v992_v36 = vpop.f32.mrf.mxu3  ;;  %v944_v37 = vadd.f32 %v943_v35, %v895_v34  ;;  %v897_v39 = vpop.f32.mrf.mxu1 }
 0x12e   : > { %v898_v43 = vadd.f32 %v897_v39, %v848_v38 }
 0x12f   : > { %v993_v41 = vadd.f32 %v992_v36, %v944_v37  ;;  %v369_v37 = vld [vmem:[#allocation2 + $0x78] sm:$0xff] }
 0x131   : > { %v1022_v42 = vadd.f32 %v993_v41, %v362_v40 }
 0x133   : > { %1038 = vst [vmem:[#allocation2 + $0x48] sm:$0xff] %v1022_v42 }
 0x134   : > { %v946_v44 = vpop.f32.mrf.mxu2  ;;  %v850_v47 = vpop.f32.mrf.mxu0 }
 0x135   : > { %v995_v45 = vpop.f32.mrf.mxu3  ;;  %v947_v46 = vadd.f32 %v946_v44, %v898_v43  ;;  %v899_v48 = vpop.f32.mrf.mxu1 }
 0x136   : > { %v900_v52 = vadd.f32 %v899_v48, %v850_v47 }
 0x137   : > { %v996_v50 = vadd.f32 %v995_v45, %v947_v46  ;;  %v370_v45 = vld [vmem:[#allocation2 + $0x28] sm:$0xff] }
 0x139   : > { %v1023_v51 = vadd.f32 %v996_v50, %v363_v49 }
 0x13b   : > { %1039 = vst [vmem:[#allocation2 + $0x40] sm:$0xff] %v1023_v51 }
 0x13c   : > { %v948_v53 = vpop.f32.mrf.mxu2  ;;  %v853_v56 = vpop.f32.mrf.mxu0 }
 0x13d   : > { %v997_v54 = vpop.f32.mrf.mxu3  ;;  %v949_v55 = vadd.f32 %v948_v53, %v900_v52  ;;  %v902_v57 = vpop.f32.mrf.mxu1 }
 0x13e   : > { %v903_v61 = vadd.f32 %v902_v57, %v853_v56 }
 0x13f   : > { %v998_v59 = vadd.f32 %v997_v54, %v949_v55 }
 0x141   : > { %v1024_v60 = vadd.f32 %v998_v59, %v364_v58 }
 0x143   : > { %1040 = vst [vmem:[#allocation2 + $0x20] sm:$0xff] %v1024_v60 }
 0x144   : > { %v951_v62 = vpop.f32.mrf.mxu2  ;;  %v855_v1 = vpop.f32.mrf.mxu0 }
 0x145   : > { %v1000_v63 = vpop.f32.mrf.mxu3  ;;  %v952_v0 = vadd.f32 %v951_v62, %v903_v61  ;;  %v904_v2 = vpop.f32.mrf.mxu1 }
 0x146   : > { %v905_v6 = vadd.f32 %v904_v2, %v855_v1 }
 0x147   : > { %v1001_v4 = vadd.f32 %v1000_v63, %v952_v0 }
 0x149   : > { %v1025_v5 = vadd.f32 %v1001_v4, %v365_v3 }
 0x14b   : > { %1041 = vst [vmem:[#allocation2 + $0x10] sm:$0xff] %v1025_v5 }
 0x14c   : > { %v953_v7 = vpop.f32.mrf.mxu2  ;;  %v858_v10 = vpop.f32.mrf.mxu0 }
 0x14d   : > { %v1002_v8 = vpop.f32.mrf.mxu3  ;;  %v954_v9 = vadd.f32 %v953_v7, %v905_v6  ;;  %v907_v11 = vpop.f32.mrf.mxu1 }
 0x14e   : > { %v908_v15 = vadd.f32 %v907_v11, %v858_v10 }
 0x14f   : > { %v1003_v13 = vadd.f32 %v1002_v8, %v954_v9 }
 0x151   : > { %v1026_v14 = vadd.f32 %v1003_v13, %v366_v12 }
 0x153   : > { %1042 = vst [vmem:[#allocation2 + $0x38] sm:$0xff] %v1026_v14 }
 0x154   : > { %v956_v16 = vpop.f32.mrf.mxu2  ;;  %v860_v19 = vpop.f32.mrf.mxu0 }
 0x155   : > { %v1005_v17 = vpop.f32.mrf.mxu3  ;;  %v957_v18 = vadd.f32 %v956_v16, %v908_v15  ;;  %v909_v20 = vpop.f32.mrf.mxu1 }
 0x156   : > { %v910_v24 = vadd.f32 %v909_v20, %v860_v19 }
 0x157   : > { %v1006_v22 = vadd.f32 %v1005_v17, %v957_v18 }
 0x159   : > { %v1027_v23 = vadd.f32 %v1006_v22, %v367_v21 }
 0x15b   : > { %1043 = vst [vmem:[#allocation2 + $0x60] sm:$0xff] %v1027_v23 }
 0x15c   : > { %v958_v25 = vpop.f32.mrf.mxu2  ;;  %v863_v29 = vpop.f32.mrf.mxu0 }
 0x15d   : > { %v1007_v26 = vpop.f32.mrf.mxu3  ;;  %v959_v27 = vadd.f32 %v958_v25, %v910_v24  ;;  %v912_v30 = vpop.f32.mrf.mxu1 }
 0x15e   : > { %v913_v33 = vadd.f32 %v912_v30, %v863_v29 }
 0x15f   : > { %v1008_v31 = vadd.f32 %v1007_v26, %v959_v27 }
 0x161   : > { %v1028_v32 = vadd.f32 %v1008_v31, %v368_v28 }
 0x163   : > { %1044 = vst [vmem:[#allocation2 + $0x70] sm:$0xff] %v1028_v32 }
 0x164   : > { %v961_v34 = vpop.f32.mrf.mxu2  ;;  %v865_v39 = vpop.f32.mrf.mxu0 }
 0x165   : > { %v1010_v35 = vpop.f32.mrf.mxu3  ;;  %v962_v36 = vadd.f32 %v961_v34, %v913_v33  ;;  %v914_v40 = vpop.f32.mrf.mxu1 }
 0x166   : > { %v915_v42 = vadd.f32 %v914_v40, %v865_v39 }
 0x167   : > { %v1011_v38 = vadd.f32 %v1010_v35, %v962_v36 }
 0x169   : > { %v1029_v41 = vadd.f32 %v1011_v38, %v369_v37 }
 0x16b   : > { %1045 = vst [vmem:[#allocation2 + $0x78] sm:$0xff] %v1029_v41 }
 0x16c   : > { %v963_v43 = vpop.f32.mrf.mxu2 }
 0x16d   : > { %v964_v44 = vadd.f32 %v963_v43, %v915_v42  ;;  %v1012_v46 = vpop.f32.mrf.mxu3 }
 0x16f   : > { %v1013_v47 = vadd.f32 %v1012_v46, %v964_v44  ;;  %1050 = sbr.rel (%p1546_p11) target bundleno = 397 (0x18d), region = 63 }
 0x171   : > { %v1030_v48 = vadd.f32 %v1013_v47, %v370_v45 }
 0x173   : > { %1046 = vst [vmem:[#allocation2 + $0x28] sm:$0xff] %v1030_v48 }
 0x174   : > { %v1051_v49 = vld [vmem:[#allocation2 + $0x30] sm:$0xff]  ;;  %v1052_v50 = vld [vmem:[#allocation2] sm:$0xff]  ;;  %v1053_v52 = vld [vmem:[#allocation2 + $0x58] sm:$0xff] }
 0x175   : > { %v1989_v51 = vld [vmem:[%s2049_s2] ss:$0 sm:$0xff]  ;;  %v1054_v53 = vld [vmem:[#allocation2 + $0x18] sm:$0xff]  ;;  %v1055_v54 = vld [vmem:[#allocation2 + $0x50] sm:$0xff] }
 0x176   : > { %v1056_v55 = vld [vmem:[#allocation2 + $0x68] sm:$0xff]  ;;  %v1071_v57 = vadd.f32 %v1989_v51, %v1051_v49  ;;  %v1072_v58 = vadd.f32 %v1989_v51, %v1052_v50  ;;  %v1073_v59 = vadd.f32 %v1989_v51, %v1053_v52  ;;  %v1074_v60 = vadd.f32 %v1989_v51, %v1054_v53  ;;  %v1059_v8 = vld [vmem:[#allocation2 + $0x40] sm:$0xff]  ;;  %v1061_v14 = vld [vmem:[#allocation2 + $0x10] sm:$0xff] }
 0x177   : > { %v1057_v56 = vld [vmem:[#allocation2 + $0x8] sm:$0xff]  ;;  %v1075_v62 = vadd.f32 %v1989_v51, %v1055_v54  ;;  %v1076_v63 = vadd.f32 %v1989_v51, %v1056_v55  ;;  %v1060_v13 = vld [vmem:[#allocation2 + $0x20] sm:$0xff]  ;;  %v1062_v15 = vld [vmem:[#allocation2 + $0x38] sm:$0xff]  ;;  %v1079_v21 = vadd.f32 %v1989_v51, %v1059_v8  ;;  %v1081_v24 = vadd.f32 %v1989_v51, %v1061_v14 }
 0x178   : > { %v1058_v61 = vld [vmem:[#allocation2 + $0x48] sm:$0xff]  ;;  %v1077_v0 = vadd.f32 %v1989_v51, %v1057_v56  ;;  %vm1087_vm0 = vcmp.ge.f32.partialorder %v1071_v57, 0.0  ;;  %vm1088_vm1 = vcmp.ge.f32.partialorder %v1072_v58, 0.0  ;;  %v1103_v2 = vmul.f32 0.2, %v1071_v57  ;;  %v1063_v26 = vld [vmem:[#allocation2 + $0x60] sm:$0xff] }
 0x179   : > { %v1078_v1 = vadd.f32 %v1989_v51, %v1058_v61  ;;  %v1104_v3 = vmul.f32 0.2, %v1072_v58  ;;  %vm1089_vm2 = vcmp.ge.f32.partialorder %v1073_v59, 0.0  ;;  %vm1090_vm3 = vcmp.ge.f32.partialorder %v1074_v60, 0.0  ;;  %v1064_v30 = vld [vmem:[#allocation2 + $0x70] sm:$0xff]  ;;  %v1065_v36 = vld [vmem:[#allocation2 + $0x78] sm:$0xff] }
 0x17a   : > { %v1105_v4 = vmul.f32 0.2, %v1073_v59  ;;  %v1106_v5 = vmul.f32 0.2, %v1074_v60  ;;  %v1119_v6 = vsel %vm1087_vm0, %v1071_v57, %v1103_v2  ;;  %vm1091_vm4 = vcmp.ge.f32.partialorder %v1075_v62, 0.0  ;;  %v1066_v41 = vld [vmem:[#allocation2 + $0x28] sm:$0xff] }
 0x17b   : > { %v1120_v7 = vsel %vm1088_vm1, %v1072_v58, %v1104_v3  ;;  %vm1092_vm5 = vcmp.ge.f32.partialorder %v1076_v63, 0.0  ;;  %v1107_v12 = vmul.f32 0.2, %v1075_v62  ;;  %v1108_v17 = vmul.f32 0.2, %v1076_v63 }
 0x17c   : > { %v1619_v9 = vpack.c.bf16 %v1120_v7, %v1119_v6  ;;  %v1121_v10 = vsel %vm1089_vm2, %v1073_v59, %v1105_v4  ;;  %v1122_v11 = vsel %vm1090_vm3, %v1074_v60, %v1106_v5  ;;  %vm1093_vm6 = vcmp.ge.f32.partialorder %v1077_v0, 0.0 }
 0x17d   : > { %v1624_v16 = vpack.c.bf16 %v1122_v11, %v1121_v10  ;;  %vm1094_vm7 = vcmp.ge.f32.partialorder %v1078_v1, 0.0  ;;  %v1123_v18 = vsel %vm1091_vm4, %v1075_v62, %v1107_v12  ;;  %v1109_v19 = vmul.f32 0.2, %v1077_v0 }
 0x17e   : > { %1620 = vst [vmem:[%s2050_s3] sm:$0xff] %v1619_v9   ;;  %v1110_v20 = vmul.f32 0.2, %v1078_v1  ;;  %v1124_v22 = vsel %vm1092_vm5, %v1076_v63, %v1108_v17  ;;  %v1080_v23 = vadd.f32 %v1989_v51, %v1060_v13  ;;  %v1082_v25 = vadd.f32 %v1989_v51, %v1062_v15 }
 0x17f   : > { %1656 = vst [vmem:[%s2050_s3 + $0x8] sm:$0xff] %v1624_v16   ;;  %v1629_v27 = vpack.c.bf16 %v1124_v22, %v1123_v18  ;;  %v1125_v28 = vsel %vm1093_vm6, %v1077_v0, %v1109_v19  ;;  %vm1095_vm8 = vcmp.ge.f32.partialorder %v1079_v21, 0.0  ;;  %v1111_v32 = vmul.f32 0.2, %v1079_v21 }
 0x180   : > { %v1126_v29 = vsel %vm1094_vm7, %v1078_v1, %v1110_v20  ;;  %vm1096_vm9 = vcmp.ge.f32.partialorder %v1080_v23, 0.0  ;;  %v1112_v33 = vmul.f32 0.2, %v1080_v23  ;;  %vm1097_vm10 = vcmp.ge.f32.partialorder %v1081_v24, 0.0 }
 0x181   : > { %v1634_v31 = vpack.c.bf16 %v1126_v29, %v1125_v28  ;;  %1657 = vst [vmem:[%s2050_s3 + $0x10] sm:$0xff] %v1629_v27   ;;  %vm1098_vm11 = vcmp.ge.f32.partialorder %v1082_v25, 0.0  ;;  %v1113_v34 = vmul.f32 0.2, %v1081_v24  ;;  %v1083_v35 = vadd.f32 %v1989_v51, %v1063_v26 }
 0x182   : > { %v1127_v37 = vsel %vm1095_vm8, %v1079_v21, %v1111_v32  ;;  %v1128_v38 = vsel %vm1096_vm9, %v1080_v23, %v1112_v33  ;;  %v1114_v39 = vmul.f32 0.2, %v1082_v25  ;;  %v1084_v40 = vadd.f32 %v1989_v51, %v1064_v30 }
 0x183   : > { %1658 = vst [vmem:[%s2050_s3 + $0x18] sm:$0xff] %v1634_v31   ;;  %v1639_v42 = vpack.c.bf16 %v1128_v38, %v1127_v37  ;;  %v1129_v43 = vsel %vm1097_vm10, %v1081_v24, %v1113_v34  ;;  %vm1099_vm12 = vcmp.ge.f32.partialorder %v1083_v35, 0.0  ;;  %v1115_v44 = vmul.f32 0.2, %v1083_v35 }
 0x184   : > { %v1130_v45 = vsel %vm1098_vm11, %v1082_v25, %v1114_v39  ;;  %vm1100_vm13 = vcmp.ge.f32.partialorder %v1084_v40, 0.0  ;;  %v1116_v46 = vmul.f32 0.2, %v1084_v40  ;;  %v1085_v47 = vadd.f32 %v1989_v51, %v1065_v36 }
 0x185   : > { %1659 = vst [vmem:[%s2050_s3 + $0x20] sm:$0xff] %v1639_v42   ;;  %v1644_v48 = vpack.c.bf16 %v1130_v45, %v1129_v43  ;;  %v1131_v49 = vsel %vm1099_vm12, %v1083_v35, %v1115_v44  ;;  %v1086_v50 = vadd.f32 %v1989_v51, %v1066_v41 }
 0x186   : > { %v1132_v52 = vsel %vm1100_vm13, %v1084_v40, %v1116_v46  ;;  %vm1101_vm14 = vcmp.ge.f32.partialorder %v1085_v47, 0.0  ;;  %v1117_v53 = vmul.f32 0.2, %v1085_v47 }
 0x187   : > { %1660 = vst [vmem:[%s2050_s3 + $0x28] sm:$0xff] %v1644_v48   ;;  %v1649_v54 = vpack.c.bf16 %v1132_v52, %v1131_v49  ;;  %vm1102_vm15 = vcmp.ge.f32.partialorder %v1086_v50, 0.0  ;;  %v1118_v55 = vmul.f32 0.2, %v1086_v50 }
 0x188   : > { %v1133_v56 = vsel %vm1101_vm14, %v1085_v47, %v1117_v53 }
 0x189   : > { %1661 = vst [vmem:[%s2050_s3 + $0x30] sm:$0xff] %v1649_v54   ;;  %v1134_v57 = vsel %vm1102_vm15, %v1086_v50, %v1118_v55 }
 0x18a   : > { %v1654_v58 = vpack.c.bf16 %v1134_v57, %v1133_v56 }
 0x18c   : > { %1662 = vst [vmem:[%s2050_s3 + $0x38] sm:$0xff] %v1654_v58  }
 0x18d PF: > { %s13_s16 = sadd.s32 1, %s1743_s16   ;;  %s2051_s12 = smov %s1731_s13 }
 0x18e   : > { %p10_p12 = scmp.ge.s32.totalorder %s13_s16, 4   ;;  %s2052_s13 = smov %s1801_s20 }
 0x18f   : > { %s2053_s14 = smov %s1739_s15  ;;  %s2054_s15 = smov %s2056_s17 }
 0x190   :  { %12 = sbr.rel (!%p10_p12) target bundleno = 3 (0x3), region = 104 }

// kernel: discriminator_unet_forward.12
= control target key start
LH: loop header
LB: loop body
LE: loop exit
PB: predicated region body
PF: predicated region fallthrough
CT: control target
= control target key end

     0   :  { %s1588_s12 = smov 0   ;;  %s1590_s13 = smov 0   ;;  %s1846_s0 = inlined_call_operand.vmem [shape: bf16[32,2048], index: 0, kind: input, shape index: {}]   ;;  %s1847_s1 = inlined_call_operand.vmem [shape: bf16[2048,256], index: 1, kind: input, shape index: {}]   ;;  %s1848_s2 = inlined_call_operand.vmem [shape: f32[1,256], index: 2, kind: input, shape index: {}]   ;;  %s1849_s3 = inlined_call_operand.vmem [shape: bf16[32,256], index: 3, kind: output, shape index: {}]  }
   0x1   :  { %s1592_s14 = smov 0   ;;  %s1594_s15 = smov 0  }
   0x2   :  { %s1596_s16 = smov 0  }
   0x3 LB: > { %s25_s17 = sadd.s32 1, %s1561_s15  ;;  %p48_p1 = scmp.ne.s32.totalorder %s1553_s13, %s1549_s12  ;;  %s1565_s16 = sphi %s1596_s16, %s13_s16   ;;  %s1561_s15 = sphi %s1594_s15, %s1853_s15   ;;  %s1557_s14 = sphi %s1592_s14, %s1852_s14   ;;  %s1553_s13 = sphi %s1590_s13, %s1851_s13   ;;  %s1549_s12 = sphi %s1588_s12, %s1850_s12  }
   0x4   : > { %p26_p0 = scmp.ge.s32.totalorder %s25_s17, 4  ;;  %p49_p2 = scmp.eq.s32.totalorder %s1565_s16, 0 }
   0x5   : > { %s41_s19 = sadd.s32 1, %s1553_s13  ;;  %p1109_p5 = scmp.ge.s32.totalorder %s1565_s16, 4 }
   0x6   : > { %s1855_s17 = smov (%p26_p0, %s25_s17), 0  ;;  %p50_p3 = por %p49_p2, %p48_p1 }
   0x7   : > { %s37_s18 = ssub.s32 %s1561_s15, %s1855_s17  ;;  %164 = sbr.rel (%p1109_p5) target bundleno = 24 (0x18), region = 20 }
   0x8   : > { %p39_p4 = scmp.eq.s32.totalorder %s37_s18, 0 }
   0xa   : > { %s1623_s20 = scalar_select %p39_p4, %s1553_s13, %s41_s19  }
   0xc   : > { %167 = sbr.rel (!%p50_p3) target bundleno = 24 (0x18), region = 24  ;;  %s169_s21 = sand.u32 (%p50_p3), 1, %s1553_s13  }
   0xd   : > { %s1412_s22 = sshll.u32 (%p50_p3), %s1561_s15, 4  ;;  %s1110_s23 = sshll.u32 (%p50_p3), %s169_s21, 6 }
   0xe   : > { %s177_s26 = scalar_lea.vmem (%p50_p3), %s1846_s0, %s1412_s22  ;;  %s171_s27 = scalar_lea.vmem (%p50_p3), [#allocation3], %s1110_s23 }
   0xf   : > { %v190_v0 = vld [vmem:[%s177_s26] sm:$0xff] (%p50_p3)  ;;  %v192_v1 = vld [vmem:[%s177_s26 + $0x8] sm:$0xff] (%p50_p3) }
  0x10   : > { %v194_v2 = vld [vmem:[%s177_s26 + $0x40] sm:$0xff] (%p50_p3)  ;;  %191 = vst [vmem:[%s171_s27] sm:$0xff] (%p50_p3), %v190_v0  ;;  %v196_v3 = vld [vmem:[%s177_s26 + $0x48] sm:$0xff] (%p50_p3) }
  0x11   : > { %193 = vst [vmem:[%s171_s27 + $0x8] sm:$0xff] %v192_v1  ;;  %v198_v4 = vld [vmem:[%s177_s26 + $0x80] sm:$0xff]  ;;  %v200_v5 = vld [vmem:[%s177_s26 + $0x88] sm:$0xff] }
  0x12   : > { %195 = vst [vmem:[%s171_s27 + $0x10] sm:$0xff] %v194_v2  ;;  %v202_v6 = vld [vmem:[%s177_s26 + $0xc0] sm:$0xff]  ;;  %v204_v7 = vld [vmem:[%s177_s26 + $0xc8] sm:$0xff] }
  0x13   : > { %197 = vst [vmem:[%s171_s27 + $0x18] sm:$0xff] %v196_v3 }
  0x14   : > { %199 = vst [vmem:[%s171_s27 + $0x20] sm:$0xff] %v198_v4 }
  0x15   : > { %201 = vst [vmem:[%s171_s27 + $0x28] sm:$0xff] %v200_v5 }
  0x16   : > { %203 = vst [vmem:[%s171_s27 + $0x30] sm:$0xff] %v202_v6 }
  0x17   : > { %205 = vst [vmem:[%s171_s27 + $0x38] sm:$0xff] %v204_v7 }
  0x18 PF: > { %p1113_p6 = scmp.ge.s32.totalorder %s1565_s16, 1  ;;  %p225_p7 = scmp.lt.s32.totalorder %s1565_s16, 5 }
  0x1a   : > { %p226_p8 = pnand %p1113_p6, %p225_p7 }
  0x1b   : > { %s232_s28 = sand.u32 (!%p226_p8), 1, %s1549_s12   ;;  %s1115_s29 = sshll.u32 (!%p226_p8), %s1557_s14, 6 }
  0x1c   : > { %229 = sbr.rel (%p226_p8) target bundleno = 295 (0x127), region = 51  ;;  %s1114_s30 = sshll.u32 (!%p226_p8), %s232_s28, 6 }
  0x1d   : > { %p278_p9 = scmp.lt.s32.totalorder (!%p226_p8), %s1115_s29, 255  ;;  %s1640_s8 = scalar_lea.vmem (!%p226_p8), [#allocation3], %s1114_s30 }
  0x1e   : > { %p1118_p10 = scmp.ne.s32.totalorder (!%p226_p8), %s1557_s14, 0 }
  0x21   : > { %s1857_s29 = smov (!%p278_p9, %s1115_s29), 255  ;;  %308 = sbr.rel (%p1118_p10) target bundleno = 47 (0x2f), region = 59 }
  0x22   : > { %s1413_s4 = sshll.u32 %s1857_s29, 3 }
  0x23   : > { %s1638_s7 = scalar_lea.vmem %s1847_s1, %s1413_s4 }
  0x26   : > { %v1567_v8 = vmov 0.0  }
  0x27   : > { %309 = vst [vmem:[#allocation2 + $0x30] sm:$0xff] %v1567_v8 }
  0x28   : > { %310 = vst [vmem:[#allocation2] sm:$0xff] %v1567_v8 }
  0x29   : > { %311 = vst [vmem:[#allocation2 + $0x18] sm:$0xff] %v1567_v8 }
  0x2a   : > { %312 = vst [vmem:[#allocation2 + $0x10] sm:$0xff] %v1567_v8 }
  0x2b   : > { %313 = vst [vmem:[#allocation2 + $0x8] sm:$0xff] %v1567_v8 }
  0x2c   : > { %314 = vst [vmem:[#allocation2 + $0x20] sm:$0xff] %v1567_v8 }
  0x2d   : > { %315 = vst [vmem:[#allocation2 + $0x28] sm:$0xff] %v1567_v8 }
  0x2e   : > { %316 = vst [vmem:[#allocation2 + $0x38] sm:$0xff] %v1567_v8 }
  0x2f PF: > { %v1209_v9 = vld [vmem:[%s1638_s7 + $0x70] sm:$0xf]  ;;  %v1437_v10 = vld [vmem:[%s1638_s7 + $0x74] sm:$0xf0]  ;;  %v1201_v20 = vld [vmem:[%s1638_s7 + $0x60] sm:$0xf] }
  0x30   : > { %v1273_v11 = vld [vmem:[%s1638_s7 + $0xf0] sm:$0xf]  ;;  %v1210_v12 = vor.u32 %v1437_v10, %v1209_v9  ;;  %v1453_v13 = vld [vmem:[%s1638_s7 + $0xf4] sm:$0xf0]  ;;  %v1435_v22 = vld [vmem:[%s1638_s7 + $0x64] sm:$0xf0] }
  0x31   : > { %v1337_v14 = vld [vmem:[%s1638_s7 + $0x170] sm:$0xf]  ;;  %v1469_v15 = vld [vmem:[%s1638_s7 + $0x174] sm:$0xf0]  ;;  %v1274_v16 = vor.u32 %v1453_v13, %v1273_v11  ;;  %v1265_v23 = vld [vmem:[%s1638_s7 + $0xe0] sm:$0xf]  ;;  %v1202_v25 = vor.u32 %v1435_v22, %v1201_v20 }
  0x32   : > { %v1338_v17 = vor.u32 %v1469_v15, %v1337_v14  ;;  %v1401_v18 = vld [vmem:[%s1638_s7 + $0x1f0] sm:$0xf]  ;;  %v1485_v19 = vld [vmem:[%s1638_s7 + $0x1f4] sm:$0xf0]  ;;  %757 = vmatpush.bf16.msra.mxu0 %v1210_v12  ;;  %v1451_v24 = vld [vmem:[%s1638_s7 + $0xe4] sm:$0xf0] }
  0x33   : > { %v1402_v21 = vor.u32 %v1485_v19, %v1401_v18  ;;  %776 = vmatpush.bf16.msra.mxu1 %v1274_v16  ;;  %v1266_v26 = vor.u32 %v1451_v24, %v1265_v23  ;;  %v1329_v27 = vld [vmem:[%s1638_s7 + $0x160] sm:$0xf]  ;;  %v1467_v28 = vld [vmem:[%s1638_s7 + $0x164] sm:$0xf0]  ;;  %v1193_v32 = vld [vmem:[%s1638_s7 + $0x50] sm:$0xf] }
  0x34   : > { %795 = vmatpush.bf16.msra.mxu2 %v1338_v17  ;;  %v1393_v29 = vld [vmem:[%s1638_s7 + $0x1e0] sm:$0xf]  ;;  %v1330_v30 = vor.u32 %v1467_v28, %v1329_v27  ;;  %v1483_v31 = vld [vmem:[%s1638_s7 + $0x1e4] sm:$0xf0]  ;;  %v1433_v33 = vld [vmem:[%s1638_s7 + $0x54] sm:$0xf0] }
  0x35   : > { %814 = vmatpush.bf16.msra.mxu3 %v1402_v21  ;;  %v1394_v34 = vor.u32 %v1483_v31, %v1393_v29  ;;  %v1257_v35 = vld [vmem:[%s1638_s7 + $0xd0] sm:$0xf]  ;;  %v1449_v36 = vld [vmem:[%s1638_s7 + $0xd4] sm:$0xf0]  ;;  %v1194_v38 = vor.u32 %v1433_v33, %v1193_v32  ;;  %v1185_v44 = vld [vmem:[%s1638_s7 + $0x40] sm:$0xf] }
  0x36   : > { %v1321_v37 = vld [vmem:[%s1638_s7 + $0x150] sm:$0xf]  ;;  %758 = vmatpush.bf16.msra.mxu0 %v1202_v25  ;;  %v1465_v39 = vld [vmem:[%s1638_s7 + $0x154] sm:$0xf0]  ;;  %v1258_v42 = vor.u32 %v1449_v36, %v1257_v35  ;;  %v1431_v45 = vld [vmem:[%s1638_s7 + $0x44] sm:$0xf0] }
  0x37   : > { %v1385_v40 = vld [vmem:[%s1638_s7 + $0x1d0] sm:$0xf]  ;;  %v1481_v41 = vld [vmem:[%s1638_s7 + $0x1d4] sm:$0xf0]  ;;  %777 = vmatpush.bf16.msra.mxu1 %v1266_v26  ;;  %v1322_v43 = vor.u32 %v1465_v39, %v1321_v37  ;;  %v1249_v46 = vld [vmem:[%s1638_s7 + $0xc0] sm:$0xf]  ;;  %v1186_v53 = vor.u32 %v1431_v45, %v1185_v44 }
  0x38   : > { %796 = vmatpush.bf16.msra.mxu2 %v1330_v30  ;;  %v1386_v47 = vor.u32 %v1481_v41, %v1385_v40  ;;  %v1447_v48 = vld [vmem:[%s1638_s7 + $0xc4] sm:$0xf0]  ;;  %v1313_v49 = vld [vmem:[%s1638_s7 + $0x140] sm:$0xf]  ;;  %v1177_v56 = vld [vmem:[%s1638_s7 + $0x30] sm:$0xf] }
  0x39   : > { %815 = vmatpush.bf16.msra.mxu3 %v1394_v34  ;;  %v1463_v50 = vld [vmem:[%s1638_s7 + $0x144] sm:$0xf0]  ;;  %v1377_v51 = vld [vmem:[%s1638_s7 + $0x1c0] sm:$0xf]  ;;  %v1250_v54 = vor.u32 %v1447_v48, %v1249_v46  ;;  %v1429_v57 = vld [vmem:[%s1638_s7 + $0x34] sm:$0xf0] }
  0x3a   : > { %v1479_v52 = vld [vmem:[%s1638_s7 + $0x1c4] sm:$0xf0]  ;;  %759 = vmatpush.bf16.msra.mxu0 %v1194_v38  ;;  %v1314_v55 = vor.u32 %v1463_v50, %v1313_v49  ;;  %v1241_v58 = vld [vmem:[%s1638_s7 + $0xb0] sm:$0xf]  ;;  %v1445_v60 = vld [vmem:[%s1638_s7 + $0xb4] sm:$0xf0]  ;;  %v1178_v1 = vor.u32 %v1429_v57, %v1177_v56 }
  0x3b   : > { %778 = vmatpush.bf16.msra.mxu1 %v1258_v42  ;;  %v1378_v59 = vor.u32 %v1479_v52, %v1377_v51  ;;  %v1305_v61 = vld [vmem:[%s1638_s7 + $0x130] sm:$0xf]  ;;  %v1461_v62 = vld [vmem:[%s1638_s7 + $0x134] sm:$0xf0]  ;;  %v1242_v2 = vor.u32 %v1445_v60, %v1241_v58  ;;  %v1169_v4 = vld [vmem:[%s1638_s7 + $0x20] sm:$0xf] }
  0x3c   : > { %797 = vmatpush.bf16.msra.mxu2 %v1322_v43  ;;  %v1369_v63 = vld [vmem:[%s1638_s7 + $0x1b0] sm:$0xf]  ;;  %v1477_v0 = vld [vmem:[%s1638_s7 + $0x1b4] sm:$0xf0]  ;;  %v1306_v3 = vor.u32 %v1461_v62, %v1305_v61  ;;  %v1427_v5 = vld [vmem:[%s1638_s7 + $0x24] sm:$0xf0] }
  0x3d   : > { %816 = vmatpush.bf16.msra.mxu3 %v1386_v47  ;;  %v1233_v6 = vld [vmem:[%s1638_s7 + $0xa0] sm:$0xf]  ;;  %v1370_v7 = vor.u32 %v1477_v0, %v1369_v63  ;;  %v1443_v8 = vld [vmem:[%s1638_s7 + $0xa4] sm:$0xf0]  ;;  %v1170_v13 = vor.u32 %v1427_v5, %v1169_v4  ;;  %v1161_v16 = vld [vmem:[%s1638_s7 + $0x10] sm:$0xf] }
  0x3e   : > { %760 = vmatpush.bf16.msra.mxu0 %v1186_v53  ;;  %v1297_v9 = vld [vmem:[%s1638_s7 + $0x120] sm:$0xf]  ;;  %v1459_v10 = vld [vmem:[%s1638_s7 + $0x124] sm:$0xf0]  ;;  %v1234_v14 = vor.u32 %v1443_v8, %v1233_v6  ;;  %v1425_v17 = vld [vmem:[%s1638_s7 + $0x14] sm:$0xf0] }
  0x3f   : > { %779 = vmatpush.bf16.msra.mxu1 %v1250_v54  ;;  %v1361_v11 = vld [vmem:[%s1638_s7 + $0x1a0] sm:$0xf]  ;;  %v1475_v12 = vld [vmem:[%s1638_s7 + $0x1a4] sm:$0xf0]  ;;  %v1298_v15 = vor.u32 %v1459_v10, %v1297_v9  ;;  %v1225_v18 = vld [vmem:[%s1638_s7 + $0x90] sm:$0xf]  ;;  %v1162_v26 = vor.u32 %v1425_v17, %v1161_v16 }
  0x40   : > { %798 = vmatpush.bf16.msra.mxu2 %v1314_v55  ;;  %v1362_v19 = vor.u32 %v1475_v12, %v1361_v11  ;;  %v1441_v20 = vld [vmem:[%s1638_s7 + $0x94] sm:$0xf0]  ;;  %v1289_v21 = vld [vmem:[%s1638_s7 + $0x110] sm:$0xf]  ;;  %v1153_v25 = vld [vmem:[%s1638_s7] sm:$0xf] }
  0x41   : > { %817 = vmatpush.bf16.msra.mxu3 %v1378_v59  ;;  %v1457_v22 = vld [vmem:[%s1638_s7 + $0x114] sm:$0xf0]  ;;  %v1353_v23 = vld [vmem:[%s1638_s7 + $0x190] sm:$0xf]  ;;  %v1423_v27 = vld [vmem:[%s1638_s7 + $0x4] sm:$0xf0]  ;;  %v1226_v30 = vor.u32 %v1441_v20, %v1225_v18 }
  0x42   : > { %761 = vmatpush.bf16.msra.mxu0 %v1178_v1  ;;  %v1473_v24 = vld [vmem:[%s1638_s7 + $0x194] sm:$0xf0]  ;;  %v1217_v28 = vld [vmem:[%s1638_s7 + $0x80] sm:$0xf]  ;;  %v1439_v29 = vld [vmem:[%s1638_s7 + $0x84] sm:$0xf0]  ;;  %v1290_v31 = vor.u32 %v1457_v22, %v1289_v21  ;;  %v1154_v43 = vor.u32 %v1423_v27, %v1153_v25 }
  0x43   : > { %780 = vmatpush.bf16.msra.mxu1 %v1242_v2  ;;  %v1281_v32 = vld [vmem:[%s1638_s7 + $0x100] sm:$0xf]  ;;  %v1455_v33 = vld [vmem:[%s1638_s7 + $0x104] sm:$0xf0]  ;;  %v1354_v35 = vor.u32 %v1473_v24, %v1353_v23  ;;  %v1416_v38 = vld [vmem:[%s1640_s8 + $0xc] sm:$0xf0]  ;;  %v1218_v47 = vor.u32 %v1439_v29, %v1217_v28 }
  0x44   : > { %799 = vmatpush.bf16.msra.mxu2 %v1306_v3  ;;  %v1345_v34 = vld [vmem:[%s1638_s7 + $0x180] sm:$0xf]  ;;  %v1471_v36 = vld [vmem:[%s1638_s7 + $0x184] sm:$0xf0]  ;;  %v1414_v39 = vld [vmem:[%s1640_s8 + $0x4] sm:$0xf]  ;;  %v1282_v48 = vor.u32 %v1455_v33, %v1281_v32 }
  0x45   : > { %818 = vmatpush.bf16.msra.mxu3 %v1370_v7  ;;  %v1121_v37 = vld [vmem:[%s1640_s8] sm:$0xf]  ;;  %v1123_v40 = vld [vmem:[%s1640_s8 + $0x10] sm:$0xf0]  ;;  %v1339_v42 = vld [vmem:[%s1638_s7 + $0x178] sm:$0xf0]  ;;  %v1346_v52 = vor.u32 %v1471_v36, %v1345_v34 }
  0x46   : > { %762 = vmatpush.bf16.msra.mxu0 %v1170_v13  ;;  %v1468_v41 = vld [vmem:[%s1638_s7 + $0x174] sm:$0xf]  ;;  %v1129_v44 = vld [vmem:[%s1640_s8 + $0x8] sm:$0xf]  ;;  %v1275_v46 = vld [vmem:[%s1638_s7 + $0xf8] sm:$0xf0]  ;;  %v1722_v57 = vor.u32 %v1416_v38, %v1121_v37  ;;  %v1727_v62 = vor.u32 %v1414_v39, %v1123_v40 }
  0x47   : > { %781 = vmatpush.bf16.msra.mxu1 %v1234_v14  ;;  %v1452_v45 = vld [vmem:[%s1638_s7 + $0xf4] sm:$0xf]  ;;  %v1417_v49 = vld [vmem:[%s1640_s8 + $0x14] sm:$0xf0]  ;;  %v1415_v50 = vld [vmem:[%s1640_s8 + $0xc] sm:$0xf]  ;;  %v1342_v53 = vor.u32 %v1468_v41, %v1339_v42 }
  0x48   : > { %800 = vmatpush.bf16.msra.mxu2 %v1298_v15  ;;  %v1131_v51 = vld [vmem:[%s1640_s8 + $0x18] sm:$0xf0]  ;;  %v1436_v54 = vld [vmem:[%s1638_s7 + $0x74] sm:$0xf]  ;;  %v1278_v58 = vor.u32 %v1452_v45, %v1275_v46  ;;  %v1466_v60 = vld [vmem:[%s1638_s7 + $0x164] sm:$0xf]  ;;  %v1729_v63 = vor.u32 %v1417_v49, %v1129_v44 }
  0x49   : > { %819 = vmatpush.bf16.msra.mxu3 %v1362_v19  ;;  %v1211_v55 = vld [vmem:[%s1638_s7 + $0x78] sm:$0xf0]  ;;  %v1484_v56 = vld [vmem:[%s1638_s7 + $0x1f4] sm:$0xf]  ;;  %v1331_v61 = vld [vmem:[%s1638_s7 + $0x168] sm:$0xf0]  ;;  %v1733_v2 = vor.u32 %v1415_v50, %v1131_v51 }
  0x4a   : > { %763 = vmatpush.bf16.msra.mxu0 %v1162_v26  ;;  %v1403_v59 = vld [vmem:[%s1638_s7 + $0x1f8] sm:$0xf0]  ;;  %v1450_v0 = vld [vmem:[%s1638_s7 + $0xe4] sm:$0xf]  ;;  %v1267_v1 = vld [vmem:[%s1638_s7 + $0xe8] sm:$0xf0]  ;;  %v1214_v3 = vor.u32 %v1436_v54, %v1211_v55  ;;  %v1334_v5 = vor.u32 %v1466_v60, %v1331_v61 }
  0x4b   : > { %782 = vmatpush.bf16.msra.mxu1 %v1226_v30  ;;  %v1406_v4 = vor.u32 %v1484_v56, %v1403_v59  ;;  %v1434_v6 = vld [vmem:[%s1638_s7 + $0x64] sm:$0xf]  ;;  %v1203_v7 = vld [vmem:[%s1638_s7 + $0x68] sm:$0xf0]  ;;  %v1270_v9 = vor.u32 %v1450_v0, %v1267_v1  ;;  %v1464_v11 = vld [vmem:[%s1638_s7 + $0x154] sm:$0xf] }
  0x4c   : > { %801 = vmatpush.bf16.msra.mxu2 %v1290_v31  ;;  %v1482_v8 = vld [vmem:[%s1638_s7 + $0x1e4] sm:$0xf]  ;;  %v1395_v10 = vld [vmem:[%s1638_s7 + $0x1e8] sm:$0xf0]  ;;  %v1323_v12 = vld [vmem:[%s1638_s7 + $0x158] sm:$0xf0]  ;;  %v1206_v15 = vor.u32 %v1434_v6, %v1203_v7 }
  0x4d   : > { %820 = vmatpush.bf16.msra.mxu3 %v1354_v35  ;;  %v1448_v13 = vld [vmem:[%s1638_s7 + $0xd4] sm:$0xf]  ;;  %v1259_v14 = vld [vmem:[%s1638_s7 + $0xd8] sm:$0xf0]  ;;  %v1398_v16 = vor.u32 %v1482_v8, %v1395_v10  ;;  %v1326_v17 = vor.u32 %v1464_v11, %v1323_v12  ;;  %v1462_v23 = vld [vmem:[%s1638_s7 + $0x144] sm:$0xf] }
  0x4e   : > { %764 = vmatpush.bf16.msra.mxu0 %v1154_v43  ;;  %v1432_v18 = vld [vmem:[%s1638_s7 + $0x54] sm:$0xf]  ;;  %v1195_v19 = vld [vmem:[%s1638_s7 + $0x58] sm:$0xf0]  ;;  %v1262_v21 = vor.u32 %v1448_v13, %v1259_v14  ;;  %v1315_v24 = vld [vmem:[%s1638_s7 + $0x148] sm:$0xf0] }
  0x4f   : > { %783 = vmatpush.bf16.msra.mxu1 %v1218_v47  ;;  %v1480_v20 = vld [vmem:[%s1638_s7 + $0x1d4] sm:$0xf]  ;;  %v1387_v22 = vld [vmem:[%s1638_s7 + $0x1d8] sm:$0xf0]  ;;  %v1446_v25 = vld [vmem:[%s1638_s7 + $0xc4] sm:$0xf]  ;;  %v1198_v27 = vor.u32 %v1432_v18, %v1195_v19  ;;  %v1318_v32 = vor.u32 %v1462_v23, %v1315_v24 }
  0x50   : > { %802 = vmatpush.bf16.msra.mxu2 %v1282_v48  ;;  %v1251_v26 = vld [vmem:[%s1638_s7 + $0xc8] sm:$0xf0]  ;;  %v1430_v28 = vld [vmem:[%s1638_s7 + $0x44] sm:$0xf]  ;;  %v1390_v31 = vor.u32 %v1480_v20, %v1387_v22  ;;  %v1137_v34 = vld [vmem:[%s1640_s8 + $0x20] sm:$0xf] }
  0x51   : > { %821 = vmatpush.bf16.msra.mxu3 %v1346_v52  ;;  %765 = vmatmul.bf16.vlgmr.msra.gmra.mxu0 %v1722_v57  ;;  %v1187_v29 = vld [vmem:[%s1638_s7 + $0x48] sm:$0xf0]  ;;  %v1478_v30 = vld [vmem:[%s1638_s7 + $0x1c4] sm:$0xf]  ;;  %v1420_v35 = vld [vmem:[%s1640_s8 + $0x2c] sm:$0xf0]  ;;  %v1254_v36 = vor.u32 %v1446_v25, %v1251_v26 }
  0x52   : > { %784 = vmatmul.bf16.vlgmr.msra.gmra.mxu1 %v1727_v62  ;;  %833 = vmatpush.bf16.msrb.mxu0 %v1214_v3  ;;  %v1379_v33 = vld [vmem:[%s1638_s7 + $0x1c8] sm:$0xf0]  ;;  %v1418_v37 = vld [vmem:[%s1640_s8 + $0x24] sm:$0xf]  ;;  %v1139_v38 = vld [vmem:[%s1640_s8 + $0x30] sm:$0xf0]  ;;  %v1190_v44 = vor.u32 %v1430_v28, %v1187_v29 }
  0x53   : > { %852 = vmatpush.bf16.msrb.mxu1 %v1278_v58  ;;  %803 = vmatmul.bf16.vlgmr.msra.gmra.mxu2 %v1729_v63  ;;  %v1460_v39 = vld [vmem:[%s1638_s7 + $0x134] sm:$0xf]  ;;  %v1307_v40 = vld [vmem:[%s1638_s7 + $0x138] sm:$0xf0]  ;;  %v1145_v41 = vld [vmem:[%s1640_s8 + $0x28] sm:$0xf]  ;;  %v1382_v48 = vor.u32 %v1478_v30, %v1379_v33  ;;  %v1779_v59 = vor.u32 %v1418_v37, %v1139_v38 }
  0x54   : > { %871 = vmatpush.bf16.msrb.mxu2 %v1342_v53  ;;  %822 = vmatmul.bf16.vlgmr.msra.gmra.mxu3 %v1733_v2  ;;  %v1444_v42 = vld [vmem:[%s1638_s7 + $0xb4] sm:$0xf]  ;;  %v1243_v43 = vld [vmem:[%s1638_s7 + $0xb8] sm:$0xf0]  ;;  %v1421_v45 = vld [vmem:[%s1640_s8 + $0x34] sm:$0xf0]  ;;  %v1310_v49 = vor.u32 %v1460_v39, %v1307_v40  ;;  %v1774_v53 = vor.u32 %v1420_v35, %v1137_v34 }
  0x55   : > { %890 = vmatpush.bf16.msrb.mxu3 %v1406_v4  ;;  %v1419_v46 = vld [vmem:[%s1640_s8 + $0x2c] sm:$0xf]  ;;  %v1147_v47 = vld [vmem:[%s1640_s8 + $0x38] sm:$0xf0]  ;;  %v1428_v50 = vld [vmem:[%s1638_s7 + $0x34] sm:$0xf]  ;;  %v1246_v54 = vor.u32 %v1444_v42, %v1243_v43  ;;  %v1781_v60 = vor.u32 %v1421_v45, %v1145_v41 }
  0x56   : > { %834 = vmatpush.bf16.msrb.mxu0 %v1206_v15  ;;  %v1179_v51 = vld [vmem:[%s1638_s7 + $0x38] sm:$0xf0]  ;;  %v1476_v52 = vld [vmem:[%s1638_s7 + $0x1b4] sm:$0xf]  ;;  %v1458_v56 = vld [vmem:[%s1638_s7 + $0x124] sm:$0xf]  ;;  %v1150_v1 = vor.u32 %v1419_v46, %v1147_v47 }
  0x57   : > { %853 = vmatpush.bf16.msrb.mxu1 %v1270_v9  ;;  %v1371_v55 = vld [vmem:[%s1638_s7 + $0x1b8] sm:$0xf0]  ;;  %v1299_v58 = vld [vmem:[%s1638_s7 + $0x128] sm:$0xf0]  ;;  %v1442_v61 = vld [vmem:[%s1638_s7 + $0xa4] sm:$0xf]  ;;  %v1182_v3 = vor.u32 %v1428_v50, %v1179_v51 }
  0x58   : > { %872 = vmatpush.bf16.msrb.mxu2 %v1334_v5  ;;  %v1235_v0 = vld [vmem:[%s1638_s7 + $0xa8] sm:$0xf0]  ;;  %v1374_v4 = vor.u32 %v1476_v52, %v1371_v55  ;;  %v1302_v5 = vor.u32 %v1458_v56, %v1299_v58  ;;  %v1426_v6 = vld [vmem:[%s1638_s7 + $0x24] sm:$0xf]  ;;  %v1456_v11 = vld [vmem:[%s1638_s7 + $0x114] sm:$0xf] }
  0x59   : > { %891 = vmatpush.bf16.msrb.mxu3 %v1398_v16  ;;  %v1171_v7 = vld [vmem:[%s1638_s7 + $0x28] sm:$0xf0]  ;;  %v1474_v8 = vld [vmem:[%s1638_s7 + $0x1a4] sm:$0xf]  ;;  %v1238_v9 = vor.u32 %v1442_v61, %v1235_v0  ;;  %v1291_v12 = vld [vmem:[%s1638_s7 + $0x118] sm:$0xf0] }
  0x5a   : > { %835 = vmatpush.bf16.msrb.mxu0 %v1198_v27  ;;  %v1363_v10 = vld [vmem:[%s1638_s7 + $0x1a8] sm:$0xf0]  ;;  %v1440_v13 = vld [vmem:[%s1638_s7 + $0x94] sm:$0xf]  ;;  %v1227_v14 = vld [vmem:[%s1638_s7 + $0x98] sm:$0xf0]  ;;  %v1174_v15 = vor.u32 %v1426_v6, %v1171_v7 }
  0x5b   : > { %854 = vmatpush.bf16.msrb.mxu1 %v1262_v21  ;;  %v1366_v16 = vor.u32 %v1474_v8, %v1363_v10  ;;  %v1424_v18 = vld [vmem:[%s1638_s7 + $0x14] sm:$0xf]  ;;  %v1163_v19 = vld [vmem:[%s1638_s7 + $0x18] sm:$0xf0]  ;;  %v1230_v21 = vor.u32 %v1440_v13, %v1227_v14  ;;  %v1454_v23 = vld [vmem:[%s1638_s7 + $0x104] sm:$0xf] }
  0x5c   : > { %873 = vmatpush.bf16.msrb.mxu2 %v1326_v17  ;;  %v1294_v17 = vor.u32 %v1456_v11, %v1291_v12  ;;  %v1472_v20 = vld [vmem:[%s1638_s7 + $0x194] sm:$0xf]  ;;  %v1355_v22 = vld [vmem:[%s1638_s7 + $0x198] sm:$0xf0]  ;;  %v1283_v24 = vld [vmem:[%s1638_s7 + $0x108] sm:$0xf0]  ;;  %v1166_v27 = vor.u32 %v1424_v18, %v1163_v19 }
  0x5d   : > { %892 = vmatpush.bf16.msrb.mxu3 %v1390_v31  ;;  %v1438_v25 = vld [vmem:[%s1638_s7 + $0x84] sm:$0xf]  ;;  %v1219_v26 = vld [vmem:[%s1638_s7 + $0x88] sm:$0xf0]  ;;  %v1358_v28 = vor.u32 %v1472_v20, %v1355_v22  ;;  %v1286_v29 = vor.u32 %v1454_v23, %v1283_v24  ;;  %v317_v43 = vld [vmem:[#allocation2 + $0x30] sm:$0xff]  ;;  %p1407_p11 = scmp.ne.s32.totalorder %s1557_s14, 3 }
  0x5e   : > { %836 = vmatpush.bf16.msrb.mxu0 %v1190_v44  ;;  %v1422_v30 = vld [vmem:[%s1638_s7 + $0x4] sm:$0xf]  ;;  %v1155_v31 = vld [vmem:[%s1638_s7 + $0x8] sm:$0xf0]  ;;  %v320_v24 = vld [vmem:[#allocation2 + $0x10] sm:$0xff] }
  0x5f   : > { %855 = vmatpush.bf16.msrb.mxu1 %v1254_v36  ;;  %v1470_v33 = vld [vmem:[%s1638_s7 + $0x184] sm:$0xf]  ;;  %v1347_v34 = vld [vmem:[%s1638_s7 + $0x188] sm:$0xf0]  ;;  %v1158_v35 = vor.u32 %v1422_v30, %v1155_v31 }
  0x60   : > { %874 = vmatpush.bf16.msrb.mxu2 %v1318_v32  ;;  %v1222_v32 = vor.u32 %v1438_v25, %v1219_v26  ;;  %v1350_v36 = vor.u32 %v1470_v33, %v1347_v34  ;;  %v323_v6 = vld [vmem:[#allocation2 + $0x28] sm:$0xff]  ;;  %v322_v33 = vld [vmem:[#allocation2 + $0x20] sm:$0xff] }
  0x61   : > { %893 = vmatpush.bf16.msrb.mxu3 %v1382_v48  ;;  %770 = vmatmul.bf16.gmra.mxu0 %v1774_v53 }
  0x62   : > { %789 = vmatmul.bf16.gmra.mxu1 %v1779_v59  ;;  %837 = vmatpush.bf16.msrb.mxu0 %v1182_v3 }
  0x63   : > { %856 = vmatpush.bf16.msrb.mxu1 %v1246_v54  ;;  %808 = vmatmul.bf16.gmra.mxu2 %v1781_v60 }
  0x64   : > { %875 = vmatpush.bf16.msrb.mxu2 %v1310_v49  ;;  %827 = vmatmul.bf16.gmra.mxu3 %v1150_v1  ;;  %v319_v49 = vld [vmem:[#allocation2 + $0x18] sm:$0xff] }
  0x65   : > { %894 = vmatpush.bf16.msrb.mxu3 %v1374_v4 }
  0x66   : > { %838 = vmatpush.bf16.msrb.mxu0 %v1174_v15 }
  0x67   : > { %857 = vmatpush.bf16.msrb.mxu1 %v1238_v9 }
  0x68   : > { %876 = vmatpush.bf16.msrb.mxu2 %v1302_v5 }
  0x69   : > { %895 = vmatpush.bf16.msrb.mxu3 %v1366_v16 }
  0x6a   : > { %839 = vmatpush.bf16.msrb.mxu0 %v1166_v27 }
  0x6b   : > { %858 = vmatpush.bf16.msrb.mxu1 %v1230_v21 }
  0x6c   : > { %877 = vmatpush.bf16.msrb.mxu2 %v1294_v17  ;;  %v318_v17 = vld [vmem:[#allocation2] sm:$0xff] }
  0x6d   : > { %896 = vmatpush.bf16.msrb.mxu3 %v1358_v28 }
  0x6e   : > { %840 = vmatpush.bf16.msrb.mxu0 %v1158_v35 }
  0x6f   : > { %859 = vmatpush.bf16.msrb.mxu1 %v1222_v32 }
  0x70   : > { %878 = vmatpush.bf16.msrb.mxu2 %v1286_v29 }
  0x71   : > { %897 = vmatpush.bf16.msrb.mxu3 %v1350_v36  ;;  %841 = vmatmul.bf16.vlgmr.msrb.gmra.mxu0 %v1722_v57 }
  0x72   : > { %860 = vmatmul.bf16.vlgmr.msrb.gmra.mxu1 %v1727_v62 }
  0x73   : > { %879 = vmatmul.bf16.vlgmr.msrb.gmra.mxu2 %v1729_v63 }
  0x74   : > { %898 = vmatmul.bf16.vlgmr.msrb.gmra.mxu3 %v1733_v2 }
  0x81   : > { %846 = vmatmul.bf16.gmra.mxu0 %v1774_v53 }
  0x82   : > { %865 = vmatmul.bf16.gmra.mxu1 %v1779_v59  ;;  %v321_v59 = vld [vmem:[#allocation2 + $0x8] sm:$0xff] }
  0x83   : > { %884 = vmatmul.bf16.gmra.mxu2 %v1781_v60 }
  0x84   : > { %903 = vmatmul.bf16.gmra.mxu3 %v1150_v1 }
  0xce   : > { %v766_v37 = vpop.f32.mrf.mxu0 }
  0xcf   : > { %v785_v38 = vpop.f32.mrf.mxu1 }
  0xd0   : > { %v786_v39 = vadd.f32 %v785_v38, %v766_v37 }
  0xd6   : > { %v804_v40 = vpop.f32.mrf.mxu2  ;;  %v768_v57 = vpop.f32.mrf.mxu0 }
  0xd7   : > { %v805_v41 = vadd.f32 %v804_v40, %v786_v39  ;;  %v823_v42 = vpop.f32.mrf.mxu3  ;;  %v787_v62 = vpop.f32.mrf.mxu1 }
  0xd8   : > { %v788_v2 = vadd.f32 %v787_v62, %v768_v57 }
  0xd9   : > { %v824_v44 = vadd.f32 %v823_v42, %v805_v41  ;;  %v324_v41 = vld [vmem:[#allocation2 + $0x38] sm:$0xff] }
  0xdb   : > { %v909_v63 = vadd.f32 %v824_v44, %v317_v43 }
  0xdd   : > { %917 = vst [vmem:[#allocation2 + $0x30] sm:$0xff] %v909_v63 }
  0xde   : > { %v806_v45 = vpop.f32.mrf.mxu2  ;;  %v771_v48 = vpop.f32.mrf.mxu0 }
  0xdf   : > { %v807_v46 = vadd.f32 %v806_v45, %v788_v2  ;;  %v825_v47 = vpop.f32.mrf.mxu3  ;;  %v790_v50 = vpop.f32.mrf.mxu1 }
  0xe0   : > { %v791_v53 = vadd.f32 %v790_v50, %v771_v48 }
  0xe1   : > { %v826_v51 = vadd.f32 %v825_v47, %v807_v46 }
  0xe3   : > { %v911_v52 = vadd.f32 %v826_v51, %v319_v49 }
  0xe5   : > { %919 = vst [vmem:[#allocation2 + $0x18] sm:$0xff] %v911_v52 }
  0xe6   : > { %v809_v54 = vpop.f32.mrf.mxu2  ;;  %v773_v58 = vpop.f32.mrf.mxu0 }
  0xe7   : > { %v810_v55 = vadd.f32 %v809_v54, %v791_v53  ;;  %v828_v56 = vpop.f32.mrf.mxu3  ;;  %v792_v60 = vpop.f32.mrf.mxu1 }
  0xe8   : > { %v793_v1 = vadd.f32 %v792_v60, %v773_v58 }
  0xe9   : > { %v829_v61 = vadd.f32 %v828_v56, %v810_v55 }
  0xeb   : > { %v913_v0 = vadd.f32 %v829_v61, %v321_v59 }
  0xed   : > { %921 = vst [vmem:[#allocation2 + $0x8] sm:$0xff] %v913_v0 }
  0xee   : > { %v811_v3 = vpop.f32.mrf.mxu2  ;;  %v842_v7 = vpop.f32.mrf.mxu0 }
  0xef   : > { %v812_v4 = vadd.f32 %v811_v3, %v793_v1  ;;  %v830_v5 = vpop.f32.mrf.mxu3  ;;  %v861_v8 = vpop.f32.mrf.mxu1 }
  0xf0   : > { %v862_v11 = vadd.f32 %v861_v8, %v842_v7 }
  0xf1   : > { %v831_v9 = vadd.f32 %v830_v5, %v812_v4 }
  0xf3   : > { %v915_v10 = vadd.f32 %v831_v9, %v323_v6 }
  0xf5   : > { %923 = vst [vmem:[#allocation2 + $0x28] sm:$0xff] %v915_v10 }
  0xf6   : > { %v880_v12 = vpop.f32.mrf.mxu2  ;;  %v844_v15 = vpop.f32.mrf.mxu0 }
  0xf7   : > { %v899_v13 = vpop.f32.mrf.mxu3  ;;  %v881_v14 = vadd.f32 %v880_v12, %v862_v11  ;;  %v863_v16 = vpop.f32.mrf.mxu1 }
  0xf8   : > { %v864_v20 = vadd.f32 %v863_v16, %v844_v15 }
  0xf9   : > { %v900_v18 = vadd.f32 %v899_v13, %v881_v14 }
  0xfb   : > { %v910_v19 = vadd.f32 %v900_v18, %v318_v17 }
  0xfd   : > { %918 = vst [vmem:[#allocation2] sm:$0xff] %v910_v19 }
  0xfe   : > { %v882_v21 = vpop.f32.mrf.mxu2  ;;  %v847_v25 = vpop.f32.mrf.mxu0 }
  0xff   : > { %v901_v22 = vpop.f32.mrf.mxu3  ;;  %v883_v23 = vadd.f32 %v882_v21, %v864_v20  ;;  %v866_v26 = vpop.f32.mrf.mxu1 }
 0x100   : > { %v867_v29 = vadd.f32 %v866_v26, %v847_v25 }
 0x101   : > { %v902_v27 = vadd.f32 %v901_v22, %v883_v23 }
 0x103   : > { %v912_v28 = vadd.f32 %v902_v27, %v320_v24 }
 0x105   : > { %920 = vst [vmem:[#allocation2 + $0x10] sm:$0xff] %v912_v28 }
 0x106   : > { %v885_v30 = vpop.f32.mrf.mxu2  ;;  %v849_v35 = vpop.f32.mrf.mxu0 }
 0x107   : > { %v904_v31 = vpop.f32.mrf.mxu3  ;;  %v886_v32 = vadd.f32 %v885_v30, %v867_v29  ;;  %v868_v36 = vpop.f32.mrf.mxu1 }
 0x108   : > { %v869_v38 = vadd.f32 %v868_v36, %v849_v35 }
 0x109   : > { %v905_v34 = vadd.f32 %v904_v31, %v886_v32 }
 0x10b   : > { %v914_v37 = vadd.f32 %v905_v34, %v322_v33 }
 0x10d   : > { %922 = vst [vmem:[#allocation2 + $0x20] sm:$0xff] %v914_v37 }
 0x10e   : > { %v887_v39 = vpop.f32.mrf.mxu2 }
 0x10f   : > { %v888_v40 = vadd.f32 %v887_v39, %v869_v38  ;;  %v906_v42 = vpop.f32.mrf.mxu3 }
 0x111   : > { %v907_v57 = vadd.f32 %v906_v42, %v888_v40  ;;  %928 = sbr.rel (%p1407_p11) target bundleno = 295 (0x127), region = 63 }
 0x113   : > { %v916_v43 = vadd.f32 %v907_v57, %v324_v41 }
 0x115   : > { %924 = vst [vmem:[#allocation2 + $0x38] sm:$0xff] %v916_v43 }
 0x116   : > { %v929_v62 = vld [vmem:[#allocation2 + $0x30] sm:$0xff]  ;;  %v930_v44 = vld [vmem:[#allocation2] sm:$0xff]  ;;  %v931_v46 = vld [vmem:[#allocation2 + $0x18] sm:$0xff] }
 0x117   : > { %v937_v63 = vld [vmem:[%s1848_s2] sm:$0x3]  ;;  %v932_v47 = vld [vmem:[#allocation2 + $0x10] sm:$0xff]  ;;  %v933_v48 = vld [vmem:[#allocation2 + $0x8] sm:$0xff] }
 0x118   : > { %v939_v2 = vperm.slane %v937_v63, 0  ;;  %v940_v45 = vperm.slane %v937_v63, 1  ;;  %v934_v49 = vld [vmem:[#allocation2 + $0x20] sm:$0xff]  ;;  %v935_v50 = vld [vmem:[#allocation2 + $0x28] sm:$0xff] }
 0x11a   : > { %v943_v52 = vadd.f32 %v939_v2, %v929_v62  ;;  %v944_v53 = vadd.f32 %v940_v45, %v930_v44  ;;  %v945_v54 = vadd.f32 %v939_v2, %v931_v46  ;;  %v946_v55 = vadd.f32 %v940_v45, %v932_v47 }
 0x11b   : > { %v947_v56 = vadd.f32 %v939_v2, %v933_v48  ;;  %v948_v58 = vadd.f32 %v940_v45, %v934_v49  ;;  %v949_v59 = vadd.f32 %v939_v2, %v935_v50 }
 0x11c   : > { %v936_v51 = vld [vmem:[#allocation2 + $0x38] sm:$0xff]  ;;  %vm951_vm0 = vcmp.ge.f32.partialorder %v943_v52, 0.0  ;;  %vm952_vm1 = vcmp.ge.f32.partialorder %v944_v53, 0.0  ;;  %v959_v61 = vmul.f32 0.2, %v943_v52  ;;  %vm953_vm2 = vcmp.ge.f32.partialorder %v945_v54, 0.0 }
 0x11d   : > { %v950_v60 = vadd.f32 %v940_v45, %v936_v51  ;;  %v960_v0 = vmul.f32 0.2, %v944_v53  ;;  %vm954_vm3 = vcmp.ge.f32.partialorder %v946_v55, 0.0  ;;  %v961_v1 = vmul.f32 0.2, %v945_v54 }
 0x11e   : > { %v962_v3 = vmul.f32 0.2, %v946_v55  ;;  %v967_v4 = vsel %vm951_vm0, %v943_v52, %v959_v61  ;;  %vm955_vm4 = vcmp.ge.f32.partialorder %v947_v56, 0.0  ;;  %vm956_vm5 = vcmp.ge.f32.partialorder %v948_v58, 0.0 }
 0x11f   : > { %v968_v5 = vsel %vm952_vm1, %v944_v53, %v960_v0  ;;  %v969_v7 = vsel %vm953_vm2, %v945_v54, %v961_v1  ;;  %v963_v9 = vmul.f32 0.2, %v947_v56  ;;  %v964_v11 = vmul.f32 0.2, %v948_v58 }
 0x120   : > { %v975_v6 = vpack.c.bf16 %v968_v5, %v967_v4  ;;  %v970_v8 = vsel %vm954_vm3, %v946_v55, %v962_v3  ;;  %vm957_vm6 = vcmp.ge.f32.partialorder %v949_v59, 0.0  ;;  %vm958_vm7 = vcmp.ge.f32.partialorder %v950_v60, 0.0 }
 0x121   : > { %v976_v10 = vpack.c.bf16 %v970_v8, %v969_v7  ;;  %v971_v12 = vsel %vm955_vm4, %v947_v56, %v963_v9  ;;  %v965_v13 = vmul.f32 0.2, %v949_v59  ;;  %v966_v14 = vmul.f32 0.2, %v950_v60 }
 0x122   : > { %979 = vst [vmem:[%s1849_s3] sm:$0xff] %v975_v6  ;;  %v972_v15 = vsel %vm956_vm5, %v948_v58, %v964_v11 }
 0x123   : > { %980 = vst [vmem:[%s1849_s3 + $0x8] sm:$0xff] %v976_v10  ;;  %v977_v16 = vpack.c.bf16 %v972_v15, %v971_v12  ;;  %v973_v17 = vsel %vm957_vm6, %v949_v59, %v965_v13  ;;  %v974_v18 = vsel %vm958_vm7, %v950_v60, %v966_v14 }
 0x124   : > { %v978_v19 = vpack.c.bf16 %v974_v18, %v973_v17 }
 0x125   : > { %981 = vst [vmem:[%s1849_s3 + $0x10] sm:$0xff] %v977_v16 }
 0x126   : > { %982 = vst [vmem:[%s1849_s3 + $0x18] sm:$0xff] %v978_v19 }
 0x127 PF: > { %s13_s16 = sadd.s32 1, %s1565_s16   ;;  %s1850_s12 = smov %s1553_s13 }
 0x128   : > { %p10_p12 = scmp.ge.s32.totalorder %s13_s16, 6   ;;  %s1851_s13 = smov %s1623_s20 }
 0x129   : > { %s1852_s14 = smov %s1561_s15  ;;  %s1853_s15 = smov %s1855_s17 }
 0x12a   :  { %12 = sbr.rel (!%p10_p12) target bundleno = 3 (0x3), region = 104 }

// kernel: discriminator_unet_forward.13
= control target key start
LH: loop header
LB: loop body
LE: loop exit
PB: predicated region body
PF: predicated region fallthrough
CT: control target
= control target key end

     0   :  { %s2317_s0 = inlined_call_operand.vmem [shape: bf16[16,4096], index: 0, kind: input, shape index: {}]   ;;  %s2318_s1 = inlined_call_operand.vmem [shape: bf16[4096,512], index: 1, kind: input, shape index: {}]   ;;  %s2319_s2 = inlined_call_operand.vmem [shape: f32[1,512], index: 2, kind: input, shape index: {}]   ;;  %s2320_s3 = inlined_call_operand.vmem [shape: bf16[16,512], index: 3, kind: output, shape index: {}]  }
   0x1   :  { %2322 = sst [smem:[#allocation7_spill]] %s2317_s0 }
   0x2   :  { %2323 = sst [smem:[#allocation8_spill]] %s2318_s1 }
   0x3   :  { %s1851_s12 = smov 0   ;;  %s1853_s13 = smov 0  }
   0x4   :  { %s1855_s14 = smov 0   ;;  %s1857_s15 = smov 0  }
   0x5   :  { %s1859_s16 = smov 0   ;;  %s1861_s17 = smov 0  }
   0x6   :  { %s1863_s18 = smov 0   ;;  %s1865_s19 = smov 0  }
   0x7   :  { %s1867_s20 = smov 0   ;;  %s1869_s21 = smov 0  }
   0x8   :  { %s1871_s22 = smov 0  }
   0x9 LB: > { %s1286_s23 = sadd.s32 4294967295, %s1828_s22   ;;  %s25_s24 = sadd.s32 1, %s1820_s20  ;;  %s1828_s22 = sphi %s1871_s22, %s13_s22   ;;  %s1824_s21 = sphi %s1869_s21, %s2340_s21   ;;  %s1820_s20 = sphi %s1867_s20, %s2339_s20   ;;  %s1816_s19 = sphi %s1865_s19, %s2338_s19   ;;  %s1812_s18 = sphi %s1863_s18, %s2337_s18   ;;  %s1808_s17 = sphi %s1861_s17, %s2336_s17   ;;  %s1804_s16 = sphi %s1859_s16, %s2335_s16   ;;  %s1800_s15 = sphi %s1857_s15, %s2334_s15   ;;  %s1796_s14 = sphi %s1855_s14, %s2333_s14   ;;  %s1792_s13 = sphi %s1853_s13, %s2332_s13   ;;  %s1788_s12 = sphi %s1851_s12, %s2331_s12  }
   0xa   : > { %p26_p0 = scmp.ge.s32.totalorder %s25_s24, 8  ;;  %s28_s25 = sadd.s32 1, %s1824_s21 }
   0xb   : > { %s41_s26 = sadd.s32 1, %s1808_s17  ;;  %p48_p1 = scmp.ne.s32.totalorder %s1808_s17, %s1804_s16 }
   0xc   : > { %s2342_s24 = smov (%p26_p0, %s25_s24), 0  ;;  %s2344_s25 = smov (!%p26_p0, %s28_s25), %s1824_s21 }
   0xd   : > { %s37_s27 = ssub.s32 %s1820_s20, %s2342_s24  ;;  %p49_p2 = scmp.eq.s32.totalorder %s1828_s22, 0 }
   0xe   : > { %p30_p3 = scmp.ge.s32.totalorder %s2344_s25, 2  ;;  %p39_p4 = scmp.eq.s32.totalorder %s37_s27, 0 }
   0xf   : > { %p1918_p5 = por %p49_p2, %p48_p1  ;;  %s69_s29 = sadd.s32 1, %s1800_s15 }
  0x10   : > { %s2346_s25 = smov (%p30_p3, %s2344_s25), 0  ;;  %p76_p6 = scmp.ne.s32.totalorder %s1800_s15, %s1796_s14 }
  0x11   : > { %2325 = sst [smem:[#allocation6_spill]] %s2346_s25  ;;  %s65_s4 = ssub.s32 %s1824_s21, %s2346_s25 }
  0x12   : > { %s1926_s30 = scalar_select %p39_p4, %s1808_s17, %s41_s26  }
  0x13   : > { %s66_s5 = sor.u32 %s65_s4, %s37_s27  ;;  %p121_p7 = scmp.eq.s32.totalorder %s65_s4, 0 }
  0x14   : > { %p67_p8 = scmp.eq.s32.totalorder %s66_s5, 0  ;;  %p1932_p9 = por %p76_p6, %p49_p2 }
  0x15   : > { %s123_s7 = sadd.s32 1, %s1792_s13  ;;  %p133_p10 = scmp.ne.s32.totalorder %s1792_s13, %s1788_s12 }
  0x16   : > { %s1940_s8 = scalar_select %p67_p8, %s1800_s15, %s69_s29  }
  0x17   : > { %s1943_s9 = scalar_select %p121_p7, %s1792_s13, %s123_s7  }
  0x18   : > { %p134_p11 = scmp.eq.s32.totalorder %s1286_s23, 15  ;;  %p1289_p13 = scmp.ge.s32.totalorder %s1828_s22, 16 }
  0x1a   : > { %p1945_p12 = por %p134_p11, %p133_p10  ;;  %156 = sbr.rel (%p1289_p13) target bundleno = 119 (0x77), region = 16 }
  0x1f   : > { %159 = sbr.rel (!%p1918_p5) target bundleno = 45 (0x2d), region = 20  ;;  %s161_s11 = sand.u32 (%p1918_p5), 1, %s1808_s17  }
  0x20   : > { %s1582_s26 = sshll.u32 (%p1918_p5), %s1820_s20, 4  ;;  %s1290_s27 = sshll.u32 (%p1918_p5), %s161_s11, 5 }
  0x21   : > { %s2328_s0 = sld [smem:[#allocation7_spill]] (%p1918_p5)  ;;  %s163_s23 = scalar_lea.vmem (%p1918_p5), [#allocation3], %s1290_s27 }
  0x27   : > { %s169_s5 = scalar_lea.vmem %s2328_s0, %s1582_s26 }
  0x28   : > { %v182_v0 = vld [vmem:[%s169_s5] sm:$0xff]  ;;  %v184_v1 = vld [vmem:[%s169_s5 + $0x8] sm:$0xff] }
  0x29   : > { %v186_v2 = vld [vmem:[%s169_s5 + $0x80] sm:$0xff]  ;;  %183 = vst [vmem:[%s163_s23] sm:$0xff] %v182_v0  ;;  %v188_v3 = vld [vmem:[%s169_s5 + $0x88] sm:$0xff] }
  0x2a   : > { %185 = vst [vmem:[%s163_s23 + $0x8] sm:$0xff] %v184_v1 }
  0x2b   : > { %187 = vst [vmem:[%s163_s23 + $0x10] sm:$0xff] %v186_v2 }
  0x2c   : > { %189 = vst [vmem:[%s163_s23 + $0x18] sm:$0xff] %v188_v3 }
  0x2d PF: > { %195 = sbr.rel (!%p1932_p9) target bundleno = 119 (0x77), region = 43  ;;  %s197_s28 = sand.u32 (%p1932_p9), 1, %s1800_s15  }
  0x2e   : > { %s1295_s7 = sshll.u32 (%p1932_p9), %s1824_s21, 1  ;;  %s1293_s11 = sshll.u32 (%p1932_p9), %s197_s28, 9 }
  0x2f   : > { %s1583_s26 = sshll.u32 (%p1932_p9), %s1820_s20, 8  ;;  %s2329_s1 = sld [smem:[#allocation8_spill]] (%p1932_p9) }
  0x30   : > { %s203_s29 = sadd.s32 (%p1932_p9), %s1583_s26, %s1295_s7  ;;  %s1970_s6 = scalar_lea.vmem (%p1932_p9), [#allocation4], %s1293_s11 }
  0x31   : > { %s1297_s4 = sshll.u32 (%p1932_p9), %s203_s29, 2 }
  0x35   : > { %s1965_s5 = scalar_lea.vmem %s2329_s1, %s1297_s4 }
  0x36   : > { %v360_v4 = vld [vmem:[%s1965_s5] sm:$0xff]  ;;  %v362_v5 = vld [vmem:[%s1965_s5 + $0x10] sm:$0xff] }
  0x37   : > { %v364_v6 = vld [vmem:[%s1965_s5 + $0x20] sm:$0xff]  ;;  %361 = vst [vmem:[%s1970_s6] sm:$0xff] %v360_v4  ;;  %v366_v7 = vld [vmem:[%s1965_s5 + $0x30] sm:$0xff] }
  0x38   : > { %363 = vst [vmem:[%s1970_s6 + $0x8] sm:$0xff] %v362_v5  ;;  %v368_v8 = vld [vmem:[%s1965_s5 + $0x40] sm:$0xff]  ;;  %v370_v9 = vld [vmem:[%s1965_s5 + $0x50] sm:$0xff] }
  0x39   : > { %365 = vst [vmem:[%s1970_s6 + $0x10] sm:$0xff] %v364_v6  ;;  %v372_v10 = vld [vmem:[%s1965_s5 + $0x60] sm:$0xff]  ;;  %v374_v11 = vld [vmem:[%s1965_s5 + $0x70] sm:$0xff] }
  0x3a   : > { %367 = vst [vmem:[%s1970_s6 + $0x18] sm:$0xff] %v366_v7  ;;  %v376_v12 = vld [vmem:[%s1965_s5 + $0x80] sm:$0xff]  ;;  %v378_v13 = vld [vmem:[%s1965_s5 + $0x90] sm:$0xff] }
  0x3b   : > { %369 = vst [vmem:[%s1970_s6 + $0x20] sm:$0xff] %v368_v8  ;;  %v380_v14 = vld [vmem:[%s1965_s5 + $0xa0] sm:$0xff]  ;;  %v382_v15 = vld [vmem:[%s1965_s5 + $0xb0] sm:$0xff] }
  0x3c   : > { %371 = vst [vmem:[%s1970_s6 + $0x28] sm:$0xff] %v370_v9  ;;  %v384_v16 = vld [vmem:[%s1965_s5 + $0xc0] sm:$0xff]  ;;  %v386_v17 = vld [vmem:[%s1965_s5 + $0xd0] sm:$0xff] }
  0x3d   : > { %373 = vst [vmem:[%s1970_s6 + $0x30] sm:$0xff] %v372_v10  ;;  %v388_v18 = vld [vmem:[%s1965_s5 + $0xe0] sm:$0xff]  ;;  %v390_v19 = vld [vmem:[%s1965_s5 + $0xf0] sm:$0xff] }
  0x3e   : > { %375 = vst [vmem:[%s1970_s6 + $0x38] sm:$0xff] %v374_v11  ;;  %v392_v20 = vld [vmem:[%s1965_s5 + $0x100] sm:$0xff]  ;;  %v394_v21 = vld [vmem:[%s1965_s5 + $0x110] sm:$0xff] }
  0x3f   : > { %377 = vst [vmem:[%s1970_s6 + $0x40] sm:$0xff] %v376_v12  ;;  %v396_v22 = vld [vmem:[%s1965_s5 + $0x120] sm:$0xff]  ;;  %v398_v23 = vld [vmem:[%s1965_s5 + $0x130] sm:$0xff] }
  0x40   : > { %379 = vst [vmem:[%s1970_s6 + $0x48] sm:$0xff] %v378_v13  ;;  %v400_v24 = vld [vmem:[%s1965_s5 + $0x140] sm:$0xff]  ;;  %v402_v25 = vld [vmem:[%s1965_s5 + $0x150] sm:$0xff] }
  0x41   : > { %381 = vst [vmem:[%s1970_s6 + $0x50] sm:$0xff] %v380_v14  ;;  %v404_v26 = vld [vmem:[%s1965_s5 + $0x160] sm:$0xff]  ;;  %v406_v27 = vld [vmem:[%s1965_s5 + $0x170] sm:$0xff] }
  0x42   : > { %383 = vst [vmem:[%s1970_s6 + $0x58] sm:$0xff] %v382_v15  ;;  %v408_v28 = vld [vmem:[%s1965_s5 + $0x180] sm:$0xff]  ;;  %v410_v29 = vld [vmem:[%s1965_s5 + $0x190] sm:$0xff] }
  0x43   : > { %385 = vst [vmem:[%s1970_s6 + $0x60] sm:$0xff] %v384_v16  ;;  %v412_v30 = vld [vmem:[%s1965_s5 + $0x1a0] sm:$0xff]  ;;  %v414_v31 = vld [vmem:[%s1965_s5 + $0x1b0] sm:$0xff] }
  0x44   : > { %387 = vst [vmem:[%s1970_s6 + $0x68] sm:$0xff] %v386_v17  ;;  %v416_v32 = vld [vmem:[%s1965_s5 + $0x1c0] sm:$0xff]  ;;  %v418_v33 = vld [vmem:[%s1965_s5 + $0x1d0] sm:$0xff] }
  0x45   : > { %389 = vst [vmem:[%s1970_s6 + $0x70] sm:$0xff] %v388_v18  ;;  %v420_v34 = vld [vmem:[%s1965_s5 + $0x1e0] sm:$0xff]  ;;  %v422_v35 = vld [vmem:[%s1965_s5 + $0x1f0] sm:$0xff] }
  0x46   : > { %391 = vst [vmem:[%s1970_s6 + $0x78] sm:$0xff] %v390_v19  ;;  %v424_v36 = vld [vmem:[%s1965_s5 + $0x200] sm:$0xff]  ;;  %v426_v37 = vld [vmem:[%s1965_s5 + $0x210] sm:$0xff] }
  0x47   : > { %393 = vst [vmem:[%s1970_s6 + $0x80] sm:$0xff] %v392_v20  ;;  %v428_v38 = vld [vmem:[%s1965_s5 + $0x220] sm:$0xff]  ;;  %v430_v39 = vld [vmem:[%s1965_s5 + $0x230] sm:$0xff] }
  0x48   : > { %395 = vst [vmem:[%s1970_s6 + $0x88] sm:$0xff] %v394_v21  ;;  %v432_v40 = vld [vmem:[%s1965_s5 + $0x240] sm:$0xff]  ;;  %v434_v41 = vld [vmem:[%s1965_s5 + $0x250] sm:$0xff] }
  0x49   : > { %397 = vst [vmem:[%s1970_s6 + $0x90] sm:$0xff] %v396_v22  ;;  %v436_v42 = vld [vmem:[%s1965_s5 + $0x260] sm:$0xff]  ;;  %v438_v43 = vld [vmem:[%s1965_s5 + $0x270] sm:$0xff] }
  0x4a   : > { %399 = vst [vmem:[%s1970_s6 + $0x98] sm:$0xff] %v398_v23  ;;  %v440_v44 = vld [vmem:[%s1965_s5 + $0x280] sm:$0xff]  ;;  %v442_v45 = vld [vmem:[%s1965_s5 + $0x290] sm:$0xff] }
  0x4b   : > { %401 = vst [vmem:[%s1970_s6 + $0xa0] sm:$0xff] %v400_v24  ;;  %v444_v46 = vld [vmem:[%s1965_s5 + $0x2a0] sm:$0xff]  ;;  %v446_v47 = vld [vmem:[%s1965_s5 + $0x2b0] sm:$0xff] }
  0x4c   : > { %403 = vst [vmem:[%s1970_s6 + $0xa8] sm:$0xff] %v402_v25  ;;  %v448_v48 = vld [vmem:[%s1965_s5 + $0x2c0] sm:$0xff]  ;;  %v450_v49 = vld [vmem:[%s1965_s5 + $0x2d0] sm:$0xff] }
  0x4d   : > { %405 = vst [vmem:[%s1970_s6 + $0xb0] sm:$0xff] %v404_v26  ;;  %v452_v50 = vld [vmem:[%s1965_s5 + $0x2e0] sm:$0xff]  ;;  %v454_v51 = vld [vmem:[%s1965_s5 + $0x2f0] sm:$0xff] }
  0x4e   : > { %407 = vst [vmem:[%s1970_s6 + $0xb8] sm:$0xff] %v406_v27  ;;  %v456_v52 = vld [vmem:[%s1965_s5 + $0x300] sm:$0xff]  ;;  %v458_v53 = vld [vmem:[%s1965_s5 + $0x310] sm:$0xff] }
  0x4f   : > { %409 = vst [vmem:[%s1970_s6 + $0xc0] sm:$0xff] %v408_v28  ;;  %v460_v54 = vld [vmem:[%s1965_s5 + $0x320] sm:$0xff]  ;;  %v462_v55 = vld [vmem:[%s1965_s5 + $0x330] sm:$0xff] }
  0x50   : > { %411 = vst [vmem:[%s1970_s6 + $0xc8] sm:$0xff] %v410_v29  ;;  %v464_v56 = vld [vmem:[%s1965_s5 + $0x340] sm:$0xff]  ;;  %v466_v57 = vld [vmem:[%s1965_s5 + $0x350] sm:$0xff] }
  0x51   : > { %413 = vst [vmem:[%s1970_s6 + $0xd0] sm:$0xff] %v412_v30  ;;  %v468_v58 = vld [vmem:[%s1965_s5 + $0x360] sm:$0xff]  ;;  %v470_v59 = vld [vmem:[%s1965_s5 + $0x370] sm:$0xff] }
  0x52   : > { %415 = vst [vmem:[%s1970_s6 + $0xd8] sm:$0xff] %v414_v31  ;;  %v472_v60 = vld [vmem:[%s1965_s5 + $0x380] sm:$0xff]  ;;  %v474_v61 = vld [vmem:[%s1965_s5 + $0x390] sm:$0xff] }
  0x53   : > { %417 = vst [vmem:[%s1970_s6 + $0xe0] sm:$0xff] %v416_v32  ;;  %v476_v62 = vld [vmem:[%s1965_s5 + $0x3a0] sm:$0xff]  ;;  %v478_v63 = vld [vmem:[%s1965_s5 + $0x3b0] sm:$0xff] }
  0x54   : > { %419 = vst [vmem:[%s1970_s6 + $0xe8] sm:$0xff] %v418_v33  ;;  %v480_v0 = vld [vmem:[%s1965_s5 + $0x3c0] sm:$0xff]  ;;  %v482_v1 = vld [vmem:[%s1965_s5 + $0x3d0] sm:$0xff] }
  0x55   : > { %421 = vst [vmem:[%s1970_s6 + $0xf0] sm:$0xff] %v420_v34  ;;  %v484_v2 = vld [vmem:[%s1965_s5 + $0x3e0] sm:$0xff]  ;;  %v486_v3 = vld [vmem:[%s1965_s5 + $0x3f0] sm:$0xff] }
  0x56   : > { %423 = vst [vmem:[%s1970_s6 + $0xf8] sm:$0xff] %v422_v35 }
  0x57   : > { %425 = vst [vmem:[%s1970_s6 + $0x100] sm:$0xff] %v424_v36 }
  0x58   : > { %427 = vst [vmem:[%s1970_s6 + $0x108] sm:$0xff] %v426_v37 }
  0x59   : > { %429 = vst [vmem:[%s1970_s6 + $0x110] sm:$0xff] %v428_v38 }
  0x5a   : > { %431 = vst [vmem:[%s1970_s6 + $0x118] sm:$0xff] %v430_v39 }
  0x5b   : > { %433 = vst [vmem:[%s1970_s6 + $0x120] sm:$0xff] %v432_v40 }
  0x5c   : > { %435 = vst [vmem:[%s1970_s6 + $0x128] sm:$0xff] %v434_v41 }
  0x5d   : > { %437 = vst [vmem:[%s1970_s6 + $0x130] sm:$0xff] %v436_v42 }
  0x5e   : > { %439 = vst [vmem:[%s1970_s6 + $0x138] sm:$0xff] %v438_v43 }
  0x5f   : > { %441 = vst [vmem:[%s1970_s6 + $0x140] sm:$0xff] %v440_v44 }
  0x60   : > { %443 = vst [vmem:[%s1970_s6 + $0x148] sm:$0xff] %v442_v45 }
  0x61   : > { %445 = vst [vmem:[%s1970_s6 + $0x150] sm:$0xff] %v444_v46 }
  0x62   : > { %447 = vst [vmem:[%s1970_s6 + $0x158] sm:$0xff] %v446_v47 }
  0x63   : > { %449 = vst [vmem:[%s1970_s6 + $0x160] sm:$0xff] %v448_v48 }
  0x64   : > { %451 = vst [vmem:[%s1970_s6 + $0x168] sm:$0xff] %v450_v49 }
  0x65   : > { %453 = vst [vmem:[%s1970_s6 + $0x170] sm:$0xff] %v452_v50 }
  0x66   : > { %455 = vst [vmem:[%s1970_s6 + $0x178] sm:$0xff] %v454_v51 }
  0x67   : > { %457 = vst [vmem:[%s1970_s6 + $0x180] sm:$0xff] %v456_v52 }
  0x68   : > { %459 = vst [vmem:[%s1970_s6 + $0x188] sm:$0xff] %v458_v53 }
  0x69   : > { %461 = vst [vmem:[%s1970_s6 + $0x190] sm:$0xff] %v460_v54 }
  0x6a   : > { %463 = vst [vmem:[%s1970_s6 + $0x198] sm:$0xff] %v462_v55 }
  0x6b   : > { %465 = vst [vmem:[%s1970_s6 + $0x1a0] sm:$0xff] %v464_v56 }
  0x6c   : > { %467 = vst [vmem:[%s1970_s6 + $0x1a8] sm:$0xff] %v466_v57 }
  0x6d   : > { %469 = vst [vmem:[%s1970_s6 + $0x1b0] sm:$0xff] %v468_v58 }
  0x6e   : > { %471 = vst [vmem:[%s1970_s6 + $0x1b8] sm:$0xff] %v470_v59 }
  0x6f   : > { %473 = vst [vmem:[%s1970_s6 + $0x1c0] sm:$0xff] %v472_v60 }
  0x70   : > { %475 = vst [vmem:[%s1970_s6 + $0x1c8] sm:$0xff] %v474_v61 }
  0x71   : > { %477 = vst [vmem:[%s1970_s6 + $0x1d0] sm:$0xff] %v476_v62 }
  0x72   : > { %479 = vst [vmem:[%s1970_s6 + $0x1d8] sm:$0xff] %v478_v63 }
  0x73   : > { %481 = vst [vmem:[%s1970_s6 + $0x1e0] sm:$0xff] %v480_v0 }
  0x74   : > { %483 = vst [vmem:[%s1970_s6 + $0x1e8] sm:$0xff] %v482_v1 }
  0x75   : > { %485 = vst [vmem:[%s1970_s6 + $0x1f0] sm:$0xff] %v484_v2 }
  0x76   : > { %487 = vst [vmem:[%s1970_s6 + $0x1f8] sm:$0xff] %v486_v3 }
  0x77 PF: > { %p1298_p0 = scmp.ge.s32.totalorder %s1828_s22, 1  ;;  %p500_p1 = scmp.lt.s32.totalorder %s1828_s22, 17 }
  0x79   : > { %p501_p2 = pnand %p1298_p0, %p500_p1 }
  0x7a   : > { %s507_s0 = sand.u32 (!%p501_p2), 1, %s1804_s16   ;;  %s514_s23 = sand.u32 (!%p501_p2), 1, %s1796_s14  }
  0x7b   : > { %504 = sbr.rel (%p501_p2) target bundleno = 378 (0x17a), region = 85  ;;  %s1299_s28 = sshll.u32 (!%p501_p2), %s507_s0, 5 }
  0x7c   : > { %s1300_s7 = sshll.u32 (!%p501_p2), %s514_s23, 9  ;;  %s541_s11 = sand.u32 (!%p501_p2), 1, %s1788_s12  }
  0x7d   : > { %s1302_s26 = sshll.u32 (!%p501_p2), %s1816_s19, 1  ;;  %s1301_s29 = sshll.u32 (!%p501_p2), %s541_s11, 4 }
  0x7e   : > { %p549_p3 = scmp.lt.s32.totalorder (!%p501_p2), %s1302_s26, 3  ;;  %s2109_s6 = scalar_lea.vmem (!%p501_p2), [#allocation3], %s1299_s28 }
  0x7f   : > { %s2111_s1 = scalar_lea.vmem (!%p501_p2), [#allocation4], %s1300_s7  ;;  %s2113_s25 = scalar_lea.vmem (!%p501_p2), [#allocation5], %s1301_s29 }
  0x80   : > { %s2348_s26 = smov (!%p549_p3, %s1302_s26), 3  ;;  %p1303_p4 = scmp.ne.s32.totalorder %s1812_s18, 0 }
  0x81   : > { %s551_s5 = scalar_lea.vmem %s2319_s2, %s2348_s26 }
  0x82   : > { %558 = sbr.rel (%p1303_p4) target bundleno = 140 (0x8c), region = 97 }
  0x87   : > { %v1830_v4 = vmov 0.0  }
  0x88   : > { %559 = vst [vmem:[#allocation2 + $0x10] sm:$0xff] %v1830_v4 }
  0x89   : > { %560 = vst [vmem:[#allocation2] sm:$0xff] %v1830_v4 }
  0x8a   : > { %561 = vst [vmem:[#allocation2 + $0x18] sm:$0xff] %v1830_v4 }
  0x8b   : > { %562 = vst [vmem:[#allocation2 + $0x8] sm:$0xff] %v1830_v4 }
  0x8c PF: > { %v1378_v5 = vld [vmem:[%s2111_s1 + $0x70] sm:$0xf]  ;;  %v1603_v6 = vld [vmem:[%s2111_s1 + $0x74] sm:$0xf0]  ;;  %v1370_v16 = vld [vmem:[%s2111_s1 + $0x60] sm:$0xf] }
  0x8d   : > { %v1442_v7 = vld [vmem:[%s2111_s1 + $0xf0] sm:$0xf]  ;;  %v1379_v8 = vor.u32 %v1603_v6, %v1378_v5  ;;  %v1619_v9 = vld [vmem:[%s2111_s1 + $0xf4] sm:$0xf0]  ;;  %v1601_v18 = vld [vmem:[%s2111_s1 + $0x64] sm:$0xf0] }
  0x8e   : > { %v1506_v10 = vld [vmem:[%s2111_s1 + $0x170] sm:$0xf]  ;;  %v1635_v11 = vld [vmem:[%s2111_s1 + $0x174] sm:$0xf0]  ;;  %v1443_v12 = vor.u32 %v1619_v9, %v1442_v7  ;;  %v1434_v19 = vld [vmem:[%s2111_s1 + $0xe0] sm:$0xf]  ;;  %v1371_v21 = vor.u32 %v1601_v18, %v1370_v16 }
  0x8f   : > { %v1507_v13 = vor.u32 %v1635_v11, %v1506_v10  ;;  %v1570_v14 = vld [vmem:[%s2111_s1 + $0x1f0] sm:$0xf]  ;;  %v1651_v15 = vld [vmem:[%s2111_s1 + $0x1f4] sm:$0xf0]  ;;  %975 = vmatpush.bf16.msra.mxu0 %v1379_v8  ;;  %v1617_v20 = vld [vmem:[%s2111_s1 + $0xe4] sm:$0xf0] }
  0x90   : > { %v1571_v17 = vor.u32 %v1651_v15, %v1570_v14  ;;  %989 = vmatpush.bf16.msra.mxu1 %v1443_v12  ;;  %v1435_v22 = vor.u32 %v1617_v20, %v1434_v19  ;;  %v1498_v23 = vld [vmem:[%s2111_s1 + $0x160] sm:$0xf]  ;;  %v1633_v24 = vld [vmem:[%s2111_s1 + $0x164] sm:$0xf0]  ;;  %v1362_v28 = vld [vmem:[%s2111_s1 + $0x50] sm:$0xf] }
  0x91   : > { %1003 = vmatpush.bf16.msra.mxu2 %v1507_v13  ;;  %v1562_v25 = vld [vmem:[%s2111_s1 + $0x1e0] sm:$0xf]  ;;  %v1499_v26 = vor.u32 %v1633_v24, %v1498_v23  ;;  %v1649_v27 = vld [vmem:[%s2111_s1 + $0x1e4] sm:$0xf0]  ;;  %v1599_v29 = vld [vmem:[%s2111_s1 + $0x54] sm:$0xf0] }
  0x92   : > { %1017 = vmatpush.bf16.msra.mxu3 %v1571_v17  ;;  %v1563_v30 = vor.u32 %v1649_v27, %v1562_v25  ;;  %v1426_v31 = vld [vmem:[%s2111_s1 + $0xd0] sm:$0xf]  ;;  %v1615_v32 = vld [vmem:[%s2111_s1 + $0xd4] sm:$0xf0]  ;;  %v1363_v34 = vor.u32 %v1599_v29, %v1362_v28  ;;  %v1354_v40 = vld [vmem:[%s2111_s1 + $0x40] sm:$0xf] }
  0x93   : > { %v1490_v33 = vld [vmem:[%s2111_s1 + $0x150] sm:$0xf]  ;;  %976 = vmatpush.bf16.msra.mxu0 %v1371_v21  ;;  %v1631_v35 = vld [vmem:[%s2111_s1 + $0x154] sm:$0xf0]  ;;  %v1427_v38 = vor.u32 %v1615_v32, %v1426_v31  ;;  %v1597_v41 = vld [vmem:[%s2111_s1 + $0x44] sm:$0xf0] }
  0x94   : > { %v1554_v36 = vld [vmem:[%s2111_s1 + $0x1d0] sm:$0xf]  ;;  %v1647_v37 = vld [vmem:[%s2111_s1 + $0x1d4] sm:$0xf0]  ;;  %990 = vmatpush.bf16.msra.mxu1 %v1435_v22  ;;  %v1491_v39 = vor.u32 %v1631_v35, %v1490_v33  ;;  %v1418_v42 = vld [vmem:[%s2111_s1 + $0xc0] sm:$0xf]  ;;  %v1355_v49 = vor.u32 %v1597_v41, %v1354_v40 }
  0x95   : > { %1004 = vmatpush.bf16.msra.mxu2 %v1499_v26  ;;  %v1555_v43 = vor.u32 %v1647_v37, %v1554_v36  ;;  %v1613_v44 = vld [vmem:[%s2111_s1 + $0xc4] sm:$0xf0]  ;;  %v1482_v45 = vld [vmem:[%s2111_s1 + $0x140] sm:$0xf]  ;;  %v1346_v52 = vld [vmem:[%s2111_s1 + $0x30] sm:$0xf] }
  0x96   : > { %1018 = vmatpush.bf16.msra.mxu3 %v1563_v30  ;;  %v1629_v46 = vld [vmem:[%s2111_s1 + $0x144] sm:$0xf0]  ;;  %v1546_v47 = vld [vmem:[%s2111_s1 + $0x1c0] sm:$0xf]  ;;  %v1419_v50 = vor.u32 %v1613_v44, %v1418_v42  ;;  %v1595_v53 = vld [vmem:[%s2111_s1 + $0x34] sm:$0xf0] }
  0x97   : > { %v1645_v48 = vld [vmem:[%s2111_s1 + $0x1c4] sm:$0xf0]  ;;  %977 = vmatpush.bf16.msra.mxu0 %v1363_v34  ;;  %v1483_v51 = vor.u32 %v1629_v46, %v1482_v45  ;;  %v1410_v54 = vld [vmem:[%s2111_s1 + $0xb0] sm:$0xf]  ;;  %v1611_v56 = vld [vmem:[%s2111_s1 + $0xb4] sm:$0xf0]  ;;  %v1347_v61 = vor.u32 %v1595_v53, %v1346_v52 }
  0x98   : > { %991 = vmatpush.bf16.msra.mxu1 %v1427_v38  ;;  %v1547_v55 = vor.u32 %v1645_v48, %v1546_v47  ;;  %v1474_v57 = vld [vmem:[%s2111_s1 + $0x130] sm:$0xf]  ;;  %v1627_v58 = vld [vmem:[%s2111_s1 + $0x134] sm:$0xf0]  ;;  %v1411_v62 = vor.u32 %v1611_v56, %v1410_v54  ;;  %v1338_v0 = vld [vmem:[%s2111_s1 + $0x20] sm:$0xf] }
  0x99   : > { %1005 = vmatpush.bf16.msra.mxu2 %v1491_v39  ;;  %v1538_v59 = vld [vmem:[%s2111_s1 + $0x1b0] sm:$0xf]  ;;  %v1643_v60 = vld [vmem:[%s2111_s1 + $0x1b4] sm:$0xf0]  ;;  %v1475_v63 = vor.u32 %v1627_v58, %v1474_v57  ;;  %v1593_v1 = vld [vmem:[%s2111_s1 + $0x24] sm:$0xf0] }
  0x9a   : > { %1019 = vmatpush.bf16.msra.mxu3 %v1555_v43  ;;  %v1402_v2 = vld [vmem:[%s2111_s1 + $0xa0] sm:$0xf]  ;;  %v1539_v3 = vor.u32 %v1643_v60, %v1538_v59  ;;  %v1609_v4 = vld [vmem:[%s2111_s1 + $0xa4] sm:$0xf0]  ;;  %v1339_v9 = vor.u32 %v1593_v1, %v1338_v0  ;;  %v1330_v12 = vld [vmem:[%s2111_s1 + $0x10] sm:$0xf] }
  0x9b   : > { %978 = vmatpush.bf16.msra.mxu0 %v1355_v49  ;;  %v1466_v5 = vld [vmem:[%s2111_s1 + $0x120] sm:$0xf]  ;;  %v1625_v6 = vld [vmem:[%s2111_s1 + $0x124] sm:$0xf0]  ;;  %v1403_v10 = vor.u32 %v1609_v4, %v1402_v2  ;;  %v1591_v13 = vld [vmem:[%s2111_s1 + $0x14] sm:$0xf0] }
  0x9c   : > { %992 = vmatpush.bf16.msra.mxu1 %v1419_v50  ;;  %v1530_v7 = vld [vmem:[%s2111_s1 + $0x1a0] sm:$0xf]  ;;  %v1641_v8 = vld [vmem:[%s2111_s1 + $0x1a4] sm:$0xf0]  ;;  %v1467_v11 = vor.u32 %v1625_v6, %v1466_v5  ;;  %v1394_v14 = vld [vmem:[%s2111_s1 + $0x90] sm:$0xf]  ;;  %v1331_v22 = vor.u32 %v1591_v13, %v1330_v12 }
  0x9d   : > { %1006 = vmatpush.bf16.msra.mxu2 %v1483_v51  ;;  %v1531_v15 = vor.u32 %v1641_v8, %v1530_v7  ;;  %v1607_v16 = vld [vmem:[%s2111_s1 + $0x94] sm:$0xf0]  ;;  %v1458_v17 = vld [vmem:[%s2111_s1 + $0x110] sm:$0xf]  ;;  %v1322_v21 = vld [vmem:[%s2111_s1] sm:$0xf] }
  0x9e   : > { %1020 = vmatpush.bf16.msra.mxu3 %v1547_v55  ;;  %v1623_v18 = vld [vmem:[%s2111_s1 + $0x114] sm:$0xf0]  ;;  %v1522_v19 = vld [vmem:[%s2111_s1 + $0x190] sm:$0xf]  ;;  %v1589_v23 = vld [vmem:[%s2111_s1 + $0x4] sm:$0xf0]  ;;  %v1395_v26 = vor.u32 %v1607_v16, %v1394_v14 }
  0x9f   : > { %979 = vmatpush.bf16.msra.mxu0 %v1347_v61  ;;  %v1639_v20 = vld [vmem:[%s2111_s1 + $0x194] sm:$0xf0]  ;;  %v1386_v24 = vld [vmem:[%s2111_s1 + $0x80] sm:$0xf]  ;;  %v1605_v25 = vld [vmem:[%s2111_s1 + $0x84] sm:$0xf0]  ;;  %v1459_v27 = vor.u32 %v1623_v18, %v1458_v17  ;;  %v1323_v38 = vor.u32 %v1589_v23, %v1322_v21 }
  0xa0   : > { %993 = vmatpush.bf16.msra.mxu1 %v1411_v62  ;;  %v1450_v28 = vld [vmem:[%s2111_s1 + $0x100] sm:$0xf]  ;;  %v1621_v29 = vld [vmem:[%s2111_s1 + $0x104] sm:$0xf0]  ;;  %v1523_v31 = vor.u32 %v1639_v20, %v1522_v19  ;;  %v1602_v33 = vld [vmem:[%s2111_s1 + $0x74] sm:$0xf]  ;;  %v1387_v42 = vor.u32 %v1605_v25, %v1386_v24 }
  0xa1   : > { %1007 = vmatpush.bf16.msra.mxu2 %v1475_v63  ;;  %v1514_v30 = vld [vmem:[%s2111_s1 + $0x180] sm:$0xf]  ;;  %v1637_v32 = vld [vmem:[%s2111_s1 + $0x184] sm:$0xf0]  ;;  %v1380_v34 = vld [vmem:[%s2111_s1 + $0x78] sm:$0xf0]  ;;  %v1451_v43 = vor.u32 %v1621_v29, %v1450_v28 }
  0xa2   : > { %1021 = vmatpush.bf16.msra.mxu3 %v1539_v3  ;;  %v1618_v35 = vld [vmem:[%s2111_s1 + $0xf4] sm:$0xf]  ;;  %v1444_v36 = vld [vmem:[%s2111_s1 + $0xf8] sm:$0xf0]  ;;  %v1600_v44 = vld [vmem:[%s2111_s1 + $0x64] sm:$0xf]  ;;  %v1515_v48 = vor.u32 %v1637_v32, %v1514_v30  ;;  %v1383_v49 = vor.u32 %v1602_v33, %v1380_v34 }
  0xa3   : > { %980 = vmatpush.bf16.msra.mxu0 %v1339_v9  ;;  %v1634_v37 = vld [vmem:[%s2111_s1 + $0x174] sm:$0xf]  ;;  %v1508_v39 = vld [vmem:[%s2111_s1 + $0x178] sm:$0xf0]  ;;  %v1372_v45 = vld [vmem:[%s2111_s1 + $0x68] sm:$0xf0]  ;;  %v1447_v54 = vor.u32 %v1618_v35, %v1444_v36 }
  0xa4   : > { %994 = vmatpush.bf16.msra.mxu1 %v1403_v10  ;;  %v1650_v40 = vld [vmem:[%s2111_s1 + $0x1f4] sm:$0xf]  ;;  %v1572_v41 = vld [vmem:[%s2111_s1 + $0x1f8] sm:$0xf0]  ;;  %v1314_v46 = vld [vmem:[%s2109_s6 + $0x8] sm:$0xf]  ;;  %v1511_v55 = vor.u32 %v1634_v37, %v1508_v39  ;;  %v1375_v4 = vor.u32 %v1600_v44, %v1372_v45 }
  0xa5   : > { %1008 = vmatpush.bf16.msra.mxu2 %v1467_v11  ;;  %v1587_v47 = vld [vmem:[%s2109_s6 + $0x14] sm:$0xf0]  ;;  %v1616_v50 = vld [vmem:[%s2111_s1 + $0xe4] sm:$0xf]  ;;  %v1436_v51 = vld [vmem:[%s2111_s1 + $0xe8] sm:$0xf0]  ;;  %v1575_v59 = vor.u32 %v1650_v40, %v1572_v41 }
  0xa6   : > { %1022 = vmatpush.bf16.msra.mxu3 %v1531_v15  ;;  %v1632_v52 = vld [vmem:[%s2111_s1 + $0x164] sm:$0xf]  ;;  %v1500_v53 = vld [vmem:[%s2111_s1 + $0x168] sm:$0xf0]  ;;  %v1316_v57 = vld [vmem:[%s2109_s6 + $0x18] sm:$0xf0]  ;;  %v2199_v60 = vor.u32 %v1587_v47, %v1314_v46  ;;  %v1439_v6 = vor.u32 %v1616_v50, %v1436_v51 }
  0xa7   : > { %981 = vmatpush.bf16.msra.mxu0 %v1331_v22  ;;  %v1585_v56 = vld [vmem:[%s2109_s6 + $0xc] sm:$0xf]  ;;  %v1306_v58 = vld [vmem:[%s2109_s6] sm:$0xf]  ;;  %v1586_v61 = vld [vmem:[%s2109_s6 + $0xc] sm:$0xf0]  ;;  %v1503_v7 = vor.u32 %v1632_v52, %v1500_v53 }
  0xa8   : > { %995 = vmatpush.bf16.msra.mxu1 %v1395_v26  ;;  %v1584_v62 = vld [vmem:[%s2109_s6 + $0x4] sm:$0xf]  ;;  %v1308_v63 = vld [vmem:[%s2109_s6 + $0x10] sm:$0xf0]  ;;  %v1564_v1 = vld [vmem:[%s2111_s1 + $0x1e8] sm:$0xf0]  ;;  %v2206_v2 = vor.u32 %v1585_v56, %v1316_v57  ;;  %v2208_v3 = vor.u32 %v1586_v61, %v1306_v58 }
  0xa9   : > { %1009 = vmatpush.bf16.msra.mxu2 %v1459_v27  ;;  %v1648_v0 = vld [vmem:[%s2111_s1 + $0x1e4] sm:$0xf]  ;;  %v2210_v5 = vor.u32 %v1584_v62, %v1308_v63  ;;  %v1598_v8 = vld [vmem:[%s2111_s1 + $0x54] sm:$0xf]  ;;  %v1364_v9 = vld [vmem:[%s2111_s1 + $0x58] sm:$0xf0] }
  0xaa   : > { %1023 = vmatpush.bf16.msra.mxu3 %v1523_v31  ;;  %v1614_v10 = vld [vmem:[%s2111_s1 + $0xd4] sm:$0xf]  ;;  %v1567_v11 = vor.u32 %v1648_v0, %v1564_v1  ;;  %v1428_v12 = vld [vmem:[%s2111_s1 + $0xd8] sm:$0xf0]  ;;  %v1367_v17 = vor.u32 %v1598_v8, %v1364_v9  ;;  %v1596_v20 = vld [vmem:[%s2111_s1 + $0x44] sm:$0xf] }
  0xab   : > { %982 = vmatpush.bf16.msra.mxu0 %v1323_v38  ;;  %v1630_v13 = vld [vmem:[%s2111_s1 + $0x154] sm:$0xf]  ;;  %v1492_v14 = vld [vmem:[%s2111_s1 + $0x158] sm:$0xf0]  ;;  %v1431_v18 = vor.u32 %v1614_v10, %v1428_v12  ;;  %v1356_v21 = vld [vmem:[%s2111_s1 + $0x48] sm:$0xf0] }
  0xac   : > { %996 = vmatpush.bf16.msra.mxu1 %v1387_v42  ;;  %v1646_v15 = vld [vmem:[%s2111_s1 + $0x1d4] sm:$0xf]  ;;  %v1556_v16 = vld [vmem:[%s2111_s1 + $0x1d8] sm:$0xf0]  ;;  %v1495_v19 = vor.u32 %v1630_v13, %v1492_v14  ;;  %v1612_v22 = vld [vmem:[%s2111_s1 + $0xc4] sm:$0xf]  ;;  %v1359_v29 = vor.u32 %v1596_v20, %v1356_v21 }
  0xad   : > { %1010 = vmatpush.bf16.msra.mxu2 %v1451_v43  ;;  %v1559_v23 = vor.u32 %v1646_v15, %v1556_v16  ;;  %v1420_v24 = vld [vmem:[%s2111_s1 + $0xc8] sm:$0xf0]  ;;  %v1628_v25 = vld [vmem:[%s2111_s1 + $0x144] sm:$0xf]  ;;  %v1594_v32 = vld [vmem:[%s2111_s1 + $0x34] sm:$0xf] }
  0xae   : > { %1024 = vmatpush.bf16.msra.mxu3 %v1515_v48  ;;  %983 = vmatmul.bf16.vlgmr.msra.gmra.mxu0 %v2208_v3  ;;  %v1484_v26 = vld [vmem:[%s2111_s1 + $0x148] sm:$0xf0]  ;;  %v1644_v27 = vld [vmem:[%s2111_s1 + $0x1c4] sm:$0xf]  ;;  %v1423_v30 = vor.u32 %v1612_v22, %v1420_v24  ;;  %v1348_v33 = vld [vmem:[%s2111_s1 + $0x38] sm:$0xf0] }
  0xaf   : > { %1031 = vmatpush.bf16.msrb.mxu0 %v1383_v49  ;;  %997 = vmatmul.bf16.vlgmr.msra.gmra.mxu1 %v2210_v5  ;;  %v1548_v28 = vld [vmem:[%s2111_s1 + $0x1c8] sm:$0xf0]  ;;  %v1487_v31 = vor.u32 %v1628_v25, %v1484_v26  ;;  %v1610_v34 = vld [vmem:[%s2111_s1 + $0xb4] sm:$0xf]  ;;  %v1412_v36 = vld [vmem:[%s2111_s1 + $0xb8] sm:$0xf0]  ;;  %v1351_v41 = vor.u32 %v1594_v32, %v1348_v33 }
  0xb0   : > { %1045 = vmatpush.bf16.msrb.mxu1 %v1447_v54  ;;  %1011 = vmatmul.bf16.vlgmr.msra.gmra.mxu2 %v2199_v60  ;;  %v1551_v35 = vor.u32 %v1644_v27, %v1548_v28  ;;  %v1626_v37 = vld [vmem:[%s2111_s1 + $0x134] sm:$0xf]  ;;  %v1476_v38 = vld [vmem:[%s2111_s1 + $0x138] sm:$0xf0]  ;;  %v1415_v42 = vor.u32 %v1610_v34, %v1412_v36  ;;  %v1592_v44 = vld [vmem:[%s2111_s1 + $0x24] sm:$0xf] }
  0xb1   : > { %1059 = vmatpush.bf16.msrb.mxu2 %v1511_v55  ;;  %1025 = vmatmul.bf16.vlgmr.msra.gmra.mxu3 %v2206_v2  ;;  %v1642_v39 = vld [vmem:[%s2111_s1 + $0x1b4] sm:$0xf]  ;;  %v1540_v40 = vld [vmem:[%s2111_s1 + $0x1b8] sm:$0xf0]  ;;  %v1479_v43 = vor.u32 %v1626_v37, %v1476_v38  ;;  %v1340_v45 = vld [vmem:[%s2111_s1 + $0x28] sm:$0xf0] }
  0xb2   : > { %1073 = vmatpush.bf16.msrb.mxu3 %v1575_v59  ;;  %v1608_v46 = vld [vmem:[%s2111_s1 + $0xa4] sm:$0xf]  ;;  %v1543_v47 = vor.u32 %v1642_v39, %v1540_v40  ;;  %v1404_v48 = vld [vmem:[%s2111_s1 + $0xa8] sm:$0xf0]  ;;  %v1343_v53 = vor.u32 %v1592_v44, %v1340_v45  ;;  %v1590_v56 = vld [vmem:[%s2111_s1 + $0x14] sm:$0xf] }
  0xb3   : > { %1032 = vmatpush.bf16.msrb.mxu0 %v1375_v4  ;;  %v1624_v49 = vld [vmem:[%s2111_s1 + $0x124] sm:$0xf]  ;;  %v1468_v50 = vld [vmem:[%s2111_s1 + $0x128] sm:$0xf0]  ;;  %v1407_v54 = vor.u32 %v1608_v46, %v1404_v48  ;;  %v1332_v57 = vld [vmem:[%s2111_s1 + $0x18] sm:$0xf0] }
  0xb4   : > { %1046 = vmatpush.bf16.msrb.mxu1 %v1439_v6  ;;  %v1640_v51 = vld [vmem:[%s2111_s1 + $0x1a4] sm:$0xf]  ;;  %v1532_v52 = vld [vmem:[%s2111_s1 + $0x1a8] sm:$0xf0]  ;;  %v1471_v55 = vor.u32 %v1624_v49, %v1468_v50  ;;  %v1606_v58 = vld [vmem:[%s2111_s1 + $0x94] sm:$0xf]  ;;  %v1335_v4 = vor.u32 %v1590_v56, %v1332_v57 }
  0xb5   : > { %1060 = vmatpush.bf16.msrb.mxu2 %v1503_v7  ;;  %v1535_v59 = vor.u32 %v1640_v51, %v1532_v52  ;;  %v1396_v61 = vld [vmem:[%s2111_s1 + $0x98] sm:$0xf0]  ;;  %v1622_v62 = vld [vmem:[%s2111_s1 + $0x114] sm:$0xf]  ;;  %v1588_v8 = vld [vmem:[%s2111_s1 + $0x4] sm:$0xf] }
  0xb6   : > { %1074 = vmatpush.bf16.msrb.mxu3 %v1567_v11  ;;  %v1460_v63 = vld [vmem:[%s2111_s1 + $0x118] sm:$0xf0]  ;;  %v1638_v0 = vld [vmem:[%s2111_s1 + $0x194] sm:$0xf]  ;;  %v1399_v6 = vor.u32 %v1606_v58, %v1396_v61  ;;  %v1324_v9 = vld [vmem:[%s2111_s1 + $0x8] sm:$0xf0] }
  0xb7   : > { %1033 = vmatpush.bf16.msrb.mxu0 %v1367_v17  ;;  %v1524_v1 = vld [vmem:[%s2111_s1 + $0x198] sm:$0xf0]  ;;  %v1463_v7 = vor.u32 %v1622_v62, %v1460_v63  ;;  %v1604_v10 = vld [vmem:[%s2111_s1 + $0x84] sm:$0xf]  ;;  %v1388_v12 = vld [vmem:[%s2111_s1 + $0x88] sm:$0xf0]  ;;  %v1327_v17 = vor.u32 %v1588_v8, %v1324_v9 }
  0xb8   : > { %1047 = vmatpush.bf16.msrb.mxu1 %v1431_v18  ;;  %v1527_v11 = vor.u32 %v1638_v0, %v1524_v1  ;;  %v1620_v13 = vld [vmem:[%s2111_s1 + $0x104] sm:$0xf]  ;;  %v1452_v14 = vld [vmem:[%s2111_s1 + $0x108] sm:$0xf0]  ;;  %v1391_v18 = vor.u32 %v1604_v10, %v1388_v12  ;;  %v563_v27 = vld [vmem:[#allocation2 + $0x10] sm:$0xff]  ;;  %p1576_p5 = scmp.ne.s32.totalorder %s1812_s18, 7 }
  0xb9   : > { %1061 = vmatpush.bf16.msrb.mxu2 %v1495_v19  ;;  %v1636_v15 = vld [vmem:[%s2111_s1 + $0x184] sm:$0xf]  ;;  %v1516_v16 = vld [vmem:[%s2111_s1 + $0x188] sm:$0xf0]  ;;  %v1455_v19 = vor.u32 %v1620_v13, %v1452_v14  ;;  %v565_v34 = vld [vmem:[#allocation2 + $0x18] sm:$0xff] }
  0xba   : > { %1075 = vmatpush.bf16.msrb.mxu3 %v1559_v23  ;;  %v1519_v20 = vor.u32 %v1636_v15, %v1516_v16  ;;  %v566_v49 = vld [vmem:[#allocation2 + $0x8] sm:$0xff] }
  0xbb   : > { %1034 = vmatpush.bf16.msrb.mxu0 %v1359_v29 }
  0xbc   : > { %1048 = vmatpush.bf16.msrb.mxu1 %v1423_v30 }
  0xbd   : > { %1062 = vmatpush.bf16.msrb.mxu2 %v1487_v31 }
  0xbe   : > { %1076 = vmatpush.bf16.msrb.mxu3 %v1551_v35 }
  0xbf   : > { %1035 = vmatpush.bf16.msrb.mxu0 %v1351_v41  ;;  %v564_v41 = vld [vmem:[#allocation2] sm:$0xff] }
  0xc0   : > { %1049 = vmatpush.bf16.msrb.mxu1 %v1415_v42 }
  0xc1   : > { %1063 = vmatpush.bf16.msrb.mxu2 %v1479_v43 }
  0xc2   : > { %1077 = vmatpush.bf16.msrb.mxu3 %v1543_v47 }
  0xc3   : > { %1036 = vmatpush.bf16.msrb.mxu0 %v1343_v53 }
  0xc4   : > { %1050 = vmatpush.bf16.msrb.mxu1 %v1407_v54 }
  0xc5   : > { %1064 = vmatpush.bf16.msrb.mxu2 %v1471_v55 }
  0xc6   : > { %1078 = vmatpush.bf16.msrb.mxu3 %v1535_v59 }
  0xc7   : > { %1037 = vmatpush.bf16.msrb.mxu0 %v1335_v4 }
  0xc8   : > { %1051 = vmatpush.bf16.msrb.mxu1 %v1399_v6 }
  0xc9   : > { %1065 = vmatpush.bf16.msrb.mxu2 %v1463_v7 }
  0xca   : > { %1079 = vmatpush.bf16.msrb.mxu3 %v1527_v11 }
  0xcb   : > { %1038 = vmatpush.bf16.msrb.mxu0 %v1327_v17 }
  0xcc   : > { %1052 = vmatpush.bf16.msrb.mxu1 %v1391_v18 }
  0xcd   : > { %1066 = vmatpush.bf16.msrb.mxu2 %v1455_v19 }
  0xce   : > { %1080 = vmatpush.bf16.msrb.mxu3 %v1519_v20  ;;  %1039 = vmatmul.bf16.vlgmr.msrb.gmra.mxu0 %v2208_v3 }
  0xcf   : > { %1053 = vmatmul.bf16.vlgmr.msrb.gmra.mxu1 %v2210_v5 }
  0xd0   : > { %1067 = vmatmul.bf16.vlgmr.msrb.gmra.mxu2 %v2199_v60 }
  0xd1   : > { %1081 = vmatmul.bf16.vlgmr.msrb.gmra.mxu3 %v2206_v2 }
 0x12b   : > { %v984_v21 = vpop.f32.mrf.mxu0 }
 0x12c   : > { %v998_v22 = vpop.f32.mrf.mxu1 }
 0x12d   : > { %v999_v23 = vadd.f32 %v998_v22, %v984_v21 }
 0x133   : > { %v1012_v24 = vpop.f32.mrf.mxu2  ;;  %v986_v29 = vpop.f32.mrf.mxu0 }
 0x134   : > { %v1013_v25 = vadd.f32 %v1012_v24, %v999_v23  ;;  %v1026_v26 = vpop.f32.mrf.mxu3  ;;  %v1000_v30 = vpop.f32.mrf.mxu1 }
 0x135   : > { %v1001_v32 = vadd.f32 %v1000_v30, %v986_v29 }
 0x136   : > { %v1027_v28 = vadd.f32 %v1026_v26, %v1013_v25 }
 0x138   : > { %v1087_v31 = vadd.f32 %v1027_v28, %v563_v27 }
 0x13a   : > { %1091 = vst [vmem:[#allocation2 + $0x10] sm:$0xff] %v1087_v31 }
 0x13b   : > { %v1014_v3 = vpop.f32.mrf.mxu2 }
 0x13c   : > { %v1015_v33 = vadd.f32 %v1014_v3, %v1001_v32  ;;  %v1028_v5 = vpop.f32.mrf.mxu3 }
 0x13e   : > { %v1029_v60 = vadd.f32 %v1028_v5, %v1015_v33 }
 0x140   : > { %v1089_v35 = vadd.f32 %v1029_v60, %v565_v34 }
 0x142   : > { %1093 = vst [vmem:[#allocation2 + $0x18] sm:$0xff] %v1089_v35 }
 0x14b   : > { %v1040_v2 = vpop.f32.mrf.mxu0 }
 0x14c   : > { %v1054_v36 = vpop.f32.mrf.mxu1 }
 0x14d   : > { %v1055_v37 = vadd.f32 %v1054_v36, %v1040_v2 }
 0x153   : > { %v1068_v38 = vpop.f32.mrf.mxu2  ;;  %v1042_v43 = vpop.f32.mrf.mxu0 }
 0x154   : > { %v1069_v39 = vadd.f32 %v1068_v38, %v1055_v37  ;;  %v1082_v40 = vpop.f32.mrf.mxu3  ;;  %v1056_v44 = vpop.f32.mrf.mxu1 }
 0x155   : > { %v1057_v46 = vadd.f32 %v1056_v44, %v1042_v43 }
 0x156   : > { %v1083_v42 = vadd.f32 %v1082_v40, %v1069_v39 }
 0x158   : > { %v1088_v45 = vadd.f32 %v1083_v42, %v564_v41 }
 0x15a   : > { %1092 = vst [vmem:[#allocation2] sm:$0xff] %v1088_v45 }
 0x15b   : > { %v1070_v47 = vpop.f32.mrf.mxu2 }
 0x15c   : > { %v1071_v48 = vadd.f32 %v1070_v47, %v1057_v46  ;;  %v1084_v50 = vpop.f32.mrf.mxu3 }
 0x15e   : > { %v1085_v51 = vadd.f32 %v1084_v50, %v1071_v48  ;;  %1098 = sbr.rel (%p1576_p5) target bundleno = 370 (0x172), region = 101 }
 0x160   : > { %v1090_v52 = vadd.f32 %v1085_v51, %v566_v49 }
 0x162   : > { %1094 = vst [vmem:[#allocation2 + $0x8] sm:$0xff] %v1090_v52 }
 0x163   : > { %v1099_v53 = vld [vmem:[#allocation2 + $0x10] sm:$0xff]  ;;  %v1100_v54 = vld [vmem:[#allocation2] sm:$0xff]  ;;  %v1101_v58 = vld [vmem:[#allocation2 + $0x18] sm:$0xff] }
 0x164   : > { %v1103_v55 = vld [vmem:[%s551_s5] sm:$0x3] }
 0x165   : > { %v1105_v56 = vperm.slane %v1103_v55, 0  ;;  %v1106_v57 = vperm.slane %v1103_v55, 1 }
 0x167   : > { %v1109_v61 = vadd.f32 %v1105_v56, %v1099_v53  ;;  %v1110_v62 = vadd.f32 %v1106_v57, %v1100_v54  ;;  %v1111_v63 = vadd.f32 %v1105_v56, %v1101_v58 }
 0x169   : > { %v1102_v59 = vld [vmem:[#allocation2 + $0x8] sm:$0xff]  ;;  %vm1113_vm0 = vcmp.ge.f32.partialorder %v1109_v61, 0.0  ;;  %vm1114_vm1 = vcmp.ge.f32.partialorder %v1110_v62, 0.0  ;;  %v1117_v1 = vmul.f32 0.2, %v1109_v61  ;;  %vm1115_vm2 = vcmp.ge.f32.partialorder %v1111_v63, 0.0 }
 0x16a   : > { %v1112_v0 = vadd.f32 %v1106_v57, %v1102_v59  ;;  %v1118_v4 = vmul.f32 0.2, %v1110_v62  ;;  %v1119_v6 = vmul.f32 0.2, %v1111_v63 }
 0x16b   : > { %v1121_v8 = vsel %vm1113_vm0, %v1109_v61, %v1117_v1 }
 0x16c   : > { %vm1116_vm3 = vcmp.ge.f32.partialorder %v1112_v0, 0.0  ;;  %v1120_v7 = vmul.f32 0.2, %v1112_v0  ;;  %v1122_v9 = vsel %vm1114_vm1, %v1110_v62, %v1118_v4  ;;  %v1123_v11 = vsel %vm1115_vm2, %v1111_v63, %v1119_v6 }
 0x16d   : > { %v1125_v10 = vpack.c.bf16 %v1122_v9, %v1121_v8 }
 0x16e   : > { %v1124_v12 = vsel %vm1116_vm3, %v1112_v0, %v1120_v7 }
 0x16f   : > { %v1126_v13 = vpack.c.bf16 %v1124_v12, %v1123_v11  ;;  %1127 = vst [vmem:[%s2113_s25] sm:$0xff] %v1125_v10 }
 0x171   : > { %1128 = vst [vmem:[%s2113_s25 + $0x8] sm:$0xff] %v1126_v13 }
 0x172 PF: > { %1135 = sbr.rel (!%p1945_p12) target bundleno = 378 (0x17a), region = 105  ;;  %s1652_s14 = sshll.u32 (%p1945_p12), %s1816_s19, 3 }
 0x173   : > { %s1141_s0 = scalar_lea.vmem (%p1945_p12), %s2320_s3, %s1652_s14 }
 0x176   : > { %v1172_v14 = vld [vmem:[%s2113_s25] sm:$0xff] (%p1945_p12) }
 0x177   : > { %1173 = vst [vmem:[%s1141_s0] sm:$0xff] %v1172_v14 }
 0x178   : > { %v1174_v15 = vld [vmem:[%s2113_s25 + $0x8] sm:$0xff] }
 0x179   : > { %1175 = vst [vmem:[%s1141_s0 + $0x10] sm:$0xff] %v1174_v15 }
 0x17a PF: > { %s13_s22 = sadd.s32 1, %s1828_s22   ;;  %s2330_s25 = sld [smem:[#allocation6_spill]] }
 0x17b   : > { %p10_p6 = scmp.ge.s32.totalorder %s13_s22, 18   ;;  %s2331_s12 = smov %s1792_s13 }
 0x17c   : > { %s2332_s13 = smov %s1943_s9  ;;  %s2333_s14 = smov %s1800_s15 }
 0x17d   : > { %s2334_s15 = smov %s1940_s8  ;;  %s2335_s16 = smov %s1808_s17 }
 0x17e   : > { %s2336_s17 = smov %s1926_s30  ;;  %s2337_s18 = smov %s1820_s20 }
 0x17f   : > { %s2338_s19 = smov %s1824_s21  ;;  %s2339_s20 = smov %s2342_s24 }
 0x180   : > { %s2340_s21 = smov %s2330_s25  ;;  %12 = sbr.rel (!%p10_p6) target bundleno = 9 (0x9), region = 185 }

// kernel: discriminator_unet_forward.14
= control target key start
LH: loop header
LB: loop body
LE: loop exit
PB: predicated region body
PF: predicated region fallthrough
CT: control target
= control target key end

     0   :  { %s1703_s15 = smov 0   ;;  %s1705_s16 = smov 0   ;;  %s1975_s0 = inlined_call_operand.vmem [shape: bf16[32,4608], index: 0, kind: input, shape index: {}]   ;;  %s1976_s1 = inlined_call_operand.vmem [shape: bf16[4608,256], index: 1, kind: input, shape index: {}]   ;;  %s1977_s2 = inlined_call_operand.vmem [shape: f32[1,256], index: 2, kind: input, shape index: {}]   ;;  %s1978_s3 = inlined_call_operand.vmem [shape: bf16[32,256], index: 3, kind: input, shape index: {}]   ;;  %s1979_s4 = inlined_call_operand.vmem [shape: bf16[32,256], index: 4, kind: output, shape index: {}]  }
   0x1   :  { %s1707_s17 = smov 0   ;;  %s1709_s18 = smov 0  }
   0x2   :  { %s1711_s19 = smov 0  }
   0x3 LB: > { %s26_s20 = sadd.s32 1, %s1671_s18  ;;  %p49_p1 = scmp.ne.s32.totalorder %s1663_s16, %s1659_s15  ;;  %s1675_s19 = sphi %s1711_s19, %s14_s19   ;;  %s1671_s18 = sphi %s1709_s18, %s1983_s18   ;;  %s1667_s17 = sphi %s1707_s17, %s1982_s17   ;;  %s1663_s16 = sphi %s1705_s16, %s1981_s16   ;;  %s1659_s15 = sphi %s1703_s15, %s1980_s15  }
   0x4   : > { %p27_p0 = scmp.ge.s32.totalorder %s26_s20, 9  ;;  %p50_p2 = scmp.eq.s32.totalorder %s1675_s19, 0 }
   0x5   : > { %s42_s22 = sadd.s32 1, %s1663_s16  ;;  %p1219_p5 = scmp.ge.s32.totalorder %s1675_s19, 9 }
   0x6   : > { %s1985_s20 = smov (%p27_p0, %s26_s20), 0  ;;  %p51_p3 = por %p50_p2, %p49_p1 }
   0x7   : > { %s38_s21 = ssub.s32 %s1671_s18, %s1985_s20  ;;  %208 = sbr.rel (%p1219_p5) target bundleno = 24 (0x18), region = 24 }
   0x8   : > { %p40_p4 = scmp.eq.s32.totalorder %s38_s21, 0 }
   0xa   : > { %s1738_s23 = scalar_select %p40_p4, %s1663_s16, %s42_s22  }
   0xc   : > { %211 = sbr.rel (!%p51_p3) target bundleno = 24 (0x18), region = 28  ;;  %s213_s24 = sand.u32 (%p51_p3), 1, %s1663_s16  }
   0xd   : > { %s1522_s25 = sshll.u32 (%p51_p3), %s1671_s18, 4  ;;  %s1220_s26 = sshll.u32 (%p51_p3), %s213_s24, 6 }
   0xe   : > { %s221_s29 = scalar_lea.vmem (%p51_p3), %s1975_s0, %s1522_s25  ;;  %s215_s30 = scalar_lea.vmem (%p51_p3), [#allocation3], %s1220_s26 }
   0xf   : > { %v234_v0 = vld [vmem:[%s221_s29] sm:$0xff] (%p51_p3)  ;;  %v236_v1 = vld [vmem:[%s221_s29 + $0x8] sm:$0xff] (%p51_p3)  ;;  %v238_v2 = vld [vmem:[%s221_s29 + $0x90] sm:$0xff] (%p51_p3) }
  0x10   : > { %235 = vst [vmem:[%s215_s30] sm:$0xff] (%p51_p3), %v234_v0  ;;  %v240_v3 = vld [vmem:[%s221_s29 + $0x98] sm:$0xff] (%p51_p3)  ;;  %v242_v4 = vld [vmem:[%s221_s29 + $0x120] sm:$0xff] (%p51_p3)  ;;  %v244_v5 = vld [vmem:[%s221_s29 + $0x128] sm:$0xff] (%p51_p3) }
  0x11   : > { %237 = vst [vmem:[%s215_s30 + $0x8] sm:$0xff] %v236_v1  ;;  %v246_v6 = vld [vmem:[%s221_s29 + $0x1b0] sm:$0xff]  ;;  %v248_v7 = vld [vmem:[%s221_s29 + $0x1b8] sm:$0xff] }
  0x12   : > { %239 = vst [vmem:[%s215_s30 + $0x10] sm:$0xff] %v238_v2 }
  0x13   : > { %241 = vst [vmem:[%s215_s30 + $0x18] sm:$0xff] %v240_v3 }
  0x14   : > { %243 = vst [vmem:[%s215_s30 + $0x20] sm:$0xff] %v242_v4 }
  0x15   : > { %245 = vst [vmem:[%s215_s30 + $0x28] sm:$0xff] %v244_v5 }
  0x16   : > { %247 = vst [vmem:[%s215_s30 + $0x30] sm:$0xff] %v246_v6 }
  0x17   : > { %249 = vst [vmem:[%s215_s30 + $0x38] sm:$0xff] %v248_v7 }
  0x18 PF: > { %p1223_p6 = scmp.ge.s32.totalorder %s1675_s19, 1  ;;  %p269_p7 = scmp.lt.s32.totalorder %s1675_s19, 10 }
  0x1a   : > { %p270_p8 = pnand %p1223_p6, %p269_p7 }
  0x1b   : > { %s276_s5 = sand.u32 (!%p270_p8), 1, %s1659_s15   ;;  %s1225_s6 = sshll.u32 (!%p270_p8), %s1667_s17, 6 }
  0x1c   : > { %273 = sbr.rel (%p270_p8) target bundleno = 299 (0x12b), region = 55  ;;  %s1224_s7 = sshll.u32 (!%p270_p8), %s276_s5, 6 }
  0x1d   : > { %p334_p9 = scmp.lt.s32.totalorder (!%p270_p8), %s1225_s6, 575  ;;  %s1755_s12 = scalar_lea.vmem (!%p270_p8), [#allocation3], %s1224_s7 }
  0x1e   : > { %p1228_p10 = scmp.ne.s32.totalorder (!%p270_p8), %s1667_s17, 0 }
  0x21   : > { %s1987_s6 = smov (!%p334_p9, %s1225_s6), 575  ;;  %376 = sbr.rel (%p1228_p10) target bundleno = 47 (0x2f), region = 63 }
  0x22   : > { %s1523_s8 = sshll.u32 %s1987_s6, 3 }
  0x23   : > { %s1753_s11 = scalar_lea.vmem %s1976_s1, %s1523_s8 }
  0x26   : > { %v1677_v8 = vmov 0.0  }
  0x27   : > { %377 = vst [vmem:[#allocation2 + $0x30] sm:$0xff] %v1677_v8 }
  0x28   : > { %378 = vst [vmem:[#allocation2] sm:$0xff] %v1677_v8 }
  0x29   : > { %379 = vst [vmem:[#allocation2 + $0x18] sm:$0xff] %v1677_v8 }
  0x2a   : > { %380 = vst [vmem:[#allocation2 + $0x10] sm:$0xff] %v1677_v8 }
  0x2b   : > { %381 = vst [vmem:[#allocation2 + $0x8] sm:$0xff] %v1677_v8 }
  0x2c   : > { %382 = vst [vmem:[#allocation2 + $0x20] sm:$0xff] %v1677_v8 }
  0x2d   : > { %383 = vst [vmem:[#allocation2 + $0x28] sm:$0xff] %v1677_v8 }
  0x2e   : > { %384 = vst [vmem:[#allocation2 + $0x38] sm:$0xff] %v1677_v8 }
  0x2f PF: > { %v1319_v9 = vld [vmem:[%s1753_s11 + $0x70] sm:$0xf]  ;;  %v1547_v10 = vld [vmem:[%s1753_s11 + $0x74] sm:$0xf0]  ;;  %v1311_v20 = vld [vmem:[%s1753_s11 + $0x60] sm:$0xf] }
  0x30   : > { %v1383_v11 = vld [vmem:[%s1753_s11 + $0xf0] sm:$0xf]  ;;  %v1320_v12 = vor.u32 %v1547_v10, %v1319_v9  ;;  %v1563_v13 = vld [vmem:[%s1753_s11 + $0xf4] sm:$0xf0]  ;;  %v1545_v22 = vld [vmem:[%s1753_s11 + $0x64] sm:$0xf0] }
  0x31   : > { %v1447_v14 = vld [vmem:[%s1753_s11 + $0x170] sm:$0xf]  ;;  %v1579_v15 = vld [vmem:[%s1753_s11 + $0x174] sm:$0xf0]  ;;  %v1384_v16 = vor.u32 %v1563_v13, %v1383_v11  ;;  %v1375_v23 = vld [vmem:[%s1753_s11 + $0xe0] sm:$0xf]  ;;  %v1312_v25 = vor.u32 %v1545_v22, %v1311_v20 }
  0x32   : > { %v1448_v17 = vor.u32 %v1579_v15, %v1447_v14  ;;  %v1511_v18 = vld [vmem:[%s1753_s11 + $0x1f0] sm:$0xf]  ;;  %v1595_v19 = vld [vmem:[%s1753_s11 + $0x1f4] sm:$0xf0]  ;;  %825 = vmatpush.bf16.msra.mxu0 %v1320_v12  ;;  %v1561_v24 = vld [vmem:[%s1753_s11 + $0xe4] sm:$0xf0] }
  0x33   : > { %v1512_v21 = vor.u32 %v1595_v19, %v1511_v18  ;;  %844 = vmatpush.bf16.msra.mxu1 %v1384_v16  ;;  %v1376_v26 = vor.u32 %v1561_v24, %v1375_v23  ;;  %v1439_v27 = vld [vmem:[%s1753_s11 + $0x160] sm:$0xf]  ;;  %v1577_v28 = vld [vmem:[%s1753_s11 + $0x164] sm:$0xf0]  ;;  %v1303_v32 = vld [vmem:[%s1753_s11 + $0x50] sm:$0xf] }
  0x34   : > { %863 = vmatpush.bf16.msra.mxu2 %v1448_v17  ;;  %v1503_v29 = vld [vmem:[%s1753_s11 + $0x1e0] sm:$0xf]  ;;  %v1440_v30 = vor.u32 %v1577_v28, %v1439_v27  ;;  %v1593_v31 = vld [vmem:[%s1753_s11 + $0x1e4] sm:$0xf0]  ;;  %v1543_v33 = vld [vmem:[%s1753_s11 + $0x54] sm:$0xf0] }
  0x35   : > { %882 = vmatpush.bf16.msra.mxu3 %v1512_v21  ;;  %v1504_v34 = vor.u32 %v1593_v31, %v1503_v29  ;;  %v1367_v35 = vld [vmem:[%s1753_s11 + $0xd0] sm:$0xf]  ;;  %v1559_v36 = vld [vmem:[%s1753_s11 + $0xd4] sm:$0xf0]  ;;  %v1304_v38 = vor.u32 %v1543_v33, %v1303_v32  ;;  %v1295_v44 = vld [vmem:[%s1753_s11 + $0x40] sm:$0xf] }
  0x36   : > { %v1431_v37 = vld [vmem:[%s1753_s11 + $0x150] sm:$0xf]  ;;  %826 = vmatpush.bf16.msra.mxu0 %v1312_v25  ;;  %v1575_v39 = vld [vmem:[%s1753_s11 + $0x154] sm:$0xf0]  ;;  %v1368_v42 = vor.u32 %v1559_v36, %v1367_v35  ;;  %v1541_v45 = vld [vmem:[%s1753_s11 + $0x44] sm:$0xf0] }
  0x37   : > { %v1495_v40 = vld [vmem:[%s1753_s11 + $0x1d0] sm:$0xf]  ;;  %v1591_v41 = vld [vmem:[%s1753_s11 + $0x1d4] sm:$0xf0]  ;;  %845 = vmatpush.bf16.msra.mxu1 %v1376_v26  ;;  %v1432_v43 = vor.u32 %v1575_v39, %v1431_v37  ;;  %v1359_v46 = vld [vmem:[%s1753_s11 + $0xc0] sm:$0xf]  ;;  %v1296_v53 = vor.u32 %v1541_v45, %v1295_v44 }
  0x38   : > { %864 = vmatpush.bf16.msra.mxu2 %v1440_v30  ;;  %v1496_v47 = vor.u32 %v1591_v41, %v1495_v40  ;;  %v1557_v48 = vld [vmem:[%s1753_s11 + $0xc4] sm:$0xf0]  ;;  %v1423_v49 = vld [vmem:[%s1753_s11 + $0x140] sm:$0xf]  ;;  %v1287_v56 = vld [vmem:[%s1753_s11 + $0x30] sm:$0xf] }
  0x39   : > { %883 = vmatpush.bf16.msra.mxu3 %v1504_v34  ;;  %v1573_v50 = vld [vmem:[%s1753_s11 + $0x144] sm:$0xf0]  ;;  %v1487_v51 = vld [vmem:[%s1753_s11 + $0x1c0] sm:$0xf]  ;;  %v1360_v54 = vor.u32 %v1557_v48, %v1359_v46  ;;  %v1539_v57 = vld [vmem:[%s1753_s11 + $0x34] sm:$0xf0] }
  0x3a   : > { %v1589_v52 = vld [vmem:[%s1753_s11 + $0x1c4] sm:$0xf0]  ;;  %827 = vmatpush.bf16.msra.mxu0 %v1304_v38  ;;  %v1424_v55 = vor.u32 %v1573_v50, %v1423_v49  ;;  %v1351_v58 = vld [vmem:[%s1753_s11 + $0xb0] sm:$0xf]  ;;  %v1555_v60 = vld [vmem:[%s1753_s11 + $0xb4] sm:$0xf0]  ;;  %v1288_v1 = vor.u32 %v1539_v57, %v1287_v56 }
  0x3b   : > { %846 = vmatpush.bf16.msra.mxu1 %v1368_v42  ;;  %v1488_v59 = vor.u32 %v1589_v52, %v1487_v51  ;;  %v1415_v61 = vld [vmem:[%s1753_s11 + $0x130] sm:$0xf]  ;;  %v1571_v62 = vld [vmem:[%s1753_s11 + $0x134] sm:$0xf0]  ;;  %v1352_v2 = vor.u32 %v1555_v60, %v1351_v58  ;;  %v1279_v4 = vld [vmem:[%s1753_s11 + $0x20] sm:$0xf] }
  0x3c   : > { %865 = vmatpush.bf16.msra.mxu2 %v1432_v43  ;;  %v1479_v63 = vld [vmem:[%s1753_s11 + $0x1b0] sm:$0xf]  ;;  %v1587_v0 = vld [vmem:[%s1753_s11 + $0x1b4] sm:$0xf0]  ;;  %v1416_v3 = vor.u32 %v1571_v62, %v1415_v61  ;;  %v1537_v5 = vld [vmem:[%s1753_s11 + $0x24] sm:$0xf0] }
  0x3d   : > { %884 = vmatpush.bf16.msra.mxu3 %v1496_v47  ;;  %v1343_v6 = vld [vmem:[%s1753_s11 + $0xa0] sm:$0xf]  ;;  %v1480_v7 = vor.u32 %v1587_v0, %v1479_v63  ;;  %v1553_v8 = vld [vmem:[%s1753_s11 + $0xa4] sm:$0xf0]  ;;  %v1280_v13 = vor.u32 %v1537_v5, %v1279_v4  ;;  %v1271_v16 = vld [vmem:[%s1753_s11 + $0x10] sm:$0xf] }
  0x3e   : > { %828 = vmatpush.bf16.msra.mxu0 %v1296_v53  ;;  %v1407_v9 = vld [vmem:[%s1753_s11 + $0x120] sm:$0xf]  ;;  %v1569_v10 = vld [vmem:[%s1753_s11 + $0x124] sm:$0xf0]  ;;  %v1344_v14 = vor.u32 %v1553_v8, %v1343_v6  ;;  %v1535_v17 = vld [vmem:[%s1753_s11 + $0x14] sm:$0xf0] }
  0x3f   : > { %847 = vmatpush.bf16.msra.mxu1 %v1360_v54  ;;  %v1471_v11 = vld [vmem:[%s1753_s11 + $0x1a0] sm:$0xf]  ;;  %v1585_v12 = vld [vmem:[%s1753_s11 + $0x1a4] sm:$0xf0]  ;;  %v1408_v15 = vor.u32 %v1569_v10, %v1407_v9  ;;  %v1335_v18 = vld [vmem:[%s1753_s11 + $0x90] sm:$0xf]  ;;  %v1272_v26 = vor.u32 %v1535_v17, %v1271_v16 }
  0x40   : > { %866 = vmatpush.bf16.msra.mxu2 %v1424_v55  ;;  %v1472_v19 = vor.u32 %v1585_v12, %v1471_v11  ;;  %v1551_v20 = vld [vmem:[%s1753_s11 + $0x94] sm:$0xf0]  ;;  %v1399_v21 = vld [vmem:[%s1753_s11 + $0x110] sm:$0xf]  ;;  %v1263_v25 = vld [vmem:[%s1753_s11] sm:$0xf] }
  0x41   : > { %885 = vmatpush.bf16.msra.mxu3 %v1488_v59  ;;  %v1567_v22 = vld [vmem:[%s1753_s11 + $0x114] sm:$0xf0]  ;;  %v1463_v23 = vld [vmem:[%s1753_s11 + $0x190] sm:$0xf]  ;;  %v1533_v27 = vld [vmem:[%s1753_s11 + $0x4] sm:$0xf0]  ;;  %v1336_v30 = vor.u32 %v1551_v20, %v1335_v18 }
  0x42   : > { %829 = vmatpush.bf16.msra.mxu0 %v1288_v1  ;;  %v1583_v24 = vld [vmem:[%s1753_s11 + $0x194] sm:$0xf0]  ;;  %v1327_v28 = vld [vmem:[%s1753_s11 + $0x80] sm:$0xf]  ;;  %v1549_v29 = vld [vmem:[%s1753_s11 + $0x84] sm:$0xf0]  ;;  %v1400_v31 = vor.u32 %v1567_v22, %v1399_v21  ;;  %v1264_v43 = vor.u32 %v1533_v27, %v1263_v25 }
  0x43   : > { %848 = vmatpush.bf16.msra.mxu1 %v1352_v2  ;;  %v1391_v32 = vld [vmem:[%s1753_s11 + $0x100] sm:$0xf]  ;;  %v1565_v33 = vld [vmem:[%s1753_s11 + $0x104] sm:$0xf0]  ;;  %v1464_v35 = vor.u32 %v1583_v24, %v1463_v23  ;;  %v1526_v38 = vld [vmem:[%s1755_s12 + $0xc] sm:$0xf0]  ;;  %v1328_v47 = vor.u32 %v1549_v29, %v1327_v28 }
  0x44   : > { %867 = vmatpush.bf16.msra.mxu2 %v1416_v3  ;;  %v1455_v34 = vld [vmem:[%s1753_s11 + $0x180] sm:$0xf]  ;;  %v1581_v36 = vld [vmem:[%s1753_s11 + $0x184] sm:$0xf0]  ;;  %v1524_v39 = vld [vmem:[%s1755_s12 + $0x4] sm:$0xf]  ;;  %v1392_v48 = vor.u32 %v1565_v33, %v1391_v32 }
  0x45   : > { %886 = vmatpush.bf16.msra.mxu3 %v1480_v7  ;;  %v1231_v37 = vld [vmem:[%s1755_s12] sm:$0xf]  ;;  %v1233_v40 = vld [vmem:[%s1755_s12 + $0x10] sm:$0xf0]  ;;  %v1449_v42 = vld [vmem:[%s1753_s11 + $0x178] sm:$0xf0]  ;;  %v1456_v52 = vor.u32 %v1581_v36, %v1455_v34 }
  0x46   : > { %830 = vmatpush.bf16.msra.mxu0 %v1280_v13  ;;  %v1578_v41 = vld [vmem:[%s1753_s11 + $0x174] sm:$0xf]  ;;  %v1239_v44 = vld [vmem:[%s1755_s12 + $0x8] sm:$0xf]  ;;  %v1385_v46 = vld [vmem:[%s1753_s11 + $0xf8] sm:$0xf0]  ;;  %v1837_v57 = vor.u32 %v1526_v38, %v1231_v37  ;;  %v1842_v62 = vor.u32 %v1524_v39, %v1233_v40 }
  0x47   : > { %849 = vmatpush.bf16.msra.mxu1 %v1344_v14  ;;  %v1562_v45 = vld [vmem:[%s1753_s11 + $0xf4] sm:$0xf]  ;;  %v1527_v49 = vld [vmem:[%s1755_s12 + $0x14] sm:$0xf0]  ;;  %v1525_v50 = vld [vmem:[%s1755_s12 + $0xc] sm:$0xf]  ;;  %v1452_v53 = vor.u32 %v1578_v41, %v1449_v42 }
  0x48   : > { %868 = vmatpush.bf16.msra.mxu2 %v1408_v15  ;;  %v1241_v51 = vld [vmem:[%s1755_s12 + $0x18] sm:$0xf0]  ;;  %v1546_v54 = vld [vmem:[%s1753_s11 + $0x74] sm:$0xf]  ;;  %v1388_v58 = vor.u32 %v1562_v45, %v1385_v46  ;;  %v1576_v60 = vld [vmem:[%s1753_s11 + $0x164] sm:$0xf]  ;;  %v1844_v63 = vor.u32 %v1527_v49, %v1239_v44 }
  0x49   : > { %887 = vmatpush.bf16.msra.mxu3 %v1472_v19  ;;  %v1321_v55 = vld [vmem:[%s1753_s11 + $0x78] sm:$0xf0]  ;;  %v1594_v56 = vld [vmem:[%s1753_s11 + $0x1f4] sm:$0xf]  ;;  %v1441_v61 = vld [vmem:[%s1753_s11 + $0x168] sm:$0xf0]  ;;  %v1848_v2 = vor.u32 %v1525_v50, %v1241_v51 }
  0x4a   : > { %831 = vmatpush.bf16.msra.mxu0 %v1272_v26  ;;  %v1513_v59 = vld [vmem:[%s1753_s11 + $0x1f8] sm:$0xf0]  ;;  %v1560_v0 = vld [vmem:[%s1753_s11 + $0xe4] sm:$0xf]  ;;  %v1377_v1 = vld [vmem:[%s1753_s11 + $0xe8] sm:$0xf0]  ;;  %v1324_v3 = vor.u32 %v1546_v54, %v1321_v55  ;;  %v1444_v5 = vor.u32 %v1576_v60, %v1441_v61 }
  0x4b   : > { %850 = vmatpush.bf16.msra.mxu1 %v1336_v30  ;;  %v1516_v4 = vor.u32 %v1594_v56, %v1513_v59  ;;  %v1544_v6 = vld [vmem:[%s1753_s11 + $0x64] sm:$0xf]  ;;  %v1313_v7 = vld [vmem:[%s1753_s11 + $0x68] sm:$0xf0]  ;;  %v1380_v9 = vor.u32 %v1560_v0, %v1377_v1  ;;  %v1574_v11 = vld [vmem:[%s1753_s11 + $0x154] sm:$0xf] }
  0x4c   : > { %869 = vmatpush.bf16.msra.mxu2 %v1400_v31  ;;  %v1592_v8 = vld [vmem:[%s1753_s11 + $0x1e4] sm:$0xf]  ;;  %v1505_v10 = vld [vmem:[%s1753_s11 + $0x1e8] sm:$0xf0]  ;;  %v1433_v12 = vld [vmem:[%s1753_s11 + $0x158] sm:$0xf0]  ;;  %v1316_v15 = vor.u32 %v1544_v6, %v1313_v7 }
  0x4d   : > { %888 = vmatpush.bf16.msra.mxu3 %v1464_v35  ;;  %v1558_v13 = vld [vmem:[%s1753_s11 + $0xd4] sm:$0xf]  ;;  %v1369_v14 = vld [vmem:[%s1753_s11 + $0xd8] sm:$0xf0]  ;;  %v1508_v16 = vor.u32 %v1592_v8, %v1505_v10  ;;  %v1436_v17 = vor.u32 %v1574_v11, %v1433_v12  ;;  %v1572_v23 = vld [vmem:[%s1753_s11 + $0x144] sm:$0xf] }
  0x4e   : > { %832 = vmatpush.bf16.msra.mxu0 %v1264_v43  ;;  %v1542_v18 = vld [vmem:[%s1753_s11 + $0x54] sm:$0xf]  ;;  %v1305_v19 = vld [vmem:[%s1753_s11 + $0x58] sm:$0xf0]  ;;  %v1372_v21 = vor.u32 %v1558_v13, %v1369_v14  ;;  %v1425_v24 = vld [vmem:[%s1753_s11 + $0x148] sm:$0xf0] }
  0x4f   : > { %851 = vmatpush.bf16.msra.mxu1 %v1328_v47  ;;  %v1590_v20 = vld [vmem:[%s1753_s11 + $0x1d4] sm:$0xf]  ;;  %v1497_v22 = vld [vmem:[%s1753_s11 + $0x1d8] sm:$0xf0]  ;;  %v1556_v25 = vld [vmem:[%s1753_s11 + $0xc4] sm:$0xf]  ;;  %v1308_v27 = vor.u32 %v1542_v18, %v1305_v19  ;;  %v1428_v32 = vor.u32 %v1572_v23, %v1425_v24 }
  0x50   : > { %870 = vmatpush.bf16.msra.mxu2 %v1392_v48  ;;  %v1361_v26 = vld [vmem:[%s1753_s11 + $0xc8] sm:$0xf0]  ;;  %v1540_v28 = vld [vmem:[%s1753_s11 + $0x44] sm:$0xf]  ;;  %v1500_v31 = vor.u32 %v1590_v20, %v1497_v22  ;;  %v1247_v34 = vld [vmem:[%s1755_s12 + $0x20] sm:$0xf] }
  0x51   : > { %889 = vmatpush.bf16.msra.mxu3 %v1456_v52  ;;  %833 = vmatmul.bf16.vlgmr.msra.gmra.mxu0 %v1837_v57  ;;  %v1297_v29 = vld [vmem:[%s1753_s11 + $0x48] sm:$0xf0]  ;;  %v1588_v30 = vld [vmem:[%s1753_s11 + $0x1c4] sm:$0xf]  ;;  %v1530_v35 = vld [vmem:[%s1755_s12 + $0x2c] sm:$0xf0]  ;;  %v1364_v36 = vor.u32 %v1556_v25, %v1361_v26 }
  0x52   : > { %852 = vmatmul.bf16.vlgmr.msra.gmra.mxu1 %v1842_v62  ;;  %901 = vmatpush.bf16.msrb.mxu0 %v1324_v3  ;;  %v1489_v33 = vld [vmem:[%s1753_s11 + $0x1c8] sm:$0xf0]  ;;  %v1528_v37 = vld [vmem:[%s1755_s12 + $0x24] sm:$0xf]  ;;  %v1249_v38 = vld [vmem:[%s1755_s12 + $0x30] sm:$0xf0]  ;;  %v1300_v44 = vor.u32 %v1540_v28, %v1297_v29 }
  0x53   : > { %920 = vmatpush.bf16.msrb.mxu1 %v1388_v58  ;;  %871 = vmatmul.bf16.vlgmr.msra.gmra.mxu2 %v1844_v63  ;;  %v1570_v39 = vld [vmem:[%s1753_s11 + $0x134] sm:$0xf]  ;;  %v1417_v40 = vld [vmem:[%s1753_s11 + $0x138] sm:$0xf0]  ;;  %v1255_v41 = vld [vmem:[%s1755_s12 + $0x28] sm:$0xf]  ;;  %v1492_v48 = vor.u32 %v1588_v30, %v1489_v33  ;;  %v1894_v59 = vor.u32 %v1528_v37, %v1249_v38 }
  0x54   : > { %939 = vmatpush.bf16.msrb.mxu2 %v1452_v53  ;;  %890 = vmatmul.bf16.vlgmr.msra.gmra.mxu3 %v1848_v2  ;;  %v1554_v42 = vld [vmem:[%s1753_s11 + $0xb4] sm:$0xf]  ;;  %v1353_v43 = vld [vmem:[%s1753_s11 + $0xb8] sm:$0xf0]  ;;  %v1531_v45 = vld [vmem:[%s1755_s12 + $0x34] sm:$0xf0]  ;;  %v1420_v49 = vor.u32 %v1570_v39, %v1417_v40  ;;  %v1889_v53 = vor.u32 %v1530_v35, %v1247_v34 }
  0x55   : > { %958 = vmatpush.bf16.msrb.mxu3 %v1516_v4  ;;  %v1529_v46 = vld [vmem:[%s1755_s12 + $0x2c] sm:$0xf]  ;;  %v1257_v47 = vld [vmem:[%s1755_s12 + $0x38] sm:$0xf0]  ;;  %v1538_v50 = vld [vmem:[%s1753_s11 + $0x34] sm:$0xf]  ;;  %v1356_v54 = vor.u32 %v1554_v42, %v1353_v43  ;;  %v1896_v60 = vor.u32 %v1531_v45, %v1255_v41 }
  0x56   : > { %902 = vmatpush.bf16.msrb.mxu0 %v1316_v15  ;;  %v1289_v51 = vld [vmem:[%s1753_s11 + $0x38] sm:$0xf0]  ;;  %v1586_v52 = vld [vmem:[%s1753_s11 + $0x1b4] sm:$0xf]  ;;  %v1568_v56 = vld [vmem:[%s1753_s11 + $0x124] sm:$0xf]  ;;  %v1260_v1 = vor.u32 %v1529_v46, %v1257_v47 }
  0x57   : > { %921 = vmatpush.bf16.msrb.mxu1 %v1380_v9  ;;  %v1481_v55 = vld [vmem:[%s1753_s11 + $0x1b8] sm:$0xf0]  ;;  %v1409_v58 = vld [vmem:[%s1753_s11 + $0x128] sm:$0xf0]  ;;  %v1552_v61 = vld [vmem:[%s1753_s11 + $0xa4] sm:$0xf]  ;;  %v1292_v3 = vor.u32 %v1538_v50, %v1289_v51 }
  0x58   : > { %940 = vmatpush.bf16.msrb.mxu2 %v1444_v5  ;;  %v1345_v0 = vld [vmem:[%s1753_s11 + $0xa8] sm:$0xf0]  ;;  %v1484_v4 = vor.u32 %v1586_v52, %v1481_v55  ;;  %v1412_v5 = vor.u32 %v1568_v56, %v1409_v58  ;;  %v1536_v6 = vld [vmem:[%s1753_s11 + $0x24] sm:$0xf]  ;;  %v1566_v11 = vld [vmem:[%s1753_s11 + $0x114] sm:$0xf] }
  0x59   : > { %959 = vmatpush.bf16.msrb.mxu3 %v1508_v16  ;;  %v1281_v7 = vld [vmem:[%s1753_s11 + $0x28] sm:$0xf0]  ;;  %v1584_v8 = vld [vmem:[%s1753_s11 + $0x1a4] sm:$0xf]  ;;  %v1348_v9 = vor.u32 %v1552_v61, %v1345_v0  ;;  %v1401_v12 = vld [vmem:[%s1753_s11 + $0x118] sm:$0xf0] }
  0x5a   : > { %903 = vmatpush.bf16.msrb.mxu0 %v1308_v27  ;;  %v1473_v10 = vld [vmem:[%s1753_s11 + $0x1a8] sm:$0xf0]  ;;  %v1550_v13 = vld [vmem:[%s1753_s11 + $0x94] sm:$0xf]  ;;  %v1337_v14 = vld [vmem:[%s1753_s11 + $0x98] sm:$0xf0]  ;;  %v1284_v15 = vor.u32 %v1536_v6, %v1281_v7 }
  0x5b   : > { %922 = vmatpush.bf16.msrb.mxu1 %v1372_v21  ;;  %v1476_v16 = vor.u32 %v1584_v8, %v1473_v10  ;;  %v1534_v18 = vld [vmem:[%s1753_s11 + $0x14] sm:$0xf]  ;;  %v1273_v19 = vld [vmem:[%s1753_s11 + $0x18] sm:$0xf0]  ;;  %v1340_v21 = vor.u32 %v1550_v13, %v1337_v14  ;;  %v1564_v23 = vld [vmem:[%s1753_s11 + $0x104] sm:$0xf] }
  0x5c   : > { %941 = vmatpush.bf16.msrb.mxu2 %v1436_v17  ;;  %v1404_v17 = vor.u32 %v1566_v11, %v1401_v12  ;;  %v1582_v20 = vld [vmem:[%s1753_s11 + $0x194] sm:$0xf]  ;;  %v1465_v22 = vld [vmem:[%s1753_s11 + $0x198] sm:$0xf0]  ;;  %v1393_v24 = vld [vmem:[%s1753_s11 + $0x108] sm:$0xf0]  ;;  %v1276_v27 = vor.u32 %v1534_v18, %v1273_v19 }
  0x5d   : > { %960 = vmatpush.bf16.msrb.mxu3 %v1500_v31  ;;  %v1548_v25 = vld [vmem:[%s1753_s11 + $0x84] sm:$0xf]  ;;  %v1329_v26 = vld [vmem:[%s1753_s11 + $0x88] sm:$0xf0]  ;;  %v1468_v28 = vor.u32 %v1582_v20, %v1465_v22  ;;  %v1396_v29 = vor.u32 %v1564_v23, %v1393_v24  ;;  %v385_v43 = vld [vmem:[#allocation2 + $0x30] sm:$0xff]  ;;  %p1517_p11 = scmp.ne.s32.totalorder %s1667_s17, 8 }
  0x5e   : > { %904 = vmatpush.bf16.msrb.mxu0 %v1300_v44  ;;  %v1532_v30 = vld [vmem:[%s1753_s11 + $0x4] sm:$0xf]  ;;  %v1265_v31 = vld [vmem:[%s1753_s11 + $0x8] sm:$0xf0]  ;;  %v388_v24 = vld [vmem:[#allocation2 + $0x10] sm:$0xff] }
  0x5f   : > { %923 = vmatpush.bf16.msrb.mxu1 %v1364_v36  ;;  %v1580_v33 = vld [vmem:[%s1753_s11 + $0x184] sm:$0xf]  ;;  %v1457_v34 = vld [vmem:[%s1753_s11 + $0x188] sm:$0xf0]  ;;  %v1268_v35 = vor.u32 %v1532_v30, %v1265_v31 }
  0x60   : > { %942 = vmatpush.bf16.msrb.mxu2 %v1428_v32  ;;  %v1332_v32 = vor.u32 %v1548_v25, %v1329_v26  ;;  %v1460_v36 = vor.u32 %v1580_v33, %v1457_v34  ;;  %v391_v6 = vld [vmem:[#allocation2 + $0x28] sm:$0xff]  ;;  %v390_v33 = vld [vmem:[#allocation2 + $0x20] sm:$0xff] }
  0x61   : > { %961 = vmatpush.bf16.msrb.mxu3 %v1492_v48  ;;  %838 = vmatmul.bf16.gmra.mxu0 %v1889_v53 }
  0x62   : > { %857 = vmatmul.bf16.gmra.mxu1 %v1894_v59  ;;  %905 = vmatpush.bf16.msrb.mxu0 %v1292_v3 }
  0x63   : > { %924 = vmatpush.bf16.msrb.mxu1 %v1356_v54  ;;  %876 = vmatmul.bf16.gmra.mxu2 %v1896_v60 }
  0x64   : > { %943 = vmatpush.bf16.msrb.mxu2 %v1420_v49  ;;  %895 = vmatmul.bf16.gmra.mxu3 %v1260_v1  ;;  %v387_v49 = vld [vmem:[#allocation2 + $0x18] sm:$0xff] }
  0x65   : > { %962 = vmatpush.bf16.msrb.mxu3 %v1484_v4 }
  0x66   : > { %906 = vmatpush.bf16.msrb.mxu0 %v1284_v15 }
  0x67   : > { %925 = vmatpush.bf16.msrb.mxu1 %v1348_v9 }
  0x68   : > { %944 = vmatpush.bf16.msrb.mxu2 %v1412_v5 }
  0x69   : > { %963 = vmatpush.bf16.msrb.mxu3 %v1476_v16 }
  0x6a   : > { %907 = vmatpush.bf16.msrb.mxu0 %v1276_v27 }
  0x6b   : > { %926 = vmatpush.bf16.msrb.mxu1 %v1340_v21 }
  0x6c   : > { %945 = vmatpush.bf16.msrb.mxu2 %v1404_v17  ;;  %v386_v17 = vld [vmem:[#allocation2] sm:$0xff] }
  0x6d   : > { %964 = vmatpush.bf16.msrb.mxu3 %v1468_v28 }
  0x6e   : > { %908 = vmatpush.bf16.msrb.mxu0 %v1268_v35 }
  0x6f   : > { %927 = vmatpush.bf16.msrb.mxu1 %v1332_v32 }
  0x70   : > { %946 = vmatpush.bf16.msrb.mxu2 %v1396_v29 }
  0x71   : > { %965 = vmatpush.bf16.msrb.mxu3 %v1460_v36  ;;  %909 = vmatmul.bf16.vlgmr.msrb.gmra.mxu0 %v1837_v57 }
  0x72   : > { %928 = vmatmul.bf16.vlgmr.msrb.gmra.mxu1 %v1842_v62 }
  0x73   : > { %947 = vmatmul.bf16.vlgmr.msrb.gmra.mxu2 %v1844_v63 }
  0x74   : > { %966 = vmatmul.bf16.vlgmr.msrb.gmra.mxu3 %v1848_v2 }
  0x81   : > { %914 = vmatmul.bf16.gmra.mxu0 %v1889_v53 }
  0x82   : > { %933 = vmatmul.bf16.gmra.mxu1 %v1894_v59  ;;  %v389_v59 = vld [vmem:[#allocation2 + $0x8] sm:$0xff] }
  0x83   : > { %952 = vmatmul.bf16.gmra.mxu2 %v1896_v60 }
  0x84   : > { %971 = vmatmul.bf16.gmra.mxu3 %v1260_v1 }
  0xce   : > { %v834_v37 = vpop.f32.mrf.mxu0 }
  0xcf   : > { %v853_v38 = vpop.f32.mrf.mxu1 }
  0xd0   : > { %v854_v39 = vadd.f32 %v853_v38, %v834_v37 }
  0xd6   : > { %v872_v40 = vpop.f32.mrf.mxu2  ;;  %v836_v57 = vpop.f32.mrf.mxu0 }
  0xd7   : > { %v873_v41 = vadd.f32 %v872_v40, %v854_v39  ;;  %v891_v42 = vpop.f32.mrf.mxu3  ;;  %v855_v62 = vpop.f32.mrf.mxu1 }
  0xd8   : > { %v856_v2 = vadd.f32 %v855_v62, %v836_v57 }
  0xd9   : > { %v892_v44 = vadd.f32 %v891_v42, %v873_v41  ;;  %v392_v41 = vld [vmem:[#allocation2 + $0x38] sm:$0xff] }
  0xdb   : > { %v977_v63 = vadd.f32 %v892_v44, %v385_v43 }
  0xdd   : > { %985 = vst [vmem:[#allocation2 + $0x30] sm:$0xff] %v977_v63 }
  0xde   : > { %v874_v45 = vpop.f32.mrf.mxu2  ;;  %v839_v48 = vpop.f32.mrf.mxu0 }
  0xdf   : > { %v875_v46 = vadd.f32 %v874_v45, %v856_v2  ;;  %v893_v47 = vpop.f32.mrf.mxu3  ;;  %v858_v50 = vpop.f32.mrf.mxu1 }
  0xe0   : > { %v859_v53 = vadd.f32 %v858_v50, %v839_v48 }
  0xe1   : > { %v894_v51 = vadd.f32 %v893_v47, %v875_v46 }
  0xe3   : > { %v979_v52 = vadd.f32 %v894_v51, %v387_v49 }
  0xe5   : > { %987 = vst [vmem:[#allocation2 + $0x18] sm:$0xff] %v979_v52 }
  0xe6   : > { %v877_v54 = vpop.f32.mrf.mxu2  ;;  %v841_v58 = vpop.f32.mrf.mxu0 }
  0xe7   : > { %v878_v55 = vadd.f32 %v877_v54, %v859_v53  ;;  %v896_v56 = vpop.f32.mrf.mxu3  ;;  %v860_v60 = vpop.f32.mrf.mxu1 }
  0xe8   : > { %v861_v1 = vadd.f32 %v860_v60, %v841_v58 }
  0xe9   : > { %v897_v61 = vadd.f32 %v896_v56, %v878_v55 }
  0xeb   : > { %v981_v0 = vadd.f32 %v897_v61, %v389_v59 }
  0xed   : > { %989 = vst [vmem:[#allocation2 + $0x8] sm:$0xff] %v981_v0 }
  0xee   : > { %v879_v3 = vpop.f32.mrf.mxu2  ;;  %v910_v7 = vpop.f32.mrf.mxu0 }
  0xef   : > { %v880_v4 = vadd.f32 %v879_v3, %v861_v1  ;;  %v898_v5 = vpop.f32.mrf.mxu3  ;;  %v929_v8 = vpop.f32.mrf.mxu1 }
  0xf0   : > { %v930_v11 = vadd.f32 %v929_v8, %v910_v7 }
  0xf1   : > { %v899_v9 = vadd.f32 %v898_v5, %v880_v4 }
  0xf3   : > { %v983_v10 = vadd.f32 %v899_v9, %v391_v6 }
  0xf5   : > { %991 = vst [vmem:[#allocation2 + $0x28] sm:$0xff] %v983_v10 }
  0xf6   : > { %v948_v12 = vpop.f32.mrf.mxu2  ;;  %v912_v15 = vpop.f32.mrf.mxu0 }
  0xf7   : > { %v967_v13 = vpop.f32.mrf.mxu3  ;;  %v949_v14 = vadd.f32 %v948_v12, %v930_v11  ;;  %v931_v16 = vpop.f32.mrf.mxu1 }
  0xf8   : > { %v932_v20 = vadd.f32 %v931_v16, %v912_v15 }
  0xf9   : > { %v968_v18 = vadd.f32 %v967_v13, %v949_v14 }
  0xfb   : > { %v978_v19 = vadd.f32 %v968_v18, %v386_v17 }
  0xfd   : > { %986 = vst [vmem:[#allocation2] sm:$0xff] %v978_v19 }
  0xfe   : > { %v950_v21 = vpop.f32.mrf.mxu2  ;;  %v915_v25 = vpop.f32.mrf.mxu0 }
  0xff   : > { %v969_v22 = vpop.f32.mrf.mxu3  ;;  %v951_v23 = vadd.f32 %v950_v21, %v932_v20  ;;  %v934_v26 = vpop.f32.mrf.mxu1 }
 0x100   : > { %v935_v29 = vadd.f32 %v934_v26, %v915_v25 }
 0x101   : > { %v970_v27 = vadd.f32 %v969_v22, %v951_v23 }
 0x103   : > { %v980_v28 = vadd.f32 %v970_v27, %v388_v24 }
 0x105   : > { %988 = vst [vmem:[#allocation2 + $0x10] sm:$0xff] %v980_v28 }
 0x106   : > { %v953_v30 = vpop.f32.mrf.mxu2  ;;  %v917_v35 = vpop.f32.mrf.mxu0 }
 0x107   : > { %v972_v31 = vpop.f32.mrf.mxu3  ;;  %v954_v32 = vadd.f32 %v953_v30, %v935_v29  ;;  %v936_v36 = vpop.f32.mrf.mxu1 }
 0x108   : > { %v937_v38 = vadd.f32 %v936_v36, %v917_v35 }
 0x109   : > { %v973_v34 = vadd.f32 %v972_v31, %v954_v32 }
 0x10b   : > { %v982_v37 = vadd.f32 %v973_v34, %v390_v33 }
 0x10d   : > { %990 = vst [vmem:[#allocation2 + $0x20] sm:$0xff] %v982_v37 }
 0x10e   : > { %v955_v39 = vpop.f32.mrf.mxu2 }
 0x10f   : > { %v956_v40 = vadd.f32 %v955_v39, %v937_v38  ;;  %v974_v42 = vpop.f32.mrf.mxu3 }
 0x111   : > { %v975_v57 = vadd.f32 %v974_v42, %v956_v40  ;;  %996 = sbr.rel (%p1517_p11) target bundleno = 299 (0x12b), region = 67 }
 0x113   : > { %v984_v43 = vadd.f32 %v975_v57, %v392_v41 }
 0x115   : > { %992 = vst [vmem:[#allocation2 + $0x38] sm:$0xff] %v984_v43 }
 0x116   : > { %v997_v62 = vld [vmem:[#allocation2 + $0x30] sm:$0xff]  ;;  %v998_v44 = vld [vmem:[#allocation2] sm:$0xff]  ;;  %v999_v47 = vld [vmem:[#allocation2 + $0x18] sm:$0xff] }
 0x117   : > { %v1005_v63 = vld [vmem:[%s1977_s2] sm:$0x3]  ;;  %v1000_v48 = vld [vmem:[#allocation2 + $0x10] sm:$0xff]  ;;  %v1044_v51 = vld [vmem:[%s1978_s3 + $0x8] sm:$0xff] }
 0x118   : > { %v1007_v2 = vperm.slane %v1005_v63, 0  ;;  %v1008_v45 = vperm.slane %v1005_v63, 1  ;;  %v1043_v46 = vld [vmem:[%s1978_s3] sm:$0xff]  ;;  %v1001_v52 = vld [vmem:[#allocation2 + $0x8] sm:$0xff]  ;;  %v1049_v59 = vunpack.c.l.bf16 %v1044_v51  ;;  %v1050_v60 = vunpack.c.h.bf16 %v1044_v51  ;;  %v1045_v8 = vld [vmem:[%s1978_s3 + $0x10] sm:$0xff] }
 0x119   : > { %v1047_v49 = vunpack.c.l.bf16 %v1043_v46  ;;  %v1048_v50 = vunpack.c.h.bf16 %v1043_v46  ;;  %v1002_v53 = vld [vmem:[#allocation2 + $0x20] sm:$0xff]  ;;  %v1003_v9 = vld [vmem:[#allocation2 + $0x28] sm:$0xff]  ;;  %v1051_v20 = vunpack.c.l.bf16 %v1045_v8  ;;  %v1052_v21 = vunpack.c.h.bf16 %v1045_v8  ;;  %v1046_v23 = vld [vmem:[%s1978_s3 + $0x18] sm:$0xff] }
 0x11a   : > { %v1011_v54 = vadd.f32 %v1007_v2, %v997_v62  ;;  %v1012_v55 = vadd.f32 %v1008_v45, %v998_v44  ;;  %v1013_v56 = vadd.f32 %v1007_v2, %v999_v47  ;;  %v1014_v58 = vadd.f32 %v1008_v45, %v1000_v48 }
 0x11b   : > { %v1015_v61 = vadd.f32 %v1007_v2, %v1001_v52  ;;  %v1016_v0 = vadd.f32 %v1008_v45, %v1002_v53  ;;  %v1017_v22 = vadd.f32 %v1007_v2, %v1003_v9  ;;  %v1053_v32 = vunpack.c.l.bf16 %v1046_v23 }
 0x11c   : > { %vm1019_vm0 = vcmp.ge.f32.partialorder %v1011_v54, 0.0  ;;  %vm1020_vm1 = vcmp.ge.f32.partialorder %v1012_v55, 0.0  ;;  %v1027_v1 = vmul.f32 0.2, %v1011_v54  ;;  %v1028_v3 = vmul.f32 0.2, %v1012_v55 }
 0x11d   : > { %vm1021_vm2 = vcmp.ge.f32.partialorder %v1013_v56, 0.0  ;;  %vm1022_vm3 = vcmp.ge.f32.partialorder %v1014_v58, 0.0  ;;  %v1029_v4 = vmul.f32 0.2, %v1013_v56  ;;  %v1030_v5 = vmul.f32 0.2, %v1014_v58 }
 0x11e   : > { %v1035_v6 = vsel %vm1019_vm0, %v1011_v54, %v1027_v1  ;;  %v1036_v7 = vsel %vm1020_vm1, %v1012_v55, %v1028_v3  ;;  %vm1023_vm4 = vcmp.ge.f32.partialorder %v1015_v61, 0.0  ;;  %vm1024_vm5 = vcmp.ge.f32.partialorder %v1016_v0, 0.0  ;;  %v1004_v14 = vld [vmem:[#allocation2 + $0x38] sm:$0xff] }
 0x11f   : > { %v1055_v10 = vadd.f32 %v1047_v49, %v1035_v6  ;;  %v1056_v11 = vadd.f32 %v1048_v50, %v1036_v7  ;;  %v1037_v12 = vsel %vm1021_vm2, %v1013_v56, %v1029_v4  ;;  %v1038_v13 = vsel %vm1022_vm3, %v1014_v58, %v1030_v5 }
 0x120   : > { %v1057_v15 = vadd.f32 %v1049_v59, %v1037_v12  ;;  %v1058_v16 = vadd.f32 %v1050_v60, %v1038_v13  ;;  %v1031_v17 = vmul.f32 0.2, %v1015_v61  ;;  %v1032_v18 = vmul.f32 0.2, %v1016_v0 }
 0x121   : > { %v1063_v19 = vpack.c.bf16 %v1056_v11, %v1055_v10  ;;  %v1018_v27 = vadd.f32 %v1008_v45, %v1004_v14  ;;  %vm1025_vm6 = vcmp.ge.f32.partialorder %v1017_v22, 0.0  ;;  %v1033_v30 = vmul.f32 0.2, %v1017_v22 }
 0x122   : > { %v1064_v24 = vpack.c.bf16 %v1058_v16, %v1057_v15  ;;  %v1039_v25 = vsel %vm1023_vm4, %v1015_v61, %v1031_v17  ;;  %v1040_v26 = vsel %vm1024_vm5, %v1016_v0, %v1032_v18  ;;  %v1054_v33 = vunpack.c.h.bf16 %v1046_v23 }
 0x123   : > { %1067 = vst [vmem:[%s1979_s4] sm:$0xff] %v1063_v19  ;;  %v1059_v28 = vadd.f32 %v1051_v20, %v1039_v25  ;;  %v1060_v29 = vadd.f32 %v1052_v21, %v1040_v26  ;;  %vm1026_vm7 = vcmp.ge.f32.partialorder %v1018_v27, 0.0  ;;  %v1034_v31 = vmul.f32 0.2, %v1018_v27 }
 0x124   : > { %1068 = vst [vmem:[%s1979_s4 + $0x8] sm:$0xff] %v1064_v24  ;;  %v1041_v35 = vsel %vm1025_vm6, %v1017_v22, %v1033_v30 }
 0x125   : > { %v1065_v34 = vpack.c.bf16 %v1060_v29, %v1059_v28  ;;  %v1042_v36 = vsel %vm1026_vm7, %v1018_v27, %v1034_v31  ;;  %v1061_v37 = vadd.f32 %v1053_v32, %v1041_v35 }
 0x126   : > { %v1062_v38 = vadd.f32 %v1054_v33, %v1042_v36 }
 0x127   : > { %1069 = vst [vmem:[%s1979_s4 + $0x10] sm:$0xff] %v1065_v34 }
 0x128   : > { %v1066_v39 = vpack.c.bf16 %v1062_v38, %v1061_v37 }
 0x12a   : > { %1070 = vst [vmem:[%s1979_s4 + $0x18] sm:$0xff] %v1066_v39 }
 0x12b PF: > { %s14_s19 = sadd.s32 1, %s1675_s19   ;;  %s1980_s15 = smov %s1663_s16 }
 0x12c   : > { %p11_p12 = scmp.ge.s32.totalorder %s14_s19, 11   ;;  %s1981_s16 = smov %s1738_s23 }
 0x12d   : > { %s1982_s17 = smov %s1671_s18  ;;  %s1983_s18 = smov %s1985_s20 }
 0x12e   :  { %13 = sbr.rel (!%p11_p12) target bundleno = 3 (0x3), region = 111 }

// kernel: discriminator_unet_forward.15
= control target key start
LH: loop header
LB: loop body
LE: loop exit
PB: predicated region body
PF: predicated region fallthrough
CT: control target
= control target key end

     0   :  { %s1485_s15 = smov 0   ;;  %s1487_s16 = smov 0   ;;  %s1693_s0 = inlined_call_operand.vmem [shape: bf16[128,2304], index: 0, kind: input, shape index: {}]   ;;  %s1694_s1 = inlined_call_operand.vmem [shape: bf16[2304,128], index: 1, kind: input, shape index: {}]   ;;  %s1695_s2 = inlined_call_operand.vmem [shape: f32[1,128], index: 2, kind: input, shape index: {}]   ;;  %s1696_s3 = inlined_call_operand.vmem [shape: bf16[128,128], index: 3, kind: input, shape index: {}]   ;;  %s1697_s4 = inlined_call_operand.vmem [shape: bf16[128,128], index: 4, kind: output, shape index: {}]  }
   0x1   :  { %s1489_s17 = smov 0   ;;  %s1491_s18 = smov 0  }
   0x2   :  { %s1493_s19 = smov 0  }
   0x3 LB: > { %s26_s20 = sadd.s32 1, %s1453_s18  ;;  %p49_p1 = scmp.ne.s32.totalorder %s1445_s16, %s1441_s15  ;;  %s1457_s19 = sphi %s1493_s19, %s14_s19   ;;  %s1453_s18 = sphi %s1491_s18, %s1701_s18   ;;  %s1449_s17 = sphi %s1489_s17, %s1700_s17   ;;  %s1445_s16 = sphi %s1487_s16, %s1699_s16   ;;  %s1441_s15 = sphi %s1485_s15, %s1698_s15  }
   0x4   : > { %p27_p0 = scmp.ge.s32.totalorder %s26_s20, 9  ;;  %p50_p2 = scmp.eq.s32.totalorder %s1457_s19, 0 }
   0x5   : > { %s42_s22 = sadd.s32 1, %s1445_s16  ;;  %p1100_p5 = scmp.ge.s32.totalorder %s1457_s19, 9 }
   0x6   : > { %s1703_s20 = smov (%p27_p0, %s26_s20), 0  ;;  %p51_p3 = por %p50_p2, %p49_p1 }
   0x7   : > { %s38_s21 = ssub.s32 %s1453_s18, %s1703_s20  ;;  %203 = sbr.rel (%p1100_p5) target bundleno = 32 (0x20), region = 24 }
   0x8   : > { %p40_p4 = scmp.eq.s32.totalorder %s38_s21, 0 }
   0xa   : > { %s1520_s23 = scalar_select %p40_p4, %s1445_s16, %s42_s22  }
   0xc   : > { %206 = sbr.rel (!%p51_p3) target bundleno = 32 (0x20), region = 28  ;;  %s208_s24 = sand.u32 (%p51_p3), 1, %s1445_s16  }
   0xd   : > { %s1242_s25 = sshll.u32 (%p51_p3), %s1453_s18, 3  ;;  %s1101_s26 = sshll.u32 (%p51_p3), %s208_s24, 7 }
   0xe   : > { %s1528_s29 = scalar_lea.vmem (%p51_p3), %s1693_s0, %s1242_s25  ;;  %s210_s30 = scalar_lea.vmem (%p51_p3), [#allocation3], %s1101_s26 }
   0xf   : > { %v275_v0 = vld [vmem:[%s1528_s29] sm:$0xff] (%p51_p3)  ;;  %v277_v1 = vld [vmem:[%s1528_s29 + $0x48] sm:$0xff] (%p51_p3)  ;;  %v279_v2 = vld [vmem:[%s1528_s29 + $0x90] sm:$0xff] (%p51_p3) }
  0x10   : > { %276 = vst [vmem:[%s210_s30] sm:$0xff] (%p51_p3), %v275_v0  ;;  %v281_v3 = vld [vmem:[%s1528_s29 + $0xd8] sm:$0xff] (%p51_p3)  ;;  %v283_v4 = vld [vmem:[%s1528_s29 + $0x120] sm:$0xff] (%p51_p3)  ;;  %v285_v5 = vld [vmem:[%s1528_s29 + $0x168] sm:$0xff] (%p51_p3) }
  0x11   : > { %278 = vst [vmem:[%s210_s30 + $0x8] sm:$0xff] %v277_v1  ;;  %v287_v6 = vld [vmem:[%s1528_s29 + $0x1b0] sm:$0xff]  ;;  %v289_v7 = vld [vmem:[%s1528_s29 + $0x1f8] sm:$0xff]  ;;  %v291_v8 = vld [vmem:[%s1528_s29 + $0x240] sm:$0xff] }
  0x12   : > { %280 = vst [vmem:[%s210_s30 + $0x10] sm:$0xff] %v279_v2  ;;  %v293_v9 = vld [vmem:[%s1528_s29 + $0x288] sm:$0xff]  ;;  %v295_v10 = vld [vmem:[%s1528_s29 + $0x2d0] sm:$0xff]  ;;  %v297_v11 = vld [vmem:[%s1528_s29 + $0x318] sm:$0xff] }
  0x13   : > { %282 = vst [vmem:[%s210_s30 + $0x18] sm:$0xff] %v281_v3  ;;  %v299_v12 = vld [vmem:[%s1528_s29 + $0x360] sm:$0xff]  ;;  %v301_v13 = vld [vmem:[%s1528_s29 + $0x3a8] sm:$0xff]  ;;  %v303_v14 = vld [vmem:[%s1528_s29 + $0x3f0] sm:$0xff] }
  0x14   : > { %284 = vst [vmem:[%s210_s30 + $0x20] sm:$0xff] %v283_v4  ;;  %v305_v15 = vld [vmem:[%s1528_s29 + $0x438] sm:$0xff] }
  0x15   : > { %286 = vst [vmem:[%s210_s30 + $0x28] sm:$0xff] %v285_v5 }
  0x16   : > { %288 = vst [vmem:[%s210_s30 + $0x30] sm:$0xff] %v287_v6 }
  0x17   : > { %290 = vst [vmem:[%s210_s30 + $0x38] sm:$0xff] %v289_v7 }
  0x18   : > { %292 = vst [vmem:[%s210_s30 + $0x40] sm:$0xff] %v291_v8 }
  0x19   : > { %294 = vst [vmem:[%s210_s30 + $0x48] sm:$0xff] %v293_v9 }
  0x1a   : > { %296 = vst [vmem:[%s210_s30 + $0x50] sm:$0xff] %v295_v10 }
  0x1b   : > { %298 = vst [vmem:[%s210_s30 + $0x58] sm:$0xff] %v297_v11 }
  0x1c   : > { %300 = vst [vmem:[%s210_s30 + $0x60] sm:$0xff] %v299_v12 }
  0x1d   : > { %302 = vst [vmem:[%s210_s30 + $0x68] sm:$0xff] %v301_v13 }
  0x1e   : > { %304 = vst [vmem:[%s210_s30 + $0x70] sm:$0xff] %v303_v14 }
  0x1f   : > { %306 = vst [vmem:[%s210_s30 + $0x78] sm:$0xff] %v305_v15 }
  0x20 PF: > { %p1104_p6 = scmp.ge.s32.totalorder %s1457_s19, 1  ;;  %p323_p7 = scmp.lt.s32.totalorder %s1457_s19, 10 }
  0x22   : > { %p324_p8 = pnand %p1104_p6, %p323_p7 }
  0x23   : > { %s330_s5 = sand.u32 (!%p324_p8), 1, %s1441_s15   ;;  %s1106_s6 = sshll.u32 (!%p324_p8), %s1449_s17, 5 }
  0x24   : > { %327 = sbr.rel (%p324_p8) target bundleno = 323 (0x143), region = 70  ;;  %s1105_s7 = sshll.u32 (!%p324_p8), %s330_s5, 7 }
  0x25   : > { %p380_p9 = scmp.lt.s32.totalorder (!%p324_p8), %s1106_s6, 287  ;;  %s1555_s12 = scalar_lea.vmem (!%p324_p8), [#allocation3], %s1105_s7 }
  0x26   : > { %p1108_p10 = scmp.ne.s32.totalorder (!%p324_p8), %s1449_s17, 0 }
  0x29   : > { %s1705_s6 = smov (!%p380_p9, %s1106_s6), 287  ;;  %412 = sbr.rel (%p1108_p10) target bundleno = 63 (0x3f), region = 78 }
  0x2a   : > { %s1107_s8 = sshll.u32 %s1705_s6, 2 }
  0x2b   : > { %s1553_s11 = scalar_lea.vmem %s1694_s1, %s1107_s8 }
  0x2e   : > { %v1459_v16 = vmov 0.0  }
  0x2f   : > { %413 = vst [vmem:[#allocation2 + $0x30] sm:$0xff] %v1459_v16 }
  0x30   : > { %414 = vst [vmem:[#allocation2] sm:$0xff] %v1459_v16 }
  0x31   : > { %415 = vst [vmem:[#allocation2 + $0x58] sm:$0xff] %v1459_v16 }
  0x32   : > { %416 = vst [vmem:[#allocation2 + $0x18] sm:$0xff] %v1459_v16 }
  0x33   : > { %417 = vst [vmem:[#allocation2 + $0x50] sm:$0xff] %v1459_v16 }
  0x34   : > { %418 = vst [vmem:[#allocation2 + $0x68] sm:$0xff] %v1459_v16 }
  0x35   : > { %419 = vst [vmem:[#allocation2 + $0x8] sm:$0xff] %v1459_v16 }
  0x36   : > { %420 = vst [vmem:[#allocation2 + $0x48] sm:$0xff] %v1459_v16 }
  0x37   : > { %421 = vst [vmem:[#allocation2 + $0x40] sm:$0xff] %v1459_v16 }
  0x38   : > { %422 = vst [vmem:[#allocation2 + $0x20] sm:$0xff] %v1459_v16 }
  0x39   : > { %423 = vst [vmem:[#allocation2 + $0x10] sm:$0xff] %v1459_v16 }
  0x3a   : > { %424 = vst [vmem:[#allocation2 + $0x38] sm:$0xff] %v1459_v16 }
  0x3b   : > { %425 = vst [vmem:[#allocation2 + $0x60] sm:$0xff] %v1459_v16 }
  0x3c   : > { %426 = vst [vmem:[#allocation2 + $0x70] sm:$0xff] %v1459_v16 }
  0x3d   : > { %427 = vst [vmem:[#allocation2 + $0x78] sm:$0xff] %v1459_v16 }
  0x3e   : > { %428 = vst [vmem:[#allocation2 + $0x28] sm:$0xff] %v1459_v16 }
  0x3f PF: > { %v1266_v17 = vld [vmem:[%s1553_s11 + $0x38] sm:$0xff]  ;;  %v1265_v19 = vld [vmem:[%s1553_s11 + $0x30] sm:$0xff]  ;;  %v1264_v21 = vld [vmem:[%s1553_s11 + $0x28] sm:$0xff]  ;;  %p1237_p11 = scmp.ne.s32.totalorder %s1449_s17, 8 }
  0x40   : > { %v1274_v18 = vld [vmem:[%s1553_s11 + $0x78] sm:$0xff]  ;;  %669 = vmatpush.bf16.msra.mxu0 %v1266_v17  ;;  %1361 = vmatpush.bf16.msra.mxu2 %v1266_v17  ;;  %v1273_v20 = vld [vmem:[%s1553_s11 + $0x70] sm:$0xff]  ;;  %v1272_v22 = vld [vmem:[%s1553_s11 + $0x68] sm:$0xff] }
  0x41   : > { %718 = vmatpush.bf16.msra.mxu1 %v1274_v18  ;;  %1369 = vmatpush.bf16.msra.mxu3 %v1274_v18  ;;  %v1263_v23 = vld [vmem:[%s1553_s11 + $0x20] sm:$0xff]  ;;  %v1262_v25 = vld [vmem:[%s1553_s11 + $0x18] sm:$0xff]  ;;  %v1261_v27 = vld [vmem:[%s1553_s11 + $0x10] sm:$0xff] }
  0x42   : > { %v1271_v24 = vld [vmem:[%s1553_s11 + $0x60] sm:$0xff]  ;;  %v1270_v26 = vld [vmem:[%s1553_s11 + $0x58] sm:$0xff]  ;;  %v1269_v28 = vld [vmem:[%s1553_s11 + $0x50] sm:$0xff] }
  0x43   : > { %v1260_v29 = vld [vmem:[%s1553_s11 + $0x8] sm:$0xff]  ;;  %v1259_v31 = vld [vmem:[%s1553_s11] sm:$0xff]  ;;  %v1119_v45 = vld [vmem:[%s1555_s12 + $0x10] sm:$0xf] }
  0x44   : > { %670 = vmatpush.bf16.msra.mxu0 %v1265_v19  ;;  %1362 = vmatpush.bf16.msra.mxu2 %v1265_v19  ;;  %v1268_v30 = vld [vmem:[%s1553_s11 + $0x48] sm:$0xff]  ;;  %v1267_v32 = vld [vmem:[%s1553_s11 + $0x40] sm:$0xff]  ;;  %v1246_v46 = vld [vmem:[%s1555_s12 + $0x14] sm:$0xf0] }
  0x45   : > { %719 = vmatpush.bf16.msra.mxu1 %v1273_v20  ;;  %1370 = vmatpush.bf16.msra.mxu3 %v1273_v20  ;;  %v1111_v33 = vld [vmem:[%s1555_s12] sm:$0xf]  ;;  %v1244_v34 = vld [vmem:[%s1555_s12 + $0x4] sm:$0xf0]  ;;  %v1243_v37 = vld [vmem:[%s1555_s12 + $0x4] sm:$0xf]  ;;  %v1120_v53 = vor.u32 %v1246_v46, %v1119_v45 }
  0x46   : > { %v1143_v35 = vld [vmem:[%s1555_s12 + $0x40] sm:$0xf]  ;;  %v1252_v36 = vld [vmem:[%s1555_s12 + $0x44] sm:$0xf0]  ;;  %v1113_v38 = vld [vmem:[%s1555_s12 + $0x8] sm:$0xf0]  ;;  %v1112_v41 = vor.u32 %v1244_v34, %v1111_v33 }
  0x47   : > { %v1251_v39 = vld [vmem:[%s1555_s12 + $0x44] sm:$0xf]  ;;  %v1145_v40 = vld [vmem:[%s1555_s12 + $0x48] sm:$0xf0]  ;;  %v1144_v42 = vor.u32 %v1252_v36, %v1143_v35  ;;  %v1116_v43 = vor.u32 %v1243_v37, %v1113_v38  ;;  %v1151_v47 = vld [vmem:[%s1555_s12 + $0x50] sm:$0xf] }
  0x48   : > { %671 = vmatpush.bf16.msra.mxu0 %v1264_v21  ;;  %1363 = vmatpush.bf16.msra.mxu2 %v1264_v21  ;;  %v1148_v44 = vor.u32 %v1251_v39, %v1145_v40  ;;  %v1254_v48 = vld [vmem:[%s1555_s12 + $0x54] sm:$0xf0]  ;;  %v1245_v49 = vld [vmem:[%s1555_s12 + $0x14] sm:$0xf]  ;;  %v1121_v50 = vld [vmem:[%s1555_s12 + $0x18] sm:$0xf0] }
  0x49   : > { %720 = vmatpush.bf16.msra.mxu1 %v1272_v22  ;;  %1371 = vmatpush.bf16.msra.mxu3 %v1272_v22  ;;  %v1253_v51 = vld [vmem:[%s1555_s12 + $0x54] sm:$0xf]  ;;  %v1153_v52 = vld [vmem:[%s1555_s12 + $0x58] sm:$0xf0]  ;;  %v1152_v54 = vor.u32 %v1254_v48, %v1151_v47  ;;  %v1124_v55 = vor.u32 %v1245_v49, %v1121_v50  ;;  %v1127_v57 = vld [vmem:[%s1555_s12 + $0x20] sm:$0xf] }
  0x4a   : > { %v1156_v56 = vor.u32 %v1253_v51, %v1153_v52  ;;  %v1248_v58 = vld [vmem:[%s1555_s12 + $0x24] sm:$0xf0]  ;;  %v1159_v59 = vld [vmem:[%s1555_s12 + $0x60] sm:$0xf]  ;;  %v1247_v61 = vld [vmem:[%s1555_s12 + $0x24] sm:$0xf] }
  0x4b   : > { %v1256_v60 = vld [vmem:[%s1555_s12 + $0x64] sm:$0xf0]  ;;  %v1129_v62 = vld [vmem:[%s1555_s12 + $0x28] sm:$0xf0]  ;;  %v1255_v63 = vld [vmem:[%s1555_s12 + $0x64] sm:$0xf]  ;;  %v1128_v1 = vor.u32 %v1248_v58, %v1127_v57 }
  0x4c   : > { %672 = vmatpush.bf16.msra.mxu0 %v1263_v23  ;;  %1364 = vmatpush.bf16.msra.mxu2 %v1263_v23  ;;  %v1161_v0 = vld [vmem:[%s1555_s12 + $0x68] sm:$0xf0]  ;;  %v1160_v2 = vor.u32 %v1256_v60, %v1159_v59  ;;  %v1132_v3 = vor.u32 %v1247_v61, %v1129_v62  ;;  %v1135_v5 = vld [vmem:[%s1555_s12 + $0x30] sm:$0xf]  ;;  %v1250_v6 = vld [vmem:[%s1555_s12 + $0x34] sm:$0xf0] }
  0x4d   : > { %721 = vmatpush.bf16.msra.mxu1 %v1271_v24  ;;  %1372 = vmatpush.bf16.msra.mxu3 %v1271_v24  ;;  %v1164_v4 = vor.u32 %v1255_v63, %v1161_v0  ;;  %v1167_v7 = vld [vmem:[%s1555_s12 + $0x70] sm:$0xf]  ;;  %v1258_v8 = vld [vmem:[%s1555_s12 + $0x74] sm:$0xf0]  ;;  %v1249_v9 = vld [vmem:[%s1555_s12 + $0x34] sm:$0xf]  ;;  %v1136_v13 = vor.u32 %v1250_v6, %v1135_v5 }
  0x4e   : > { %v1137_v10 = vld [vmem:[%s1555_s12 + $0x38] sm:$0xf0]  ;;  %v1257_v11 = vld [vmem:[%s1555_s12 + $0x74] sm:$0xf]  ;;  %v1168_v14 = vor.u32 %v1258_v8, %v1167_v7  ;;  %v437_v23 = vld [vmem:[#allocation2 + $0x40] sm:$0xff] }
  0x4f   : > { %v1169_v12 = vld [vmem:[%s1555_s12 + $0x78] sm:$0xf0]  ;;  %v1140_v15 = vor.u32 %v1249_v9, %v1137_v10  ;;  %v429_v18 = vld [vmem:[#allocation2 + $0x30] sm:$0xff]  ;;  %v438_v33 = vld [vmem:[#allocation2 + $0x20] sm:$0xff] }
  0x50   : > { %673 = vmatpush.bf16.msra.mxu0 %v1262_v25  ;;  %1365 = vmatpush.bf16.msra.mxu2 %v1262_v25  ;;  %v1172_v16 = vor.u32 %v1257_v11, %v1169_v12  ;;  %v431_v37 = vld [vmem:[#allocation2 + $0x58] sm:$0xff]  ;;  %v433_v57 = vld [vmem:[#allocation2 + $0x50] sm:$0xff]  ;;  %v441_v63 = vld [vmem:[#allocation2 + $0x60] sm:$0xff] }
  0x51   : > { %722 = vmatpush.bf16.msra.mxu1 %v1270_v26  ;;  %1373 = vmatpush.bf16.msra.mxu3 %v1270_v26  ;;  %v432_v47 = vld [vmem:[#allocation2 + $0x18] sm:$0xff]  ;;  %v442_v9 = vld [vmem:[#allocation2 + $0x70] sm:$0xff] }
  0x54   : > { %674 = vmatpush.bf16.msra.mxu0 %v1261_v27  ;;  %1366 = vmatpush.bf16.msra.mxu2 %v1261_v27  ;;  %v430_v27 = vld [vmem:[#allocation2] sm:$0xff] }
  0x55   : > { %723 = vmatpush.bf16.msra.mxu1 %v1269_v28  ;;  %1374 = vmatpush.bf16.msra.mxu3 %v1269_v28 }
  0x58   : > { %675 = vmatpush.bf16.msra.mxu0 %v1260_v29  ;;  %1367 = vmatpush.bf16.msra.mxu2 %v1260_v29 }
  0x59   : > { %724 = vmatpush.bf16.msra.mxu1 %v1268_v30  ;;  %1375 = vmatpush.bf16.msra.mxu3 %v1268_v30 }
  0x5c   : > { %676 = vmatpush.bf16.msra.mxu0 %v1259_v31  ;;  %1368 = vmatpush.bf16.msra.mxu2 %v1259_v31 }
  0x5d   : > { %725 = vmatpush.bf16.msra.mxu1 %v1267_v32  ;;  %1376 = vmatpush.bf16.msra.mxu3 %v1267_v32 }
  0x5f   : > { %677 = vmatmul.bf16.vlgmr.msra.gmra.mxu0 %v1112_v41  ;;  %697 = vmatmul.bf16.vlgmr.msra.gmra.mxu2 %v1144_v42 }
  0x60   : > { %726 = vmatmul.bf16.vlgmr.msra.gmra.mxu1 %v1116_v43  ;;  %746 = vmatmul.bf16.vlgmr.msra.gmra.mxu3 %v1148_v44  ;;  %v439_v43 = vld [vmem:[#allocation2 + $0x10] sm:$0xff] }
  0x6f   : > { %682 = vmatmul.bf16.gmra.mxu0 %v1120_v53  ;;  %702 = vmatmul.bf16.gmra.mxu2 %v1152_v54  ;;  %v440_v53 = vld [vmem:[#allocation2 + $0x38] sm:$0xff] }
  0x70   : > { %731 = vmatmul.bf16.gmra.mxu1 %v1124_v55  ;;  %751 = vmatmul.bf16.gmra.mxu3 %v1156_v56 }
  0x7f   : > { %687 = vmatmul.bf16.gmra.mxu0 %v1128_v1  ;;  %707 = vmatmul.bf16.gmra.mxu2 %v1160_v2 }
  0x80   : > { %736 = vmatmul.bf16.gmra.mxu1 %v1132_v3  ;;  %756 = vmatmul.bf16.gmra.mxu3 %v1164_v4  ;;  %v434_v3 = vld [vmem:[#allocation2 + $0x68] sm:$0xff] }
  0x8f   : > { %692 = vmatmul.bf16.gmra.mxu0 %v1136_v13  ;;  %712 = vmatmul.bf16.gmra.mxu2 %v1168_v14  ;;  %v435_v13 = vld [vmem:[#allocation2 + $0x8] sm:$0xff] }
  0x90   : > { %741 = vmatmul.bf16.gmra.mxu1 %v1140_v15  ;;  %761 = vmatmul.bf16.gmra.mxu3 %v1172_v16 }
  0xdc   : > { %v678_v17 = vpop.f32.mrf.mxu0 }
  0xdd   : > { %v727_v19 = vpop.f32.mrf.mxu1 }
  0xde   : > { %v728_v20 = vadd.f32 %v727_v19, %v678_v17  ;;  %v443_v19 = vld [vmem:[#allocation2 + $0x78] sm:$0xff] }
  0xe0   : > { %v767_v21 = vadd.f32 %v728_v20, %v429_v18 }
  0xe2   : > { %783 = vst [vmem:[#allocation2 + $0x30] sm:$0xff] %v767_v21  ;;  %v698_v22 = vpop.f32.mrf.mxu2 }
  0xe3   : > { %v747_v24 = vpop.f32.mrf.mxu3 }
  0xe4   : > { %v748_v25 = vadd.f32 %v747_v24, %v698_v22  ;;  %v680_v26 = vpop.f32.mrf.mxu0 }
  0xe5   : > { %v729_v28 = vpop.f32.mrf.mxu1 }
  0xe6   : > { %v775_v29 = vadd.f32 %v748_v25, %v437_v23  ;;  %v730_v30 = vadd.f32 %v729_v28, %v680_v26  ;;  %v436_v23 = vld [vmem:[#allocation2 + $0x48] sm:$0xff] }
  0xe8   : > { %791 = vst [vmem:[#allocation2 + $0x40] sm:$0xff] %v775_v29  ;;  %v768_v31 = vadd.f32 %v730_v30, %v430_v27  ;;  %v444_v29 = vld [vmem:[#allocation2 + $0x28] sm:$0xff] }
  0xea   : > { %784 = vst [vmem:[#allocation2] sm:$0xff] %v768_v31  ;;  %v700_v32 = vpop.f32.mrf.mxu2 }
  0xeb   : > { %v749_v34 = vpop.f32.mrf.mxu3 }
  0xec   : > { %v750_v35 = vadd.f32 %v749_v34, %v700_v32  ;;  %v683_v36 = vpop.f32.mrf.mxu0 }
  0xed   : > { %v732_v38 = vpop.f32.mrf.mxu1 }
  0xee   : > { %v776_v39 = vadd.f32 %v750_v35, %v438_v33  ;;  %v733_v40 = vadd.f32 %v732_v38, %v683_v36 }
  0xf0   : > { %792 = vst [vmem:[#allocation2 + $0x20] sm:$0xff] %v776_v39  ;;  %v769_v41 = vadd.f32 %v733_v40, %v431_v37 }
  0xf2   : > { %785 = vst [vmem:[#allocation2 + $0x58] sm:$0xff] %v769_v41  ;;  %v703_v42 = vpop.f32.mrf.mxu2 }
  0xf3   : > { %v752_v44 = vpop.f32.mrf.mxu3 }
  0xf4   : > { %v753_v45 = vadd.f32 %v752_v44, %v703_v42  ;;  %v685_v46 = vpop.f32.mrf.mxu0 }
  0xf5   : > { %v734_v48 = vpop.f32.mrf.mxu1 }
  0xf6   : > { %v777_v49 = vadd.f32 %v753_v45, %v439_v43  ;;  %v735_v50 = vadd.f32 %v734_v48, %v685_v46 }
  0xf8   : > { %793 = vst [vmem:[#allocation2 + $0x10] sm:$0xff] %v777_v49  ;;  %v770_v51 = vadd.f32 %v735_v50, %v432_v47 }
  0xfa   : > { %786 = vst [vmem:[#allocation2 + $0x18] sm:$0xff] %v770_v51  ;;  %v705_v52 = vpop.f32.mrf.mxu2 }
  0xfb   : > { %v754_v54 = vpop.f32.mrf.mxu3 }
  0xfc   : > { %v755_v55 = vadd.f32 %v754_v54, %v705_v52  ;;  %v688_v56 = vpop.f32.mrf.mxu0 }
  0xfd   : > { %v737_v58 = vpop.f32.mrf.mxu1 }
  0xfe   : > { %v778_v59 = vadd.f32 %v755_v55, %v440_v53  ;;  %v738_v60 = vadd.f32 %v737_v58, %v688_v56 }
 0x100   : > { %794 = vst [vmem:[#allocation2 + $0x38] sm:$0xff] %v778_v59  ;;  %v771_v61 = vadd.f32 %v738_v60, %v433_v57 }
 0x102   : > { %787 = vst [vmem:[#allocation2 + $0x50] sm:$0xff] %v771_v61  ;;  %v708_v62 = vpop.f32.mrf.mxu2 }
 0x103   : > { %v757_v0 = vpop.f32.mrf.mxu3 }
 0x104   : > { %v758_v1 = vadd.f32 %v757_v0, %v708_v62  ;;  %v690_v2 = vpop.f32.mrf.mxu0 }
 0x105   : > { %v739_v4 = vpop.f32.mrf.mxu1 }
 0x106   : > { %v779_v5 = vadd.f32 %v758_v1, %v441_v63  ;;  %v740_v6 = vadd.f32 %v739_v4, %v690_v2 }
 0x108   : > { %795 = vst [vmem:[#allocation2 + $0x60] sm:$0xff] %v779_v5  ;;  %v772_v7 = vadd.f32 %v740_v6, %v434_v3 }
 0x10a   : > { %788 = vst [vmem:[#allocation2 + $0x68] sm:$0xff] %v772_v7  ;;  %v710_v8 = vpop.f32.mrf.mxu2 }
 0x10b   : > { %v759_v10 = vpop.f32.mrf.mxu3 }
 0x10c   : > { %v760_v11 = vadd.f32 %v759_v10, %v710_v8  ;;  %v693_v12 = vpop.f32.mrf.mxu0 }
 0x10d   : > { %v742_v14 = vpop.f32.mrf.mxu1 }
 0x10e   : > { %v780_v15 = vadd.f32 %v760_v11, %v442_v9  ;;  %v743_v16 = vadd.f32 %v742_v14, %v693_v12 }
 0x110   : > { %796 = vst [vmem:[#allocation2 + $0x70] sm:$0xff] %v780_v15  ;;  %v773_v17 = vadd.f32 %v743_v16, %v435_v13 }
 0x112   : > { %789 = vst [vmem:[#allocation2 + $0x8] sm:$0xff] %v773_v17  ;;  %v713_v18 = vpop.f32.mrf.mxu2 }
 0x113   : > { %v762_v20 = vpop.f32.mrf.mxu3 }
 0x114   : > { %v763_v21 = vadd.f32 %v762_v20, %v713_v18  ;;  %v695_v22 = vpop.f32.mrf.mxu0 }
 0x115   : > { %v744_v24 = vpop.f32.mrf.mxu1 }
 0x116   : > { %v781_v25 = vadd.f32 %v763_v21, %v443_v19  ;;  %v745_v26 = vadd.f32 %v744_v24, %v695_v22 }
 0x118   : > { %797 = vst [vmem:[#allocation2 + $0x78] sm:$0xff] %v781_v25  ;;  %v774_v27 = vadd.f32 %v745_v26, %v436_v23 }
 0x11a   : > { %790 = vst [vmem:[#allocation2 + $0x48] sm:$0xff] %v774_v27  ;;  %v715_v28 = vpop.f32.mrf.mxu2 }
 0x11b   : > { %v764_v30 = vpop.f32.mrf.mxu3 }
 0x11c   : > { %v765_v31 = vadd.f32 %v764_v30, %v715_v28  ;;  %802 = sbr.rel (%p1237_p11) target bundleno = 323 (0x143), region = 82 }
 0x11e   : > { %v782_v32 = vadd.f32 %v765_v31, %v444_v29 }
 0x120   : > { %798 = vst [vmem:[#allocation2 + $0x28] sm:$0xff] %v782_v32 }
 0x121   : > { %v803_v33 = vld [vmem:[#allocation2 + $0x30] sm:$0xff]  ;;  %v804_v34 = vld [vmem:[#allocation2] sm:$0xff]  ;;  %v805_v37 = vld [vmem:[#allocation2 + $0x58] sm:$0xff] }
 0x122   : > { %v1610_v35 = vld [vmem:[%s1695_s2] ss:$0 sm:$0xff]  ;;  %v806_v40 = vld [vmem:[#allocation2 + $0x18] sm:$0xff]  ;;  %v1347_v41 = vld [vmem:[%s1696_s3 + $0x8] sm:$0xff]  }
 0x123   : > { %v1276_v36 = vld [vmem:[%s1696_s3] sm:$0xff]   ;;  %v807_v42 = vld [vmem:[#allocation2 + $0x50] sm:$0xff]  ;;  %v823_v43 = vadd.f32 %v1610_v35, %v803_v33  ;;  %v824_v44 = vadd.f32 %v1610_v35, %v804_v34  ;;  %v825_v45 = vadd.f32 %v1610_v35, %v805_v37  ;;  %v826_v46 = vadd.f32 %v1610_v35, %v806_v40  ;;  %v808_v47 = vld [vmem:[#allocation2 + $0x68] sm:$0xff] }
 0x124   : > { %v1277_v38 = vunpack.c.l.bf16 %v1276_v36  ;;  %v1278_v39 = vunpack.c.h.bf16 %v1276_v36  ;;  %v1281_v48 = vunpack.c.l.bf16 %v1347_v41  ;;  %v1282_v49 = vunpack.c.h.bf16 %v1347_v41  ;;  %v1348_v58 = vld [vmem:[%s1696_s3 + $0x10] sm:$0xff]   ;;  %v809_v59 = vld [vmem:[#allocation2 + $0x8] sm:$0xff]  ;;  %v1349_v9 = vld [vmem:[%s1696_s3 + $0x18] sm:$0xff]  }
 0x125   : > { %v827_v50 = vadd.f32 %v1610_v35, %v807_v42  ;;  %v828_v51 = vadd.f32 %v1610_v35, %v808_v47  ;;  %vm839_vm0 = vcmp.ge.f32.partialorder %v823_v43, 0.0  ;;  %vm840_vm1 = vcmp.ge.f32.partialorder %v824_v44, 0.0  ;;  %v810_v0 = vld [vmem:[#allocation2 + $0x48] sm:$0xff]  ;;  %v811_v14 = vld [vmem:[#allocation2 + $0x40] sm:$0xff]  ;;  %v813_v27 = vld [vmem:[#allocation2 + $0x10] sm:$0xff] }
 0x126   : > { %v855_v52 = vmul.f32 0.2, %v823_v43  ;;  %v856_v53 = vmul.f32 0.2, %v824_v44  ;;  %vm841_vm2 = vcmp.ge.f32.partialorder %v825_v45, 0.0  ;;  %vm842_vm3 = vcmp.ge.f32.partialorder %v826_v46, 0.0 }
 0x127   : > { %v857_v54 = vmul.f32 0.2, %v825_v45  ;;  %v858_v55 = vmul.f32 0.2, %v826_v46  ;;  %vm843_vm4 = vcmp.ge.f32.partialorder %v827_v50, 0.0  ;;  %vm844_vm5 = vcmp.ge.f32.partialorder %v828_v51, 0.0 }
 0x128   : > { %v871_v56 = vsel %vm839_vm0, %v823_v43, %v855_v52  ;;  %v872_v57 = vsel %vm840_vm1, %v824_v44, %v856_v53  ;;  %v859_v3 = vmul.f32 0.2, %v827_v50  ;;  %v860_v4 = vmul.f32 0.2, %v828_v51  ;;  %v812_v15 = vld [vmem:[#allocation2 + $0x20] sm:$0xff]  ;;  %v814_v28 = vld [vmem:[#allocation2 + $0x38] sm:$0xff] }
 0x129   : > { %v919_v60 = vadd.f32 %v1277_v38, %v871_v56  ;;  %v920_v61 = vadd.f32 %v1278_v39, %v872_v57  ;;  %v873_v62 = vsel %vm841_vm2, %v825_v45, %v857_v54  ;;  %v874_v63 = vsel %vm842_vm3, %v826_v46, %v858_v55  ;;  %v1350_v19 = vld [vmem:[%s1696_s3 + $0x20] sm:$0xff]   ;;  %v1351_v29 = vld [vmem:[%s1696_s3 + $0x28] sm:$0xff]   ;;  %v816_v42 = vld [vmem:[#allocation2 + $0x70] sm:$0xff] }
 0x12a   : > { %v921_v1 = vadd.f32 %v1281_v48, %v873_v62  ;;  %v922_v2 = vadd.f32 %v1282_v49, %v874_v63  ;;  %v1285_v6 = vunpack.c.l.bf16 %v1348_v58  ;;  %v1286_v7 = vunpack.c.h.bf16 %v1348_v58  ;;  %v815_v34 = vld [vmem:[#allocation2 + $0x60] sm:$0xff]  ;;  %v1352_v47 = vld [vmem:[%s1696_s3 + $0x30] sm:$0xff]   ;;  %v817_v57 = vld [vmem:[#allocation2 + $0x78] sm:$0xff] }
 0x12b   : > { %v1310_v5 = vpack.c.bf16 %v920_v61, %v919_v60  ;;  %v829_v8 = vadd.f32 %v1610_v35, %v809_v59  ;;  %v875_v11 = vsel %vm843_vm4, %v827_v50, %v859_v3  ;;  %v876_v12 = vsel %vm844_vm5, %v828_v51, %v860_v4  ;;  %v818_v58 = vld [vmem:[#allocation2 + $0x28] sm:$0xff]  ;;  %v1353_v62 = vld [vmem:[%s1696_s3 + $0x38] sm:$0xff]  }
 0x12c   : > { %v1315_v10 = vpack.c.bf16 %v922_v2, %v921_v1  ;;  %v830_v13 = vadd.f32 %v1610_v35, %v810_v0  ;;  %v923_v16 = vadd.f32 %v1285_v6, %v875_v11  ;;  %v924_v17 = vadd.f32 %v1286_v7, %v876_v12 }
 0x12d   : > { %1311 = vst [vmem:[%s1697_s4] sm:$0xff] %v1310_v5   ;;  %vm845_vm6 = vcmp.ge.f32.partialorder %v829_v8, 0.0  ;;  %v861_v18 = vmul.f32 0.2, %v829_v8  ;;  %v1289_v21 = vunpack.c.l.bf16 %v1349_v9  ;;  %v1290_v22 = vunpack.c.h.bf16 %v1349_v9 }
 0x12e   : > { %1354 = vst [vmem:[%s1697_s4 + $0x8] sm:$0xff] %v1315_v10   ;;  %vm846_vm7 = vcmp.ge.f32.partialorder %v830_v13, 0.0  ;;  %v862_v20 = vmul.f32 0.2, %v830_v13  ;;  %v1320_v23 = vpack.c.bf16 %v924_v17, %v923_v16  ;;  %v831_v25 = vadd.f32 %v1610_v35, %v811_v14 }
 0x12f   : > { %v877_v24 = vsel %vm845_vm6, %v829_v8, %v861_v18  ;;  %v832_v26 = vadd.f32 %v1610_v35, %v812_v15  ;;  %v1293_v32 = vunpack.c.l.bf16 %v1350_v19  ;;  %v1294_v33 = vunpack.c.h.bf16 %v1350_v19 }
 0x130   : > { %v878_v30 = vsel %vm846_vm7, %v830_v13, %v862_v20  ;;  %v925_v31 = vadd.f32 %v1289_v21, %v877_v24  ;;  %1355 = vst [vmem:[%s1697_s4 + $0x10] sm:$0xff] %v1320_v23   ;;  %vm847_vm8 = vcmp.ge.f32.partialorder %v831_v25, 0.0  ;;  %v863_v37 = vmul.f32 0.2, %v831_v25 }
 0x131   : > { %v926_v36 = vadd.f32 %v1290_v22, %v878_v30  ;;  %vm848_vm9 = vcmp.ge.f32.partialorder %v832_v26, 0.0  ;;  %v864_v38 = vmul.f32 0.2, %v832_v26  ;;  %v833_v39 = vadd.f32 %v1610_v35, %v813_v27 }
 0x132   : > { %v834_v40 = vadd.f32 %v1610_v35, %v814_v28  ;;  %v1297_v41 = vunpack.c.l.bf16 %v1351_v29  ;;  %v879_v44 = vsel %vm847_vm8, %v831_v25, %v863_v37  ;;  %v1298_v45 = vunpack.c.h.bf16 %v1351_v29 }
 0x133   : > { %v1325_v43 = vpack.c.bf16 %v926_v36, %v925_v31  ;;  %v835_v46 = vadd.f32 %v1610_v35, %v815_v34  ;;  %v880_v48 = vsel %vm848_vm9, %v832_v26, %v864_v38  ;;  %v927_v49 = vadd.f32 %v1293_v32, %v879_v44 }
 0x134   : > { %vm849_vm10 = vcmp.ge.f32.partialorder %v833_v39, 0.0  ;;  %vm850_vm11 = vcmp.ge.f32.partialorder %v834_v40, 0.0  ;;  %v928_v50 = vadd.f32 %v1294_v33, %v880_v48  ;;  %v865_v51 = vmul.f32 0.2, %v833_v39 }
 0x135   : > { %1356 = vst [vmem:[%s1697_s4 + $0x18] sm:$0xff] %v1325_v43   ;;  %v866_v52 = vmul.f32 0.2, %v834_v40  ;;  %v836_v53 = vadd.f32 %v1610_v35, %v816_v42  ;;  %vm851_vm12 = vcmp.ge.f32.partialorder %v835_v46, 0.0  ;;  %v867_v54 = vmul.f32 0.2, %v835_v46 }
 0x136   : > { %v1301_v55 = vunpack.c.l.bf16 %v1352_v47  ;;  %v1302_v56 = vunpack.c.h.bf16 %v1352_v47  ;;  %v1330_v59 = vpack.c.bf16 %v928_v50, %v927_v49  ;;  %v881_v60 = vsel %vm849_vm10, %v833_v39, %v865_v51 }
 0x137   : > { %v882_v61 = vsel %vm850_vm11, %v834_v40, %v866_v52  ;;  %vm852_vm13 = vcmp.ge.f32.partialorder %v836_v53, 0.0  ;;  %v929_v63 = vadd.f32 %v1297_v41, %v881_v60  ;;  %v868_v1 = vmul.f32 0.2, %v836_v53 }
 0x138   : > { %v930_v0 = vadd.f32 %v1298_v45, %v882_v61  ;;  %v883_v2 = vsel %vm851_vm12, %v835_v46, %v867_v54  ;;  %1357 = vst [vmem:[%s1697_s4 + $0x20] sm:$0xff] %v1330_v59   ;;  %v837_v4 = vadd.f32 %v1610_v35, %v817_v57  ;;  %v838_v5 = vadd.f32 %v1610_v35, %v818_v58 }
 0x139   : > { %v931_v3 = vadd.f32 %v1301_v55, %v883_v2  ;;  %v884_v7 = vsel %vm852_vm13, %v836_v53, %v868_v1  ;;  %v1305_v8 = vunpack.c.l.bf16 %v1353_v62  ;;  %v1306_v9 = vunpack.c.h.bf16 %v1353_v62 }
 0x13a   : > { %v1335_v6 = vpack.c.bf16 %v930_v0, %v929_v63  ;;  %v932_v10 = vadd.f32 %v1302_v56, %v884_v7  ;;  %vm853_vm14 = vcmp.ge.f32.partialorder %v837_v4, 0.0  ;;  %vm854_vm15 = vcmp.ge.f32.partialorder %v838_v5, 0.0 }
 0x13b   : > { %v869_v11 = vmul.f32 0.2, %v837_v4  ;;  %v870_v12 = vmul.f32 0.2, %v838_v5 }
 0x13c   : > { %1358 = vst [vmem:[%s1697_s4 + $0x28] sm:$0xff] %v1335_v6   ;;  %v1340_v13 = vpack.c.bf16 %v932_v10, %v931_v3 }
 0x13d   : > { %v885_v14 = vsel %vm853_vm14, %v837_v4, %v869_v11  ;;  %v886_v15 = vsel %vm854_vm15, %v838_v5, %v870_v12 }
 0x13e   : > { %v933_v16 = vadd.f32 %v1305_v8, %v885_v14  ;;  %1359 = vst [vmem:[%s1697_s4 + $0x30] sm:$0xff] %v1340_v13   ;;  %v934_v35 = vadd.f32 %v1306_v9, %v886_v15 }
 0x140   : > { %v1345_v17 = vpack.c.bf16 %v934_v35, %v933_v16 }
 0x142   : > { %1360 = vst [vmem:[%s1697_s4 + $0x38] sm:$0xff] %v1345_v17  }
 0x143 PF: > { %s14_s19 = sadd.s32 1, %s1457_s19   ;;  %s1698_s15 = smov %s1445_s16 }
 0x144   : > { %p11_p12 = scmp.ge.s32.totalorder %s14_s19, 11   ;;  %s1699_s16 = smov %s1520_s23 }
 0x145   : > { %s1700_s17 = smov %s1453_s18  ;;  %s1701_s18 = smov %s1703_s20 }
 0x146   :  { %13 = sbr.rel (!%p11_p12) target bundleno = 3 (0x3), region = 126 }

// kernel: discriminator_unet_forward.16
= control target key start
LH: loop header
LB: loop body
LE: loop exit
PB: predicated region body
PF: predicated region fallthrough
CT: control target
= control target key end

     0   :  { %s1831_s15 = smov 0   ;;  %s1833_s16 = smov 0   ;;  %s2099_s0 = inlined_call_operand.vmem [shape: bf16[512,1152], index: 0, kind: input, shape index: {}]   ;;  %s2100_s1 = inlined_call_operand.vmem [shape: bf16[1152,128], index: 1, kind: input, shape index: {}]   ;;  %s2101_s2 = inlined_call_operand.vmem [shape: f32[1,128], index: 2, kind: input, shape index: {}]   ;;  %s2102_s3 = inlined_call_operand.vmem [shape: bf16[512,128], index: 3, kind: input, shape index: {}]   ;;  %s2103_s4 = inlined_call_operand.vmem [shape: bf16[512,128], index: 4, kind: output, shape index: {}]  }
   0x1   :  { %s1835_s17 = smov 0   ;;  %s1837_s18 = smov 0  }
   0x2   :  { %s1839_s19 = smov 0   ;;  %s1841_s20 = smov 0  }
   0x3   :  { %s1843_s21 = smov 0  }
   0x4 LB: > { %s26_s22 = sadd.s32 1, %s1795_s19  ;;  %s33_s23 = sadd.s32 1, %s1799_s20  ;;  %s1803_s21 = sphi %s1843_s21, %s14_s21   ;;  %s1799_s20 = sphi %s1841_s20, %s2109_s20   ;;  %s1795_s19 = sphi %s1839_s19, %s2108_s19   ;;  %s1791_s18 = sphi %s1837_s18, %s2107_s18   ;;  %s1787_s17 = sphi %s1835_s17, %s2106_s17   ;;  %s1783_s16 = sphi %s1833_s16, %s2105_s16   ;;  %s1779_s15 = sphi %s1831_s15, %s2104_s15  }
   0x5   : > { %p27_p0 = scmp.ge.s32.totalorder %s26_s22, 9  ;;  %p49_p1 = scmp.ne.s32.totalorder %s1783_s16, %s1779_s15 }
   0x6   : > { %p50_p2 = scmp.eq.s32.totalorder %s1803_s21, 0  ;;  %s42_s27 = sadd.s32 1, %s1783_s16 }
   0x7   : > { %s2111_s22 = smov (%p27_p0, %s26_s22), 0  ;;  %s2113_s23 = smov (!%p27_p0, %s33_s23), %s1799_s20 }
   0x8   : > { %p51_p3 = por %p50_p2, %p49_p1  ;;  %p35_p4 = scmp.ge.s32.totalorder %s2113_s23, 2 }
   0x9   : > { %s38_s24 = ssub.s32 %s1795_s19, %s2111_s22  ;;  %p1355_p6 = scmp.ge.s32.totalorder %s1803_s21, 18 }
   0xa   : > { %s2115_s23 = smov (%p35_p4, %s2113_s23), 0 }
   0xb   : > { %s37_s25 = ssub.s32 %s1799_s20, %s2115_s23  ;;  %191 = sbr.rel (%p1355_p6) target bundleno = 55 (0x37), region = 20 }
   0xc   : > { %s39_s26 = sor.u32 %s38_s24, %s37_s25 }
   0xd   : > { %p40_p5 = scmp.eq.s32.totalorder %s39_s26, 0 }
   0xf   : > { %s1882_s28 = scalar_select %p40_p5, %s1783_s16, %s42_s27  }
  0x10   : > { %194 = sbr.rel (!%p51_p3) target bundleno = 55 (0x37), region = 24  ;;  %s196_s29 = sand.u32 (%p51_p3), 1, %s1783_s16  }
  0x11   : > { %s1690_s30 = smul.u32 (%p51_p3), 288, %s1799_s20  ;;  %s1356_s5 = sshll.u32 (%p51_p3), %s196_s29, 7 }
  0x12   : > { %s1896_s11 = scalar_lea.vmem (%p51_p3), [#allocation3], %s1356_s5 }
  0x13   : > { %s201_s6 = sadd.s32 (%p51_p3), %s1795_s19, %s1690_s30 }
  0x14   : > { %s1359_s7 = sshll.u32 (%p51_p3), %s201_s6, 2 }
  0x15   : > { %s1891_s10 = scalar_lea.vmem %s2099_s0, %s1359_s7 }
  0x16   : > { %v220_v0 = vld [vmem:[%s1891_s10] sm:$0xf]  ;;  %v222_v1 = vld [vmem:[%s1891_s10 + $0x24] sm:$0xf]  ;;  %v224_v2 = vld [vmem:[%s1891_s10 + $0x48] sm:$0xf] }
  0x17   : > { %221 = vst [vmem:[%s1896_s11] sm:$0xf] %v220_v0  ;;  %v226_v3 = vld [vmem:[%s1891_s10 + $0x6c] sm:$0xf]  ;;  %v228_v4 = vld [vmem:[%s1891_s10 + $0x90] sm:$0xf] }
  0x18   : > { %223 = vst [vmem:[%s1896_s11 + $0x4] sm:$0xf] %v222_v1  ;;  %v230_v5 = vld [vmem:[%s1891_s10 + $0xb4] sm:$0xf]  ;;  %v232_v6 = vld [vmem:[%s1891_s10 + $0xd8] sm:$0xf] }
  0x19   : > { %225 = vst [vmem:[%s1896_s11 + $0x8] sm:$0xf] %v224_v2  ;;  %v234_v7 = vld [vmem:[%s1891_s10 + $0xfc] sm:$0xf]  ;;  %v236_v8 = vld [vmem:[%s1891_s10 + $0x120] sm:$0xf] }
  0x1a   : > { %227 = vst [vmem:[%s1896_s11 + $0xc] sm:$0xf] %v226_v3  ;;  %v238_v9 = vld [vmem:[%s1891_s10 + $0x144] sm:$0xf]  ;;  %v240_v10 = vld [vmem:[%s1891_s10 + $0x168] sm:$0xf] }
  0x1b   : > { %229 = vst [vmem:[%s1896_s11 + $0x10] sm:$0xf] %v228_v4  ;;  %v242_v11 = vld [vmem:[%s1891_s10 + $0x18c] sm:$0xf]  ;;  %v244_v12 = vld [vmem:[%s1891_s10 + $0x1b0] sm:$0xf] }
  0x1c   : > { %231 = vst [vmem:[%s1896_s11 + $0x14] sm:$0xf] %v230_v5  ;;  %v246_v13 = vld [vmem:[%s1891_s10 + $0x1d4] sm:$0xf]  ;;  %v248_v14 = vld [vmem:[%s1891_s10 + $0x1f8] sm:$0xf] }
  0x1d   : > { %233 = vst [vmem:[%s1896_s11 + $0x18] sm:$0xf] %v232_v6  ;;  %v250_v15 = vld [vmem:[%s1891_s10 + $0x21c] sm:$0xf]  ;;  %v252_v16 = vld [vmem:[%s1891_s10 + $0x240] sm:$0xf] }
  0x1e   : > { %235 = vst [vmem:[%s1896_s11 + $0x1c] sm:$0xf] %v234_v7  ;;  %v254_v17 = vld [vmem:[%s1891_s10 + $0x264] sm:$0xf]  ;;  %v256_v18 = vld [vmem:[%s1891_s10 + $0x288] sm:$0xf] }
  0x1f   : > { %237 = vst [vmem:[%s1896_s11 + $0x20] sm:$0xf] %v236_v8  ;;  %v258_v19 = vld [vmem:[%s1891_s10 + $0x2ac] sm:$0xf]  ;;  %v260_v20 = vld [vmem:[%s1891_s10 + $0x2d0] sm:$0xf] }
  0x20   : > { %239 = vst [vmem:[%s1896_s11 + $0x24] sm:$0xf] %v238_v9  ;;  %v262_v21 = vld [vmem:[%s1891_s10 + $0x2f4] sm:$0xf]  ;;  %v264_v22 = vld [vmem:[%s1891_s10 + $0x318] sm:$0xf] }
  0x21   : > { %241 = vst [vmem:[%s1896_s11 + $0x28] sm:$0xf] %v240_v10  ;;  %v266_v23 = vld [vmem:[%s1891_s10 + $0x33c] sm:$0xf]  ;;  %v268_v24 = vld [vmem:[%s1891_s10 + $0x360] sm:$0xf] }
  0x22   : > { %243 = vst [vmem:[%s1896_s11 + $0x2c] sm:$0xf] %v242_v11  ;;  %v270_v25 = vld [vmem:[%s1891_s10 + $0x384] sm:$0xf]  ;;  %v272_v26 = vld [vmem:[%s1891_s10 + $0x3a8] sm:$0xf] }
  0x23   : > { %245 = vst [vmem:[%s1896_s11 + $0x30] sm:$0xf] %v244_v12  ;;  %v274_v27 = vld [vmem:[%s1891_s10 + $0x3cc] sm:$0xf]  ;;  %v276_v28 = vld [vmem:[%s1891_s10 + $0x3f0] sm:$0xf] }
  0x24   : > { %247 = vst [vmem:[%s1896_s11 + $0x34] sm:$0xf] %v246_v13  ;;  %v278_v29 = vld [vmem:[%s1891_s10 + $0x414] sm:$0xf]  ;;  %v280_v30 = vld [vmem:[%s1891_s10 + $0x438] sm:$0xf] }
  0x25   : > { %249 = vst [vmem:[%s1896_s11 + $0x38] sm:$0xf] %v248_v14  ;;  %v282_v31 = vld [vmem:[%s1891_s10 + $0x45c] sm:$0xf] }
  0x26   : > { %251 = vst [vmem:[%s1896_s11 + $0x3c] sm:$0xf] %v250_v15 }
  0x27   : > { %253 = vst [vmem:[%s1896_s11 + $0x40] sm:$0xf] %v252_v16 }
  0x28   : > { %255 = vst [vmem:[%s1896_s11 + $0x44] sm:$0xf] %v254_v17 }
  0x29   : > { %257 = vst [vmem:[%s1896_s11 + $0x48] sm:$0xf] %v256_v18 }
  0x2a   : > { %259 = vst [vmem:[%s1896_s11 + $0x4c] sm:$0xf] %v258_v19 }
  0x2b   : > { %261 = vst [vmem:[%s1896_s11 + $0x50] sm:$0xf] %v260_v20 }
  0x2c   : > { %263 = vst [vmem:[%s1896_s11 + $0x54] sm:$0xf] %v262_v21 }
  0x2d   : > { %265 = vst [vmem:[%s1896_s11 + $0x58] sm:$0xf] %v264_v22 }
  0x2e   : > { %267 = vst [vmem:[%s1896_s11 + $0x5c] sm:$0xf] %v266_v23 }
  0x2f   : > { %269 = vst [vmem:[%s1896_s11 + $0x60] sm:$0xf] %v268_v24 }
  0x30   : > { %271 = vst [vmem:[%s1896_s11 + $0x64] sm:$0xf] %v270_v25 }
  0x31   : > { %273 = vst [vmem:[%s1896_s11 + $0x68] sm:$0xf] %v272_v26 }
  0x32   : > { %275 = vst [vmem:[%s1896_s11 + $0x6c] sm:$0xf] %v274_v27 }
  0x33   : > { %277 = vst [vmem:[%s1896_s11 + $0x70] sm:$0xf] %v276_v28 }
  0x34   : > { %279 = vst [vmem:[%s1896_s11 + $0x74] sm:$0xf] %v278_v29 }
  0x35   : > { %281 = vst [vmem:[%s1896_s11 + $0x78] sm:$0xf] %v280_v30 }
  0x36   : > { %283 = vst [vmem:[%s1896_s11 + $0x7c] sm:$0xf] %v282_v31 }
  0x37 PF: > { %p1360_p7 = scmp.ge.s32.totalorder %s1803_s21, 1  ;;  %p394_p8 = scmp.lt.s32.totalorder %s1803_s21, 19 }
  0x39   : > { %p395_p9 = pnand %p1360_p7, %p394_p8 }
  0x3a   : > { %s401_s12 = sand.u32 (!%p395_p9), 1, %s1779_s15   ;;  %s1362_s13 = sshll.u32 (!%p395_p9), %s1787_s17, 4 }
  0x3b   : > { %398 = sbr.rel (%p395_p9) target bundleno = 390 (0x186), region = 73  ;;  %s1361_s14 = sshll.u32 (!%p395_p9), %s401_s12, 7 }
  0x3c   : > { %p450_p10 = scmp.lt.s32.totalorder (!%p395_p9), %s1362_s13, 143  ;;  %s1364_s24 = sshll.u32 (!%p395_p9), %s1791_s18, 5 }
  0x3d   : > { %p462_p11 = scmp.lt.s32.totalorder (!%p395_p9), %s1364_s24, 63  ;;  %s1979_s18 = scalar_lea.vmem (!%p395_p9), [#allocation3], %s1361_s14 }
  0x3e   : > { %p1368_p12 = scmp.ne.s32.totalorder (!%p395_p9), %s1787_s17, 0 }
  0x40   : > { %s2117_s13 = smov (!%p450_p10, %s1362_s13), 143  ;;  %s2119_s24 = smov (!%p462_p11, %s1364_s24), 63 }
  0x41   : > { %s1363_s25 = sshll.u32 %s2117_s13, 2  ;;  %s1365_s30 = sshll.u32 %s2119_s24, 2 }
  0x42   : > { %s1967_s29 = scalar_lea.vmem %s2100_s1, %s1363_s25  ;;  %s1972_s7 = scalar_lea.vmem %s2102_s3, %s1365_s30 }
  0x43   : > { %s1977_s9 = scalar_lea.vmem %s2103_s4, %s1365_s30  ;;  %482 = sbr.rel (%p1368_p12) target bundleno = 105 (0x69), region = 81 }
  0x48   : > { %v1805_v32 = vmov 0.0  }
  0x49   : > { %483 = vst [vmem:[#allocation2 + $0xb0] sm:$0xff] %v1805_v32 }
  0x4a   : > { %484 = vst [vmem:[#allocation2] sm:$0xff] %v1805_v32 }
  0x4b   : > { %485 = vst [vmem:[#allocation2 + $0xd8] sm:$0xff] %v1805_v32 }
  0x4c   : > { %486 = vst [vmem:[#allocation2 + $0x18] sm:$0xff] %v1805_v32 }
  0x4d   : > { %487 = vst [vmem:[#allocation2 + $0x50] sm:$0xff] %v1805_v32 }
  0x4e   : > { %488 = vst [vmem:[#allocation2 + $0x68] sm:$0xff] %v1805_v32 }
  0x4f   : > { %489 = vst [vmem:[#allocation2 + $0x30] sm:$0xff] %v1805_v32 }
  0x50   : > { %490 = vst [vmem:[#allocation2 + $0x48] sm:$0xff] %v1805_v32 }
  0x51   : > { %491 = vst [vmem:[#allocation2 + $0x80] sm:$0xff] %v1805_v32 }
  0x52   : > { %492 = vst [vmem:[#allocation2 + $0x88] sm:$0xff] %v1805_v32 }
  0x53   : > { %493 = vst [vmem:[#allocation2 + $0xe8] sm:$0xff] %v1805_v32 }
  0x54   : > { %494 = vst [vmem:[#allocation2 + $0xb8] sm:$0xff] %v1805_v32 }
  0x55   : > { %495 = vst [vmem:[#allocation2 + $0x60] sm:$0xff] %v1805_v32 }
  0x56   : > { %496 = vst [vmem:[#allocation2 + $0xf0] sm:$0xff] %v1805_v32 }
  0x57   : > { %497 = vst [vmem:[#allocation2 + $0x8] sm:$0xff] %v1805_v32 }
  0x58   : > { %498 = vst [vmem:[#allocation2 + $0x78] sm:$0xff] %v1805_v32 }
  0x59   : > { %499 = vst [vmem:[#allocation2 + $0x38] sm:$0xff] %v1805_v32 }
  0x5a   : > { %500 = vst [vmem:[#allocation2 + $0x58] sm:$0xff] %v1805_v32 }
  0x5b   : > { %501 = vst [vmem:[#allocation2 + $0x40] sm:$0xff] %v1805_v32 }
  0x5c   : > { %502 = vst [vmem:[#allocation2 + $0xc8] sm:$0xff] %v1805_v32 }
  0x5d   : > { %503 = vst [vmem:[#allocation2 + $0xe0] sm:$0xff] %v1805_v32 }
  0x5e   : > { %504 = vst [vmem:[#allocation2 + $0x90] sm:$0xff] %v1805_v32 }
  0x5f   : > { %505 = vst [vmem:[#allocation2 + $0x70] sm:$0xff] %v1805_v32 }
  0x60   : > { %506 = vst [vmem:[#allocation2 + $0xc0] sm:$0xff] %v1805_v32 }
  0x61   : > { %507 = vst [vmem:[#allocation2 + $0xa8] sm:$0xff] %v1805_v32 }
  0x62   : > { %508 = vst [vmem:[#allocation2 + $0xd0] sm:$0xff] %v1805_v32 }
  0x63   : > { %509 = vst [vmem:[#allocation2 + $0x10] sm:$0xff] %v1805_v32 }
  0x64   : > { %510 = vst [vmem:[#allocation2 + $0x28] sm:$0xff] %v1805_v32 }
  0x65   : > { %511 = vst [vmem:[#allocation2 + $0xa0] sm:$0xff] %v1805_v32 }
  0x66   : > { %512 = vst [vmem:[#allocation2 + $0xf8] sm:$0xff] %v1805_v32 }
  0x67   : > { %513 = vst [vmem:[#allocation2 + $0x20] sm:$0xff] %v1805_v32 }
  0x68   : > { %514 = vst [vmem:[#allocation2 + $0x98] sm:$0xff] %v1805_v32 }
  0x69 PF: > { %v1491_v33 = vld [vmem:[%s1967_s29 + $0x38] sm:$0xff]  ;;  %v1490_v34 = vld [vmem:[%s1967_s29 + $0x30] sm:$0xff]  ;;  %v1489_v35 = vld [vmem:[%s1967_s29 + $0x28] sm:$0xff]  ;;  %p1465_p13 = scmp.ne.s32.totalorder %s1787_s17, 8 }
  0x6a   : > { %739 = vmatpush.bf16.msra.mxu0 %v1491_v33  ;;  %1666 = vmatpush.bf16.msra.mxu1 %v1491_v33  ;;  %v1488_v36 = vld [vmem:[%s1967_s29 + $0x20] sm:$0xff]  ;;  %v1487_v37 = vld [vmem:[%s1967_s29 + $0x18] sm:$0xff]  ;;  %v1486_v38 = vld [vmem:[%s1967_s29 + $0x10] sm:$0xff] }
  0x6b   : > { %1667 = vmatpush.bf16.msra.mxu2 %v1491_v33  ;;  %1668 = vmatpush.bf16.msra.mxu3 %v1491_v33  ;;  %v1485_v39 = vld [vmem:[%s1967_s29 + $0x8] sm:$0xff]  ;;  %v1484_v40 = vld [vmem:[%s1967_s29] sm:$0xff]  ;;  %v1470_v49 = vld [vmem:[%s1979_s18 + $0x10] sm:$0xff] }
  0x6c   : > { %v1468_v41 = vld [vmem:[%s1979_s18] sm:$0xff]  ;;  %v1469_v45 = vld [vmem:[%s1979_s18 + $0x8] sm:$0xff]  ;;  %v1474_v50 = vld [vmem:[%s1979_s18 + $0x30] sm:$0xff] }
  0x6d   : > { %v1472_v42 = vld [vmem:[%s1979_s18 + $0x20] sm:$0xff]  ;;  %v1473_v46 = vld [vmem:[%s1979_s18 + $0x28] sm:$0xff]  ;;  %v1478_v51 = vld [vmem:[%s1979_s18 + $0x50] sm:$0xff] }
  0x6e   : > { %740 = vmatpush.bf16.msra.mxu0 %v1490_v34  ;;  %1669 = vmatpush.bf16.msra.mxu1 %v1490_v34  ;;  %v1476_v43 = vld [vmem:[%s1979_s18 + $0x40] sm:$0xff]  ;;  %v1477_v47 = vld [vmem:[%s1979_s18 + $0x48] sm:$0xff]  ;;  %v1482_v52 = vld [vmem:[%s1979_s18 + $0x70] sm:$0xff] }
  0x6f   : > { %1670 = vmatpush.bf16.msra.mxu2 %v1490_v34  ;;  %1671 = vmatpush.bf16.msra.mxu3 %v1490_v34  ;;  %v1480_v44 = vld [vmem:[%s1979_s18 + $0x60] sm:$0xff]  ;;  %v1481_v48 = vld [vmem:[%s1979_s18 + $0x68] sm:$0xff]  ;;  %v1471_v53 = vld [vmem:[%s1979_s18 + $0x18] sm:$0xff] }
  0x70   : > { %v1475_v54 = vld [vmem:[%s1979_s18 + $0x38] sm:$0xff]  ;;  %v515_v57 = vld [vmem:[#allocation2 + $0xb0] sm:$0xff]  ;;  %v523_v58 = vld [vmem:[#allocation2 + $0x80] sm:$0xff] }
  0x71   : > { %v1479_v55 = vld [vmem:[%s1979_s18 + $0x58] sm:$0xff]  ;;  %v539_v0 = vld [vmem:[#allocation2 + $0xa8] sm:$0xff]  ;;  %v516_v1 = vld [vmem:[#allocation2] sm:$0xff] }
  0x72   : > { %741 = vmatpush.bf16.msra.mxu0 %v1489_v35  ;;  %1672 = vmatpush.bf16.msra.mxu1 %v1489_v35  ;;  %v1483_v56 = vld [vmem:[%s1979_s18 + $0x78] sm:$0xff]  ;;  %v524_v2 = vld [vmem:[#allocation2 + $0x88] sm:$0xff]  ;;  %v540_v12 = vld [vmem:[#allocation2 + $0xd0] sm:$0xff] }
  0x73   : > { %1673 = vmatpush.bf16.msra.mxu2 %v1489_v35  ;;  %1674 = vmatpush.bf16.msra.mxu3 %v1489_v35  ;;  %v531_v63 = vld [vmem:[#allocation2 + $0x38] sm:$0xff]  ;;  %v525_v14 = vld [vmem:[#allocation2 + $0xe8] sm:$0xff]  ;;  %v533_v23 = vld [vmem:[#allocation2 + $0x40] sm:$0xff] }
  0x74   : > { %v532_v11 = vld [vmem:[#allocation2 + $0x58] sm:$0xff]  ;;  %v541_v24 = vld [vmem:[#allocation2 + $0x10] sm:$0xff]  ;;  %v534_v35 = vld [vmem:[#allocation2 + $0xc8] sm:$0xff] }
  0x75   : > { %v517_v13 = vld [vmem:[#allocation2 + $0xd8] sm:$0xff] }
  0x76   : > { %742 = vmatpush.bf16.msra.mxu0 %v1488_v36  ;;  %1675 = vmatpush.bf16.msra.mxu1 %v1488_v36  ;;  %v518_v25 = vld [vmem:[#allocation2 + $0x18] sm:$0xff] }
  0x77   : > { %1676 = vmatpush.bf16.msra.mxu2 %v1488_v36  ;;  %1677 = vmatpush.bf16.msra.mxu3 %v1488_v36  ;;  %v526_v26 = vld [vmem:[#allocation2 + $0xb8] sm:$0xff]  ;;  %v542_v36 = vld [vmem:[#allocation2 + $0x28] sm:$0xff] }
  0x7a   : > { %743 = vmatpush.bf16.msra.mxu0 %v1487_v37  ;;  %1678 = vmatpush.bf16.msra.mxu1 %v1487_v37 }
  0x7b   : > { %1679 = vmatpush.bf16.msra.mxu2 %v1487_v37  ;;  %1680 = vmatpush.bf16.msra.mxu3 %v1487_v37  ;;  %v519_v37 = vld [vmem:[#allocation2 + $0x50] sm:$0xff] }
  0x7e   : > { %744 = vmatpush.bf16.msra.mxu0 %v1486_v38  ;;  %1681 = vmatpush.bf16.msra.mxu1 %v1486_v38 }
  0x7f   : > { %1682 = vmatpush.bf16.msra.mxu2 %v1486_v38  ;;  %1683 = vmatpush.bf16.msra.mxu3 %v1486_v38  ;;  %v527_v38 = vld [vmem:[#allocation2 + $0x60] sm:$0xff] }
  0x82   : > { %745 = vmatpush.bf16.msra.mxu0 %v1485_v39  ;;  %1684 = vmatpush.bf16.msra.mxu1 %v1485_v39 }
  0x83   : > { %1685 = vmatpush.bf16.msra.mxu2 %v1485_v39  ;;  %1686 = vmatpush.bf16.msra.mxu3 %v1485_v39 }
  0x86   : > { %746 = vmatpush.bf16.msra.mxu0 %v1484_v40  ;;  %1687 = vmatpush.bf16.msra.mxu1 %v1484_v40 }
  0x87   : > { %1688 = vmatpush.bf16.msra.mxu2 %v1484_v40  ;;  %1689 = vmatpush.bf16.msra.mxu3 %v1484_v40 }
  0x89   : > { %747 = vmatmul.bf16.vlgmr.msra.gmra.mxu0 %v1468_v41  ;;  %767 = vmatmul.bf16.vlgmr.msra.gmra.mxu1 %v1472_v42 }
  0x8a   : > { %787 = vmatmul.bf16.vlgmr.msra.gmra.mxu2 %v1476_v43  ;;  %807 = vmatmul.bf16.vlgmr.msra.gmra.mxu3 %v1480_v44 }
  0x99   : > { %752 = vmatmul.bf16.gmra.mxu0 %v1469_v45  ;;  %772 = vmatmul.bf16.gmra.mxu1 %v1473_v46 }
  0x9a   : > { %792 = vmatmul.bf16.gmra.mxu2 %v1477_v47  ;;  %812 = vmatmul.bf16.gmra.mxu3 %v1481_v48  ;;  %v535_v47 = vld [vmem:[#allocation2 + $0xe0] sm:$0xff] }
  0x9b   : > { %v543_v48 = vld [vmem:[#allocation2 + $0xa0] sm:$0xff] }
  0xa9   : > { %757 = vmatmul.bf16.gmra.mxu0 %v1470_v49  ;;  %777 = vmatmul.bf16.gmra.mxu1 %v1474_v50  ;;  %v520_v49 = vld [vmem:[#allocation2 + $0x68] sm:$0xff]  ;;  %v528_v50 = vld [vmem:[#allocation2 + $0xf0] sm:$0xff] }
  0xaa   : > { %797 = vmatmul.bf16.gmra.mxu2 %v1478_v51  ;;  %817 = vmatmul.bf16.gmra.mxu3 %v1482_v52 }
  0xb9   : > { %762 = vmatmul.bf16.gmra.mxu0 %v1471_v53  ;;  %782 = vmatmul.bf16.gmra.mxu1 %v1475_v54 }
  0xba   : > { %802 = vmatmul.bf16.gmra.mxu2 %v1479_v55  ;;  %822 = vmatmul.bf16.gmra.mxu3 %v1483_v56 }
 0x106   : > { %v748_v59 = vpop.f32.mrf.mxu0  ;;  %v768_v60 = vpop.f32.mrf.mxu1 }
 0x107   : > { %v828_v61 = vadd.f32 %v748_v59, %v515_v57  ;;  %v836_v62 = vadd.f32 %v768_v60, %v523_v58  ;;  %v536_v59 = vld [vmem:[#allocation2 + $0x90] sm:$0xff]  ;;  %v544_v60 = vld [vmem:[#allocation2 + $0xf8] sm:$0xff] }
 0x109   : > { %860 = vst [vmem:[#allocation2 + $0xb0] sm:$0xff] %v828_v61  ;;  %v521_v61 = vld [vmem:[#allocation2 + $0x30] sm:$0xff] }
 0x10a   : > { %868 = vst [vmem:[#allocation2 + $0x80] sm:$0xff] %v836_v62  ;;  %v529_v62 = vld [vmem:[#allocation2 + $0x8] sm:$0xff] }
 0x10d   : > { %v788_v3 = vpop.f32.mrf.mxu2  ;;  %v808_v4 = vpop.f32.mrf.mxu3 }
 0x10e   : > { %v844_v5 = vadd.f32 %v788_v3, %v531_v63  ;;  %v852_v6 = vadd.f32 %v808_v4, %v539_v0  ;;  %v750_v7 = vpop.f32.mrf.mxu0  ;;  %v770_v8 = vpop.f32.mrf.mxu1 }
 0x10f   : > { %v829_v9 = vadd.f32 %v750_v7, %v516_v1  ;;  %v837_v10 = vadd.f32 %v770_v8, %v524_v2  ;;  %v537_v7 = vld [vmem:[#allocation2 + $0x70] sm:$0xff]  ;;  %v545_v8 = vld [vmem:[#allocation2 + $0x20] sm:$0xff] }
 0x110   : > { %876 = vst [vmem:[#allocation2 + $0x38] sm:$0xff] %v844_v5 }
 0x111   : > { %884 = vst [vmem:[#allocation2 + $0xa8] sm:$0xff] %v852_v6 }
 0x112   : > { %861 = vst [vmem:[#allocation2] sm:$0xff] %v829_v9  ;;  %v522_v9 = vld [vmem:[#allocation2 + $0x48] sm:$0xff] }
 0x113   : > { %869 = vst [vmem:[#allocation2 + $0x88] sm:$0xff] %v837_v10  ;;  %v530_v10 = vld [vmem:[#allocation2 + $0x78] sm:$0xff] }
 0x115   : > { %v790_v15 = vpop.f32.mrf.mxu2  ;;  %v810_v16 = vpop.f32.mrf.mxu3 }
 0x116   : > { %v845_v17 = vadd.f32 %v790_v15, %v532_v11  ;;  %v853_v18 = vadd.f32 %v810_v16, %v540_v12  ;;  %v753_v19 = vpop.f32.mrf.mxu0  ;;  %v773_v20 = vpop.f32.mrf.mxu1 }
 0x117   : > { %v830_v21 = vadd.f32 %v753_v19, %v517_v13  ;;  %v838_v22 = vadd.f32 %v773_v20, %v525_v14  ;;  %v538_v19 = vld [vmem:[#allocation2 + $0xc0] sm:$0xff]  ;;  %v546_v20 = vld [vmem:[#allocation2 + $0x98] sm:$0xff] }
 0x118   : > { %877 = vst [vmem:[#allocation2 + $0x58] sm:$0xff] %v845_v17 }
 0x119   : > { %885 = vst [vmem:[#allocation2 + $0xd0] sm:$0xff] %v853_v18 }
 0x11a   : > { %862 = vst [vmem:[#allocation2 + $0xd8] sm:$0xff] %v830_v21 }
 0x11b   : > { %870 = vst [vmem:[#allocation2 + $0xe8] sm:$0xff] %v838_v22 }
 0x11d   : > { %v793_v27 = vpop.f32.mrf.mxu2  ;;  %v813_v28 = vpop.f32.mrf.mxu3 }
 0x11e   : > { %v846_v29 = vadd.f32 %v793_v27, %v533_v23  ;;  %v854_v30 = vadd.f32 %v813_v28, %v541_v24  ;;  %v755_v31 = vpop.f32.mrf.mxu0  ;;  %v775_v32 = vpop.f32.mrf.mxu1 }
 0x11f   : > { %v831_v33 = vadd.f32 %v755_v31, %v518_v25  ;;  %v839_v34 = vadd.f32 %v775_v32, %v526_v26 }
 0x120   : > { %878 = vst [vmem:[#allocation2 + $0x40] sm:$0xff] %v846_v29 }
 0x121   : > { %886 = vst [vmem:[#allocation2 + $0x10] sm:$0xff] %v854_v30 }
 0x122   : > { %863 = vst [vmem:[#allocation2 + $0x18] sm:$0xff] %v831_v33 }
 0x123   : > { %871 = vst [vmem:[#allocation2 + $0xb8] sm:$0xff] %v839_v34 }
 0x125   : > { %v795_v39 = vpop.f32.mrf.mxu2  ;;  %v815_v40 = vpop.f32.mrf.mxu3 }
 0x126   : > { %v847_v41 = vadd.f32 %v795_v39, %v534_v35  ;;  %v855_v42 = vadd.f32 %v815_v40, %v542_v36  ;;  %v758_v43 = vpop.f32.mrf.mxu0  ;;  %v778_v44 = vpop.f32.mrf.mxu1 }
 0x127   : > { %v832_v45 = vadd.f32 %v758_v43, %v519_v37  ;;  %v840_v46 = vadd.f32 %v778_v44, %v527_v38 }
 0x128   : > { %879 = vst [vmem:[#allocation2 + $0xc8] sm:$0xff] %v847_v41 }
 0x129   : > { %887 = vst [vmem:[#allocation2 + $0x28] sm:$0xff] %v855_v42 }
 0x12a   : > { %864 = vst [vmem:[#allocation2 + $0x50] sm:$0xff] %v832_v45 }
 0x12b   : > { %872 = vst [vmem:[#allocation2 + $0x60] sm:$0xff] %v840_v46 }
 0x12d   : > { %v798_v51 = vpop.f32.mrf.mxu2  ;;  %v818_v52 = vpop.f32.mrf.mxu3 }
 0x12e   : > { %v848_v53 = vadd.f32 %v798_v51, %v535_v47  ;;  %v856_v54 = vadd.f32 %v818_v52, %v543_v48  ;;  %v760_v55 = vpop.f32.mrf.mxu0  ;;  %v780_v56 = vpop.f32.mrf.mxu1 }
 0x12f   : > { %v833_v57 = vadd.f32 %v760_v55, %v520_v49  ;;  %v841_v58 = vadd.f32 %v780_v56, %v528_v50 }
 0x130   : > { %880 = vst [vmem:[#allocation2 + $0xe0] sm:$0xff] %v848_v53 }
 0x131   : > { %888 = vst [vmem:[#allocation2 + $0xa0] sm:$0xff] %v856_v54 }
 0x132   : > { %865 = vst [vmem:[#allocation2 + $0x68] sm:$0xff] %v833_v57 }
 0x133   : > { %873 = vst [vmem:[#allocation2 + $0xf0] sm:$0xff] %v841_v58 }
 0x135   : > { %v800_v63 = vpop.f32.mrf.mxu2  ;;  %v820_v0 = vpop.f32.mrf.mxu3 }
 0x136   : > { %v849_v1 = vadd.f32 %v800_v63, %v536_v59  ;;  %v857_v2 = vadd.f32 %v820_v0, %v544_v60  ;;  %v763_v3 = vpop.f32.mrf.mxu0  ;;  %v783_v4 = vpop.f32.mrf.mxu1 }
 0x137   : > { %v834_v5 = vadd.f32 %v763_v3, %v521_v61  ;;  %v842_v6 = vadd.f32 %v783_v4, %v529_v62 }
 0x138   : > { %881 = vst [vmem:[#allocation2 + $0x90] sm:$0xff] %v849_v1 }
 0x139   : > { %889 = vst [vmem:[#allocation2 + $0xf8] sm:$0xff] %v857_v2 }
 0x13a   : > { %866 = vst [vmem:[#allocation2 + $0x30] sm:$0xff] %v834_v5 }
 0x13b   : > { %874 = vst [vmem:[#allocation2 + $0x8] sm:$0xff] %v842_v6 }
 0x13d   : > { %v803_v11 = vpop.f32.mrf.mxu2  ;;  %v823_v12 = vpop.f32.mrf.mxu3 }
 0x13e   : > { %v850_v13 = vadd.f32 %v803_v11, %v537_v7  ;;  %v858_v14 = vadd.f32 %v823_v12, %v545_v8  ;;  %v765_v15 = vpop.f32.mrf.mxu0  ;;  %v785_v16 = vpop.f32.mrf.mxu1 }
 0x13f   : > { %v835_v17 = vadd.f32 %v765_v15, %v522_v9  ;;  %v843_v18 = vadd.f32 %v785_v16, %v530_v10 }
 0x140   : > { %882 = vst [vmem:[#allocation2 + $0x70] sm:$0xff] %v850_v13 }
 0x141   : > { %890 = vst [vmem:[#allocation2 + $0x20] sm:$0xff] %v858_v14 }
 0x142   : > { %867 = vst [vmem:[#allocation2 + $0x48] sm:$0xff] %v835_v17 }
 0x143   : > { %875 = vst [vmem:[#allocation2 + $0x78] sm:$0xff] %v843_v18 }
 0x145   : > { %v805_v21 = vpop.f32.mrf.mxu2  ;;  %v825_v22 = vpop.f32.mrf.mxu3  ;;  %895 = sbr.rel (%p1465_p13) target bundleno = 390 (0x186), region = 85 }
 0x146   : > { %v851_v23 = vadd.f32 %v805_v21, %v538_v19  ;;  %v859_v24 = vadd.f32 %v825_v22, %v546_v20 }
 0x148   : > { %883 = vst [vmem:[#allocation2 + $0xc0] sm:$0xff] %v851_v23 }
 0x149   : > { %891 = vst [vmem:[#allocation2 + $0x98] sm:$0xff] %v859_v24 }
 0x14a   : > { %v896_v25 = vld [vmem:[#allocation2 + $0xb0] sm:$0xff]  ;;  %v897_v26 = vld [vmem:[#allocation2] sm:$0xff]  ;;  %v898_v29 = vld [vmem:[#allocation2 + $0xd8] sm:$0xff] }
 0x14b   : > { %v2010_v27 = vld [vmem:[%s2101_s2] ss:$0 sm:$0xff]  ;;  %v899_v32 = vld [vmem:[#allocation2 + $0x18] sm:$0xff]  ;;  %v1636_v33 = vld [vmem:[%s1972_s7 + $0x8] sm:$0xff]  }
 0x14c   : > { %v1493_v28 = vld [vmem:[%s1972_s7] sm:$0xff]   ;;  %v900_v34 = vld [vmem:[#allocation2 + $0x50] sm:$0xff]  ;;  %v932_v35 = vadd.f32 %v2010_v27, %v896_v25  ;;  %v933_v36 = vadd.f32 %v2010_v27, %v897_v26  ;;  %v934_v37 = vadd.f32 %v2010_v27, %v898_v29  ;;  %v935_v38 = vadd.f32 %v2010_v27, %v899_v32  ;;  %v901_v39 = vld [vmem:[#allocation2 + $0x68] sm:$0xff] }
 0x14d   : > { %v1494_v30 = vunpack.c.l.bf16 %v1493_v28  ;;  %v1495_v31 = vunpack.c.h.bf16 %v1493_v28  ;;  %v1498_v40 = vunpack.c.l.bf16 %v1636_v33  ;;  %v1499_v41 = vunpack.c.h.bf16 %v1636_v33  ;;  %v1637_v50 = vld [vmem:[%s1972_s7 + $0x10] sm:$0xff]   ;;  %v903_v56 = vld [vmem:[#allocation2 + $0x48] sm:$0xff]  ;;  %v1638_v1 = vld [vmem:[%s1972_s7 + $0x18] sm:$0xff]  }
 0x14e   : > { %v936_v42 = vadd.f32 %v2010_v27, %v900_v34  ;;  %v937_v43 = vadd.f32 %v2010_v27, %v901_v39  ;;  %vm964_vm0 = vcmp.ge.f32.partialorder %v932_v35, 0.0  ;;  %vm965_vm1 = vcmp.ge.f32.partialorder %v933_v36, 0.0  ;;  %v902_v51 = vld [vmem:[#allocation2 + $0x30] sm:$0xff]  ;;  %v904_v6 = vld [vmem:[#allocation2 + $0x80] sm:$0xff]  ;;  %v905_v7 = vld [vmem:[#allocation2 + $0x88] sm:$0xff] }
 0x14f   : > { %v996_v44 = vmul.f32 0.2, %v932_v35  ;;  %v997_v45 = vmul.f32 0.2, %v933_v36  ;;  %vm966_vm2 = vcmp.ge.f32.partialorder %v934_v37, 0.0  ;;  %vm967_vm3 = vcmp.ge.f32.partialorder %v935_v38, 0.0 }
 0x150   : > { %v998_v46 = vmul.f32 0.2, %v934_v37  ;;  %v999_v47 = vmul.f32 0.2, %v935_v38  ;;  %vm968_vm4 = vcmp.ge.f32.partialorder %v936_v42, 0.0  ;;  %vm969_vm5 = vcmp.ge.f32.partialorder %v937_v43, 0.0 }
 0x151   : > { %v1028_v48 = vsel %vm964_vm0, %v932_v35, %v996_v44  ;;  %v1029_v49 = vsel %vm965_vm1, %v933_v36, %v997_v45  ;;  %v1000_v59 = vmul.f32 0.2, %v936_v42  ;;  %v1001_v60 = vmul.f32 0.2, %v937_v43  ;;  %v1639_v11 = vld [vmem:[%s1972_s7 + $0x20] sm:$0xff]   ;;  %v906_v19 = vld [vmem:[#allocation2 + $0xe8] sm:$0xff] }
 0x152   : > { %v1124_v52 = vadd.f32 %v1494_v30, %v1028_v48  ;;  %v1125_v53 = vadd.f32 %v1495_v31, %v1029_v49  ;;  %v1030_v54 = vsel %vm966_vm2, %v934_v37, %v998_v46  ;;  %v1031_v55 = vsel %vm967_vm3, %v935_v38, %v999_v47  ;;  %v907_v20 = vld [vmem:[#allocation2 + $0xb8] sm:$0xff]  ;;  %v1640_v21 = vld [vmem:[%s1972_s7 + $0x28] sm:$0xff]   ;;  %v908_v26 = vld [vmem:[#allocation2 + $0x60] sm:$0xff] }
 0x153   : > { %v1126_v57 = vadd.f32 %v1498_v40, %v1030_v54  ;;  %v1127_v58 = vadd.f32 %v1499_v41, %v1031_v55  ;;  %v1502_v62 = vunpack.c.l.bf16 %v1637_v50  ;;  %v1503_v63 = vunpack.c.h.bf16 %v1637_v50  ;;  %v909_v34 = vld [vmem:[#allocation2 + $0xf0] sm:$0xff]  ;;  %v910_v49 = vld [vmem:[#allocation2 + $0x8] sm:$0xff]  ;;  %v911_v50 = vld [vmem:[#allocation2 + $0x78] sm:$0xff] }
 0x154   : > { %v1559_v61 = vpack.c.bf16 %v1125_v53, %v1124_v52  ;;  %v938_v0 = vadd.f32 %v2010_v27, %v902_v51  ;;  %v1032_v3 = vsel %vm968_vm4, %v936_v42, %v1000_v59  ;;  %v1033_v4 = vsel %vm969_vm5, %v937_v43, %v1001_v60  ;;  %v1641_v39 = vld [vmem:[%s1972_s7 + $0x30] sm:$0xff]   ;;  %v1642_v51 = vld [vmem:[%s1972_s7 + $0x38] sm:$0xff]  }
 0x155   : > { %v1564_v2 = vpack.c.bf16 %v1127_v58, %v1126_v57  ;;  %v939_v5 = vadd.f32 %v2010_v27, %v903_v56  ;;  %v1128_v8 = vadd.f32 %v1502_v62, %v1032_v3  ;;  %v1129_v9 = vadd.f32 %v1503_v63, %v1033_v4  ;;  %v912_v55 = vld [vmem:[#allocation2 + $0x38] sm:$0xff] }
 0x156   : > { %1560 = vst [vmem:[%s1977_s9] sm:$0xff] %v1559_v61   ;;  %vm970_vm6 = vcmp.ge.f32.partialorder %v938_v0, 0.0  ;;  %v1002_v10 = vmul.f32 0.2, %v938_v0  ;;  %v1506_v13 = vunpack.c.l.bf16 %v1638_v1  ;;  %v1507_v14 = vunpack.c.h.bf16 %v1638_v1 }
 0x157   : > { %1651 = vst [vmem:[%s1977_s9 + $0x8] sm:$0xff] %v1564_v2   ;;  %vm971_vm7 = vcmp.ge.f32.partialorder %v939_v5, 0.0  ;;  %v1003_v12 = vmul.f32 0.2, %v939_v5  ;;  %v1569_v15 = vpack.c.bf16 %v1129_v9, %v1128_v8  ;;  %v940_v17 = vadd.f32 %v2010_v27, %v904_v6  ;;  %v914_v8 = vld [vmem:[#allocation2 + $0x40] sm:$0xff]  ;;  %v915_v9 = vld [vmem:[#allocation2 + $0xc8] sm:$0xff] }
 0x158   : > { %v1034_v16 = vsel %vm970_vm6, %v938_v0, %v1002_v10  ;;  %v941_v18 = vadd.f32 %v2010_v27, %v905_v7  ;;  %v1510_v24 = vunpack.c.l.bf16 %v1639_v11  ;;  %v1511_v25 = vunpack.c.h.bf16 %v1639_v11  ;;  %v913_v0 = vld [vmem:[#allocation2 + $0x58] sm:$0xff] }
 0x159   : > { %v1035_v22 = vsel %vm971_vm7, %v939_v5, %v1003_v12  ;;  %v1130_v23 = vadd.f32 %v1506_v13, %v1034_v16  ;;  %1652 = vst [vmem:[%s1977_s9 + $0x10] sm:$0xff] %v1569_v15   ;;  %vm972_vm8 = vcmp.ge.f32.partialorder %v940_v17, 0.0  ;;  %v1004_v29 = vmul.f32 0.2, %v940_v17  ;;  %v1643_v5 = vld [vmem:[%s1972_s7 + $0x40] sm:$0xff]  }
 0x15a   : > { %v1131_v28 = vadd.f32 %v1507_v14, %v1035_v22  ;;  %vm973_vm9 = vcmp.ge.f32.partialorder %v941_v18, 0.0  ;;  %v1005_v30 = vmul.f32 0.2, %v941_v18  ;;  %v942_v31 = vadd.f32 %v2010_v27, %v906_v19 }
 0x15b   : > { %v943_v32 = vadd.f32 %v2010_v27, %v907_v20  ;;  %v1514_v33 = vunpack.c.l.bf16 %v1640_v21  ;;  %v1036_v36 = vsel %vm972_vm8, %v940_v17, %v1004_v29  ;;  %v1515_v37 = vunpack.c.h.bf16 %v1640_v21  ;;  %v1644_v17 = vld [vmem:[%s1972_s7 + $0x48] sm:$0xff]  }
 0x15c   : > { %v1574_v35 = vpack.c.bf16 %v1131_v28, %v1130_v23  ;;  %v944_v38 = vadd.f32 %v2010_v27, %v908_v26  ;;  %v1037_v40 = vsel %vm973_vm9, %v941_v18, %v1005_v30  ;;  %v1132_v41 = vadd.f32 %v1510_v24, %v1036_v36  ;;  %v917_v26 = vld [vmem:[#allocation2 + $0x90] sm:$0xff] }
 0x15d   : > { %vm974_vm10 = vcmp.ge.f32.partialorder %v942_v31, 0.0  ;;  %vm975_vm11 = vcmp.ge.f32.partialorder %v943_v32, 0.0  ;;  %v1133_v42 = vadd.f32 %v1511_v25, %v1037_v40  ;;  %v1006_v43 = vmul.f32 0.2, %v942_v31  ;;  %v916_v25 = vld [vmem:[#allocation2 + $0xe0] sm:$0xff] }
 0x15e   : > { %1653 = vst [vmem:[%s1977_s9 + $0x18] sm:$0xff] %v1574_v35   ;;  %v1007_v44 = vmul.f32 0.2, %v943_v32  ;;  %v945_v45 = vadd.f32 %v2010_v27, %v909_v34  ;;  %vm976_vm12 = vcmp.ge.f32.partialorder %v944_v38, 0.0  ;;  %v1008_v46 = vmul.f32 0.2, %v944_v38 }
 0x15f   : > { %v1518_v47 = vunpack.c.l.bf16 %v1641_v39  ;;  %v1519_v48 = vunpack.c.h.bf16 %v1641_v39  ;;  %v1579_v52 = vpack.c.bf16 %v1133_v42, %v1132_v41  ;;  %v1038_v53 = vsel %vm974_vm10, %v942_v31, %v1006_v43  ;;  %v919_v43 = vld [vmem:[#allocation2 + $0xc0] sm:$0xff] }
 0x160   : > { %v1039_v54 = vsel %vm975_vm11, %v943_v32, %v1007_v44  ;;  %vm977_vm13 = vcmp.ge.f32.partialorder %v945_v45, 0.0  ;;  %v1134_v56 = vadd.f32 %v1514_v33, %v1038_v53  ;;  %v1009_v58 = vmul.f32 0.2, %v945_v45  ;;  %v1645_v32 = vld [vmem:[%s1972_s7 + $0x50] sm:$0xff]  }
 0x161   : > { %v1135_v57 = vadd.f32 %v1515_v37, %v1039_v54  ;;  %v1040_v59 = vsel %vm976_vm12, %v944_v38, %v1008_v46  ;;  %1654 = vst [vmem:[%s1977_s9 + $0x20] sm:$0xff] %v1579_v52   ;;  %v946_v61 = vadd.f32 %v2010_v27, %v910_v49  ;;  %v947_v62 = vadd.f32 %v2010_v27, %v911_v50  ;;  %v918_v33 = vld [vmem:[#allocation2 + $0x70] sm:$0xff] }
 0x162   : > { %v1136_v60 = vadd.f32 %v1518_v47, %v1040_v59  ;;  %v1522_v63 = vunpack.c.l.bf16 %v1642_v51  ;;  %v1041_v2 = vsel %vm977_vm13, %v945_v45, %v1009_v58  ;;  %v1523_v3 = vunpack.c.h.bf16 %v1642_v51  ;;  %v1646_v45 = vld [vmem:[%s1972_s7 + $0x58] sm:$0xff]  }
 0x163   : > { %v1584_v1 = vpack.c.bf16 %v1135_v57, %v1134_v56  ;;  %v948_v4 = vadd.f32 %v2010_v27, %v912_v55  ;;  %v1137_v6 = vadd.f32 %v1519_v48, %v1041_v2  ;;  %vm978_vm14 = vcmp.ge.f32.partialorder %v946_v61, 0.0  ;;  %v920_v55 = vld [vmem:[#allocation2 + $0xa8] sm:$0xff]  ;;  %v921_v56 = vld [vmem:[#allocation2 + $0xd0] sm:$0xff]  ;;  %v1647_v57 = vld [vmem:[%s1972_s7 + $0x60] sm:$0xff]  }
 0x164   : > { %vm979_vm15 = vcmp.ge.f32.partialorder %v947_v62, 0.0  ;;  %v1010_v7 = vmul.f32 0.2, %v946_v61  ;;  %v1011_v10 = vmul.f32 0.2, %v947_v62  ;;  %v949_v11 = vadd.f32 %v2010_v27, %v913_v0 }
 0x165   : > { %1655 = vst [vmem:[%s1977_s9 + $0x28] sm:$0xff] %v1584_v1   ;;  %vm980_vm0 = vcmp.ge.f32.partialorder %v948_v4, 0.0  ;;  %v1012_v12 = vmul.f32 0.2, %v948_v4  ;;  %v1589_v13 = vpack.c.bf16 %v1137_v6, %v1136_v60  ;;  %v1526_v15 = vunpack.c.l.bf16 %v1643_v5  ;;  %v923_v6 = vld [vmem:[#allocation2 + $0x28] sm:$0xff] }
 0x166   : > { %v1042_v14 = vsel %vm978_vm14, %v946_v61, %v1010_v7  ;;  %v1527_v16 = vunpack.c.h.bf16 %v1643_v5  ;;  %v1043_v18 = vsel %vm979_vm15, %v947_v62, %v1011_v10  ;;  %vm981_vm1 = vcmp.ge.f32.partialorder %v949_v11, 0.0  ;;  %v922_v5 = vld [vmem:[#allocation2 + $0x10] sm:$0xff]  ;;  %v1648_v7 = vld [vmem:[%s1972_s7 + $0x68] sm:$0xff]  }
 0x167   : > { %v1138_v19 = vadd.f32 %v1522_v63, %v1042_v14  ;;  %v1013_v20 = vmul.f32 0.2, %v949_v11  ;;  %1656 = vst [vmem:[%s1977_s9 + $0x30] sm:$0xff] %v1589_v13   ;;  %v1139_v21 = vadd.f32 %v1523_v3, %v1043_v18  ;;  %v1044_v22 = vsel %vm980_vm0, %v948_v4, %v1012_v12  ;;  %v924_v12 = vld [vmem:[#allocation2 + $0xa0] sm:$0xff] }
 0x168   : > { %v950_v23 = vadd.f32 %v2010_v27, %v914_v8  ;;  %v951_v24 = vadd.f32 %v2010_v27, %v915_v9  ;;  %v1140_v29 = vadd.f32 %v1526_v15, %v1044_v22  ;;  %v1530_v30 = vunpack.c.l.bf16 %v1644_v17 }
 0x169   : > { %v1045_v28 = vsel %vm981_vm1, %v949_v11, %v1013_v20  ;;  %v1531_v31 = vunpack.c.h.bf16 %v1644_v17  ;;  %v1594_v34 = vpack.c.bf16 %v1139_v21, %v1138_v19  ;;  %v952_v38 = vadd.f32 %v2010_v27, %v916_v25  ;;  %v925_v19 = vld [vmem:[#allocation2 + $0xf8] sm:$0xff] }
 0x16a   : > { %v1141_v35 = vadd.f32 %v1527_v16, %v1045_v28  ;;  %vm982_vm2 = vcmp.ge.f32.partialorder %v950_v23, 0.0  ;;  %vm983_vm3 = vcmp.ge.f32.partialorder %v951_v24, 0.0  ;;  %v1014_v36 = vmul.f32 0.2, %v950_v23 }
 0x16b   : > { %v1015_v37 = vmul.f32 0.2, %v951_v24  ;;  %v953_v39 = vadd.f32 %v2010_v27, %v917_v26  ;;  %1657 = vst [vmem:[%s1977_s9 + $0x38] sm:$0xff] %v1594_v34   ;;  %v1534_v41 = vunpack.c.l.bf16 %v1645_v32  ;;  %v1535_v42 = vunpack.c.h.bf16 %v1645_v32 }
 0x16c   : > { %v1599_v40 = vpack.c.bf16 %v1141_v35, %v1140_v29  ;;  %v954_v44 = vadd.f32 %v2010_v27, %v918_v33  ;;  %v1046_v46 = vsel %vm982_vm2, %v950_v23, %v1014_v36  ;;  %vm984_vm4 = vcmp.ge.f32.partialorder %v952_v38, 0.0  ;;  %v926_v35 = vld [vmem:[#allocation2 + $0x20] sm:$0xff]  ;;  %v927_v36 = vld [vmem:[#allocation2 + $0x98] sm:$0xff] }
 0x16d   : > { %v1047_v47 = vsel %vm983_vm3, %v951_v24, %v1015_v37  ;;  %vm985_vm5 = vcmp.ge.f32.partialorder %v953_v39, 0.0  ;;  %v1142_v48 = vadd.f32 %v1530_v30, %v1046_v46  ;;  %v1016_v50 = vmul.f32 0.2, %v952_v38  ;;  %v1649_v24 = vld [vmem:[%s1972_s7 + $0x70] sm:$0xff]  }
 0x16e   : > { %1658 = vst [vmem:[%s1977_s9 + $0x40] sm:$0xff] %v1599_v40   ;;  %v1143_v49 = vadd.f32 %v1531_v31, %v1047_v47  ;;  %v1017_v51 = vmul.f32 0.2, %v953_v39  ;;  %v955_v52 = vadd.f32 %v2010_v27, %v919_v43  ;;  %vm986_vm6 = vcmp.ge.f32.partialorder %v954_v44, 0.0  ;;  %v1650_v40 = vld [vmem:[%s1972_s7 + $0x78] sm:$0xff]  }
 0x16f   : > { %v1018_v53 = vmul.f32 0.2, %v954_v44  ;;  %v1538_v54 = vunpack.c.l.bf16 %v1646_v45  ;;  %v1048_v59 = vsel %vm984_vm4, %v952_v38, %v1016_v50  ;;  %v1539_v61 = vunpack.c.h.bf16 %v1646_v45 }
 0x170   : > { %v1604_v58 = vpack.c.bf16 %v1143_v49, %v1142_v48  ;;  %v1049_v60 = vsel %vm985_vm5, %v953_v39, %v1017_v51  ;;  %v1144_v62 = vadd.f32 %v1534_v41, %v1048_v59  ;;  %vm987_vm7 = vcmp.ge.f32.partialorder %v955_v52, 0.0 }
 0x171   : > { %v1145_v63 = vadd.f32 %v1535_v42, %v1049_v60  ;;  %v1019_v0 = vmul.f32 0.2, %v955_v52  ;;  %v1050_v1 = vsel %vm986_vm6, %v954_v44, %v1018_v53  ;;  %v956_v2 = vadd.f32 %v2010_v27, %v920_v55 }
 0x172   : > { %1659 = vst [vmem:[%s1977_s9 + $0x48] sm:$0xff] %v1604_v58   ;;  %v957_v3 = vadd.f32 %v2010_v27, %v921_v56  ;;  %v1542_v4 = vunpack.c.l.bf16 %v1647_v57  ;;  %v1146_v10 = vadd.f32 %v1538_v54, %v1050_v1  ;;  %v1543_v11 = vunpack.c.h.bf16 %v1647_v57 }
 0x173   : > { %v1609_v8 = vpack.c.bf16 %v1145_v63, %v1144_v62  ;;  %v1051_v9 = vsel %vm987_vm7, %v955_v52, %v1019_v0  ;;  %vm988_vm8 = vcmp.ge.f32.partialorder %v956_v2, 0.0  ;;  %v1020_v14 = vmul.f32 0.2, %v956_v2 }
 0x174   : > { %v1147_v13 = vadd.f32 %v1539_v61, %v1051_v9  ;;  %vm989_vm9 = vcmp.ge.f32.partialorder %v957_v3, 0.0  ;;  %v1021_v15 = vmul.f32 0.2, %v957_v3  ;;  %v958_v16 = vadd.f32 %v2010_v27, %v922_v5 }
 0x175   : > { %1660 = vst [vmem:[%s1977_s9 + $0x50] sm:$0xff] %v1609_v8   ;;  %v959_v17 = vadd.f32 %v2010_v27, %v923_v6  ;;  %v1546_v18 = vunpack.c.l.bf16 %v1648_v7  ;;  %v1052_v21 = vsel %vm988_vm8, %v956_v2, %v1020_v14  ;;  %v1547_v22 = vunpack.c.h.bf16 %v1648_v7 }
 0x176   : > { %v1614_v20 = vpack.c.bf16 %v1147_v13, %v1146_v10  ;;  %v960_v23 = vadd.f32 %v2010_v27, %v924_v12  ;;  %v1053_v25 = vsel %vm989_vm9, %v957_v3, %v1021_v15  ;;  %v1148_v26 = vadd.f32 %v1542_v4, %v1052_v21 }
 0x177   : > { %vm990_vm10 = vcmp.ge.f32.partialorder %v958_v16, 0.0  ;;  %vm991_vm11 = vcmp.ge.f32.partialorder %v959_v17, 0.0  ;;  %v1149_v28 = vadd.f32 %v1543_v11, %v1053_v25  ;;  %v1022_v29 = vmul.f32 0.2, %v958_v16 }
 0x178   : > { %1661 = vst [vmem:[%s1977_s9 + $0x58] sm:$0xff] %v1614_v20   ;;  %v1023_v30 = vmul.f32 0.2, %v959_v17  ;;  %v961_v31 = vadd.f32 %v2010_v27, %v925_v19  ;;  %vm992_vm12 = vcmp.ge.f32.partialorder %v960_v23, 0.0  ;;  %v1024_v32 = vmul.f32 0.2, %v960_v23 }
 0x179   : > { %v1550_v33 = vunpack.c.l.bf16 %v1649_v24  ;;  %v1551_v34 = vunpack.c.h.bf16 %v1649_v24  ;;  %v1619_v37 = vpack.c.bf16 %v1149_v28, %v1148_v26  ;;  %v1054_v38 = vsel %vm990_vm10, %v958_v16, %v1022_v29 }
 0x17a   : > { %v1055_v39 = vsel %vm991_vm11, %v959_v17, %v1023_v30  ;;  %vm993_vm13 = vcmp.ge.f32.partialorder %v961_v31, 0.0  ;;  %v1150_v41 = vadd.f32 %v1546_v18, %v1054_v38  ;;  %v1025_v43 = vmul.f32 0.2, %v961_v31 }
 0x17b   : > { %v1151_v42 = vadd.f32 %v1547_v22, %v1055_v39  ;;  %v1056_v44 = vsel %vm992_vm12, %v960_v23, %v1024_v32  ;;  %1662 = vst [vmem:[%s1977_s9 + $0x60] sm:$0xff] %v1619_v37   ;;  %v962_v46 = vadd.f32 %v2010_v27, %v926_v35  ;;  %v963_v47 = vadd.f32 %v2010_v27, %v927_v36 }
 0x17c   : > { %v1152_v45 = vadd.f32 %v1550_v33, %v1056_v44  ;;  %v1057_v49 = vsel %vm993_vm13, %v961_v31, %v1025_v43  ;;  %v1554_v50 = vunpack.c.l.bf16 %v1650_v40  ;;  %v1555_v51 = vunpack.c.h.bf16 %v1650_v40 }
 0x17d   : > { %v1624_v48 = vpack.c.bf16 %v1151_v42, %v1150_v41  ;;  %v1153_v52 = vadd.f32 %v1551_v34, %v1057_v49  ;;  %vm994_vm14 = vcmp.ge.f32.partialorder %v962_v46, 0.0  ;;  %vm995_vm15 = vcmp.ge.f32.partialorder %v963_v47, 0.0 }
 0x17e   : > { %v1026_v53 = vmul.f32 0.2, %v962_v46  ;;  %v1027_v54 = vmul.f32 0.2, %v963_v47 }
 0x17f   : > { %1663 = vst [vmem:[%s1977_s9 + $0x68] sm:$0xff] %v1624_v48   ;;  %v1629_v55 = vpack.c.bf16 %v1153_v52, %v1152_v45 }
 0x180   : > { %v1058_v56 = vsel %vm994_vm14, %v962_v46, %v1026_v53  ;;  %v1059_v57 = vsel %vm995_vm15, %v963_v47, %v1027_v54 }
 0x181   : > { %v1154_v58 = vadd.f32 %v1554_v50, %v1058_v56  ;;  %1664 = vst [vmem:[%s1977_s9 + $0x70] sm:$0xff] %v1629_v55   ;;  %v1155_v59 = vadd.f32 %v1555_v51, %v1059_v57 }
 0x183   : > { %v1634_v60 = vpack.c.bf16 %v1155_v59, %v1154_v58 }
 0x185   : > { %1665 = vst [vmem:[%s1977_s9 + $0x78] sm:$0xff] %v1634_v60  }
 0x186 PF: > { %s14_s21 = sadd.s32 1, %s1803_s21   ;;  %s2104_s15 = smov %s1783_s16 }
 0x187   : > { %p11_p0 = scmp.ge.s32.totalorder %s14_s21, 20   ;;  %s2105_s16 = smov %s1882_s28 }
 0x188   : > { %s2106_s17 = smov %s1795_s19  ;;  %s2107_s18 = smov %s1799_s20 }
 0x189   : > { %s2108_s19 = smov %s2111_s22  ;;  %s2109_s20 = smov %s2115_s23 }
 0x18a   :  { %13 = sbr.rel (!%p11_p0) target bundleno = 4 (0x4), region = 129 }

// kernel: discriminator_unet_forward.17
= control target key start
LH: loop header
LB: loop body
LE: loop exit
PB: predicated region body
PF: predicated region fallthrough
CT: control target
= control target key end

     0   :  { %s1574_s12 = smov 0   ;;  %s1576_s13 = smov 0   ;;  %s1823_s0 = inlined_call_operand.vmem [shape: bf16[512,640], index: 0, kind: input, shape index: {}]   ;;  %s1824_s1 = inlined_call_operand.vmem [shape: bf16[640,128], index: 1, kind: input, shape index: {}]   ;;  %s1825_s2 = inlined_call_operand.vmem [shape: f32[1,128], index: 2, kind: input, shape index: {}]   ;;  %s1826_s3 = inlined_call_operand.vmem [shape: bf16[512,128], index: 3, kind: output, shape index: {}]  }
   0x1   :  { %s1578_s14 = smov 0   ;;  %s1580_s15 = smov 0  }
   0x2   :  { %s1582_s16 = smov 0   ;;  %s1584_s17 = smov 0  }
   0x3   :  { %s1586_s18 = smov 0  }
   0x4 LB: > { %s25_s19 = sadd.s32 1, %s1543_s16  ;;  %s32_s20 = sadd.s32 1, %s1547_s17  ;;  %s1551_s18 = sphi %s1586_s18, %s13_s18   ;;  %s1547_s17 = sphi %s1584_s17, %s1832_s17   ;;  %s1543_s16 = sphi %s1582_s16, %s1831_s16   ;;  %s1539_s15 = sphi %s1580_s15, %s1830_s15   ;;  %s1535_s14 = sphi %s1578_s14, %s1829_s14   ;;  %s1531_s13 = sphi %s1576_s13, %s1828_s13   ;;  %s1527_s12 = sphi %s1574_s12, %s1827_s12  }
   0x5   : > { %p26_p0 = scmp.ge.s32.totalorder %s25_s19, 5  ;;  %p48_p1 = scmp.ne.s32.totalorder %s1531_s13, %s1527_s12 }
   0x6   : > { %p49_p2 = scmp.eq.s32.totalorder %s1551_s18, 0  ;;  %s41_s24 = sadd.s32 1, %s1531_s13 }
   0x7   : > { %s1834_s19 = smov (%p26_p0, %s25_s19), 0  ;;  %s1836_s20 = smov (!%p26_p0, %s32_s20), %s1547_s17 }
   0x8   : > { %p50_p3 = por %p49_p2, %p48_p1  ;;  %p34_p4 = scmp.ge.s32.totalorder %s1836_s20, 2 }
   0x9   : > { %s37_s21 = ssub.s32 %s1543_s16, %s1834_s19  ;;  %p1184_p6 = scmp.ge.s32.totalorder %s1551_s18, 10 }
   0xa   : > { %s1838_s20 = smov (%p34_p4, %s1836_s20), 0 }
   0xb   : > { %s36_s22 = ssub.s32 %s1547_s17, %s1838_s20  ;;  %162 = sbr.rel (%p1184_p6) target bundleno = 55 (0x37), region = 20 }
   0xc   : > { %s38_s23 = sor.u32 %s37_s21, %s36_s22 }
   0xd   : > { %p39_p5 = scmp.eq.s32.totalorder %s38_s23, 0 }
   0xf   : > { %s1625_s25 = scalar_select %p39_p5, %s1531_s13, %s41_s24  }
  0x10   : > { %165 = sbr.rel (!%p50_p3) target bundleno = 55 (0x37), region = 24  ;;  %s167_s26 = sand.u32 (%p50_p3), 1, %s1531_s13  }
  0x11   : > { %s1438_s27 = smul.u32 (%p50_p3), 160, %s1547_s17  ;;  %s1185_s28 = sshll.u32 (%p50_p3), %s167_s26, 7 }
  0x12   : > { %s1639_s7 = scalar_lea.vmem (%p50_p3), [#allocation3], %s1185_s28 }
  0x13   : > { %s172_s29 = sadd.s32 (%p50_p3), %s1543_s16, %s1438_s27 }
  0x14   : > { %s1188_s30 = sshll.u32 (%p50_p3), %s172_s29, 2 }
  0x15   : > { %s1634_s6 = scalar_lea.vmem %s1823_s0, %s1188_s30 }
  0x16   : > { %v191_v0 = vld [vmem:[%s1634_s6] sm:$0xf]  ;;  %v193_v1 = vld [vmem:[%s1634_s6 + $0x14] sm:$0xf]  ;;  %v195_v2 = vld [vmem:[%s1634_s6 + $0x28] sm:$0xf] }
  0x17   : > { %192 = vst [vmem:[%s1639_s7] sm:$0xf] %v191_v0  ;;  %v197_v3 = vld [vmem:[%s1634_s6 + $0x3c] sm:$0xf]  ;;  %v199_v4 = vld [vmem:[%s1634_s6 + $0x50] sm:$0xf] }
  0x18   : > { %194 = vst [vmem:[%s1639_s7 + $0x4] sm:$0xf] %v193_v1  ;;  %v201_v5 = vld [vmem:[%s1634_s6 + $0x64] sm:$0xf]  ;;  %v203_v6 = vld [vmem:[%s1634_s6 + $0x78] sm:$0xf] }
  0x19   : > { %196 = vst [vmem:[%s1639_s7 + $0x8] sm:$0xf] %v195_v2  ;;  %v205_v7 = vld [vmem:[%s1634_s6 + $0x8c] sm:$0xf]  ;;  %v207_v8 = vld [vmem:[%s1634_s6 + $0xa0] sm:$0xf] }
  0x1a   : > { %198 = vst [vmem:[%s1639_s7 + $0xc] sm:$0xf] %v197_v3  ;;  %v209_v9 = vld [vmem:[%s1634_s6 + $0xb4] sm:$0xf]  ;;  %v211_v10 = vld [vmem:[%s1634_s6 + $0xc8] sm:$0xf] }
  0x1b   : > { %200 = vst [vmem:[%s1639_s7 + $0x10] sm:$0xf] %v199_v4  ;;  %v213_v11 = vld [vmem:[%s1634_s6 + $0xdc] sm:$0xf]  ;;  %v215_v12 = vld [vmem:[%s1634_s6 + $0xf0] sm:$0xf] }
  0x1c   : > { %202 = vst [vmem:[%s1639_s7 + $0x14] sm:$0xf] %v201_v5  ;;  %v217_v13 = vld [vmem:[%s1634_s6 + $0x104] sm:$0xf]  ;;  %v219_v14 = vld [vmem:[%s1634_s6 + $0x118] sm:$0xf] }
  0x1d   : > { %204 = vst [vmem:[%s1639_s7 + $0x18] sm:$0xf] %v203_v6  ;;  %v221_v15 = vld [vmem:[%s1634_s6 + $0x12c] sm:$0xf]  ;;  %v223_v16 = vld [vmem:[%s1634_s6 + $0x140] sm:$0xf] }
  0x1e   : > { %206 = vst [vmem:[%s1639_s7 + $0x1c] sm:$0xf] %v205_v7  ;;  %v225_v17 = vld [vmem:[%s1634_s6 + $0x154] sm:$0xf]  ;;  %v227_v18 = vld [vmem:[%s1634_s6 + $0x168] sm:$0xf] }
  0x1f   : > { %208 = vst [vmem:[%s1639_s7 + $0x20] sm:$0xf] %v207_v8  ;;  %v229_v19 = vld [vmem:[%s1634_s6 + $0x17c] sm:$0xf]  ;;  %v231_v20 = vld [vmem:[%s1634_s6 + $0x190] sm:$0xf] }
  0x20   : > { %210 = vst [vmem:[%s1639_s7 + $0x24] sm:$0xf] %v209_v9  ;;  %v233_v21 = vld [vmem:[%s1634_s6 + $0x1a4] sm:$0xf]  ;;  %v235_v22 = vld [vmem:[%s1634_s6 + $0x1b8] sm:$0xf] }
  0x21   : > { %212 = vst [vmem:[%s1639_s7 + $0x28] sm:$0xf] %v211_v10  ;;  %v237_v23 = vld [vmem:[%s1634_s6 + $0x1cc] sm:$0xf]  ;;  %v239_v24 = vld [vmem:[%s1634_s6 + $0x1e0] sm:$0xf] }
  0x22   : > { %214 = vst [vmem:[%s1639_s7 + $0x2c] sm:$0xf] %v213_v11  ;;  %v241_v25 = vld [vmem:[%s1634_s6 + $0x1f4] sm:$0xf]  ;;  %v243_v26 = vld [vmem:[%s1634_s6 + $0x208] sm:$0xf] }
  0x23   : > { %216 = vst [vmem:[%s1639_s7 + $0x30] sm:$0xf] %v215_v12  ;;  %v245_v27 = vld [vmem:[%s1634_s6 + $0x21c] sm:$0xf]  ;;  %v247_v28 = vld [vmem:[%s1634_s6 + $0x230] sm:$0xf] }
  0x24   : > { %218 = vst [vmem:[%s1639_s7 + $0x34] sm:$0xf] %v217_v13  ;;  %v249_v29 = vld [vmem:[%s1634_s6 + $0x244] sm:$0xf]  ;;  %v251_v30 = vld [vmem:[%s1634_s6 + $0x258] sm:$0xf] }
  0x25   : > { %220 = vst [vmem:[%s1639_s7 + $0x38] sm:$0xf] %v219_v14  ;;  %v253_v31 = vld [vmem:[%s1634_s6 + $0x26c] sm:$0xf] }
  0x26   : > { %222 = vst [vmem:[%s1639_s7 + $0x3c] sm:$0xf] %v221_v15 }
  0x27   : > { %224 = vst [vmem:[%s1639_s7 + $0x40] sm:$0xf] %v223_v16 }
  0x28   : > { %226 = vst [vmem:[%s1639_s7 + $0x44] sm:$0xf] %v225_v17 }
  0x29   : > { %228 = vst [vmem:[%s1639_s7 + $0x48] sm:$0xf] %v227_v18 }
  0x2a   : > { %230 = vst [vmem:[%s1639_s7 + $0x4c] sm:$0xf] %v229_v19 }
  0x2b   : > { %232 = vst [vmem:[%s1639_s7 + $0x50] sm:$0xf] %v231_v20 }
  0x2c   : > { %234 = vst [vmem:[%s1639_s7 + $0x54] sm:$0xf] %v233_v21 }
  0x2d   : > { %236 = vst [vmem:[%s1639_s7 + $0x58] sm:$0xf] %v235_v22 }
  0x2e   : > { %238 = vst [vmem:[%s1639_s7 + $0x5c] sm:$0xf] %v237_v23 }
  0x2f   : > { %240 = vst [vmem:[%s1639_s7 + $0x60] sm:$0xf] %v239_v24 }
  0x30   : > { %242 = vst [vmem:[%s1639_s7 + $0x64] sm:$0xf] %v241_v25 }
  0x31   : > { %244 = vst [vmem:[%s1639_s7 + $0x68] sm:$0xf] %v243_v26 }
  0x32   : > { %246 = vst [vmem:[%s1639_s7 + $0x6c] sm:$0xf] %v245_v27 }
  0x33   : > { %248 = vst [vmem:[%s1639_s7 + $0x70] sm:$0xf] %v247_v28 }
  0x34   : > { %250 = vst [vmem:[%s1639_s7 + $0x74] sm:$0xf] %v249_v29 }
  0x35   : > { %252 = vst [vmem:[%s1639_s7 + $0x78] sm:$0xf] %v251_v30 }
  0x36   : > { %254 = vst [vmem:[%s1639_s7 + $0x7c] sm:$0xf] %v253_v31 }
  0x37 PF: > { %p1189_p7 = scmp.ge.s32.totalorder %s1551_s18, 1  ;;  %p353_p8 = scmp.lt.s32.totalorder %s1551_s18, 11 }
  0x39   : > { %p354_p9 = pnand %p1189_p7, %p353_p8 }
  0x3a   : > { %s360_s8 = sand.u32 (!%p354_p9), 1, %s1527_s12   ;;  %s1191_s9 = sshll.u32 (!%p354_p9), %s1535_s14, 4 }
  0x3b   : > { %357 = sbr.rel (%p354_p9) target bundleno = 373 (0x175), region = 69  ;;  %s1190_s10 = sshll.u32 (!%p354_p9), %s360_s8, 7 }
  0x3c   : > { %p399_p10 = scmp.lt.s32.totalorder (!%p354_p9), %s1191_s9, 79  ;;  %s1193_s11 = sshll.u32 (!%p354_p9), %s1539_s15, 5 }
  0x3d   : > { %p411_p11 = scmp.lt.s32.totalorder (!%p354_p9), %s1193_s11, 63  ;;  %s1717_s12 = scalar_lea.vmem (!%p354_p9), [#allocation3], %s1190_s10 }
  0x3e   : > { %p1195_p12 = scmp.ne.s32.totalorder (!%p354_p9), %s1535_s14, 0 }
  0x40   : > { %s1840_s9 = smov (!%p399_p10, %s1191_s9), 79  ;;  %s1842_s11 = smov (!%p411_p11, %s1193_s11), 63 }
  0x41   : > { %s1192_s21 = sshll.u32 %s1840_s9, 2  ;;  %s1194_s26 = sshll.u32 %s1842_s11, 2 }
  0x42   : > { %s1710_s24 = scalar_lea.vmem %s1824_s1, %s1192_s21  ;;  %s1715_s29 = scalar_lea.vmem %s1826_s3, %s1194_s26 }
  0x43   : > { %422 = sbr.rel (%p1195_p12) target bundleno = 105 (0x69), region = 77 }
  0x48   : > { %v1553_v32 = vmov 0.0  }
  0x49   : > { %423 = vst [vmem:[#allocation2 + $0xb0] sm:$0xff] %v1553_v32 }
  0x4a   : > { %424 = vst [vmem:[#allocation2] sm:$0xff] %v1553_v32 }
  0x4b   : > { %425 = vst [vmem:[#allocation2 + $0xd8] sm:$0xff] %v1553_v32 }
  0x4c   : > { %426 = vst [vmem:[#allocation2 + $0x18] sm:$0xff] %v1553_v32 }
  0x4d   : > { %427 = vst [vmem:[#allocation2 + $0x50] sm:$0xff] %v1553_v32 }
  0x4e   : > { %428 = vst [vmem:[#allocation2 + $0x68] sm:$0xff] %v1553_v32 }
  0x4f   : > { %429 = vst [vmem:[#allocation2 + $0x30] sm:$0xff] %v1553_v32 }
  0x50   : > { %430 = vst [vmem:[#allocation2 + $0x48] sm:$0xff] %v1553_v32 }
  0x51   : > { %431 = vst [vmem:[#allocation2 + $0x80] sm:$0xff] %v1553_v32 }
  0x52   : > { %432 = vst [vmem:[#allocation2 + $0x88] sm:$0xff] %v1553_v32 }
  0x53   : > { %433 = vst [vmem:[#allocation2 + $0xe8] sm:$0xff] %v1553_v32 }
  0x54   : > { %434 = vst [vmem:[#allocation2 + $0xb8] sm:$0xff] %v1553_v32 }
  0x55   : > { %435 = vst [vmem:[#allocation2 + $0x60] sm:$0xff] %v1553_v32 }
  0x56   : > { %436 = vst [vmem:[#allocation2 + $0xf0] sm:$0xff] %v1553_v32 }
  0x57   : > { %437 = vst [vmem:[#allocation2 + $0x8] sm:$0xff] %v1553_v32 }
  0x58   : > { %438 = vst [vmem:[#allocation2 + $0x78] sm:$0xff] %v1553_v32 }
  0x59   : > { %439 = vst [vmem:[#allocation2 + $0x38] sm:$0xff] %v1553_v32 }
  0x5a   : > { %440 = vst [vmem:[#allocation2 + $0x58] sm:$0xff] %v1553_v32 }
  0x5b   : > { %441 = vst [vmem:[#allocation2 + $0x40] sm:$0xff] %v1553_v32 }
  0x5c   : > { %442 = vst [vmem:[#allocation2 + $0xc8] sm:$0xff] %v1553_v32 }
  0x5d   : > { %443 = vst [vmem:[#allocation2 + $0xe0] sm:$0xff] %v1553_v32 }
  0x5e   : > { %444 = vst [vmem:[#allocation2 + $0x90] sm:$0xff] %v1553_v32 }
  0x5f   : > { %445 = vst [vmem:[#allocation2 + $0x70] sm:$0xff] %v1553_v32 }
  0x60   : > { %446 = vst [vmem:[#allocation2 + $0xc0] sm:$0xff] %v1553_v32 }
  0x61   : > { %447 = vst [vmem:[#allocation2 + $0xa8] sm:$0xff] %v1553_v32 }
  0x62   : > { %448 = vst [vmem:[#allocation2 + $0xd0] sm:$0xff] %v1553_v32 }
  0x63   : > { %449 = vst [vmem:[#allocation2 + $0x10] sm:$0xff] %v1553_v32 }
  0x64   : > { %450 = vst [vmem:[#allocation2 + $0x28] sm:$0xff] %v1553_v32 }
  0x65   : > { %451 = vst [vmem:[#allocation2 + $0xa0] sm:$0xff] %v1553_v32 }
  0x66   : > { %452 = vst [vmem:[#allocation2 + $0xf8] sm:$0xff] %v1553_v32 }
  0x67   : > { %453 = vst [vmem:[#allocation2 + $0x20] sm:$0xff] %v1553_v32 }
  0x68   : > { %454 = vst [vmem:[#allocation2 + $0x98] sm:$0xff] %v1553_v32 }
  0x69 PF: > { %v1318_v33 = vld [vmem:[%s1710_s24 + $0x38] sm:$0xff]  ;;  %v1317_v34 = vld [vmem:[%s1710_s24 + $0x30] sm:$0xff]  ;;  %v1316_v35 = vld [vmem:[%s1710_s24 + $0x28] sm:$0xff]  ;;  %p1292_p13 = scmp.ne.s32.totalorder %s1535_s14, 4 }
  0x6a   : > { %679 = vmatpush.bf16.msra.mxu0 %v1318_v33  ;;  %1414 = vmatpush.bf16.msra.mxu1 %v1318_v33  ;;  %v1315_v36 = vld [vmem:[%s1710_s24 + $0x20] sm:$0xff]  ;;  %v1314_v37 = vld [vmem:[%s1710_s24 + $0x18] sm:$0xff]  ;;  %v1313_v38 = vld [vmem:[%s1710_s24 + $0x10] sm:$0xff] }
  0x6b   : > { %1415 = vmatpush.bf16.msra.mxu2 %v1318_v33  ;;  %1416 = vmatpush.bf16.msra.mxu3 %v1318_v33  ;;  %v1312_v39 = vld [vmem:[%s1710_s24 + $0x8] sm:$0xff]  ;;  %v1311_v40 = vld [vmem:[%s1710_s24] sm:$0xff]  ;;  %v1297_v49 = vld [vmem:[%s1717_s12 + $0x10] sm:$0xff] }
  0x6c   : > { %v1295_v41 = vld [vmem:[%s1717_s12] sm:$0xff]  ;;  %v1296_v45 = vld [vmem:[%s1717_s12 + $0x8] sm:$0xff]  ;;  %v1301_v50 = vld [vmem:[%s1717_s12 + $0x30] sm:$0xff] }
  0x6d   : > { %v1299_v42 = vld [vmem:[%s1717_s12 + $0x20] sm:$0xff]  ;;  %v1300_v46 = vld [vmem:[%s1717_s12 + $0x28] sm:$0xff]  ;;  %v1305_v51 = vld [vmem:[%s1717_s12 + $0x50] sm:$0xff] }
  0x6e   : > { %680 = vmatpush.bf16.msra.mxu0 %v1317_v34  ;;  %1417 = vmatpush.bf16.msra.mxu1 %v1317_v34  ;;  %v1303_v43 = vld [vmem:[%s1717_s12 + $0x40] sm:$0xff]  ;;  %v1304_v47 = vld [vmem:[%s1717_s12 + $0x48] sm:$0xff]  ;;  %v1309_v52 = vld [vmem:[%s1717_s12 + $0x70] sm:$0xff] }
  0x6f   : > { %1418 = vmatpush.bf16.msra.mxu2 %v1317_v34  ;;  %1419 = vmatpush.bf16.msra.mxu3 %v1317_v34  ;;  %v1307_v44 = vld [vmem:[%s1717_s12 + $0x60] sm:$0xff]  ;;  %v1308_v48 = vld [vmem:[%s1717_s12 + $0x68] sm:$0xff]  ;;  %v1298_v53 = vld [vmem:[%s1717_s12 + $0x18] sm:$0xff] }
  0x70   : > { %v1302_v54 = vld [vmem:[%s1717_s12 + $0x38] sm:$0xff]  ;;  %v455_v57 = vld [vmem:[#allocation2 + $0xb0] sm:$0xff]  ;;  %v463_v58 = vld [vmem:[#allocation2 + $0x80] sm:$0xff] }
  0x71   : > { %v1306_v55 = vld [vmem:[%s1717_s12 + $0x58] sm:$0xff]  ;;  %v479_v0 = vld [vmem:[#allocation2 + $0xa8] sm:$0xff]  ;;  %v456_v1 = vld [vmem:[#allocation2] sm:$0xff] }
  0x72   : > { %681 = vmatpush.bf16.msra.mxu0 %v1316_v35  ;;  %1420 = vmatpush.bf16.msra.mxu1 %v1316_v35  ;;  %v1310_v56 = vld [vmem:[%s1717_s12 + $0x78] sm:$0xff]  ;;  %v464_v2 = vld [vmem:[#allocation2 + $0x88] sm:$0xff]  ;;  %v480_v12 = vld [vmem:[#allocation2 + $0xd0] sm:$0xff] }
  0x73   : > { %1421 = vmatpush.bf16.msra.mxu2 %v1316_v35  ;;  %1422 = vmatpush.bf16.msra.mxu3 %v1316_v35  ;;  %v471_v63 = vld [vmem:[#allocation2 + $0x38] sm:$0xff]  ;;  %v465_v14 = vld [vmem:[#allocation2 + $0xe8] sm:$0xff]  ;;  %v473_v23 = vld [vmem:[#allocation2 + $0x40] sm:$0xff] }
  0x74   : > { %v472_v11 = vld [vmem:[#allocation2 + $0x58] sm:$0xff]  ;;  %v481_v24 = vld [vmem:[#allocation2 + $0x10] sm:$0xff]  ;;  %v474_v35 = vld [vmem:[#allocation2 + $0xc8] sm:$0xff] }
  0x75   : > { %v457_v13 = vld [vmem:[#allocation2 + $0xd8] sm:$0xff] }
  0x76   : > { %682 = vmatpush.bf16.msra.mxu0 %v1315_v36  ;;  %1423 = vmatpush.bf16.msra.mxu1 %v1315_v36  ;;  %v458_v25 = vld [vmem:[#allocation2 + $0x18] sm:$0xff] }
  0x77   : > { %1424 = vmatpush.bf16.msra.mxu2 %v1315_v36  ;;  %1425 = vmatpush.bf16.msra.mxu3 %v1315_v36  ;;  %v466_v26 = vld [vmem:[#allocation2 + $0xb8] sm:$0xff]  ;;  %v482_v36 = vld [vmem:[#allocation2 + $0x28] sm:$0xff] }
  0x7a   : > { %683 = vmatpush.bf16.msra.mxu0 %v1314_v37  ;;  %1426 = vmatpush.bf16.msra.mxu1 %v1314_v37 }
  0x7b   : > { %1427 = vmatpush.bf16.msra.mxu2 %v1314_v37  ;;  %1428 = vmatpush.bf16.msra.mxu3 %v1314_v37  ;;  %v459_v37 = vld [vmem:[#allocation2 + $0x50] sm:$0xff] }
  0x7e   : > { %684 = vmatpush.bf16.msra.mxu0 %v1313_v38  ;;  %1429 = vmatpush.bf16.msra.mxu1 %v1313_v38 }
  0x7f   : > { %1430 = vmatpush.bf16.msra.mxu2 %v1313_v38  ;;  %1431 = vmatpush.bf16.msra.mxu3 %v1313_v38  ;;  %v467_v38 = vld [vmem:[#allocation2 + $0x60] sm:$0xff] }
  0x82   : > { %685 = vmatpush.bf16.msra.mxu0 %v1312_v39  ;;  %1432 = vmatpush.bf16.msra.mxu1 %v1312_v39 }
  0x83   : > { %1433 = vmatpush.bf16.msra.mxu2 %v1312_v39  ;;  %1434 = vmatpush.bf16.msra.mxu3 %v1312_v39 }
  0x86   : > { %686 = vmatpush.bf16.msra.mxu0 %v1311_v40  ;;  %1435 = vmatpush.bf16.msra.mxu1 %v1311_v40 }
  0x87   : > { %1436 = vmatpush.bf16.msra.mxu2 %v1311_v40  ;;  %1437 = vmatpush.bf16.msra.mxu3 %v1311_v40 }
  0x89   : > { %687 = vmatmul.bf16.vlgmr.msra.gmra.mxu0 %v1295_v41  ;;  %707 = vmatmul.bf16.vlgmr.msra.gmra.mxu1 %v1299_v42 }
  0x8a   : > { %727 = vmatmul.bf16.vlgmr.msra.gmra.mxu2 %v1303_v43  ;;  %747 = vmatmul.bf16.vlgmr.msra.gmra.mxu3 %v1307_v44 }
  0x99   : > { %692 = vmatmul.bf16.gmra.mxu0 %v1296_v45  ;;  %712 = vmatmul.bf16.gmra.mxu1 %v1300_v46 }
  0x9a   : > { %732 = vmatmul.bf16.gmra.mxu2 %v1304_v47  ;;  %752 = vmatmul.bf16.gmra.mxu3 %v1308_v48  ;;  %v475_v47 = vld [vmem:[#allocation2 + $0xe0] sm:$0xff] }
  0x9b   : > { %v483_v48 = vld [vmem:[#allocation2 + $0xa0] sm:$0xff] }
  0xa9   : > { %697 = vmatmul.bf16.gmra.mxu0 %v1297_v49  ;;  %717 = vmatmul.bf16.gmra.mxu1 %v1301_v50  ;;  %v460_v49 = vld [vmem:[#allocation2 + $0x68] sm:$0xff]  ;;  %v468_v50 = vld [vmem:[#allocation2 + $0xf0] sm:$0xff] }
  0xaa   : > { %737 = vmatmul.bf16.gmra.mxu2 %v1305_v51  ;;  %757 = vmatmul.bf16.gmra.mxu3 %v1309_v52 }
  0xb9   : > { %702 = vmatmul.bf16.gmra.mxu0 %v1298_v53  ;;  %722 = vmatmul.bf16.gmra.mxu1 %v1302_v54 }
  0xba   : > { %742 = vmatmul.bf16.gmra.mxu2 %v1306_v55  ;;  %762 = vmatmul.bf16.gmra.mxu3 %v1310_v56 }
 0x106   : > { %v688_v59 = vpop.f32.mrf.mxu0  ;;  %v708_v60 = vpop.f32.mrf.mxu1 }
 0x107   : > { %v768_v61 = vadd.f32 %v688_v59, %v455_v57  ;;  %v776_v62 = vadd.f32 %v708_v60, %v463_v58  ;;  %v476_v59 = vld [vmem:[#allocation2 + $0x90] sm:$0xff]  ;;  %v484_v60 = vld [vmem:[#allocation2 + $0xf8] sm:$0xff] }
 0x109   : > { %800 = vst [vmem:[#allocation2 + $0xb0] sm:$0xff] %v768_v61  ;;  %v461_v61 = vld [vmem:[#allocation2 + $0x30] sm:$0xff] }
 0x10a   : > { %808 = vst [vmem:[#allocation2 + $0x80] sm:$0xff] %v776_v62  ;;  %v469_v62 = vld [vmem:[#allocation2 + $0x8] sm:$0xff] }
 0x10d   : > { %v728_v3 = vpop.f32.mrf.mxu2  ;;  %v748_v4 = vpop.f32.mrf.mxu3 }
 0x10e   : > { %v784_v5 = vadd.f32 %v728_v3, %v471_v63  ;;  %v792_v6 = vadd.f32 %v748_v4, %v479_v0  ;;  %v690_v7 = vpop.f32.mrf.mxu0  ;;  %v710_v8 = vpop.f32.mrf.mxu1 }
 0x10f   : > { %v769_v9 = vadd.f32 %v690_v7, %v456_v1  ;;  %v777_v10 = vadd.f32 %v710_v8, %v464_v2  ;;  %v477_v7 = vld [vmem:[#allocation2 + $0x70] sm:$0xff]  ;;  %v485_v8 = vld [vmem:[#allocation2 + $0x20] sm:$0xff] }
 0x110   : > { %816 = vst [vmem:[#allocation2 + $0x38] sm:$0xff] %v784_v5 }
 0x111   : > { %824 = vst [vmem:[#allocation2 + $0xa8] sm:$0xff] %v792_v6 }
 0x112   : > { %801 = vst [vmem:[#allocation2] sm:$0xff] %v769_v9  ;;  %v462_v9 = vld [vmem:[#allocation2 + $0x48] sm:$0xff] }
 0x113   : > { %809 = vst [vmem:[#allocation2 + $0x88] sm:$0xff] %v777_v10  ;;  %v470_v10 = vld [vmem:[#allocation2 + $0x78] sm:$0xff] }
 0x115   : > { %v730_v15 = vpop.f32.mrf.mxu2  ;;  %v750_v16 = vpop.f32.mrf.mxu3 }
 0x116   : > { %v785_v17 = vadd.f32 %v730_v15, %v472_v11  ;;  %v793_v18 = vadd.f32 %v750_v16, %v480_v12  ;;  %v693_v19 = vpop.f32.mrf.mxu0  ;;  %v713_v20 = vpop.f32.mrf.mxu1 }
 0x117   : > { %v770_v21 = vadd.f32 %v693_v19, %v457_v13  ;;  %v778_v22 = vadd.f32 %v713_v20, %v465_v14  ;;  %v478_v19 = vld [vmem:[#allocation2 + $0xc0] sm:$0xff]  ;;  %v486_v20 = vld [vmem:[#allocation2 + $0x98] sm:$0xff] }
 0x118   : > { %817 = vst [vmem:[#allocation2 + $0x58] sm:$0xff] %v785_v17 }
 0x119   : > { %825 = vst [vmem:[#allocation2 + $0xd0] sm:$0xff] %v793_v18 }
 0x11a   : > { %802 = vst [vmem:[#allocation2 + $0xd8] sm:$0xff] %v770_v21 }
 0x11b   : > { %810 = vst [vmem:[#allocation2 + $0xe8] sm:$0xff] %v778_v22 }
 0x11d   : > { %v733_v27 = vpop.f32.mrf.mxu2  ;;  %v753_v28 = vpop.f32.mrf.mxu3 }
 0x11e   : > { %v786_v29 = vadd.f32 %v733_v27, %v473_v23  ;;  %v794_v30 = vadd.f32 %v753_v28, %v481_v24  ;;  %v695_v31 = vpop.f32.mrf.mxu0  ;;  %v715_v32 = vpop.f32.mrf.mxu1 }
 0x11f   : > { %v771_v33 = vadd.f32 %v695_v31, %v458_v25  ;;  %v779_v34 = vadd.f32 %v715_v32, %v466_v26 }
 0x120   : > { %818 = vst [vmem:[#allocation2 + $0x40] sm:$0xff] %v786_v29 }
 0x121   : > { %826 = vst [vmem:[#allocation2 + $0x10] sm:$0xff] %v794_v30 }
 0x122   : > { %803 = vst [vmem:[#allocation2 + $0x18] sm:$0xff] %v771_v33 }
 0x123   : > { %811 = vst [vmem:[#allocation2 + $0xb8] sm:$0xff] %v779_v34 }
 0x125   : > { %v735_v39 = vpop.f32.mrf.mxu2  ;;  %v755_v40 = vpop.f32.mrf.mxu3 }
 0x126   : > { %v787_v41 = vadd.f32 %v735_v39, %v474_v35  ;;  %v795_v42 = vadd.f32 %v755_v40, %v482_v36  ;;  %v698_v43 = vpop.f32.mrf.mxu0  ;;  %v718_v44 = vpop.f32.mrf.mxu1 }
 0x127   : > { %v772_v45 = vadd.f32 %v698_v43, %v459_v37  ;;  %v780_v46 = vadd.f32 %v718_v44, %v467_v38 }
 0x128   : > { %819 = vst [vmem:[#allocation2 + $0xc8] sm:$0xff] %v787_v41 }
 0x129   : > { %827 = vst [vmem:[#allocation2 + $0x28] sm:$0xff] %v795_v42 }
 0x12a   : > { %804 = vst [vmem:[#allocation2 + $0x50] sm:$0xff] %v772_v45 }
 0x12b   : > { %812 = vst [vmem:[#allocation2 + $0x60] sm:$0xff] %v780_v46 }
 0x12d   : > { %v738_v51 = vpop.f32.mrf.mxu2  ;;  %v758_v52 = vpop.f32.mrf.mxu3 }
 0x12e   : > { %v788_v53 = vadd.f32 %v738_v51, %v475_v47  ;;  %v796_v54 = vadd.f32 %v758_v52, %v483_v48  ;;  %v700_v55 = vpop.f32.mrf.mxu0  ;;  %v720_v56 = vpop.f32.mrf.mxu1 }
 0x12f   : > { %v773_v57 = vadd.f32 %v700_v55, %v460_v49  ;;  %v781_v58 = vadd.f32 %v720_v56, %v468_v50 }
 0x130   : > { %820 = vst [vmem:[#allocation2 + $0xe0] sm:$0xff] %v788_v53 }
 0x131   : > { %828 = vst [vmem:[#allocation2 + $0xa0] sm:$0xff] %v796_v54 }
 0x132   : > { %805 = vst [vmem:[#allocation2 + $0x68] sm:$0xff] %v773_v57 }
 0x133   : > { %813 = vst [vmem:[#allocation2 + $0xf0] sm:$0xff] %v781_v58 }
 0x135   : > { %v740_v63 = vpop.f32.mrf.mxu2  ;;  %v760_v0 = vpop.f32.mrf.mxu3 }
 0x136   : > { %v789_v1 = vadd.f32 %v740_v63, %v476_v59  ;;  %v797_v2 = vadd.f32 %v760_v0, %v484_v60  ;;  %v703_v3 = vpop.f32.mrf.mxu0  ;;  %v723_v4 = vpop.f32.mrf.mxu1 }
 0x137   : > { %v774_v5 = vadd.f32 %v703_v3, %v461_v61  ;;  %v782_v6 = vadd.f32 %v723_v4, %v469_v62 }
 0x138   : > { %821 = vst [vmem:[#allocation2 + $0x90] sm:$0xff] %v789_v1 }
 0x139   : > { %829 = vst [vmem:[#allocation2 + $0xf8] sm:$0xff] %v797_v2 }
 0x13a   : > { %806 = vst [vmem:[#allocation2 + $0x30] sm:$0xff] %v774_v5 }
 0x13b   : > { %814 = vst [vmem:[#allocation2 + $0x8] sm:$0xff] %v782_v6 }
 0x13d   : > { %v743_v11 = vpop.f32.mrf.mxu2  ;;  %v763_v12 = vpop.f32.mrf.mxu3 }
 0x13e   : > { %v790_v13 = vadd.f32 %v743_v11, %v477_v7  ;;  %v798_v14 = vadd.f32 %v763_v12, %v485_v8  ;;  %v705_v15 = vpop.f32.mrf.mxu0  ;;  %v725_v16 = vpop.f32.mrf.mxu1 }
 0x13f   : > { %v775_v17 = vadd.f32 %v705_v15, %v462_v9  ;;  %v783_v18 = vadd.f32 %v725_v16, %v470_v10 }
 0x140   : > { %822 = vst [vmem:[#allocation2 + $0x70] sm:$0xff] %v790_v13 }
 0x141   : > { %830 = vst [vmem:[#allocation2 + $0x20] sm:$0xff] %v798_v14 }
 0x142   : > { %807 = vst [vmem:[#allocation2 + $0x48] sm:$0xff] %v775_v17 }
 0x143   : > { %815 = vst [vmem:[#allocation2 + $0x78] sm:$0xff] %v783_v18 }
 0x145   : > { %v745_v21 = vpop.f32.mrf.mxu2  ;;  %v765_v22 = vpop.f32.mrf.mxu3  ;;  %835 = sbr.rel (%p1292_p13) target bundleno = 373 (0x175), region = 81 }
 0x146   : > { %v791_v23 = vadd.f32 %v745_v21, %v478_v19  ;;  %v799_v24 = vadd.f32 %v765_v22, %v486_v20 }
 0x148   : > { %823 = vst [vmem:[#allocation2 + $0xc0] sm:$0xff] %v791_v23 }
 0x149   : > { %831 = vst [vmem:[#allocation2 + $0x98] sm:$0xff] %v799_v24 }
 0x14a   : > { %v836_v25 = vld [vmem:[#allocation2 + $0xb0] sm:$0xff]  ;;  %v837_v26 = vld [vmem:[#allocation2] sm:$0xff]  ;;  %v838_v28 = vld [vmem:[#allocation2 + $0xd8] sm:$0xff] }
 0x14b   : > { %v1748_v27 = vld [vmem:[%s1825_s2] ss:$0 sm:$0xff]  ;;  %v839_v29 = vld [vmem:[#allocation2 + $0x18] sm:$0xff]  ;;  %v840_v30 = vld [vmem:[#allocation2 + $0x50] sm:$0xff] }
 0x14c   : > { %v841_v31 = vld [vmem:[#allocation2 + $0x68] sm:$0xff]  ;;  %v842_v32 = vld [vmem:[#allocation2 + $0x30] sm:$0xff]  ;;  %v872_v33 = vadd.f32 %v1748_v27, %v836_v25  ;;  %v873_v34 = vadd.f32 %v1748_v27, %v837_v26  ;;  %v874_v35 = vadd.f32 %v1748_v27, %v838_v28  ;;  %v875_v36 = vadd.f32 %v1748_v27, %v839_v29  ;;  %v844_v48 = vld [vmem:[#allocation2 + $0x80] sm:$0xff] }
 0x14d   : > { %v843_v37 = vld [vmem:[#allocation2 + $0x48] sm:$0xff]  ;;  %v876_v38 = vadd.f32 %v1748_v27, %v840_v30  ;;  %v877_v39 = vadd.f32 %v1748_v27, %v841_v31  ;;  %v878_v40 = vadd.f32 %v1748_v27, %v842_v32  ;;  %v847_v55 = vld [vmem:[#allocation2 + $0xb8] sm:$0xff]  ;;  %v880_v61 = vadd.f32 %v1748_v27, %v844_v48  ;;  %v848_v2 = vld [vmem:[#allocation2 + $0x60] sm:$0xff] }
 0x14e   : > { %v879_v41 = vadd.f32 %v1748_v27, %v843_v37  ;;  %vm904_vm0 = vcmp.ge.f32.partialorder %v872_v33, 0.0  ;;  %vm905_vm1 = vcmp.ge.f32.partialorder %v873_v34, 0.0  ;;  %v936_v42 = vmul.f32 0.2, %v872_v33  ;;  %v845_v53 = vld [vmem:[#allocation2 + $0x88] sm:$0xff]  ;;  %v849_v6 = vld [vmem:[#allocation2 + $0xf0] sm:$0xff] }
 0x14f   : > { %v937_v43 = vmul.f32 0.2, %v873_v34  ;;  %vm906_vm2 = vcmp.ge.f32.partialorder %v874_v35, 0.0  ;;  %vm907_vm3 = vcmp.ge.f32.partialorder %v875_v36, 0.0  ;;  %v938_v44 = vmul.f32 0.2, %v874_v35 }
 0x150   : > { %v939_v45 = vmul.f32 0.2, %v875_v36  ;;  %v968_v46 = vsel %vm904_vm0, %v872_v33, %v936_v42  ;;  %vm908_vm4 = vcmp.ge.f32.partialorder %v876_v38, 0.0  ;;  %vm909_vm5 = vcmp.ge.f32.partialorder %v877_v39, 0.0  ;;  %v846_v54 = vld [vmem:[#allocation2 + $0xe8] sm:$0xff]  ;;  %v851_v17 = vld [vmem:[#allocation2 + $0x78] sm:$0xff] }
 0x151   : > { %v969_v47 = vsel %vm905_vm1, %v873_v34, %v937_v43  ;;  %v970_v50 = vsel %vm906_vm2, %v874_v35, %v938_v44  ;;  %v940_v52 = vmul.f32 0.2, %v876_v38  ;;  %v941_v57 = vmul.f32 0.2, %v877_v39  ;;  %v850_v12 = vld [vmem:[#allocation2 + $0x8] sm:$0xff]  ;;  %v852_v18 = vld [vmem:[#allocation2 + $0x38] sm:$0xff] }
 0x152   : > { %v1322_v49 = vpack.c.bf16 %v969_v47, %v968_v46  ;;  %v971_v51 = vsel %vm907_vm3, %v875_v36, %v939_v45  ;;  %vm910_vm6 = vcmp.ge.f32.partialorder %v878_v40, 0.0  ;;  %vm911_vm7 = vcmp.ge.f32.partialorder %v879_v41, 0.0  ;;  %v853_v22 = vld [vmem:[#allocation2 + $0x58] sm:$0xff]  ;;  %v854_v34 = vld [vmem:[#allocation2 + $0x40] sm:$0xff]  ;;  %v855_v35 = vld [vmem:[#allocation2 + $0xc8] sm:$0xff] }
 0x153   : > { %v1327_v56 = vpack.c.bf16 %v971_v51, %v970_v50  ;;  %v972_v58 = vsel %vm908_vm4, %v876_v38, %v940_v52  ;;  %v942_v59 = vmul.f32 0.2, %v878_v40  ;;  %v943_v60 = vmul.f32 0.2, %v879_v41  ;;  %v856_v36 = vld [vmem:[#allocation2 + $0xe0] sm:$0xff]  ;;  %v858_v47 = vld [vmem:[#allocation2 + $0x70] sm:$0xff] }
 0x154   : > { %1323 = vst [vmem:[%s1715_s29] sm:$0xff] %v1322_v49   ;;  %v973_v62 = vsel %vm909_vm5, %v877_v39, %v941_v57  ;;  %v881_v63 = vadd.f32 %v1748_v27, %v845_v53  ;;  %v882_v0 = vadd.f32 %v1748_v27, %v846_v54  ;;  %v883_v1 = vadd.f32 %v1748_v27, %v847_v55  ;;  %v857_v39 = vld [vmem:[#allocation2 + $0x90] sm:$0xff]  ;;  %v859_v52 = vld [vmem:[#allocation2 + $0xc0] sm:$0xff]  ;;  %v860_v55 = vld [vmem:[#allocation2 + $0xa8] sm:$0xff] }
 0x155   : > { %1399 = vst [vmem:[%s1715_s29 + $0x8] sm:$0xff] %v1327_v56   ;;  %v1332_v3 = vpack.c.bf16 %v973_v62, %v972_v58  ;;  %v974_v4 = vsel %vm910_vm6, %v878_v40, %v942_v59  ;;  %v975_v5 = vsel %vm911_vm7, %v879_v41, %v943_v60  ;;  %vm912_vm8 = vcmp.ge.f32.partialorder %v880_v61, 0.0  ;;  %v861_v62 = vld [vmem:[#allocation2 + $0xd0] sm:$0xff] }
 0x156   : > { %v1337_v7 = vpack.c.bf16 %v975_v5, %v974_v4  ;;  %vm913_vm9 = vcmp.ge.f32.partialorder %v881_v63, 0.0  ;;  %v944_v8 = vmul.f32 0.2, %v880_v61  ;;  %v945_v9 = vmul.f32 0.2, %v881_v63 }
 0x157   : > { %1400 = vst [vmem:[%s1715_s29 + $0x10] sm:$0xff] %v1332_v3   ;;  %vm914_vm10 = vcmp.ge.f32.partialorder %v882_v0, 0.0  ;;  %vm915_vm11 = vcmp.ge.f32.partialorder %v883_v1, 0.0  ;;  %v946_v10 = vmul.f32 0.2, %v882_v0  ;;  %v884_v11 = vadd.f32 %v1748_v27, %v848_v2  ;;  %v862_v2 = vld [vmem:[#allocation2 + $0x10] sm:$0xff] }
 0x158   : > { %1401 = vst [vmem:[%s1715_s29 + $0x18] sm:$0xff] %v1337_v7   ;;  %v976_v13 = vsel %vm912_vm8, %v880_v61, %v944_v8  ;;  %v977_v14 = vsel %vm913_vm9, %v881_v63, %v945_v9  ;;  %v947_v15 = vmul.f32 0.2, %v883_v1  ;;  %v885_v16 = vadd.f32 %v1748_v27, %v849_v6  ;;  %v863_v3 = vld [vmem:[#allocation2 + $0x28] sm:$0xff]  ;;  %v864_v7 = vld [vmem:[#allocation2 + $0xa0] sm:$0xff] }
 0x159   : > { %v1342_v19 = vpack.c.bf16 %v977_v14, %v976_v13  ;;  %v978_v20 = vsel %vm914_vm10, %v882_v0, %v946_v10  ;;  %vm916_vm12 = vcmp.ge.f32.partialorder %v884_v11, 0.0  ;;  %v948_v21 = vmul.f32 0.2, %v884_v11 }
 0x15a   : > { %v979_v23 = vsel %vm915_vm11, %v883_v1, %v947_v15  ;;  %vm917_vm13 = vcmp.ge.f32.partialorder %v885_v16, 0.0  ;;  %v949_v24 = vmul.f32 0.2, %v885_v16  ;;  %v886_v25 = vadd.f32 %v1748_v27, %v850_v12  ;;  %v865_v15 = vld [vmem:[#allocation2 + $0xf8] sm:$0xff] }
 0x15b   : > { %1402 = vst [vmem:[%s1715_s29 + $0x20] sm:$0xff] %v1342_v19   ;;  %v1347_v26 = vpack.c.bf16 %v979_v23, %v978_v20  ;;  %v980_v28 = vsel %vm916_vm12, %v884_v11, %v948_v21  ;;  %v887_v29 = vadd.f32 %v1748_v27, %v851_v17  ;;  %v888_v30 = vadd.f32 %v1748_v27, %v852_v18  ;;  %v866_v19 = vld [vmem:[#allocation2 + $0x20] sm:$0xff] }
 0x15c   : > { %v981_v31 = vsel %vm917_vm13, %v885_v16, %v949_v24  ;;  %vm918_vm14 = vcmp.ge.f32.partialorder %v886_v25, 0.0  ;;  %v950_v32 = vmul.f32 0.2, %v886_v25  ;;  %v889_v33 = vadd.f32 %v1748_v27, %v853_v22 }
 0x15d   : > { %1403 = vst [vmem:[%s1715_s29 + $0x28] sm:$0xff] %v1347_v26   ;;  %v1352_v37 = vpack.c.bf16 %v981_v31, %v980_v28  ;;  %vm919_vm15 = vcmp.ge.f32.partialorder %v887_v29, 0.0  ;;  %v951_v38 = vmul.f32 0.2, %v887_v29  ;;  %vm920_vm0 = vcmp.ge.f32.partialorder %v888_v30, 0.0  ;;  %v867_v26 = vld [vmem:[#allocation2 + $0x98] sm:$0xff] }
 0x15e   : > { %v982_v40 = vsel %vm918_vm14, %v886_v25, %v950_v32  ;;  %vm921_vm1 = vcmp.ge.f32.partialorder %v889_v33, 0.0  ;;  %v952_v41 = vmul.f32 0.2, %v888_v30  ;;  %v953_v42 = vmul.f32 0.2, %v889_v33 }
 0x15f   : > { %1404 = vst [vmem:[%s1715_s29 + $0x30] sm:$0xff] %v1352_v37   ;;  %v983_v43 = vsel %vm919_vm15, %v887_v29, %v951_v38  ;;  %v890_v44 = vadd.f32 %v1748_v27, %v854_v34  ;;  %v891_v45 = vadd.f32 %v1748_v27, %v855_v35  ;;  %v892_v46 = vadd.f32 %v1748_v27, %v856_v36 }
 0x160   : > { %v1357_v48 = vpack.c.bf16 %v983_v43, %v982_v40  ;;  %v984_v49 = vsel %vm920_vm0, %v888_v30, %v952_v41  ;;  %v985_v50 = vsel %vm921_vm1, %v889_v33, %v953_v42  ;;  %v893_v51 = vadd.f32 %v1748_v27, %v857_v39 }
 0x161   : > { %v1362_v53 = vpack.c.bf16 %v985_v50, %v984_v49  ;;  %vm922_vm2 = vcmp.ge.f32.partialorder %v890_v44, 0.0  ;;  %vm923_vm3 = vcmp.ge.f32.partialorder %v891_v45, 0.0  ;;  %v954_v54 = vmul.f32 0.2, %v890_v44 }
 0x162   : > { %1405 = vst [vmem:[%s1715_s29 + $0x38] sm:$0xff] %v1357_v48   ;;  %v955_v56 = vmul.f32 0.2, %v891_v45  ;;  %vm924_vm4 = vcmp.ge.f32.partialorder %v892_v46, 0.0  ;;  %vm925_vm5 = vcmp.ge.f32.partialorder %v893_v51, 0.0  ;;  %v894_v57 = vadd.f32 %v1748_v27, %v858_v47 }
 0x163   : > { %1406 = vst [vmem:[%s1715_s29 + $0x40] sm:$0xff] %v1362_v53   ;;  %v986_v58 = vsel %vm922_vm2, %v890_v44, %v954_v54  ;;  %v956_v59 = vmul.f32 0.2, %v892_v46  ;;  %v957_v60 = vmul.f32 0.2, %v893_v51  ;;  %v895_v61 = vadd.f32 %v1748_v27, %v859_v52 }
 0x164   : > { %v987_v63 = vsel %vm923_vm3, %v891_v45, %v955_v56  ;;  %vm926_vm6 = vcmp.ge.f32.partialorder %v894_v57, 0.0  ;;  %v958_v0 = vmul.f32 0.2, %v894_v57  ;;  %v896_v1 = vadd.f32 %v1748_v27, %v860_v55 }
 0x165   : > { %v1367_v4 = vpack.c.bf16 %v987_v63, %v986_v58  ;;  %v988_v5 = vsel %vm924_vm4, %v892_v46, %v956_v59  ;;  %v989_v6 = vsel %vm925_vm5, %v893_v51, %v957_v60  ;;  %vm927_vm7 = vcmp.ge.f32.partialorder %v895_v61, 0.0 }
 0x166   : > { %v1372_v8 = vpack.c.bf16 %v989_v6, %v988_v5  ;;  %v959_v9 = vmul.f32 0.2, %v895_v61  ;;  %v990_v10 = vsel %vm926_vm6, %v894_v57, %v958_v0  ;;  %v897_v11 = vadd.f32 %v1748_v27, %v861_v62 }
 0x167   : > { %1407 = vst [vmem:[%s1715_s29 + $0x48] sm:$0xff] %v1367_v4   ;;  %vm928_vm8 = vcmp.ge.f32.partialorder %v896_v1, 0.0  ;;  %v960_v12 = vmul.f32 0.2, %v896_v1  ;;  %v898_v13 = vadd.f32 %v1748_v27, %v862_v2  ;;  %v899_v14 = vadd.f32 %v1748_v27, %v863_v3 }
 0x168   : > { %1408 = vst [vmem:[%s1715_s29 + $0x50] sm:$0xff] %v1372_v8   ;;  %v991_v16 = vsel %vm927_vm7, %v895_v61, %v959_v9  ;;  %vm929_vm9 = vcmp.ge.f32.partialorder %v897_v11, 0.0  ;;  %v961_v17 = vmul.f32 0.2, %v897_v11  ;;  %v900_v18 = vadd.f32 %v1748_v27, %v864_v7 }
 0x169   : > { %v1377_v20 = vpack.c.bf16 %v991_v16, %v990_v10  ;;  %v992_v21 = vsel %vm928_vm8, %v896_v1, %v960_v12  ;;  %vm930_vm10 = vcmp.ge.f32.partialorder %v898_v13, 0.0  ;;  %vm931_vm11 = vcmp.ge.f32.partialorder %v899_v14, 0.0 }
 0x16a   : > { %v993_v22 = vsel %vm929_vm9, %v897_v11, %v961_v17  ;;  %v962_v23 = vmul.f32 0.2, %v898_v13  ;;  %v963_v24 = vmul.f32 0.2, %v899_v14  ;;  %v901_v25 = vadd.f32 %v1748_v27, %v865_v15 }
 0x16b   : > { %1409 = vst [vmem:[%s1715_s29 + $0x58] sm:$0xff] %v1377_v20   ;;  %v1382_v28 = vpack.c.bf16 %v993_v22, %v992_v21  ;;  %vm932_vm12 = vcmp.ge.f32.partialorder %v900_v18, 0.0  ;;  %v964_v29 = vmul.f32 0.2, %v900_v18  ;;  %v902_v30 = vadd.f32 %v1748_v27, %v866_v19 }
 0x16c   : > { %v994_v31 = vsel %vm930_vm10, %v898_v13, %v962_v23  ;;  %v995_v32 = vsel %vm931_vm11, %v899_v14, %v963_v24  ;;  %vm933_vm13 = vcmp.ge.f32.partialorder %v901_v25, 0.0  ;;  %v965_v33 = vmul.f32 0.2, %v901_v25 }
 0x16d   : > { %1410 = vst [vmem:[%s1715_s29 + $0x60] sm:$0xff] %v1382_v28   ;;  %v1387_v34 = vpack.c.bf16 %v995_v32, %v994_v31  ;;  %v996_v35 = vsel %vm932_vm12, %v900_v18, %v964_v29  ;;  %v903_v36 = vadd.f32 %v1748_v27, %v867_v26  ;;  %vm934_vm14 = vcmp.ge.f32.partialorder %v902_v30, 0.0 }
 0x16e   : > { %v997_v37 = vsel %vm933_vm13, %v901_v25, %v965_v33  ;;  %v966_v38 = vmul.f32 0.2, %v902_v30 }
 0x16f   : > { %1411 = vst [vmem:[%s1715_s29 + $0x68] sm:$0xff] %v1387_v34   ;;  %v1392_v39 = vpack.c.bf16 %v997_v37, %v996_v35  ;;  %vm935_vm15 = vcmp.ge.f32.partialorder %v903_v36, 0.0  ;;  %v967_v40 = vmul.f32 0.2, %v903_v36 }
 0x170   : > { %v998_v41 = vsel %vm934_vm14, %v902_v30, %v966_v38 }
 0x171   : > { %1412 = vst [vmem:[%s1715_s29 + $0x70] sm:$0xff] %v1392_v39   ;;  %v999_v42 = vsel %vm935_vm15, %v903_v36, %v967_v40 }
 0x172   : > { %v1397_v43 = vpack.c.bf16 %v999_v42, %v998_v41 }
 0x174   : > { %1413 = vst [vmem:[%s1715_s29 + $0x78] sm:$0xff] %v1397_v43  }
 0x175 PF: > { %s13_s18 = sadd.s32 1, %s1551_s18   ;;  %s1827_s12 = smov %s1531_s13 }
 0x176   : > { %p10_p0 = scmp.ge.s32.totalorder %s13_s18, 12   ;;  %s1828_s13 = smov %s1625_s25 }
 0x177   : > { %s1829_s14 = smov %s1543_s16  ;;  %s1830_s15 = smov %s1547_s17 }
 0x178   : > { %s1831_s16 = smov %s1834_s19  ;;  %s1832_s17 = smov %s1838_s20 }
 0x179   :  { %12 = sbr.rel (!%p10_p0) target bundleno = 4 (0x4), region = 122 }

// kernel: discriminator_unet_forward.19
= control target key start
LH: loop header
LB: loop body
LE: loop exit
PB: predicated region body
PF: predicated region fallthrough
CT: control target
= control target key end

     0   :  { %s1351_s12 = smov 0   ;;  %s1353_s13 = smov 0   ;;  %s1612_s0 = inlined_call_operand.vmem [shape: bf16[512,640], index: 0, kind: input, shape index: {}]   ;;  %s1613_s1 = inlined_call_operand.vmem [shape: bf16[640,128], index: 1, kind: input, shape index: {}]   ;;  %s1614_s2 = inlined_call_operand.vmem [shape: f32[1,128], index: 2, kind: input, shape index: {}]   ;;  %s1615_s3 = inlined_call_operand.vmem [shape: f32[512,128], index: 3, kind: output, shape index: {}]  }
   0x1   :  { %s1355_s14 = smov 0   ;;  %s1357_s15 = smov 0  }
   0x2   :  { %s1359_s16 = smov 0   ;;  %s1361_s17 = smov 0  }
   0x3   :  { %s1363_s18 = smov 0  }
   0x4 LB: > { %s25_s19 = sadd.s32 1, %s1320_s16  ;;  %s32_s20 = sadd.s32 1, %s1324_s17  ;;  %s1328_s18 = sphi %s1363_s18, %s13_s18   ;;  %s1324_s17 = sphi %s1361_s17, %s1621_s17   ;;  %s1320_s16 = sphi %s1359_s16, %s1620_s16   ;;  %s1316_s15 = sphi %s1357_s15, %s1619_s15   ;;  %s1312_s14 = sphi %s1355_s14, %s1618_s14   ;;  %s1308_s13 = sphi %s1353_s13, %s1617_s13   ;;  %s1304_s12 = sphi %s1351_s12, %s1616_s12  }
   0x5   : > { %p26_p0 = scmp.ge.s32.totalorder %s25_s19, 5  ;;  %p48_p1 = scmp.ne.s32.totalorder %s1308_s13, %s1304_s12 }
   0x6   : > { %p49_p2 = scmp.eq.s32.totalorder %s1328_s18, 0  ;;  %s41_s24 = sadd.s32 1, %s1308_s13 }
   0x7   : > { %s1623_s19 = smov (%p26_p0, %s25_s19), 0  ;;  %s1625_s20 = smov (!%p26_p0, %s32_s20), %s1324_s17 }
   0x8   : > { %p50_p3 = por %p49_p2, %p48_p1  ;;  %p34_p4 = scmp.ge.s32.totalorder %s1625_s20, 2 }
   0x9   : > { %s37_s21 = ssub.s32 %s1320_s16, %s1623_s19  ;;  %p1056_p6 = scmp.ge.s32.totalorder %s1328_s18, 10 }
   0xa   : > { %s1627_s20 = smov (%p34_p4, %s1625_s20), 0 }
   0xb   : > { %s36_s22 = ssub.s32 %s1324_s17, %s1627_s20  ;;  %162 = sbr.rel (%p1056_p6) target bundleno = 55 (0x37), region = 20 }
   0xc   : > { %s38_s23 = sor.u32 %s37_s21, %s36_s22 }
   0xd   : > { %p39_p5 = scmp.eq.s32.totalorder %s38_s23, 0 }
   0xf   : > { %s1402_s25 = scalar_select %p39_p5, %s1308_s13, %s41_s24  }
  0x10   : > { %165 = sbr.rel (!%p50_p3) target bundleno = 55 (0x37), region = 24  ;;  %s167_s26 = sand.u32 (%p50_p3), 1, %s1308_s13  }
  0x11   : > { %s1215_s27 = smul.u32 (%p50_p3), 160, %s1324_s17  ;;  %s1057_s28 = sshll.u32 (%p50_p3), %s167_s26, 7 }
  0x12   : > { %s1416_s7 = scalar_lea.vmem (%p50_p3), [#allocation3], %s1057_s28 }
  0x13   : > { %s172_s29 = sadd.s32 (%p50_p3), %s1320_s16, %s1215_s27 }
  0x14   : > { %s1060_s30 = sshll.u32 (%p50_p3), %s172_s29, 2 }
  0x15   : > { %s1411_s6 = scalar_lea.vmem %s1612_s0, %s1060_s30 }
  0x16   : > { %v191_v0 = vld [vmem:[%s1411_s6] sm:$0xf]  ;;  %v193_v1 = vld [vmem:[%s1411_s6 + $0x14] sm:$0xf]  ;;  %v195_v2 = vld [vmem:[%s1411_s6 + $0x28] sm:$0xf] }
  0x17   : > { %192 = vst [vmem:[%s1416_s7] sm:$0xf] %v191_v0  ;;  %v197_v3 = vld [vmem:[%s1411_s6 + $0x3c] sm:$0xf]  ;;  %v199_v4 = vld [vmem:[%s1411_s6 + $0x50] sm:$0xf] }
  0x18   : > { %194 = vst [vmem:[%s1416_s7 + $0x4] sm:$0xf] %v193_v1  ;;  %v201_v5 = vld [vmem:[%s1411_s6 + $0x64] sm:$0xf]  ;;  %v203_v6 = vld [vmem:[%s1411_s6 + $0x78] sm:$0xf] }
  0x19   : > { %196 = vst [vmem:[%s1416_s7 + $0x8] sm:$0xf] %v195_v2  ;;  %v205_v7 = vld [vmem:[%s1411_s6 + $0x8c] sm:$0xf]  ;;  %v207_v8 = vld [vmem:[%s1411_s6 + $0xa0] sm:$0xf] }
  0x1a   : > { %198 = vst [vmem:[%s1416_s7 + $0xc] sm:$0xf] %v197_v3  ;;  %v209_v9 = vld [vmem:[%s1411_s6 + $0xb4] sm:$0xf]  ;;  %v211_v10 = vld [vmem:[%s1411_s6 + $0xc8] sm:$0xf] }
  0x1b   : > { %200 = vst [vmem:[%s1416_s7 + $0x10] sm:$0xf] %v199_v4  ;;  %v213_v11 = vld [vmem:[%s1411_s6 + $0xdc] sm:$0xf]  ;;  %v215_v12 = vld [vmem:[%s1411_s6 + $0xf0] sm:$0xf] }
  0x1c   : > { %202 = vst [vmem:[%s1416_s7 + $0x14] sm:$0xf] %v201_v5  ;;  %v217_v13 = vld [vmem:[%s1411_s6 + $0x104] sm:$0xf]  ;;  %v219_v14 = vld [vmem:[%s1411_s6 + $0x118] sm:$0xf] }
  0x1d   : > { %204 = vst [vmem:[%s1416_s7 + $0x18] sm:$0xf] %v203_v6  ;;  %v221_v15 = vld [vmem:[%s1411_s6 + $0x12c] sm:$0xf]  ;;  %v223_v16 = vld [vmem:[%s1411_s6 + $0x140] sm:$0xf] }
  0x1e   : > { %206 = vst [vmem:[%s1416_s7 + $0x1c] sm:$0xf] %v205_v7  ;;  %v225_v17 = vld [vmem:[%s1411_s6 + $0x154] sm:$0xf]  ;;  %v227_v18 = vld [vmem:[%s1411_s6 + $0x168] sm:$0xf] }
  0x1f   : > { %208 = vst [vmem:[%s1416_s7 + $0x20] sm:$0xf] %v207_v8  ;;  %v229_v19 = vld [vmem:[%s1411_s6 + $0x17c] sm:$0xf]  ;;  %v231_v20 = vld [vmem:[%s1411_s6 + $0x190] sm:$0xf] }
  0x20   : > { %210 = vst [vmem:[%s1416_s7 + $0x24] sm:$0xf] %v209_v9  ;;  %v233_v21 = vld [vmem:[%s1411_s6 + $0x1a4] sm:$0xf]  ;;  %v235_v22 = vld [vmem:[%s1411_s6 + $0x1b8] sm:$0xf] }
  0x21   : > { %212 = vst [vmem:[%s1416_s7 + $0x28] sm:$0xf] %v211_v10  ;;  %v237_v23 = vld [vmem:[%s1411_s6 + $0x1cc] sm:$0xf]  ;;  %v239_v24 = vld [vmem:[%s1411_s6 + $0x1e0] sm:$0xf] }
  0x22   : > { %214 = vst [vmem:[%s1416_s7 + $0x2c] sm:$0xf] %v213_v11  ;;  %v241_v25 = vld [vmem:[%s1411_s6 + $0x1f4] sm:$0xf]  ;;  %v243_v26 = vld [vmem:[%s1411_s6 + $0x208] sm:$0xf] }
  0x23   : > { %216 = vst [vmem:[%s1416_s7 + $0x30] sm:$0xf] %v215_v12  ;;  %v245_v27 = vld [vmem:[%s1411_s6 + $0x21c] sm:$0xf]  ;;  %v247_v28 = vld [vmem:[%s1411_s6 + $0x230] sm:$0xf] }
  0x24   : > { %218 = vst [vmem:[%s1416_s7 + $0x34] sm:$0xf] %v217_v13  ;;  %v249_v29 = vld [vmem:[%s1411_s6 + $0x244] sm:$0xf]  ;;  %v251_v30 = vld [vmem:[%s1411_s6 + $0x258] sm:$0xf] }
  0x25   : > { %220 = vst [vmem:[%s1416_s7 + $0x38] sm:$0xf] %v219_v14  ;;  %v253_v31 = vld [vmem:[%s1411_s6 + $0x26c] sm:$0xf] }
  0x26   : > { %222 = vst [vmem:[%s1416_s7 + $0x3c] sm:$0xf] %v221_v15 }
  0x27   : > { %224 = vst [vmem:[%s1416_s7 + $0x40] sm:$0xf] %v223_v16 }
  0x28   : > { %226 = vst [vmem:[%s1416_s7 + $0x44] sm:$0xf] %v225_v17 }
  0x29   : > { %228 = vst [vmem:[%s1416_s7 + $0x48] sm:$0xf] %v227_v18 }
  0x2a   : > { %230 = vst [vmem:[%s1416_s7 + $0x4c] sm:$0xf] %v229_v19 }
  0x2b   : > { %232 = vst [vmem:[%s1416_s7 + $0x50] sm:$0xf] %v231_v20 }
  0x2c   : > { %234 = vst [vmem:[%s1416_s7 + $0x54] sm:$0xf] %v233_v21 }
  0x2d   : > { %236 = vst [vmem:[%s1416_s7 + $0x58] sm:$0xf] %v235_v22 }
  0x2e   : > { %238 = vst [vmem:[%s1416_s7 + $0x5c] sm:$0xf] %v237_v23 }
  0x2f   : > { %240 = vst [vmem:[%s1416_s7 + $0x60] sm:$0xf] %v239_v24 }
  0x30   : > { %242 = vst [vmem:[%s1416_s7 + $0x64] sm:$0xf] %v241_v25 }
  0x31   : > { %244 = vst [vmem:[%s1416_s7 + $0x68] sm:$0xf] %v243_v26 }
  0x32   : > { %246 = vst [vmem:[%s1416_s7 + $0x6c] sm:$0xf] %v245_v27 }
  0x33   : > { %248 = vst [vmem:[%s1416_s7 + $0x70] sm:$0xf] %v247_v28 }
  0x34   : > { %250 = vst [vmem:[%s1416_s7 + $0x74] sm:$0xf] %v249_v29 }
  0x35   : > { %252 = vst [vmem:[%s1416_s7 + $0x78] sm:$0xf] %v251_v30 }
  0x36   : > { %254 = vst [vmem:[%s1416_s7 + $0x7c] sm:$0xf] %v253_v31 }
  0x37 PF: > { %p1061_p7 = scmp.ge.s32.totalorder %s1328_s18, 1  ;;  %p353_p8 = scmp.lt.s32.totalorder %s1328_s18, 11 }
  0x39   : > { %p354_p9 = pnand %p1061_p7, %p353_p8 }
  0x3a   : > { %s360_s8 = sand.u32 (!%p354_p9), 1, %s1304_s12   ;;  %s1063_s9 = sshll.u32 (!%p354_p9), %s1312_s14, 4 }
  0x3b   : > { %357 = sbr.rel (%p354_p9) target bundleno = 365 (0x16d), region = 69  ;;  %s1062_s10 = sshll.u32 (!%p354_p9), %s360_s8, 7 }
  0x3c   : > { %p399_p10 = scmp.lt.s32.totalorder (!%p354_p9), %s1063_s9, 79  ;;  %s1065_s11 = sshll.u32 (!%p354_p9), %s1316_s15, 5 }
  0x3d   : > { %p411_p11 = scmp.lt.s32.totalorder (!%p354_p9), %s1065_s11, 63  ;;  %s1494_s12 = scalar_lea.vmem (!%p354_p9), [#allocation3], %s1062_s10 }
  0x3e   : > { %p1067_p12 = scmp.ne.s32.totalorder (!%p354_p9), %s1312_s14, 0 }
  0x40   : > { %s1629_s9 = smov (!%p399_p10, %s1063_s9), 79  ;;  %s1631_s11 = smov (!%p411_p11, %s1065_s11), 63 }
  0x41   : > { %s1064_s21 = sshll.u32 %s1629_s9, 2  ;;  %s1066_s26 = sshll.u32 %s1631_s11, 3 }
  0x42   : > { %s1487_s24 = scalar_lea.vmem %s1613_s1, %s1064_s21  ;;  %s1492_s29 = scalar_lea.vmem %s1615_s3, %s1066_s26 }
  0x43   : > { %422 = sbr.rel (%p1067_p12) target bundleno = 105 (0x69), region = 77 }
  0x48   : > { %v1330_v32 = vmov 0.0  }
  0x49   : > { %423 = vst [vmem:[#allocation2 + $0xb0] sm:$0xff] %v1330_v32 }
  0x4a   : > { %424 = vst [vmem:[#allocation2] sm:$0xff] %v1330_v32 }
  0x4b   : > { %425 = vst [vmem:[#allocation2 + $0xd8] sm:$0xff] %v1330_v32 }
  0x4c   : > { %426 = vst [vmem:[#allocation2 + $0x18] sm:$0xff] %v1330_v32 }
  0x4d   : > { %427 = vst [vmem:[#allocation2 + $0x50] sm:$0xff] %v1330_v32 }
  0x4e   : > { %428 = vst [vmem:[#allocation2 + $0x68] sm:$0xff] %v1330_v32 }
  0x4f   : > { %429 = vst [vmem:[#allocation2 + $0x30] sm:$0xff] %v1330_v32 }
  0x50   : > { %430 = vst [vmem:[#allocation2 + $0x48] sm:$0xff] %v1330_v32 }
  0x51   : > { %431 = vst [vmem:[#allocation2 + $0x80] sm:$0xff] %v1330_v32 }
  0x52   : > { %432 = vst [vmem:[#allocation2 + $0x88] sm:$0xff] %v1330_v32 }
  0x53   : > { %433 = vst [vmem:[#allocation2 + $0xe8] sm:$0xff] %v1330_v32 }
  0x54   : > { %434 = vst [vmem:[#allocation2 + $0xb8] sm:$0xff] %v1330_v32 }
  0x55   : > { %435 = vst [vmem:[#allocation2 + $0x60] sm:$0xff] %v1330_v32 }
  0x56   : > { %436 = vst [vmem:[#allocation2 + $0xf0] sm:$0xff] %v1330_v32 }
  0x57   : > { %437 = vst [vmem:[#allocation2 + $0x8] sm:$0xff] %v1330_v32 }
  0x58   : > { %438 = vst [vmem:[#allocation2 + $0x78] sm:$0xff] %v1330_v32 }
  0x59   : > { %439 = vst [vmem:[#allocation2 + $0x38] sm:$0xff] %v1330_v32 }
  0x5a   : > { %440 = vst [vmem:[#allocation2 + $0x58] sm:$0xff] %v1330_v32 }
  0x5b   : > { %441 = vst [vmem:[#allocation2 + $0x40] sm:$0xff] %v1330_v32 }
  0x5c   : > { %442 = vst [vmem:[#allocation2 + $0xc8] sm:$0xff] %v1330_v32 }
  0x5d   : > { %443 = vst [vmem:[#allocation2 + $0xe0] sm:$0xff] %v1330_v32 }
  0x5e   : > { %444 = vst [vmem:[#allocation2 + $0x90] sm:$0xff] %v1330_v32 }
  0x5f   : > { %445 = vst [vmem:[#allocation2 + $0x70] sm:$0xff] %v1330_v32 }
  0x60   : > { %446 = vst [vmem:[#allocation2 + $0xc0] sm:$0xff] %v1330_v32 }
  0x61   : > { %447 = vst [vmem:[#allocation2 + $0xa8] sm:$0xff] %v1330_v32 }
  0x62   : > { %448 = vst [vmem:[#allocation2 + $0xd0] sm:$0xff] %v1330_v32 }
  0x63   : > { %449 = vst [vmem:[#allocation2 + $0x10] sm:$0xff] %v1330_v32 }
  0x64   : > { %450 = vst [vmem:[#allocation2 + $0x28] sm:$0xff] %v1330_v32 }
  0x65   : > { %451 = vst [vmem:[#allocation2 + $0xa0] sm:$0xff] %v1330_v32 }
  0x66   : > { %452 = vst [vmem:[#allocation2 + $0xf8] sm:$0xff] %v1330_v32 }
  0x67   : > { %453 = vst [vmem:[#allocation2 + $0x20] sm:$0xff] %v1330_v32 }
  0x68   : > { %454 = vst [vmem:[#allocation2 + $0x98] sm:$0xff] %v1330_v32 }
  0x69 PF: > { %v1190_v33 = vld [vmem:[%s1487_s24 + $0x38] sm:$0xff]  ;;  %v1189_v34 = vld [vmem:[%s1487_s24 + $0x30] sm:$0xff]  ;;  %v1188_v35 = vld [vmem:[%s1487_s24 + $0x28] sm:$0xff]  ;;  %p1164_p13 = scmp.ne.s32.totalorder %s1312_s14, 4 }
  0x6a   : > { %679 = vmatpush.bf16.msra.mxu0 %v1190_v33  ;;  %1191 = vmatpush.bf16.msra.mxu1 %v1190_v33  ;;  %v1187_v36 = vld [vmem:[%s1487_s24 + $0x20] sm:$0xff]  ;;  %v1186_v37 = vld [vmem:[%s1487_s24 + $0x18] sm:$0xff]  ;;  %v1185_v38 = vld [vmem:[%s1487_s24 + $0x10] sm:$0xff] }
  0x6b   : > { %1192 = vmatpush.bf16.msra.mxu2 %v1190_v33  ;;  %1193 = vmatpush.bf16.msra.mxu3 %v1190_v33  ;;  %v1184_v39 = vld [vmem:[%s1487_s24 + $0x8] sm:$0xff]  ;;  %v1183_v40 = vld [vmem:[%s1487_s24] sm:$0xff]  ;;  %v1169_v49 = vld [vmem:[%s1494_s12 + $0x10] sm:$0xff] }
  0x6c   : > { %v1167_v41 = vld [vmem:[%s1494_s12] sm:$0xff]  ;;  %v1168_v45 = vld [vmem:[%s1494_s12 + $0x8] sm:$0xff]  ;;  %v1173_v50 = vld [vmem:[%s1494_s12 + $0x30] sm:$0xff] }
  0x6d   : > { %v1171_v42 = vld [vmem:[%s1494_s12 + $0x20] sm:$0xff]  ;;  %v1172_v46 = vld [vmem:[%s1494_s12 + $0x28] sm:$0xff]  ;;  %v1177_v51 = vld [vmem:[%s1494_s12 + $0x50] sm:$0xff] }
  0x6e   : > { %680 = vmatpush.bf16.msra.mxu0 %v1189_v34  ;;  %1194 = vmatpush.bf16.msra.mxu1 %v1189_v34  ;;  %v1175_v43 = vld [vmem:[%s1494_s12 + $0x40] sm:$0xff]  ;;  %v1176_v47 = vld [vmem:[%s1494_s12 + $0x48] sm:$0xff]  ;;  %v1181_v52 = vld [vmem:[%s1494_s12 + $0x70] sm:$0xff] }
  0x6f   : > { %1195 = vmatpush.bf16.msra.mxu2 %v1189_v34  ;;  %1196 = vmatpush.bf16.msra.mxu3 %v1189_v34  ;;  %v1179_v44 = vld [vmem:[%s1494_s12 + $0x60] sm:$0xff]  ;;  %v1180_v48 = vld [vmem:[%s1494_s12 + $0x68] sm:$0xff]  ;;  %v1170_v53 = vld [vmem:[%s1494_s12 + $0x18] sm:$0xff] }
  0x70   : > { %v1174_v54 = vld [vmem:[%s1494_s12 + $0x38] sm:$0xff]  ;;  %v455_v57 = vld [vmem:[#allocation2 + $0xb0] sm:$0xff]  ;;  %v463_v58 = vld [vmem:[#allocation2 + $0x80] sm:$0xff] }
  0x71   : > { %v1178_v55 = vld [vmem:[%s1494_s12 + $0x58] sm:$0xff]  ;;  %v479_v0 = vld [vmem:[#allocation2 + $0xa8] sm:$0xff]  ;;  %v456_v1 = vld [vmem:[#allocation2] sm:$0xff] }
  0x72   : > { %681 = vmatpush.bf16.msra.mxu0 %v1188_v35  ;;  %1197 = vmatpush.bf16.msra.mxu1 %v1188_v35  ;;  %v1182_v56 = vld [vmem:[%s1494_s12 + $0x78] sm:$0xff]  ;;  %v464_v2 = vld [vmem:[#allocation2 + $0x88] sm:$0xff]  ;;  %v480_v12 = vld [vmem:[#allocation2 + $0xd0] sm:$0xff] }
  0x73   : > { %1198 = vmatpush.bf16.msra.mxu2 %v1188_v35  ;;  %1199 = vmatpush.bf16.msra.mxu3 %v1188_v35  ;;  %v471_v63 = vld [vmem:[#allocation2 + $0x38] sm:$0xff]  ;;  %v465_v14 = vld [vmem:[#allocation2 + $0xe8] sm:$0xff]  ;;  %v473_v23 = vld [vmem:[#allocation2 + $0x40] sm:$0xff] }
  0x74   : > { %v472_v11 = vld [vmem:[#allocation2 + $0x58] sm:$0xff]  ;;  %v481_v24 = vld [vmem:[#allocation2 + $0x10] sm:$0xff]  ;;  %v474_v35 = vld [vmem:[#allocation2 + $0xc8] sm:$0xff] }
  0x75   : > { %v457_v13 = vld [vmem:[#allocation2 + $0xd8] sm:$0xff] }
  0x76   : > { %682 = vmatpush.bf16.msra.mxu0 %v1187_v36  ;;  %1200 = vmatpush.bf16.msra.mxu1 %v1187_v36  ;;  %v458_v25 = vld [vmem:[#allocation2 + $0x18] sm:$0xff] }
  0x77   : > { %1201 = vmatpush.bf16.msra.mxu2 %v1187_v36  ;;  %1202 = vmatpush.bf16.msra.mxu3 %v1187_v36  ;;  %v466_v26 = vld [vmem:[#allocation2 + $0xb8] sm:$0xff]  ;;  %v482_v36 = vld [vmem:[#allocation2 + $0x28] sm:$0xff] }
  0x7a   : > { %683 = vmatpush.bf16.msra.mxu0 %v1186_v37  ;;  %1203 = vmatpush.bf16.msra.mxu1 %v1186_v37 }
  0x7b   : > { %1204 = vmatpush.bf16.msra.mxu2 %v1186_v37  ;;  %1205 = vmatpush.bf16.msra.mxu3 %v1186_v37  ;;  %v459_v37 = vld [vmem:[#allocation2 + $0x50] sm:$0xff] }
  0x7e   : > { %684 = vmatpush.bf16.msra.mxu0 %v1185_v38  ;;  %1206 = vmatpush.bf16.msra.mxu1 %v1185_v38 }
  0x7f   : > { %1207 = vmatpush.bf16.msra.mxu2 %v1185_v38  ;;  %1208 = vmatpush.bf16.msra.mxu3 %v1185_v38  ;;  %v467_v38 = vld [vmem:[#allocation2 + $0x60] sm:$0xff] }
  0x82   : > { %685 = vmatpush.bf16.msra.mxu0 %v1184_v39  ;;  %1209 = vmatpush.bf16.msra.mxu1 %v1184_v39 }
  0x83   : > { %1210 = vmatpush.bf16.msra.mxu2 %v1184_v39  ;;  %1211 = vmatpush.bf16.msra.mxu3 %v1184_v39 }
  0x86   : > { %686 = vmatpush.bf16.msra.mxu0 %v1183_v40  ;;  %1212 = vmatpush.bf16.msra.mxu1 %v1183_v40 }
  0x87   : > { %1213 = vmatpush.bf16.msra.mxu2 %v1183_v40  ;;  %1214 = vmatpush.bf16.msra.mxu3 %v1183_v40 }
  0x89   : > { %687 = vmatmul.bf16.vlgmr.msra.gmra.mxu0 %v1167_v41  ;;  %707 = vmatmul.bf16.vlgmr.msra.gmra.mxu1 %v1171_v42 }
  0x8a   : > { %727 = vmatmul.bf16.vlgmr.msra.gmra.mxu2 %v1175_v43  ;;  %747 = vmatmul.bf16.vlgmr.msra.gmra.mxu3 %v1179_v44 }
  0x99   : > { %692 = vmatmul.bf16.gmra.mxu0 %v1168_v45  ;;  %712 = vmatmul.bf16.gmra.mxu1 %v1172_v46 }
  0x9a   : > { %732 = vmatmul.bf16.gmra.mxu2 %v1176_v47  ;;  %752 = vmatmul.bf16.gmra.mxu3 %v1180_v48  ;;  %v475_v47 = vld [vmem:[#allocation2 + $0xe0] sm:$0xff] }
  0x9b   : > { %v483_v48 = vld [vmem:[#allocation2 + $0xa0] sm:$0xff] }
  0xa9   : > { %697 = vmatmul.bf16.gmra.mxu0 %v1169_v49  ;;  %717 = vmatmul.bf16.gmra.mxu1 %v1173_v50  ;;  %v460_v49 = vld [vmem:[#allocation2 + $0x68] sm:$0xff]  ;;  %v468_v50 = vld [vmem:[#allocation2 + $0xf0] sm:$0xff] }
  0xaa   : > { %737 = vmatmul.bf16.gmra.mxu2 %v1177_v51  ;;  %757 = vmatmul.bf16.gmra.mxu3 %v1181_v52 }
  0xb9   : > { %702 = vmatmul.bf16.gmra.mxu0 %v1170_v53  ;;  %722 = vmatmul.bf16.gmra.mxu1 %v1174_v54 }
  0xba   : > { %742 = vmatmul.bf16.gmra.mxu2 %v1178_v55  ;;  %762 = vmatmul.bf16.gmra.mxu3 %v1182_v56 }
 0x106   : > { %v688_v59 = vpop.f32.mrf.mxu0  ;;  %v708_v60 = vpop.f32.mrf.mxu1 }
 0x107   : > { %v768_v61 = vadd.f32 %v688_v59, %v455_v57  ;;  %v776_v62 = vadd.f32 %v708_v60, %v463_v58  ;;  %v476_v59 = vld [vmem:[#allocation2 + $0x90] sm:$0xff]  ;;  %v484_v60 = vld [vmem:[#allocation2 + $0xf8] sm:$0xff] }
 0x109   : > { %800 = vst [vmem:[#allocation2 + $0xb0] sm:$0xff] %v768_v61  ;;  %v461_v61 = vld [vmem:[#allocation2 + $0x30] sm:$0xff] }
 0x10a   : > { %808 = vst [vmem:[#allocation2 + $0x80] sm:$0xff] %v776_v62  ;;  %v469_v62 = vld [vmem:[#allocation2 + $0x8] sm:$0xff] }
 0x10d   : > { %v728_v3 = vpop.f32.mrf.mxu2  ;;  %v748_v4 = vpop.f32.mrf.mxu3 }
 0x10e   : > { %v784_v5 = vadd.f32 %v728_v3, %v471_v63  ;;  %v792_v6 = vadd.f32 %v748_v4, %v479_v0  ;;  %v690_v7 = vpop.f32.mrf.mxu0  ;;  %v710_v8 = vpop.f32.mrf.mxu1 }
 0x10f   : > { %v769_v9 = vadd.f32 %v690_v7, %v456_v1  ;;  %v777_v10 = vadd.f32 %v710_v8, %v464_v2  ;;  %v477_v7 = vld [vmem:[#allocation2 + $0x70] sm:$0xff]  ;;  %v485_v8 = vld [vmem:[#allocation2 + $0x20] sm:$0xff] }
 0x110   : > { %816 = vst [vmem:[#allocation2 + $0x38] sm:$0xff] %v784_v5 }
 0x111   : > { %824 = vst [vmem:[#allocation2 + $0xa8] sm:$0xff] %v792_v6 }
 0x112   : > { %801 = vst [vmem:[#allocation2] sm:$0xff] %v769_v9  ;;  %v462_v9 = vld [vmem:[#allocation2 + $0x48] sm:$0xff] }
 0x113   : > { %809 = vst [vmem:[#allocation2 + $0x88] sm:$0xff] %v777_v10  ;;  %v470_v10 = vld [vmem:[#allocation2 + $0x78] sm:$0xff] }
 0x115   : > { %v730_v15 = vpop.f32.mrf.mxu2  ;;  %v750_v16 = vpop.f32.mrf.mxu3 }
 0x116   : > { %v785_v17 = vadd.f32 %v730_v15, %v472_v11  ;;  %v793_v18 = vadd.f32 %v750_v16, %v480_v12  ;;  %v693_v19 = vpop.f32.mrf.mxu0  ;;  %v713_v20 = vpop.f32.mrf.mxu1 }
 0x117   : > { %v770_v21 = vadd.f32 %v693_v19, %v457_v13  ;;  %v778_v22 = vadd.f32 %v713_v20, %v465_v14  ;;  %v478_v19 = vld [vmem:[#allocation2 + $0xc0] sm:$0xff]  ;;  %v486_v20 = vld [vmem:[#allocation2 + $0x98] sm:$0xff] }
 0x118   : > { %817 = vst [vmem:[#allocation2 + $0x58] sm:$0xff] %v785_v17 }
 0x119   : > { %825 = vst [vmem:[#allocation2 + $0xd0] sm:$0xff] %v793_v18 }
 0x11a   : > { %802 = vst [vmem:[#allocation2 + $0xd8] sm:$0xff] %v770_v21 }
 0x11b   : > { %810 = vst [vmem:[#allocation2 + $0xe8] sm:$0xff] %v778_v22 }
 0x11d   : > { %v733_v27 = vpop.f32.mrf.mxu2  ;;  %v753_v28 = vpop.f32.mrf.mxu3 }
 0x11e   : > { %v786_v29 = vadd.f32 %v733_v27, %v473_v23  ;;  %v794_v30 = vadd.f32 %v753_v28, %v481_v24  ;;  %v695_v31 = vpop.f32.mrf.mxu0  ;;  %v715_v32 = vpop.f32.mrf.mxu1 }
 0x11f   : > { %v771_v33 = vadd.f32 %v695_v31, %v458_v25  ;;  %v779_v34 = vadd.f32 %v715_v32, %v466_v26 }
 0x120   : > { %818 = vst [vmem:[#allocation2 + $0x40] sm:$0xff] %v786_v29 }
 0x121   : > { %826 = vst [vmem:[#allocation2 + $0x10] sm:$0xff] %v794_v30 }
 0x122   : > { %803 = vst [vmem:[#allocation2 + $0x18] sm:$0xff] %v771_v33 }
 0x123   : > { %811 = vst [vmem:[#allocation2 + $0xb8] sm:$0xff] %v779_v34 }
 0x125   : > { %v735_v39 = vpop.f32.mrf.mxu2  ;;  %v755_v40 = vpop.f32.mrf.mxu3 }
 0x126   : > { %v787_v41 = vadd.f32 %v735_v39, %v474_v35  ;;  %v795_v42 = vadd.f32 %v755_v40, %v482_v36  ;;  %v698_v43 = vpop.f32.mrf.mxu0  ;;  %v718_v44 = vpop.f32.mrf.mxu1 }
 0x127   : > { %v772_v45 = vadd.f32 %v698_v43, %v459_v37  ;;  %v780_v46 = vadd.f32 %v718_v44, %v467_v38 }
 0x128   : > { %819 = vst [vmem:[#allocation2 + $0xc8] sm:$0xff] %v787_v41 }
 0x129   : > { %827 = vst [vmem:[#allocation2 + $0x28] sm:$0xff] %v795_v42 }
 0x12a   : > { %804 = vst [vmem:[#allocation2 + $0x50] sm:$0xff] %v772_v45 }
 0x12b   : > { %812 = vst [vmem:[#allocation2 + $0x60] sm:$0xff] %v780_v46 }
 0x12d   : > { %v738_v51 = vpop.f32.mrf.mxu2  ;;  %v758_v52 = vpop.f32.mrf.mxu3 }
 0x12e   : > { %v788_v53 = vadd.f32 %v738_v51, %v475_v47  ;;  %v796_v54 = vadd.f32 %v758_v52, %v483_v48  ;;  %v700_v55 = vpop.f32.mrf.mxu0  ;;  %v720_v56 = vpop.f32.mrf.mxu1 }
 0x12f   : > { %v773_v57 = vadd.f32 %v700_v55, %v460_v49  ;;  %v781_v58 = vadd.f32 %v720_v56, %v468_v50 }
 0x130   : > { %820 = vst [vmem:[#allocation2 + $0xe0] sm:$0xff] %v788_v53 }
 0x131   : > { %828 = vst [vmem:[#allocation2 + $0xa0] sm:$0xff] %v796_v54 }
 0x132   : > { %805 = vst [vmem:[#allocation2 + $0x68] sm:$0xff] %v773_v57 }
 0x133   : > { %813 = vst [vmem:[#allocation2 + $0xf0] sm:$0xff] %v781_v58 }
 0x135   : > { %v740_v63 = vpop.f32.mrf.mxu2  ;;  %v760_v0 = vpop.f32.mrf.mxu3 }
 0x136   : > { %v789_v1 = vadd.f32 %v740_v63, %v476_v59  ;;  %v797_v2 = vadd.f32 %v760_v0, %v484_v60  ;;  %v703_v3 = vpop.f32.mrf.mxu0  ;;  %v723_v4 = vpop.f32.mrf.mxu1 }
 0x137   : > { %v774_v5 = vadd.f32 %v703_v3, %v461_v61  ;;  %v782_v6 = vadd.f32 %v723_v4, %v469_v62 }
 0x138   : > { %821 = vst [vmem:[#allocation2 + $0x90] sm:$0xff] %v789_v1 }
 0x139   : > { %829 = vst [vmem:[#allocation2 + $0xf8] sm:$0xff] %v797_v2 }
 0x13a   : > { %806 = vst [vmem:[#allocation2 + $0x30] sm:$0xff] %v774_v5 }
 0x13b   : > { %814 = vst [vmem:[#allocation2 + $0x8] sm:$0xff] %v782_v6 }
 0x13d   : > { %v743_v11 = vpop.f32.mrf.mxu2  ;;  %v763_v12 = vpop.f32.mrf.mxu3 }
 0x13e   : > { %v790_v13 = vadd.f32 %v743_v11, %v477_v7  ;;  %v798_v14 = vadd.f32 %v763_v12, %v485_v8  ;;  %v705_v15 = vpop.f32.mrf.mxu0  ;;  %v725_v16 = vpop.f32.mrf.mxu1 }
 0x13f   : > { %v775_v17 = vadd.f32 %v705_v15, %v462_v9  ;;  %v783_v18 = vadd.f32 %v725_v16, %v470_v10 }
 0x140   : > { %822 = vst [vmem:[#allocation2 + $0x70] sm:$0xff] %v790_v13 }
 0x141   : > { %830 = vst [vmem:[#allocation2 + $0x20] sm:$0xff] %v798_v14 }
 0x142   : > { %807 = vst [vmem:[#allocation2 + $0x48] sm:$0xff] %v775_v17 }
 0x143   : > { %815 = vst [vmem:[#allocation2 + $0x78] sm:$0xff] %v783_v18 }
 0x145   : > { %v745_v21 = vpop.f32.mrf.mxu2  ;;  %v765_v22 = vpop.f32.mrf.mxu3  ;;  %835 = sbr.rel (%p1164_p13) target bundleno = 365 (0x16d), region = 81 }
 0x146   : > { %v791_v23 = vadd.f32 %v745_v21, %v478_v19  ;;  %v799_v24 = vadd.f32 %v765_v22, %v486_v20 }
 0x148   : > { %823 = vst [vmem:[#allocation2 + $0xc0] sm:$0xff] %v791_v23 }
 0x149   : > { %831 = vst [vmem:[#allocation2 + $0x98] sm:$0xff] %v799_v24 }
 0x14a   : > { %v836_v25 = vld [vmem:[#allocation2 + $0xb0] sm:$0xff]  ;;  %v1525_v26 = vld [vmem:[%s1614_s2] ss:$0 sm:$0xff]  ;;  %v838_v28 = vld [vmem:[#allocation2 + $0xd8] sm:$0xff] }
 0x14b   : > { %v837_v27 = vld [vmem:[#allocation2] sm:$0xff]  ;;  %v839_v29 = vld [vmem:[#allocation2 + $0x18] sm:$0xff]  ;;  %v872_v30 = vadd.f32 %v1525_v26, %v836_v25  ;;  %v874_v32 = vadd.f32 %v1525_v26, %v838_v28  ;;  %v840_v33 = vld [vmem:[#allocation2 + $0x50] sm:$0xff] }
 0x14c   : > { %v873_v31 = vadd.f32 %v1525_v26, %v837_v27  ;;  %v841_v34 = vld [vmem:[#allocation2 + $0x68] sm:$0xff]  ;;  %v875_v35 = vadd.f32 %v1525_v26, %v839_v29  ;;  %v842_v36 = vld [vmem:[#allocation2 + $0x30] sm:$0xff]  ;;  %v876_v37 = vadd.f32 %v1525_v26, %v840_v33  ;;  %v844_v40 = vld [vmem:[#allocation2 + $0x80] sm:$0xff] }
 0x14d   : > { %904 = vst [vmem:[%s1492_s29] sm:$0xff] %v872_v30  ;;  %v843_v38 = vld [vmem:[#allocation2 + $0x48] sm:$0xff]  ;;  %v877_v39 = vadd.f32 %v1525_v26, %v841_v34  ;;  %v878_v41 = vadd.f32 %v1525_v26, %v842_v36  ;;  %v880_v45 = vadd.f32 %v1525_v26, %v844_v40  ;;  %v847_v46 = vld [vmem:[#allocation2 + $0xb8] sm:$0xff]  ;;  %v848_v48 = vld [vmem:[#allocation2 + $0x60] sm:$0xff] }
 0x14e   : > { %905 = vst [vmem:[%s1492_s29 + $0x8] sm:$0xff] %v873_v31  ;;  %v845_v42 = vld [vmem:[#allocation2 + $0x88] sm:$0xff]  ;;  %v879_v43 = vadd.f32 %v1525_v26, %v843_v38  ;;  %v849_v50 = vld [vmem:[#allocation2 + $0xf0] sm:$0xff]  ;;  %v883_v51 = vadd.f32 %v1525_v26, %v847_v46  ;;  %v884_v53 = vadd.f32 %v1525_v26, %v848_v48  ;;  %v851_v54 = vld [vmem:[#allocation2 + $0x78] sm:$0xff] }
 0x14f   : > { %906 = vst [vmem:[%s1492_s29 + $0x10] sm:$0xff] %v874_v32  ;;  %v846_v44 = vld [vmem:[#allocation2 + $0xe8] sm:$0xff]  ;;  %v881_v47 = vadd.f32 %v1525_v26, %v845_v42  ;;  %v885_v55 = vadd.f32 %v1525_v26, %v849_v50  ;;  %v852_v56 = vld [vmem:[#allocation2 + $0x38] sm:$0xff]  ;;  %v887_v59 = vadd.f32 %v1525_v26, %v851_v54  ;;  %v854_v60 = vld [vmem:[#allocation2 + $0x40] sm:$0xff] }
 0x150   : > { %907 = vst [vmem:[%s1492_s29 + $0x18] sm:$0xff] %v875_v35  ;;  %v882_v49 = vadd.f32 %v1525_v26, %v846_v44  ;;  %v850_v52 = vld [vmem:[#allocation2 + $0x8] sm:$0xff]  ;;  %v853_v58 = vld [vmem:[#allocation2 + $0x58] sm:$0xff]  ;;  %v888_v61 = vadd.f32 %v1525_v26, %v852_v56  ;;  %v856_v0 = vld [vmem:[#allocation2 + $0xe0] sm:$0xff]  ;;  %v890_v1 = vadd.f32 %v1525_v26, %v854_v60 }
 0x151   : > { %908 = vst [vmem:[%s1492_s29 + $0x20] sm:$0xff] %v876_v37  ;;  %v886_v57 = vadd.f32 %v1525_v26, %v850_v52  ;;  %v855_v62 = vld [vmem:[#allocation2 + $0xc8] sm:$0xff]  ;;  %v889_v63 = vadd.f32 %v1525_v26, %v853_v58  ;;  %v857_v2 = vld [vmem:[#allocation2 + $0x90] sm:$0xff]  ;;  %v892_v5 = vadd.f32 %v1525_v26, %v856_v0  ;;  %v859_v6 = vld [vmem:[#allocation2 + $0xc0] sm:$0xff] }
 0x152   : > { %909 = vst [vmem:[%s1492_s29 + $0x28] sm:$0xff] %v877_v39  ;;  %v891_v3 = vadd.f32 %v1525_v26, %v855_v62  ;;  %v858_v4 = vld [vmem:[#allocation2 + $0x70] sm:$0xff]  ;;  %v893_v7 = vadd.f32 %v1525_v26, %v857_v2  ;;  %v860_v8 = vld [vmem:[#allocation2 + $0xa8] sm:$0xff]  ;;  %v895_v11 = vadd.f32 %v1525_v26, %v859_v6  ;;  %v864_v16 = vld [vmem:[#allocation2 + $0xa0] sm:$0xff] }
 0x153   : > { %910 = vst [vmem:[%s1492_s29 + $0x30] sm:$0xff] %v878_v41  ;;  %v894_v9 = vadd.f32 %v1525_v26, %v858_v4  ;;  %v861_v10 = vld [vmem:[#allocation2 + $0xd0] sm:$0xff]  ;;  %v896_v13 = vadd.f32 %v1525_v26, %v860_v8  ;;  %v863_v14 = vld [vmem:[#allocation2 + $0x28] sm:$0xff]  ;;  %v865_v18 = vld [vmem:[#allocation2 + $0xf8] sm:$0xff]  ;;  %v900_v21 = vadd.f32 %v1525_v26, %v864_v16 }
 0x154   : > { %911 = vst [vmem:[%s1492_s29 + $0x38] sm:$0xff] %v879_v43  ;;  %v862_v12 = vld [vmem:[#allocation2 + $0x10] sm:$0xff]  ;;  %v897_v15 = vadd.f32 %v1525_v26, %v861_v10  ;;  %v899_v19 = vadd.f32 %v1525_v26, %v863_v14  ;;  %v866_v20 = vld [vmem:[#allocation2 + $0x20] sm:$0xff]  ;;  %v867_v22 = vld [vmem:[#allocation2 + $0x98] sm:$0xff]  ;;  %v901_v23 = vadd.f32 %v1525_v26, %v865_v18 }
 0x155   : > { %912 = vst [vmem:[%s1492_s29 + $0x40] sm:$0xff] %v880_v45  ;;  %v898_v17 = vadd.f32 %v1525_v26, %v862_v12  ;;  %v902_v24 = vadd.f32 %v1525_v26, %v866_v20  ;;  %v903_v25 = vadd.f32 %v1525_v26, %v867_v22 }
 0x156   : > { %913 = vst [vmem:[%s1492_s29 + $0x48] sm:$0xff] %v881_v47 }
 0x157   : > { %914 = vst [vmem:[%s1492_s29 + $0x50] sm:$0xff] %v882_v49 }
 0x158   : > { %915 = vst [vmem:[%s1492_s29 + $0x58] sm:$0xff] %v883_v51 }
 0x159   : > { %916 = vst [vmem:[%s1492_s29 + $0x60] sm:$0xff] %v884_v53 }
 0x15a   : > { %917 = vst [vmem:[%s1492_s29 + $0x68] sm:$0xff] %v885_v55 }
 0x15b   : > { %918 = vst [vmem:[%s1492_s29 + $0x70] sm:$0xff] %v886_v57 }
 0x15c   : > { %919 = vst [vmem:[%s1492_s29 + $0x78] sm:$0xff] %v887_v59 }
 0x15d   : > { %920 = vst [vmem:[%s1492_s29 + $0x80] sm:$0xff] %v888_v61 }
 0x15e   : > { %921 = vst [vmem:[%s1492_s29 + $0x88] sm:$0xff] %v889_v63 }
 0x15f   : > { %922 = vst [vmem:[%s1492_s29 + $0x90] sm:$0xff] %v890_v1 }
 0x160   : > { %923 = vst [vmem:[%s1492_s29 + $0x98] sm:$0xff] %v891_v3 }
 0x161   : > { %924 = vst [vmem:[%s1492_s29 + $0xa0] sm:$0xff] %v892_v5 }
 0x162   : > { %925 = vst [vmem:[%s1492_s29 + $0xa8] sm:$0xff] %v893_v7 }
 0x163   : > { %926 = vst [vmem:[%s1492_s29 + $0xb0] sm:$0xff] %v894_v9 }
 0x164   : > { %927 = vst [vmem:[%s1492_s29 + $0xb8] sm:$0xff] %v895_v11 }
 0x165   : > { %928 = vst [vmem:[%s1492_s29 + $0xc0] sm:$0xff] %v896_v13 }
 0x166   : > { %929 = vst [vmem:[%s1492_s29 + $0xc8] sm:$0xff] %v897_v15 }
 0x167   : > { %930 = vst [vmem:[%s1492_s29 + $0xd0] sm:$0xff] %v898_v17 }
 0x168   : > { %931 = vst [vmem:[%s1492_s29 + $0xd8] sm:$0xff] %v899_v19 }
 0x169   : > { %932 = vst [vmem:[%s1492_s29 + $0xe0] sm:$0xff] %v900_v21 }
 0x16a   : > { %933 = vst [vmem:[%s1492_s29 + $0xe8] sm:$0xff] %v901_v23 }
 0x16b   : > { %934 = vst [vmem:[%s1492_s29 + $0xf0] sm:$0xff] %v902_v24 }
 0x16c   : > { %935 = vst [vmem:[%s1492_s29 + $0xf8] sm:$0xff] %v903_v25 }
 0x16d PF: > { %s13_s18 = sadd.s32 1, %s1328_s18   ;;  %s1616_s12 = smov %s1308_s13 }
 0x16e   : > { %p10_p0 = scmp.ge.s32.totalorder %s13_s18, 12   ;;  %s1617_s13 = smov %s1402_s25 }
 0x16f   : > { %s1618_s14 = smov %s1320_s16  ;;  %s1619_s15 = smov %s1324_s17 }
 0x170   : > { %s1620_s16 = smov %s1623_s19  ;;  %s1621_s17 = smov %s1627_s20 }
 0x171   :  { %12 = sbr.rel (!%p10_p0) target bundleno = 4 (0x4), region = 122 }

</bundles_post_ra>
